<compile_context>
chip_gen: v7x
topology: tpu7x:2x2x1
jax: 0.10.0
libtpu: 0.0.40
codegen_flags: <defaults>
</compile_context>

<pallas_src>
import jax
import jax.numpy as jnp
from jax.experimental import pallas as pl
from jax.experimental.pallas import tpu as pltpu


# ----------------------------------------------------------------------------
# Generation / budget helpers
# ----------------------------------------------------------------------------
def _tpu_generation_info():
    """Best-effort (per-core VMEM bytes, MXU k_align, tensorcores per chip)."""
    kind = ""
    try:
        kind = jax.devices()[0].device_kind.lower()
    except Exception:
        pass
    old_gen = any(t in kind for t in ("v2", "v3", "v4", "v5 lite", "v5e", "v5lite"))
    is_v7 = "v7" in kind
    k_align = 128 if old_gen else 256          # v5e MXU is 4x128^2: don't pad K to 256
    num_cores = 2 if is_v7 else 1              # only v7x splits a "parallel" axis across TCs
    if is_v7:
        vmem_bytes = 64 << 20                  # per-TensorCore on v7x
    elif old_gen or "v5" in kind or "v6" in kind:
        vmem_bytes = 128 << 20
    else:
        vmem_bytes = 64 << 20                  # unknown generation: be conservative
    try:
        vmem_bytes = min(vmem_bytes, int(pltpu.get_tpu_info().vmem_capacity_bytes))
    except Exception:
        pass
    return vmem_bytes, k_align, num_cores


def _pick_tile(bf, t_pad, itemsize, num_cores):
    """Largest lane-aligned tile s.t. the live one-hot stays small, the grid has
    at least `num_cores` steps (v7x), and we don't pad rows by more than one tile."""
    bf_ceil = max(128, pl.cdiv(bf, 128) * 128)
    for tile in (1024, 512, 256, 128):
        if tile > bf_ceil:
            continue
        if t_pad * tile * itemsize > (8 << 20):     # keep one-hot operand modest
            continue
        if pl.cdiv(bf, tile) < num_cores and tile > 128:
            continue
        return tile
    return 128


# ----------------------------------------------------------------------------
# Path A: transposed one-hot matmul, table resident in VMEM (small/medium T)
# ----------------------------------------------------------------------------
def prepare_onehot_operand(tables, *, k_align=256, compute_dtype=None):
    """One-time parameter prep: (T, D) -> (D, T_pad) transposed, zero-padded,
    optionally cast to bf16.  Do this ONCE at init, not per forward call."""
    t, d = tables.shape
    compute_dtype = tables.dtype if compute_dtype is None else compute_dtype
    t_pad = pl.cdiv(t, k_align) * k_align
    tables_t = tables.T.astype(compute_dtype)                 # (D, T)
    if t_pad != t:
        tables_t = jnp.pad(tables_t, ((0, 0), (0, t_pad - t)))  # zero K padding
    return tables_t


def _embed_onehot_kernel(idx_ref, tableT_ref, out_ref):
    """One grid step: gather `tile` rows via transposed one-hot matmul.

    idx_ref    : (1, tile)   int32  flat row indices (lane-dense)
    tableT_ref : (D, T_pad)  float  transposed table, VMEM resident (single buffer)
    out_ref    : (D, tile)   float  gathered embeddings, transposed (lane-dense)
    """
    t_pad = tableT_ref.shape[1]
    idx = idx_ref[...]                                              # (1, tile)
    tile = idx.shape[1]
    rows = jax.lax.broadcasted_iota(jnp.int32, (t_pad, tile), 0)    # (T_pad, tile)
    # Exact 0/1 one-hot; padded / out-of-range indices select nothing -> zeros.
    onehot = (rows == idx).astype(tableT_ref.dtype)
    out_ref[...] = jnp.dot(
        tableT_ref[...], onehot,
        preferred_element_type=jnp.float32,
        precision=jax.lax.Precision.HIGHEST,   # bit-exact lookup semantics
    ).astype(out_ref.dtype)


def _embed_forward_onehot(flat_idx, tables_t, b, f, d, *, out_dtype, tile,
                          onehot_need, vmem_bytes, out_layout):
    bf = b * f
    bf_pad = pl.cdiv(bf, tile) * tile
    if bf_pad != bf:
        flat_idx = jnp.pad(flat_idx, (0, bf_pad - bf))   # pad with valid row 0
    idx2d = flat_idx.reshape(1, bf_pad)                  # lane-dense index layout

    # Raise the scoped VMEM limit enough for the resident table + one-hot, but
    # never past ~90% of physical (oversized tables go to the gather path).
    vmem_limit = int(min(max(onehot_need * 5 // 4 + (4 << 20), 32 << 20),
                         (vmem_bytes * 9) // 10))

    out_t = pl.pallas_call(
        _embed_onehot_kernel,
        out_shape=jax.ShapeDtypeStruct((d, bf_pad), out_dtype),
        grid_spec=pltpu.PrefetchScalarGridSpec(
            num_scalar_prefetch=0,
            grid=(bf_pad // tile,),
            in_specs=[
                # lane-dense index block: one small DMA per step
                pl.BlockSpec((1, tile), lambda i: (0, i)),
                # whole table resident in VMEM, single-buffered (no double buffer)
                pl.BlockSpec(memory_space=pltpu.MemorySpace.VMEM),
            ],
            # lane-dense output block: last dim multiple of 128 -> unmasked stores
            out_specs=pl.BlockSpec((d, tile), lambda i: (0, i)),
        ),
        compiler_params=pltpu.CompilerParams(
            dimension_semantics=("parallel",),   # spreads steps over both TCs on v7x
            vmem_limit_bytes=vmem_limit,
        ),
    )(idx2d, tables_t)

    out_t = out_t[:, :bf]
    if out_layout == "DBF":
        return out_t.reshape(d, b, f)            # kernel-native: no output transpose
    return out_t.T.reshape(b, f, d)              # matches torch.stack([...], dim=1)


# ----------------------------------------------------------------------------
# Path B: DMA gather from HBM (large vocabularies; O(BF*D) bytes, indep. of T)
# ----------------------------------------------------------------------------
def _embed_gather_kernel(idx_ref, table_ref, out_ref, sem):
    """Gather `block` embedding rows per grid step via per-row async DMAs.

    idx_ref   : (BF_pad,) int32 in SMEM (scalar prefetch, whole array)
    table_ref : (T, D) in HBM (memory_space=pl.ANY)
    out_ref   : (block, D) VMEM output block (DMA'd into directly)
    sem       : (1,) DMA semaphore shared by all row copies of this step
    """
    block = out_ref.shape[0]
    base = pl.program_id(0) * block

    def issue(r, carry):
        row = idx_ref[base + r]
        pltpu.make_async_copy(
            table_ref.at[pl.ds(row, 1)], out_ref.at[pl.ds(r, 1)], sem.at[0]
        ).start()
        return carry

    jax.lax.fori_loop(0, block, issue, 0)

    def drain(r, carry):
        # All row copies are the same size; each wait retires one of them.
        pltpu.make_async_copy(
            table_ref.at[pl.ds(0, 1)], out_ref.at[pl.ds(r, 1)], sem.at[0]
        ).wait()
        return carry

    jax.lax.fori_loop(0, block, drain, 0)


def _embed_forward_gather(flat_idx, tables, b, f, d, *, block, out_layout):
    bf = b * f
    block = max(8, (block // 8) * 8)
    block = min(block, max(8, pl.cdiv(bf, 8) * 8))
    bf_pad = pl.cdiv(bf, block) * block
    if bf_pad != bf:
        flat_idx = jnp.pad(flat_idx, (0, bf_pad - bf))   # pad with valid row 0

    out = pl.pallas_call(
        _embed_gather_kernel,
        out_shape=jax.ShapeDtypeStruct((bf_pad, d), tables.dtype),
        grid_spec=pltpu.PrefetchScalarGridSpec(
            num_scalar_prefetch=1,                        # flat_idx -> SMEM
            grid=(bf_pad // block,),
            in_specs=[pl.BlockSpec(memory_space=pl.ANY)], # table stays in HBM
            out_specs=pl.BlockSpec((block, d), lambda i, idx: (i, 0)),
            scratch_shapes=[pltpu.SemaphoreType.DMA((1,))],
        ),
        compiler_params=pltpu.CompilerParams(
            dimension_semantics=("arbitrary",),
        ),
    )(flat_idx, tables)

    out = out[:bf]
    if out_layout == "DBF":
        return out.reshape(b, f, d).transpose(2, 0, 1)
    return out.reshape(b, f, d)                           # already row-major -> free


# ----------------------------------------------------------------------------
# Public forward
# ----------------------------------------------------------------------------
def embed_layer_forward(sparse_input, tables, offsets, *, tables_t=None,
                        tile=None, block=256, compute_dtype=None,
                        out_layout="BFD", path="auto", vmem_budget_frac=0.6):
    """Pallas EmbedLayer forward.

    sparse_input : (B, F) int32, sparse_input[:, f] in [0, embed_num[f])
    tables       : (T, D) float, all per-field embedding tables concatenated
    offsets      : (F,)   int32, starting row of each field's table
    tables_t     : optional pre-prepared (D, T_pad) operand from
                   prepare_onehot_operand(); pass it to avoid re-transposing the
                   table on every forward call (recommended).
    tile / block : per-step rows for the one-hot / gather paths (auto-sized).
    compute_dtype: MXU dtype for the one-hot path (bf16 worthwhile on v6e/v7x).
    out_layout   : "BFD" (default, matches torch.stack dim=1) or "DBF"
                   (kernel-native for the one-hot path; skips the transpose).
    path         : "auto" | "onehot" | "gather".
    returns      : (B, F, D) for "BFD", (D, B, F) for "DBF".
    """
    b, f = sparse_input.shape
    t, d = tables.shape
    vmem_bytes, k_align, num_cores = _tpu_generation_info()

    if compute_dtype is None:
        compute_dtype = tables_t.dtype if tables_t is not None else tables.dtype
    itemsize = jnp.dtype(compute_dtype).itemsize

    # Flatten (batch, field) and add per-field row offsets (plain-JAX glue).
    flat_idx = (sparse_input.astype(jnp.int32)
                + offsets[None, :].astype(jnp.int32)).reshape(-1)   # (BF,)
    bf = b * f

    t_pad = tables_t.shape[1] if tables_t is not None else pl.cdiv(t, k_align) * k_align
    tile_sel = tile if tile is not None else _pick_tile(bf, t_pad, itemsize, num_cores)
    # VMEM needed by the one-hot path: resident table (single buffer) + live
    # one-hot + double-buffered out/idx blocks.
    onehot_need = (d * t_pad * itemsize
                   + t_pad * tile_sel * itemsize
                   + 2 * d * tile_sel * tables.dtype.itemsize
                   + 2 * tile_sel * 4)

    if path == "auto":
        path = "onehot" if onehot_need <= vmem_budget_frac * vmem_bytes else "gather"

    if path == "onehot":
        if tables_t is None:
            # NOTE: callers should precompute this once and pass it in -- doing it
            # here costs a full HBM read+write of the table on every forward.
            tables_t = prepare_onehot_operand(tables, k_align=k_align,
                                              compute_dtype=compute_dtype)
        return _embed_forward_onehot(flat_idx, tables_t, b, f, d,
                                     out_dtype=tables.dtype, tile=tile_sel,
                                     onehot_need=onehot_need,
                                     vmem_bytes=vmem_bytes, out_layout=out_layout)
    if path == "gather":
        return _embed_forward_gather(flat_idx, tables, b, f, d,
                                     block=block, out_layout=out_layout)
    raise ValueError(f"unknown path {path!r}")


def make_embed_params(embed_num, embed_dim, key):
    """Deterministic init mirroring nn.init.uniform_(w, -0.05, 0.05)."""
    tables, offsets, off = [], [], 0
    for i, num in enumerate(embed_num):
        k = jax.random.fold_in(key, i)
        tables.append(jax.random.uniform(k, (num, embed_dim), jnp.float32, -0.05, 0.05))
        offsets.append(off)
        off += num
    return jnp.concatenate(tables, axis=0), jnp.asarray(offsets, jnp.int32)


if __name__ == "__main__":
    key = jax.random.PRNGKey(0)

    # Small shapes consistent with the module; batch deliberately NOT a multiple
    # of any tile so the padding paths are exercised.
    embed_num = [10, 20, 30, 40]   # one nn.Embedding per sparse field
    embed_dim = 16
    batch = 250
    num_fields = len(embed_num)

    tables, offsets = make_embed_params(embed_num, embed_dim, key)

    # sparse_input[:, i] in [0, embed_num[i])
    idx_cols = []
    for i, num in enumerate(embed_num):
        k = jax.random.fold_in(jax.random.fold_in(key, 1000), i)
        idx_cols.append(jax.random.randint(k, (batch, 1), 0, num, jnp.int32))
    sparse_input = jnp.concatenate(idx_cols, axis=1)   # (batch, num_fields)

    # Pure-JAX reference: per-field table lookup, stacked on dim=1.
    flat = (sparse_input + offsets[None, :]).reshape(-1)
    ref = jnp.take(tables, flat, axis=0).reshape(batch, num_fields, embed_dim)

    # Prepare the transposed/padded table ONCE (parameter-time, not per call).
    _, k_align, _ = _tpu_generation_info()
    tables_t = prepare_onehot_operand(tables, k_align=k_align)

    # Path A: one-hot matmul (auto-selected for this small concatenated vocab).
    out_a = embed_layer_forward(sparse_input, tables, offsets, tables_t=tables_t)
    out_a = jax.block_until_ready(out_a)
    assert out_a.shape == (batch, num_fields, embed_dim)
    assert jnp.allclose(out_a, ref, atol=1e-6), "onehot path mismatch vs reference"

    # Path B: DMA-gather fallback (forced, to exercise the large-vocab path).
    out_b = embed_layer_forward(sparse_input, tables, offsets, path="gather")
    out_b = jax.block_until_ready(out_b)
    assert out_b.shape == (batch, num_fields, embed_dim)
    assert jnp.allclose(out_b, ref), "gather path mismatch vs reference"

    print("KERNEL_OK")
</pallas_src>

<mosaic_0001>
module attributes {stable_mosaic.version = 11 : i64} {
  func.func @_embed_onehot_kernel(%arg0: i32, %arg1: memref<1x1024xi32, #tpu.memory_space<vmem>>, %arg2: memref<16x256xf32, #tpu.memory_space<vmem>>, %arg3: memref<16x1024xf32, #tpu.memory_space<vmem>>) attributes {dimension_semantics = [#tpu.dimension_semantics<parallel>], iteration_bounds = array<i64: 1>, scalar_prefetch = 0 : i64, scratch_operands = 0 : i64, tpu.core_type = #tpu.core_type<tc>, window_params = [{transform_indices = @transform_0, window_bounds = array<i64: 1, 1024>}, {pipeline_mode = #tpu.pipeline_mode<synchronous>, transform_indices = @transform_1, window_bounds = array<i64: 16, 256>}, {transform_indices = @transform_2, window_bounds = array<i64: 16, 1024>}]} {
    %c0 = arith.constant 0 : index
    %c0_0 = arith.constant 0 : index
    %0 = vector.load %arg1[%c0, %c0_0] : memref<1x1024xi32, #tpu.memory_space<vmem>>, vector<1x1024xi32>
    %1 = tpu.iota {dimensions = array<i32: 0>} : vector<256x1024xi32>
    %2 = vector.broadcast %0 : vector<1x1024xi32> to vector<256x1024xi32>
    %3 = arith.cmpi eq, %1, %2 : vector<256x1024xi32>
    %4 = arith.extui %3 : vector<256x1024xi1> to vector<256x1024xi32>
    %5 = arith.sitofp %4 : vector<256x1024xi32> to vector<256x1024xf32>
    %c0_1 = arith.constant 0 : index
    %c0_2 = arith.constant 0 : index
    %6 = vector.load %arg2[%c0_1, %c0_2] : memref<16x256xf32, #tpu.memory_space<vmem>>, vector<16x256xf32>
    %cst = arith.constant dense<0.000000e+00> : vector<16x1024xf32>
    %7 = tpu.matmul %6, %5, %cst {dimension_numbers = #tpu.dot_dimension_numbers<[1], [0], [0], [1], [0, 0, 1, 1], [], []>, precision = #tpu.contract_precision<fp32>} : vector<16x256xf32>, vector<256x1024xf32>, vector<16x1024xf32> -> vector<16x1024xf32>
    %c0_3 = arith.constant 0 : index
    %c0_4 = arith.constant 0 : index
    %8 = vector.load %arg3[%c0_3, %c0_4] : memref<16x1024xf32, #tpu.memory_space<vmem>>, vector<16x1024xf32>
    tpu.vector_store %arg3[%c0_3, %c0_4], %7 {strides = array<i32>} : memref<16x1024xf32, #tpu.memory_space<vmem>>, vector<16x1024xf32>,
    return
  }
  func.func @transform_0(%arg0: i32) -> (i32, i32) {
    %c0_i32 = arith.constant 0 : i32
    %c0_i32_0 = arith.constant 0 : i32
    return %c0_i32, %arg0 : i32, i32
  }
  func.func @transform_1(%arg0: i32) -> (i32, i32) {
    %c0_i32 = arith.constant 0 : i32
    %c0_i32_0 = arith.constant 0 : i32
    %c0_i32_1 = arith.constant 0 : i32
    return %c0_i32, %c0_i32_0 : i32, i32
  }
  func.func @transform_2(%arg0: i32) -> (i32, i32) {
    %c0_i32 = arith.constant 0 : i32
    %c0_i32_0 = arith.constant 0 : i32
    return %c0_i32, %arg0 : i32, i32
  }
}

</mosaic_0001>

<bundles_post_ra>
// kernel: tpu_custom_call.1
= control target key start
LH: loop header
LB: loop body
LE: loop exit
PB: predicated region body
PF: predicated region fallthrough
CT: control target
= control target key end

     0   :  { %7 = vsyncpa [#allocation3], 0  ;;  %s15369_s0 = inlined_call_operand.hbm [shape: s32[1,1024], index: 0, kind: input, shape index: {}]   ;;  %s15370_s1 = inlined_call_operand.hbm [shape: f32[16,256], index: 1, kind: input, shape index: {}]   ;;  %s15371_s2 = inlined_call_operand.hbm [shape: f32[16,1024], index: 2, kind: output, shape index: {}]  }
   0x1   :  { %8 = vsyncpa [#allocation6], 0 }
   0x2   :  { %9 = vsyncpa [#allocation4], 0  ;;  %s9016_s9 = smov [#allocation2]   ;;  %s9017_s11 = smov [#allocation5]  }
   0x3   :  { %s16_s10 = sshll.u32 %s9016_s9, 4  ;;  %s25_s12 = sshll.u32 %s9017_s11, 4  ;;  %s17_s10 = int_to_ptr.vmem [resolvable:$true] %s16_s10  ;;  %s9040_s12 = int_to_ptr.vmem [resolvable:$true] %s25_s12 }
   0x4   :  { %s8944_s15 = scalar_lea.hbm %s15369_s0, 128 }
   0x5   :  { %p8945_p0 = scmp.ne.s32.totalorder %s15369_s0, %s8944_s15  ;;  %p8948_p1 = scmp.lt.u32.totalorder %s8944_s15, %s15369_s0 }
   0x7   :  { %p8950_p2 = pnand %p8948_p1, %p8945_p0 }
   0x9   :  { %8953 = shalt.err (!%p8950_p2)
}
   0xa   :  { %s8954_s20 = scalar_lea.vmem %s17_s10, 128  ;;  %p8959_p4 = scmp.lt.s32.totalorder %s17_s10, %s17_s10 }
   0xb   :  { %p8955_p3 = scmp.ne.s32.totalorder %s17_s10, %s8954_s20  ;;  %p8960_p5 = scmp.lt.s32.totalorder %s8954_s20, %s8954_s20 }
   0xd   :  { %p8961_p6 = por %p8960_p5, %p8959_p4 }
   0xf   :  { %p8962_p7 = pnand %p8961_p6, %p8955_p3 }
  0x11   :  { %8965 = shalt.err (!%p8962_p7)
}
  0x12   :  { %19 = dma.hbm_to_vmem [thread:$0]  %s15369_s0, 128, %s17_s10, [#allocation3]  }
  0x13   :  { %s8966_s25 = scalar_lea.hbm %s15370_s1, 512 }
  0x14   :  { %p8967_p8 = scmp.ne.s32.totalorder %s15370_s1, %s8966_s25  ;;  %p8970_p9 = scmp.lt.u32.totalorder %s8966_s25, %s15370_s1 }
  0x16   :  { %p8972_p10 = pnand %p8970_p9, %p8967_p8 }
  0x18   :  { %8975 = shalt.err (!%p8972_p10)
}
  0x19   :  { %s8976_s30 = scalar_lea.vmem %s9040_s12, 512  ;;  %p8981_p12 = scmp.lt.s32.totalorder %s9040_s12, %s9040_s12 }
  0x1a   :  { %p8977_p11 = scmp.ne.s32.totalorder %s9040_s12, %s8976_s30  ;;  %p8982_p13 = scmp.lt.s32.totalorder %s8976_s30, %s8976_s30 }
  0x1c   :  { %p8983_p0 = por %p8982_p13, %p8981_p12 }
  0x1e   :  { %p8984_p1 = pnand %p8983_p0, %p8977_p11 }
  0x20   :  { %8987 = shalt.err (!%p8984_p1)
}
  0x21   :  { %s9018_s0 = smov 256   ;;  %s9019_s3 = smov 16  }
  0x22   :  { %31 = dma.hbm_to_vmem [thread:$0]  %s15370_s1, 512, %s9040_s12, [#allocation6], %s9018_s0, %s9018_s0, %s9019_s3  }
  0x23   :  { %9010 = dma.done.wait [#allocation3], 128  }
  0x24   :  { %9011 = vsyncadd [#allocation3], 4294967168 }
  0x25   :  { %9012 = dma.done.wait [#allocation6], 512  }
  0x26   :  { %9013 = vsyncadd [#allocation6], 4294966784  ;;  %v39_v0 = vlaneseq  ;;  %v38_v14 = vld [vmem:[#allocation2] sm:$0xff]  ;;  %v15418_v27 = vmov 0.0   ;;  %v16713_v30 = vmov 0  ;;  %v16718_v36 = vmov 0 }
  0x27   :  { %v15384_v33 = vmov 1.0|1.0   ;;  %v16721_v41 = vmov 0  ;;  %v16726_v46 = vmov 0  ;;  %v16731_v53 = vmov 0  ;;  %s9022_s1 = smov [#allocation7]  }
  0x28   :  { %v9071_v1 = vshrl.u32 %v39_v0, 7  ;;  %v16734_v58 = vmov 0  ;;  %s6281_s6 = sshll.u32 %s9022_s1, 4  ;;  %s6282_s6 = int_to_ptr.vmem [resolvable:$true] %s6281_s6 }
  0x29   :  { %s8988_s7 = scalar_lea.vmem %s6282_s6, 2048  ;;  %p8993_p3 = scmp.lt.s32.totalorder %s6282_s6, %s6282_s6 }
  0x2a   :  { %16696 = vst [vmem:[#allocation11_spill] sm:$0xff] %v9071_v1  ;;  %v9074_v2 = vadd.s32 8, %v9071_v1  ;;  %v78_v3 = vsub.s32 1, %v9071_v1  ;;  %v86_v4 = vsub.s32 3, %v9071_v1  ;;  %v74_v5 = vsub.s32 0, %v9071_v1  ;;  %p8989_p2 = scmp.ne.s32.totalorder %s6282_s6, %s8988_s7  ;;  %p8994_p4 = scmp.lt.s32.totalorder %s8988_s7, %s8988_s7 }
  0x2b   :  { %v82_v6 = vsub.s32 2, %v9071_v1  ;;  %v9081_v7 = vadd.s32 16, %v9071_v1  ;;  %v9084_v8 = vadd.s32 24, %v9071_v1  ;;  %v9087_v9 = vadd.s32 32, %v9071_v1 }
  0x2c   :  { %16697 = vst [vmem:[#allocation12_spill] sm:$0xff] %v9074_v2  ;;  %v9090_v10 = vadd.s32 40, %v9071_v1  ;;  %v9093_v11 = vadd.s32 48, %v9071_v1  ;;  %v9096_v12 = vadd.s32 56, %v9071_v1  ;;  %v9099_v13 = vadd.s32 64, %v9071_v1  ;;  %p8995_p5 = por %p8994_p4, %p8993_p3 }
  0x2d   :  { %16698 = vst [vmem:[#allocation13_spill] sm:$0xff] %v9081_v7  ;;  %16699 = vst [vmem:[#allocation14_spill] sm:$0xff] %v9084_v8  ;;  %v9102_v15 = vadd.s32 72, %v9071_v1  ;;  %v9105_v16 = vadd.s32 80, %v9071_v1  ;;  %v9108_v17 = vadd.s32 88, %v9071_v1  ;;  %v9111_v18 = vadd.s32 96, %v9071_v1 }
  0x2e   :  { %16700 = vst [vmem:[#allocation15_spill] sm:$0xff] %v9087_v9  ;;  %16701 = vst [vmem:[#allocation16_spill] sm:$0xff] %v9090_v10  ;;  %v9113_v19 = vrot.slane %v38_v14, %v78_v3  ;;  %v9115_v20 = vrot.slane %v38_v14, %v86_v4  ;;  %v9117_v21 = vrot.slane %v38_v14, %v74_v5  ;;  %v9122_v23 = vadd.s32 104, %v9071_v1  ;;  %p8996_p6 = pnand %p8995_p5, %p8989_p2 }
  0x2f   :  { %16702 = vst [vmem:[#allocation17_spill] sm:$0xff] %v9093_v11  ;;  %16703 = vst [vmem:[#allocation18_spill] sm:$0xff] %v9096_v12  ;;  %v9119_v22 = vrot.slane %v38_v14, %v82_v6  ;;  %v9125_v24 = vadd.s32 112, %v9071_v1  ;;  %v9128_v25 = vadd.s32 120, %v9071_v1  ;;  %v9131_v26 = vadd.s32 128, %v9071_v1 }
  0x30   :  { %16704 = vst [vmem:[#allocation19_spill] sm:$0xff] %v9099_v13  ;;  %16705 = vst [vmem:[#allocation20_spill] sm:$0xff] %v9102_v15  ;;  %vm105_vm0 = vcmp.eq.s32.totalorder %v9071_v1, %v9113_v19  ;;  %vm113_vm1 = vcmp.eq.s32.totalorder %v9074_v2, %v9113_v19  ;;  %vm107_vm2 = vcmp.eq.s32.totalorder %v9071_v1, %v9115_v20 }
  0x31   :  { %16706 = vst [vmem:[#allocation21_spill] sm:$0xff] %v9105_v16  ;;  %16707 = vst [vmem:[#allocation22_spill] sm:$0xff] %v9108_v17  ;;  %vm115_vm3 = vcmp.eq.s32.totalorder %v9074_v2, %v9115_v20  ;;  %v6295_v28 = vsel %vm105_vm0, 1.0, %v15418_v27  ;;  %v6303_v29 = vsel %vm113_vm1, 1.0, %v15418_v27  ;;  %v6297_v31 = vsel %vm107_vm2, 1.0, %v15418_v27 }
  0x32   :  { %16708 = vst [vmem:[#allocation23_spill] sm:$0xff] %v9111_v18  ;;  %16709 = vst [vmem:[#allocation24_spill] sm:$0xff] %v9122_v23  ;;  %v6305_v32 = vsel %vm115_vm3, 1.0, %v15418_v27  ;;  %v9152_v34 = vsub.f32 %v6295_v28, %v6295_v28  ;;  %v9154_v35 = vsub.f32 %v6303_v29, %v6303_v29  ;;  %v9160_v37 = vsub.f32 %v6297_v31, %v6297_v31 }
  0x33   :  { %16710 = vst [vmem:[#allocation25_spill] sm:$0xff] %v9125_v24  ;;  %16711 = vst [vmem:[#allocation26_spill] sm:$0xff] %v9128_v25  ;;  %v9162_v38 = vsub.f32 %v6305_v32, %v6305_v32  ;;  %vm104_vm6 = vcmp.eq.s32.totalorder %v9071_v1, %v9117_v21  ;;  %vm112_vm7 = vcmp.eq.s32.totalorder %v9074_v2, %v9117_v21  ;;  %v16740_v32 = vmov 0 }
  0x34   :  { %16712 = vst [vmem:[#allocation27_spill] sm:$0xff] %v9131_v26  ;;  %vm9143_vm4 = vmpackc.low %vm113_vm1, %vm105_vm0  ;;  %vm106_vm8 = vcmp.eq.s32.totalorder %v9071_v1, %v9119_v22  ;;  %vm114_vm9 = vcmp.eq.s32.totalorder %v9074_v2, %v9119_v22  ;;  %v6294_v39 = vsel %vm104_vm6, 1.0, %v15418_v27  ;;  %v6302_v40 = vsel %vm112_vm7, 1.0, %v15418_v27 }
  0x35   :  { %v16714_v30 = vsel %vm9143_vm4, 4294967295, %v16713_v30  ;;  %7319 = vmatprep.subr.msk.bf16.mxu0 %vm9143_vm4, %v15384_v33  ;;  %16716 = vst [vmem:[#allocation29_spill] sm:$0xff] %v9152_v34  ;;  %16717 = vst [vmem:[#allocation30_spill] sm:$0xff] %v9154_v35  ;;  %v6296_v42 = vsel %vm106_vm8, 1.0, %v15418_v27  ;;  %v6304_v43 = vsel %vm114_vm9, 1.0, %v15418_v27  ;;  %v9186_v44 = vsub.f32 %v6294_v39, %v6294_v39 }
  0x36   :  { %16715 = vst [vmem:[#allocation28_spill] sm:$0xff] %v16714_v30  ;;  %vm9156_vm5 = vmpackc.low %vm115_vm3, %vm107_vm2  ;;  %v9188_v45 = vsub.f32 %v6302_v40, %v6302_v40  ;;  %v9194_v47 = vsub.f32 %v6296_v42, %v6296_v42  ;;  %v9196_v48 = vsub.f32 %v6304_v43, %v6304_v43  ;;  %vm121_vm12 = vcmp.eq.s32.totalorder %v9081_v7, %v9113_v19 }
  0x37   :  { %v16719_v36 = vsel %vm9156_vm5, 4294967295, %v16718_v36  ;;  %7703 = vmatprep.subr.msk.bf16.mxu1 %vm9156_vm5, %v15384_v33  ;;  %vm9177_vm10 = vmpackc.low %vm112_vm7, %vm104_vm6  ;;  %16724 = vst [vmem:[#allocation33_spill] sm:$0xff] %v9186_v44  ;;  %vm129_vm13 = vcmp.eq.s32.totalorder %v9084_v8, %v9113_v19  ;;  %vm123_vm14 = vcmp.eq.s32.totalorder %v9081_v7, %v9115_v20  ;;  %vm131_vm15 = vcmp.eq.s32.totalorder %v9084_v8, %v9115_v20 }
  0x38   :  { %16720 = vst [vmem:[#allocation31_spill] sm:$0xff] %v16719_v36  ;;  %v16722_v41 = vsel %vm9177_vm10, 4294967295, %v16721_v41  ;;  %7321 = vmatpush1.bf16.msk.msra.mxu0 %vm9177_vm10, %v15384_v33  ;;  %16725 = vst [vmem:[#allocation34_spill] sm:$0xff] %v9188_v45  ;;  %v15375_v49 = vand.u32 4294901760, %v9186_v44  ;;  %v15374_v50 = vand.u32 4294901760, %v9188_v45  ;;  %v15373_v51 = vand.u32 4294901760, %v9194_v47 }
  0x39   :  { %16723 = vst [vmem:[#allocation32_spill] sm:$0xff] %v16722_v41  ;;  %vm9190_vm11 = vmpackc.low %vm114_vm9, %vm106_vm8  ;;  %v15372_v52 = vand.u32 4294901760, %v9196_v48  ;;  %v6311_v54 = vsel %vm121_vm12, 1.0, %v15418_v27  ;;  %v6319_v55 = vsel %vm129_vm13, 1.0, %v15418_v27  ;;  %v6313_v56 = vsel %vm123_vm14, 1.0, %v15418_v27 }
  0x3a   :  { %v16727_v46 = vsel %vm9190_vm11, 4294967295, %v16726_v46  ;;  %16729 = vst [vmem:[#allocation36_spill] sm:$0xff] %v9194_v47  ;;  %16730 = vst [vmem:[#allocation37_spill] sm:$0xff] %v9196_v48  ;;  %7705 = vmatpush1.bf16.msk.msra.mxu1 %vm9190_vm11, %v15384_v33  ;;  %v6321_v57 = vsel %vm131_vm15, 1.0, %v15418_v27  ;;  %v9231_v59 = vsub.f32 %v9186_v44, %v15375_v49  ;;  %v9236_v60 = vsub.f32 %v9188_v45, %v15374_v50 }
  0x3b   :  { %16728 = vst [vmem:[#allocation35_spill] sm:$0xff] %v16727_v46  ;;  %vm9213_vm0 = vmpackc.low %vm129_vm13, %vm121_vm12  ;;  %v9241_v61 = vsub.f32 %v9194_v47, %v15373_v51  ;;  %v9246_v62 = vsub.f32 %v9196_v48, %v15372_v52  ;;  %v9251_v63 = vsub.f32 %v6311_v54, %v6311_v54  ;;  %v9253_v0 = vsub.f32 %v6319_v55, %v6319_v55 }
  0x3c   :  { %v16732_v53 = vsel %vm9213_vm0, 4294967295, %v16731_v53  ;;  %7323 = vmatprep.subr.msk.bf16.mxu0 %vm9213_vm0, %v15384_v33  ;;  %vm9224_vm1 = vmpackc.low %vm131_vm15, %vm123_vm14  ;;  %v9255_v3 = vsub.f32 %v6313_v56, %v6313_v56  ;;  %v9257_v4 = vsub.f32 %v6321_v57, %v6321_v57  ;;  %vm120_vm2 = vcmp.eq.s32.totalorder %v9081_v7, %v9117_v21 }
  0x3d   :  { %16733 = vst [vmem:[#allocation38_spill] sm:$0xff] %v16732_v53  ;;  %v16735_v58 = vsel %vm9224_vm1, 4294967295, %v16734_v58  ;;  %7707 = vmatprep.subr.msk.bf16.mxu1 %vm9224_vm1, %v15384_v33  ;;  %16737 = vst [vmem:[#allocation40_spill] sm:$0xff] %v9253_v0  ;;  %vm128_vm3 = vcmp.eq.s32.totalorder %v9084_v8, %v9117_v21  ;;  %vm122_vm6 = vcmp.eq.s32.totalorder %v9081_v7, %v9119_v22  ;;  %v6310_v29 = vsel %vm120_vm2, 1.0, %v15418_v27 }
  0x3e   :  { %16736 = vst [vmem:[#allocation39_spill] sm:$0xff] %v16735_v58  ;;  %16738 = vst [vmem:[#allocation41_spill] sm:$0xff] %v9255_v3  ;;  %vm130_vm7 = vcmp.eq.s32.totalorder %v9084_v8, %v9119_v22  ;;  %v6318_v31 = vsel %vm128_vm3, 1.0, %v15418_v27  ;;  %v6312_v39 = vsel %vm122_vm6, 1.0, %v15418_v27  ;;  %v9282_v42 = vsub.f32 %v6310_v29, %v6310_v29 }
  0x3f   :  { %16739 = vst [vmem:[#allocation42_spill] sm:$0xff] %v9257_v4  ;;  %vm9273_vm8 = vmpackc.low %vm128_vm3, %vm120_vm2  ;;  %v6320_v40 = vsel %vm130_vm7, 1.0, %v15418_v27  ;;  %v9284_v43 = vsub.f32 %v6318_v31, %v6318_v31  ;;  %v16745_v54 = vmov 0  ;;  %v9290_v55 = vsub.f32 %v6312_v39, %v6312_v39 }
  0x40   :  { %v16741_v32 = vsel %vm9273_vm8, 4294967295, %v16740_v32  ;;  %7325 = vmatpush1.bf16.msk.msra.mxu0 %vm9273_vm8, %v15384_v33  ;;  %16743 = vst [vmem:[#allocation44_spill] sm:$0xff] %v9282_v42  ;;  %vm9286_vm9 = vmpackc.low %vm130_vm7, %vm122_vm6  ;;  %v9292_v56 = vsub.f32 %v6320_v40, %v6320_v40  ;;  %vm137_vm12 = vcmp.eq.s32.totalorder %v9087_v9, %v9113_v19  ;;  %vm145_vm13 = vcmp.eq.s32.totalorder %v9090_v10, %v9113_v19 }
  0x41   :  { %16742 = vst [vmem:[#allocation43_spill] sm:$0xff] %v16741_v32  ;;  %16744 = vst [vmem:[#allocation45_spill] sm:$0xff] %v9284_v43  ;;  %v16746_v54 = vsel %vm9286_vm9, 4294967295, %v16745_v54  ;;  %7709 = vmatpush1.bf16.msk.msra.mxu1 %vm9286_vm9, %v15384_v33  ;;  %vm139_vm14 = vcmp.eq.s32.totalorder %v9087_v9, %v9115_v20  ;;  %vm147_vm15 = vcmp.eq.s32.totalorder %v9090_v10, %v9115_v20  ;;  %v16750_v40 = vmov 0 }
  0x42   :  { %16747 = vst [vmem:[#allocation46_spill] sm:$0xff] %v16746_v54  ;;  %16748 = vst [vmem:[#allocation47_spill] sm:$0xff] %v9290_v55  ;;  %v6327_v52 = vsel %vm137_vm12, 1.0, %v15418_v27  ;;  %v6335_v51 = vsel %vm145_vm13, 1.0, %v15418_v27  ;;  %v6329_v50 = vsel %vm139_vm14, 1.0, %v15418_v27  ;;  %v6337_v49 = vsel %vm147_vm15, 1.0, %v15418_v27 }
  0x43   :  { %16749 = vst [vmem:[#allocation48_spill] sm:$0xff] %v9292_v56  ;;  %vm9309_vm2 = vmpackc.low %vm145_vm13, %vm137_vm12  ;;  %v16753_v31 = vmov 0  ;;  %v9324_v39 = vsub.f32 %v6327_v52, %v6327_v52  ;;  %v9326_v29 = vsub.f32 %v6335_v51, %v6335_v51  ;;  %v9331_v57 = vsub.f32 %v6329_v50, %v6329_v50 }
  0x44   :  { %v16751_v40 = vsel %vm9309_vm2, 4294967295, %v16750_v40  ;;  %7327 = vmatprep.subr.msk.bf16.mxu0 %vm9309_vm2, %v15384_v33  ;;  %vm9320_vm3 = vmpackc.low %vm147_vm15, %vm139_vm14  ;;  %v9333_v28 = vsub.f32 %v6337_v49, %v6337_v49  ;;  %vm136_vm6 = vcmp.eq.s32.totalorder %v9087_v9, %v9117_v21  ;;  %vm144_vm7 = vcmp.eq.s32.totalorder %v9090_v10, %v9117_v21 }
  0x45   :  { %16752 = vst [vmem:[#allocation49_spill] sm:$0xff] %v16751_v40  ;;  %v16754_v31 = vsel %vm9320_vm3, 4294967295, %v16753_v31  ;;  %16756 = vst [vmem:[#allocation51_spill] sm:$0xff] %v9324_v39  ;;  %7711 = vmatprep.subr.msk.bf16.mxu1 %vm9320_vm3, %v15384_v33  ;;  %vm138_vm12 = vcmp.eq.s32.totalorder %v9087_v9, %v9119_v22  ;;  %vm146_vm13 = vcmp.eq.s32.totalorder %v9090_v10, %v9119_v22  ;;  %v6326_v51 = vsel %vm136_vm6, 1.0, %v15418_v27 }
  0x46   :  { %16755 = vst [vmem:[#allocation50_spill] sm:$0xff] %v16754_v31  ;;  %16757 = vst [vmem:[#allocation52_spill] sm:$0xff] %v9326_v29  ;;  %v6334_v52 = vsel %vm144_vm7, 1.0, %v15418_v27  ;;  %v16760_v50 = vmov 0  ;;  %v6328_v49 = vsel %vm138_vm12, 1.0, %v15418_v27  ;;  %v6336_v14 = vsel %vm146_vm13, 1.0, %v15418_v27 }
  0x47   :  { %16758 = vst [vmem:[#allocation53_spill] sm:$0xff] %v9331_v57  ;;  %16759 = vst [vmem:[#allocation54_spill] sm:$0xff] %v9333_v28  ;;  %v9354_v6 = vsub.f32 %v6326_v51, %v6326_v51  ;;  %v9356_v5 = vsub.f32 %v6334_v52, %v6334_v52  ;;  %v16765_v10 = vmov 0  ;;  %v9362_v9 = vsub.f32 %v6328_v49, %v6328_v49 }
  0x48   :  { %vm9345_vm14 = vmpackc.low %vm144_vm7, %vm136_vm6  ;;  %v9364_v8 = vsub.f32 %v6336_v14, %v6336_v14  ;;  %vm153_vm6 = vcmp.eq.s32.totalorder %v9093_v11, %v9113_v19  ;;  %vm161_vm7 = vcmp.eq.s32.totalorder %v9096_v12, %v9113_v19  ;;  %v16774_v52 = vmov 0 }
  0x49   :  { %v16761_v50 = vsel %vm9345_vm14, 4294967295, %v16760_v50  ;;  %7329 = vmatpush1.bf16.msk.msra.mxu0 %vm9345_vm14, %v15384_v33  ;;  %16763 = vst [vmem:[#allocation56_spill] sm:$0xff] %v9354_v6  ;;  %16764 = vst [vmem:[#allocation57_spill] sm:$0xff] %v9356_v5  ;;  %v6343_v7 = vsel %vm153_vm6, 1.0, %v15418_v27  ;;  %v6351_v2 = vsel %vm161_vm7, 1.0, %v15418_v27 }
  0x4a   :  { %16762 = vst [vmem:[#allocation55_spill] sm:$0xff] %v16761_v50  ;;  %vm9358_vm15 = vmpackc.low %vm146_vm13, %vm138_vm12  ;;  %vm155_vm12 = vcmp.eq.s32.totalorder %v9093_v11, %v9115_v20  ;;  %vm163_vm13 = vcmp.eq.s32.totalorder %v9096_v12, %v9115_v20  ;;  %v9396_v49 = vsub.f32 %v6343_v7, %v6343_v7  ;;  %v9398_v50 = vsub.f32 %v6351_v2, %v6351_v2 }
  0x4b   :  { %v16766_v10 = vsel %vm9358_vm15, 4294967295, %v16765_v10  ;;  %16768 = vst [vmem:[#allocation59_spill] sm:$0xff] %v9362_v9  ;;  %16769 = vst [vmem:[#allocation60_spill] sm:$0xff] %v9364_v8  ;;  %7713 = vmatpush1.bf16.msk.msra.mxu1 %vm9358_vm15, %v15384_v33  ;;  %v16770_v33 = vmov 0  ;;  %v6345_v51 = vsel %vm155_vm12, 1.0, %v15418_v27  ;;  %v6353_v14 = vsel %vm163_vm13, 1.0, %v15418_v27 }
  0x4c   :  { %16767 = vst [vmem:[#allocation58_spill] sm:$0xff] %v16766_v10  ;;  %vm9381_vm15 = vmpackc.low %vm161_vm7, %vm153_vm6  ;;  %v16773_v10 = vmov 1.0|1.0   ;;  %v9403_v31 = vsub.f32 %v6345_v51, %v6345_v51  ;;  %vm152_vm6 = vcmp.eq.s32.totalorder %v9093_v11, %v9117_v21  ;;  %vm160_vm7 = vcmp.eq.s32.totalorder %v9096_v12, %v9117_v21 }
  0x4d   :  { %v16771_v33 = vsel %vm9381_vm15, 4294967295, %v16770_v33  ;;  %7331 = vmatprep.subr.msk.bf16.mxu0 %vm9381_vm15, %v16773_v10  ;;  %vm9392_vm14 = vmpackc.low %vm163_vm13, %vm155_vm12  ;;  %16777 = vst [vmem:[#allocation63_spill] sm:$0xff] %v9396_v49  ;;  %vm154_vm12 = vcmp.eq.s32.totalorder %v9093_v11, %v9119_v22  ;;  %vm162_vm13 = vcmp.eq.s32.totalorder %v9096_v12, %v9119_v22  ;;  %v6342_v2 = vsel %vm152_vm6, 1.0, %v15418_v27 }
  0x4e   :  { %16772 = vst [vmem:[#allocation61_spill] sm:$0xff] %v16771_v33  ;;  %v16775_v52 = vsel %vm9392_vm14, 4294967295, %v16774_v52  ;;  %16778 = vst [vmem:[#allocation64_spill] sm:$0xff] %v9398_v50  ;;  %7715 = vmatprep.subr.msk.bf16.mxu1 %vm9392_vm14, %v16773_v10  ;;  %v9405_v33 = vsub.f32 %v6353_v14, %v6353_v14  ;;  %v6350_v7 = vsel %vm160_vm7, 1.0, %v15418_v27  ;;  %v16781_v51 = vmov 0 }
  0x4f   :  { %16776 = vst [vmem:[#allocation62_spill] sm:$0xff] %v16775_v52  ;;  %16779 = vst [vmem:[#allocation65_spill] sm:$0xff] %v9403_v31  ;;  %v6344_v14 = vsel %vm154_vm12, 1.0, %v15418_v27  ;;  %v6352_v52 = vsel %vm162_vm13, 1.0, %v15418_v27  ;;  %v9426_v11 = vsub.f32 %v6342_v2, %v6342_v2  ;;  %v9428_v40 = vsub.f32 %v6350_v7, %v6350_v7 }
  0x50   :  { %16780 = vst [vmem:[#allocation66_spill] sm:$0xff] %v9405_v33  ;;  %vm9417_vm14 = vmpackc.low %vm160_vm7, %vm152_vm6  ;;  %v16786_v12 = vmov 0  ;;  %v9434_v54 = vsub.f32 %v6344_v14, %v6344_v14  ;;  %v9436_v32 = vsub.f32 %v6352_v52, %v6352_v52  ;;  %vm169_vm6 = vcmp.eq.s32.totalorder %v9099_v13, %v9113_v19 }
  0x51   :  { %v16782_v51 = vsel %vm9417_vm14, 4294967295, %v16781_v51  ;;  %7333 = vmatpush1.bf16.msk.msra.mxu0 %vm9417_vm14, %v16773_v10  ;;  %16784 = vst [vmem:[#allocation68_spill] sm:$0xff] %v9426_v11  ;;  %16785 = vst [vmem:[#allocation69_spill] sm:$0xff] %v9428_v40  ;;  %vm177_vm7 = vcmp.eq.s32.totalorder %v9102_v15, %v9113_v19  ;;  %v16791_v27 = vmov 0  ;;  %v16795_v7 = vmov 0 }
  0x52   :  { %16783 = vst [vmem:[#allocation67_spill] sm:$0xff] %v16782_v51  ;;  %vm9430_vm15 = vmpackc.low %vm162_vm13, %vm154_vm12  ;;  %vm171_vm12 = vcmp.eq.s32.totalorder %v9099_v13, %v9115_v20  ;;  %vm179_vm13 = vcmp.eq.s32.totalorder %v9102_v15, %v9115_v20 }
  0x53   :  { %v16787_v12 = vsel %vm9430_vm15, 4294967295, %v16786_v12  ;;  %16789 = vst [vmem:[#allocation71_spill] sm:$0xff] %v9434_v54  ;;  %16790 = vst [vmem:[#allocation72_spill] sm:$0xff] %v9436_v32  ;;  %7717 = vmatpush1.bf16.msk.msra.mxu1 %vm9430_vm15, %v16773_v10 }
  0x54   :  { %16788 = vst [vmem:[#allocation70_spill] sm:$0xff] %v16787_v12  ;;  %vm9453_vm15 = vmpackc.low %vm177_vm7, %vm169_vm6  ;;  %v16794_v12 = vmov 0.0  }
  0x55   :  { %v16792_v27 = vsel %vm9453_vm15, 4294967295, %v16791_v27  ;;  %v6359_v51 = vsel %vm169_vm6, 1.0, %v16794_v12  ;;  %v6367_v58 = vsel %vm177_vm7, 1.0, %v16794_v12  ;;  %7335 = vmatprep.subr.msk.bf16.mxu0 %vm9453_vm15, %v16773_v10  ;;  %v6361_v2 = vsel %vm171_vm12, 1.0, %v16794_v12  ;;  %vm9464_vm14 = vmpackc.low %vm179_vm13, %vm171_vm12 }
  0x56   :  { %16793 = vst [vmem:[#allocation73_spill] sm:$0xff] %v16792_v27  ;;  %v6369_v52 = vsel %vm179_vm13, 1.0, %v16794_v12  ;;  %v16796_v7 = vsel %vm9464_vm14, 4294967295, %v16795_v7  ;;  %v9468_v14 = vsub.f32 %v6359_v51, %v6359_v51  ;;  %v9470_v53 = vsub.f32 %v6367_v58, %v6367_v58  ;;  %7719 = vmatprep.subr.msk.bf16.mxu1 %vm9464_vm14, %v16773_v10 }
  0x57   :  { %16797 = vst [vmem:[#allocation74_spill] sm:$0xff] %v16796_v7  ;;  %v9475_v46 = vsub.f32 %v6361_v2, %v6361_v2  ;;  %v9477_v27 = vsub.f32 %v6369_v52, %v6369_v52  ;;  %vm168_vm6 = vcmp.eq.s32.totalorder %v9099_v13, %v9117_v21  ;;  %vm176_vm7 = vcmp.eq.s32.totalorder %v9102_v15, %v9117_v21 }
  0x58   :  { %16798 = vst [vmem:[#allocation75_spill] sm:$0xff] %v9468_v14  ;;  %16799 = vst [vmem:[#allocation76_spill] sm:$0xff] %v9470_v53  ;;  %vm170_vm12 = vcmp.eq.s32.totalorder %v9099_v13, %v9119_v22  ;;  %vm178_vm13 = vcmp.eq.s32.totalorder %v9102_v15, %v9119_v22  ;;  %v6358_v58 = vsel %vm168_vm6, 1.0, %v16794_v12  ;;  %v6366_v51 = vsel %vm176_vm7, 1.0, %v16794_v12 }
  0x59   :  { %16800 = vst [vmem:[#allocation77_spill] sm:$0xff] %v9475_v46  ;;  %16801 = vst [vmem:[#allocation78_spill] sm:$0xff] %v9477_v27  ;;  %v16802_v2 = vmov 0  ;;  %v6360_v52 = vsel %vm170_vm12, 1.0, %v16794_v12  ;;  %v6368_v7 = vsel %vm178_vm13, 1.0, %v16794_v12  ;;  %v9498_v13 = vsub.f32 %v6358_v58, %v6358_v58 }
  0x5a   :  { %vm9489_vm14 = vmpackc.low %vm176_vm7, %vm168_vm6  ;;  %v9500_v41 = vsub.f32 %v6366_v51, %v6366_v51  ;;  %v16807_v15 = vmov 0  ;;  %v9506_v36 = vsub.f32 %v6360_v52, %v6360_v52  ;;  %v9508_v30 = vsub.f32 %v6368_v7, %v6368_v7 }
  0x5b   :  { %v16803_v2 = vsel %vm9489_vm14, 4294967295, %v16802_v2  ;;  %7337 = vmatpush1.bf16.msk.msra.mxu0 %vm9489_vm14, %v16773_v10  ;;  %16805 = vst [vmem:[#allocation80_spill] sm:$0xff] %v9498_v13  ;;  %vm9502_vm15 = vmpackc.low %vm178_vm13, %vm170_vm12  ;;  %vm185_vm6 = vcmp.eq.s32.totalorder %v9105_v16, %v9113_v19  ;;  %vm193_vm7 = vcmp.eq.s32.totalorder %v9108_v17, %v9113_v19  ;;  %vm187_vm12 = vcmp.eq.s32.totalorder %v9105_v16, %v9115_v20 }
  0x5c   :  { %16804 = vst [vmem:[#allocation79_spill] sm:$0xff] %v16803_v2  ;;  %16806 = vst [vmem:[#allocation81_spill] sm:$0xff] %v9500_v41  ;;  %v16808_v15 = vsel %vm9502_vm15, 4294967295, %v16807_v15  ;;  %7721 = vmatpush1.bf16.msk.msra.mxu1 %vm9502_vm15, %v16773_v10  ;;  %vm195_vm13 = vcmp.eq.s32.totalorder %v9108_v17, %v9115_v20  ;;  %v6375_v2 = vsel %vm185_vm6, 1.0, %v16794_v12  ;;  %v6383_v48 = vsel %vm193_vm7, 1.0, %v16794_v12 }
  0x5d   :  { %16809 = vst [vmem:[#allocation82_spill] sm:$0xff] %v16808_v15  ;;  %16810 = vst [vmem:[#allocation83_spill] sm:$0xff] %v9506_v36  ;;  %v16812_v15 = vmov 0  ;;  %v6377_v58 = vsel %vm187_vm12, 1.0, %v16794_v12  ;;  %v6385_v7 = vsel %vm195_vm13, 1.0, %v16794_v12  ;;  %v16815_v51 = vmov 0 }
  0x5e   :  { %16811 = vst [vmem:[#allocation84_spill] sm:$0xff] %v9508_v30  ;;  %vm9525_vm15 = vmpackc.low %vm193_vm7, %vm185_vm6  ;;  %v9540_v52 = vsub.f32 %v6375_v2, %v6375_v2  ;;  %v9542_v47 = vsub.f32 %v6383_v48, %v6383_v48  ;;  %v9547_v45 = vsub.f32 %v6377_v58, %v6377_v58  ;;  %vm184_vm6 = vcmp.eq.s32.totalorder %v9105_v16, %v9117_v21 }
  0x5f   :  { %v16813_v15 = vsel %vm9525_vm15, 4294967295, %v16812_v15  ;;  %7339 = vmatprep.subr.msk.bf16.mxu0 %vm9525_vm15, %v16773_v10  ;;  %vm9536_vm14 = vmpackc.low %vm195_vm13, %vm187_vm12  ;;  %vm192_vm7 = vcmp.eq.s32.totalorder %v9108_v17, %v9117_v21  ;;  %vm186_vm12 = vcmp.eq.s32.totalorder %v9105_v16, %v9119_v22  ;;  %vm194_vm13 = vcmp.eq.s32.totalorder %v9108_v17, %v9119_v22 }
  0x60   :  { %16814 = vst [vmem:[#allocation85_spill] sm:$0xff] %v16813_v15  ;;  %v16816_v51 = vsel %vm9536_vm14, 4294967295, %v16815_v51  ;;  %16818 = vst [vmem:[#allocation87_spill] sm:$0xff] %v9540_v52  ;;  %7723 = vmatprep.subr.msk.bf16.mxu1 %vm9536_vm14, %v16773_v10  ;;  %v9549_v15 = vsub.f32 %v6385_v7, %v6385_v7  ;;  %v6374_v48 = vsel %vm184_vm6, 1.0, %v16794_v12  ;;  %v6382_v2 = vsel %vm192_vm7, 1.0, %v16794_v12 }
  0x61   :  { %16817 = vst [vmem:[#allocation86_spill] sm:$0xff] %v16816_v51  ;;  %16819 = vst [vmem:[#allocation88_spill] sm:$0xff] %v9542_v47  ;;  %v16822_v58 = vmov 0  ;;  %v6376_v7 = vsel %vm186_vm12, 1.0, %v16794_v12  ;;  %v6384_v51 = vsel %vm194_vm13, 1.0, %v16794_v12  ;;  %v9570_v16 = vsub.f32 %v6374_v48, %v6374_v48 }
  0x62   :  { %16820 = vst [vmem:[#allocation89_spill] sm:$0xff] %v9547_v45  ;;  %16821 = vst [vmem:[#allocation90_spill] sm:$0xff] %v9549_v15  ;;  %v9572_v44 = vsub.f32 %v6382_v2, %v6382_v2  ;;  %v16827_v17 = vmov 0  ;;  %v9578_v15 = vsub.f32 %v6376_v7, %v6376_v7  ;;  %v9580_v45 = vsub.f32 %v6384_v51, %v6384_v51 }
  0x63   :  { %vm9561_vm14 = vmpackc.low %vm192_vm7, %vm184_vm6  ;;  %16825 = vst [vmem:[#allocation92_spill] sm:$0xff] %v9570_v16  ;;  %vm201_vm6 = vcmp.eq.s32.totalorder %v9111_v18, %v9113_v19  ;;  %vm209_vm7 = vcmp.eq.s32.totalorder %v9122_v23, %v9113_v19  ;;  %v16835_v2 = vmov 0 }
  0x64   :  { %v16823_v58 = vsel %vm9561_vm14, 4294967295, %v16822_v58  ;;  %7341 = vmatpush1.bf16.msk.msra.mxu0 %vm9561_vm14, %v16773_v10  ;;  %16826 = vst [vmem:[#allocation93_spill] sm:$0xff] %v9572_v44  ;;  %vm9574_vm15 = vmpackc.low %vm194_vm13, %vm186_vm12  ;;  %vm203_vm12 = vcmp.eq.s32.totalorder %v9111_v18, %v9115_v20  ;;  %vm211_vm13 = vcmp.eq.s32.totalorder %v9122_v23, %v9115_v20  ;;  %v6399_v47 = vsel %vm209_vm7, 1.0, %v16794_v12 }
  0x65   :  { %16824 = vst [vmem:[#allocation91_spill] sm:$0xff] %v16823_v58  ;;  %v16828_v17 = vsel %vm9574_vm15, 4294967295, %v16827_v17  ;;  %16830 = vst [vmem:[#allocation95_spill] sm:$0xff] %v9578_v15  ;;  %7725 = vmatpush1.bf16.msk.msra.mxu1 %vm9574_vm15, %v16773_v10  ;;  %v6391_v58 = vsel %vm201_vm6, 1.0, %v16794_v12  ;;  %v6393_v48 = vsel %vm203_vm12, 1.0, %v16794_v12  ;;  %v6401_v51 = vsel %vm211_vm13, 1.0, %v16794_v12 }
  0x66   :  { %16829 = vst [vmem:[#allocation94_spill] sm:$0xff] %v16828_v17  ;;  %16831 = vst [vmem:[#allocation96_spill] sm:$0xff] %v9580_v45  ;;  %v16832_v17 = vmov 0  ;;  %v9612_v7 = vsub.f32 %v6391_v58, %v6391_v58  ;;  %v9614_v45 = vsub.f32 %v6399_v47, %v6399_v47  ;;  %v9619_v15 = vsub.f32 %v6393_v48, %v6393_v48 }
  0x67   :  { %vm9597_vm15 = vmpackc.low %vm209_vm7, %vm201_vm6  ;;  %vm200_vm6 = vcmp.eq.s32.totalorder %v9111_v18, %v9117_v21  ;;  %vm208_vm7 = vcmp.eq.s32.totalorder %v9122_v23, %v9117_v21  ;;  %v16842_v48 = vmov 0 }
  0x68   :  { %v16833_v17 = vsel %vm9597_vm15, 4294967295, %v16832_v17  ;;  %7343 = vmatprep.subr.msk.bf16.mxu0 %vm9597_vm15, %v16773_v10  ;;  %vm9608_vm14 = vmpackc.low %vm211_vm13, %vm203_vm12  ;;  %16838 = vst [vmem:[#allocation99_spill] sm:$0xff] %v9612_v7  ;;  %vm202_vm12 = vcmp.eq.s32.totalorder %v9111_v18, %v9119_v22  ;;  %vm210_vm13 = vcmp.eq.s32.totalorder %v9122_v23, %v9119_v22  ;;  %v6390_v47 = vsel %vm200_vm6, 1.0, %v16794_v12 }
  0x69   :  { %16834 = vst [vmem:[#allocation97_spill] sm:$0xff] %v16833_v17  ;;  %v16836_v2 = vsel %vm9608_vm14, 4294967295, %v16835_v2  ;;  %16839 = vst [vmem:[#allocation100_spill] sm:$0xff] %v9614_v45  ;;  %7727 = vmatprep.subr.msk.bf16.mxu1 %vm9608_vm14, %v16773_v10  ;;  %v9621_v17 = vsub.f32 %v6401_v51, %v6401_v51  ;;  %v6398_v58 = vsel %vm208_vm7, 1.0, %v16794_v12  ;;  %v6392_v51 = vsel %vm202_vm12, 1.0, %v16794_v12 }
  0x6a   :  { %16837 = vst [vmem:[#allocation98_spill] sm:$0xff] %v16836_v2  ;;  %16840 = vst [vmem:[#allocation101_spill] sm:$0xff] %v9619_v15  ;;  %v6400_v2 = vsel %vm210_vm13, 1.0, %v16794_v12  ;;  %v9642_v18 = vsub.f32 %v6390_v47, %v6390_v47  ;;  %v16847_v23 = vmov 0  ;;  %v9650_v15 = vsub.f32 %v6392_v51, %v6392_v51 }
  0x6b   :  { %16841 = vst [vmem:[#allocation102_spill] sm:$0xff] %v9621_v17  ;;  %vm9633_vm14 = vmpackc.low %vm208_vm7, %vm200_vm6  ;;  %v9644_v17 = vsub.f32 %v6398_v58, %v6398_v58  ;;  %v9652_v45 = vsub.f32 %v6400_v2, %v6400_v2  ;;  %vm217_vm6 = vcmp.eq.s32.totalorder %v9125_v24, %v9113_v19  ;;  %vm225_vm7 = vcmp.eq.s32.totalorder %v9128_v25, %v9113_v19 }
  0x6c   :  { %v16843_v48 = vsel %vm9633_vm14, 4294967295, %v16842_v48  ;;  %7345 = vmatpush1.bf16.msk.msra.mxu0 %vm9633_vm14, %v16773_v10  ;;  %16845 = vst [vmem:[#allocation104_spill] sm:$0xff] %v9642_v18  ;;  %vm9646_vm15 = vmpackc.low %vm210_vm13, %vm202_vm12  ;;  %vm219_vm12 = vcmp.eq.s32.totalorder %v9125_v24, %v9115_v20  ;;  %vm227_vm13 = vcmp.eq.s32.totalorder %v9128_v25, %v9115_v20  ;;  %v6415_v7 = vsel %vm225_vm7, 1.0, %v16794_v12 }
  0x6d   :  { %16844 = vst [vmem:[#allocation103_spill] sm:$0xff] %v16843_v48  ;;  %16846 = vst [vmem:[#allocation105_spill] sm:$0xff] %v9644_v17  ;;  %v16848_v23 = vsel %vm9646_vm15, 4294967295, %v16847_v23  ;;  %7729 = vmatpush1.bf16.msk.msra.mxu1 %vm9646_vm15, %v16773_v10  ;;  %v6407_v48 = vsel %vm217_vm6, 1.0, %v16794_v12  ;;  %v6409_v47 = vsel %vm219_vm12, 1.0, %v16794_v12  ;;  %v6417_v2 = vsel %vm227_vm13, 1.0, %v16794_v12 }
  0x6e   :  { %16849 = vst [vmem:[#allocation106_spill] sm:$0xff] %v16848_v23  ;;  %16850 = vst [vmem:[#allocation107_spill] sm:$0xff] %v9650_v15  ;;  %v16852_v23 = vmov 0  ;;  %v16855_v58 = vmov 0  ;;  %v9684_v51 = vsub.f32 %v6407_v48, %v6407_v48  ;;  %v9691_v15 = vsub.f32 %v6409_v47, %v6409_v47 }
  0x6f   :  { %16851 = vst [vmem:[#allocation108_spill] sm:$0xff] %v9652_v45  ;;  %vm9669_vm15 = vmpackc.low %vm225_vm7, %vm217_vm6  ;;  %v9686_v45 = vsub.f32 %v6415_v7, %v6415_v7  ;;  %vm216_vm6 = vcmp.eq.s32.totalorder %v9125_v24, %v9117_v21  ;;  %vm224_vm7 = vcmp.eq.s32.totalorder %v9128_v25, %v9117_v21  ;;  %v16862_v47 = vmov 0 }
  0x70   :  { %v16853_v23 = vsel %vm9669_vm15, 4294967295, %v16852_v23  ;;  %7347 = vmatprep.subr.msk.bf16.mxu0 %vm9669_vm15, %v16773_v10  ;;  %vm9680_vm14 = vmpackc.low %vm227_vm13, %vm219_vm12  ;;  %16858 = vst [vmem:[#allocation111_spill] sm:$0xff] %v9684_v51  ;;  %vm218_vm12 = vcmp.eq.s32.totalorder %v9125_v24, %v9119_v22  ;;  %vm226_vm13 = vcmp.eq.s32.totalorder %v9128_v25, %v9119_v22  ;;  %v6406_v7 = vsel %vm216_vm6, 1.0, %v16794_v12 }
  0x71   :  { %16854 = vst [vmem:[#allocation109_spill] sm:$0xff] %v16853_v23  ;;  %v16856_v58 = vsel %vm9680_vm14, 4294967295, %v16855_v58  ;;  %16859 = vst [vmem:[#allocation112_spill] sm:$0xff] %v9686_v45  ;;  %7731 = vmatprep.subr.msk.bf16.mxu1 %vm9680_vm14, %v16773_v10  ;;  %v9693_v23 = vsub.f32 %v6417_v2, %v6417_v2  ;;  %v6414_v48 = vsel %vm224_vm7, 1.0, %v16794_v12  ;;  %v6408_v2 = vsel %vm218_vm12, 1.0, %v16794_v12 }
  0x72   :  { %16857 = vst [vmem:[#allocation110_spill] sm:$0xff] %v16856_v58  ;;  %16860 = vst [vmem:[#allocation113_spill] sm:$0xff] %v9691_v15  ;;  %v6416_v58 = vsel %vm226_vm13, 1.0, %v16794_v12  ;;  %v9714_v24 = vsub.f32 %v6406_v7, %v6406_v7  ;;  %v16867_v25 = vmov 0  ;;  %v9722_v15 = vsub.f32 %v6408_v2, %v6408_v2 }
  0x73   :  { %16861 = vst [vmem:[#allocation114_spill] sm:$0xff] %v9693_v23  ;;  %vm9705_vm14 = vmpackc.low %vm224_vm7, %vm216_vm6  ;;  %v9716_v23 = vsub.f32 %v6414_v48, %v6414_v48  ;;  %v9724_v45 = vsub.f32 %v6416_v58, %v6416_v58  ;;  %v9730_v51 = vadd.s32 136, %v9071_v1  ;;  %vm233_vm6 = vcmp.eq.s32.totalorder %v9131_v26, %v9113_v19 }
  0x74   :  { %v16863_v47 = vsel %vm9705_vm14, 4294967295, %v16862_v47  ;;  %7349 = vmatpush1.bf16.msk.msra.mxu0 %vm9705_vm14, %v16773_v10  ;;  %16865 = vst [vmem:[#allocation116_spill] sm:$0xff] %v9714_v24  ;;  %vm9718_vm15 = vmpackc.low %vm226_vm13, %vm218_vm12  ;;  %vm235_vm7 = vcmp.eq.s32.totalorder %v9131_v26, %v9115_v20  ;;  %v16873_v58 = vmov 0 }
  0x75   :  { %16864 = vst [vmem:[#allocation115_spill] sm:$0xff] %v16863_v47  ;;  %16866 = vst [vmem:[#allocation117_spill] sm:$0xff] %v9716_v23  ;;  %v16868_v25 = vsel %vm9718_vm15, 4294967295, %v16867_v25  ;;  %7733 = vmatpush1.bf16.msk.msra.mxu1 %vm9718_vm15, %v16773_v10  ;;  %vm241_vm13 = vcmp.eq.s32.totalorder %v9730_v51, %v9113_v19  ;;  %vm243_vm15 = vcmp.eq.s32.totalorder %v9730_v51, %v9115_v20  ;;  %v6425_v47 = vsel %vm235_vm7, 1.0, %v16794_v12 }
  0x76   :  { %16869 = vst [vmem:[#allocation118_spill] sm:$0xff] %v16868_v25  ;;  %16870 = vst [vmem:[#allocation119_spill] sm:$0xff] %v9722_v15  ;;  %v6423_v25 = vsel %vm233_vm6, 1.0, %v16794_v12  ;;  %v6431_v7 = vsel %vm241_vm13, 1.0, %v16794_v12  ;;  %v6433_v48 = vsel %vm243_vm15, 1.0, %v16794_v12  ;;  %v16879_v23 = vmov 0 }
  0x77   :  { %16871 = vst [vmem:[#allocation120_spill] sm:$0xff] %v9724_v45  ;;  %16872 = vst [vmem:[#allocation121_spill] sm:$0xff] %v9730_v51  ;;  %v9756_v2 = vsub.f32 %v6423_v25, %v6423_v25  ;;  %v9759_v45 = vsub.f32 %v6425_v47, %v6425_v47  ;;  %v9764_v15 = vsub.f32 %v6431_v7, %v6431_v7  ;;  %v16885_v7 = vmov 0 }
  0x78   :  { %vm9752_vm12 = vmpackc.low %vm241_vm13, %vm233_vm6  ;;  %v9773_v24 = vsub.f32 %v6433_v48, %v6433_v48  ;;  %vm240_vm6 = vcmp.eq.s32.totalorder %v9730_v51, %v9117_v21  ;;  %vm16883_vm13 = vcmp.eq.s32.totalorder %v9131_v26, %v9117_v21 }
  0x79   :  { %v16874_v58 = vsel %vm9752_vm12, 4294967295, %v16873_v58  ;;  %16876 = vst [vmem:[#allocation123_spill] sm:$0xff] %v9756_v2  ;;  %16877 = vst [vmem:[#allocation124_spill] sm:$0xff] %v9759_v45  ;;  %7351 = vmatprep.subr.msk.bf16.mxu0 %vm9752_vm12, %v16773_v10  ;;  %v6422_v25 = vsel %vm16883_vm13, 1.0, %v16794_v12  ;;  %v6430_v47 = vsel %vm240_vm6, 1.0, %v16794_v12  ;;  %vm234_vm12 = vcmp.eq.s32.totalorder %v9131_v26, %v9119_v22 }
  0x7a   :  { %16875 = vst [vmem:[#allocation122_spill] sm:$0xff] %v16874_v58  ;;  %16878 = vst [vmem:[#allocation125_spill] sm:$0xff] %v9764_v15  ;;  %v9792_v48 = vsub.f32 %v6422_v25, %v6422_v25  ;;  %v6424_v58 = vsel %vm234_vm12, 1.0, %v16794_v12  ;;  %v16890_v45 = vmov 0  ;;  %v9810_v25 = vadd.s32 144, %v9071_v1 }
  0x7b   :  { %vm9769_vm14 = vmpackc.low %vm243_vm15, %vm235_vm7  ;;  %16882 = vst [vmem:[#allocation127_spill] sm:$0xff] %v9773_v24  ;;  %v9909_v2 = vadd.s32 176, %v9071_v1 }
  0x7c   :  { %v16880_v23 = vsel %vm9769_vm14, 4294967295, %v16879_v23  ;;  %7735 = vmatprep.subr.msk.bf16.mxu1 %vm9769_vm14, %v16773_v10  ;;  %vm16884_vm15 = vmmov %vm16883_vm13  ;;  %16888 = vst [vmem:[#allocation129_spill] sm:$0xff] %v9792_v48  ;;  %vm242_vm13 = vcmp.eq.s32.totalorder %v9730_v51, %v9119_v22  ;;  %v9816_v51 = vsub.f32 %v6424_v58, %v6424_v58 }
  0x7d   :  { %16881 = vst [vmem:[#allocation126_spill] sm:$0xff] %v16880_v23  ;;  %vm9788_vm7 = vmpackc.low %vm240_vm6, %vm16884_vm15  ;;  %v9801_v23 = vsub.f32 %v6430_v47, %v6430_v47  ;;  %v6432_v24 = vsel %vm242_vm13, 1.0, %v16794_v12  ;;  %vm251_vm15 = vcmp.eq.s32.totalorder %v9810_v25, %v9115_v20 }
  0x7e   :  { %v16886_v7 = vsel %vm9788_vm7, 4294967295, %v16885_v7  ;;  %7353 = vmatpush1.bf16.msk.msra.mxu0 %vm9788_vm7, %v16773_v10  ;;  %vm9805_vm6 = vmpackc.low %vm242_vm13, %vm234_vm12  ;;  %16893 = vst [vmem:[#allocation132_spill] sm:$0xff] %v9810_v25  ;;  %v9818_v47 = vsub.f32 %v6432_v24, %v6432_v24  ;;  %vm249_vm12 = vcmp.eq.s32.totalorder %v9810_v25, %v9113_v19  ;;  %v6441_v26 = vsel %vm251_vm15, 1.0, %v16794_v12 }
  0x7f   :  { %16887 = vst [vmem:[#allocation128_spill] sm:$0xff] %v16886_v7  ;;  %16889 = vst [vmem:[#allocation130_spill] sm:$0xff] %v9801_v23  ;;  %v16891_v45 = vsel %vm9805_vm6, 4294967295, %v16890_v45  ;;  %7737 = vmatpush1.bf16.msk.msra.mxu1 %vm9805_vm6, %v16773_v10  ;;  %v9821_v7 = vadd.s32 152, %v9071_v1  ;;  %v6439_v24 = vsel %vm249_vm12, 1.0, %v16794_v12  ;;  %v9855_v48 = vsub.f32 %v6441_v26, %v6441_v26 }
  0x80   :  { %16892 = vst [vmem:[#allocation131_spill] sm:$0xff] %v16891_v45  ;;  %16894 = vst [vmem:[#allocation133_spill] sm:$0xff] %v9816_v51  ;;  %v16897_v45 = vmov 0  ;;  %v9840_v23 = vsub.f32 %v6439_v24, %v6439_v24  ;;  %v16902_v51 = vmov 0  ;;  %v16909_v26 = vmov 0 }
  0x81   :  { %16895 = vst [vmem:[#allocation134_spill] sm:$0xff] %v9818_v47  ;;  %16896 = vst [vmem:[#allocation135_spill] sm:$0xff] %v9821_v7  ;;  %vm257_vm6 = vcmp.eq.s32.totalorder %v9821_v7, %v9113_v19  ;;  %vm259_vm13 = vcmp.eq.s32.totalorder %v9821_v7, %v9115_v20 }
  0x82   :  { %v6447_v15 = vsel %vm257_vm6, 1.0, %v16794_v12  ;;  %vm9836_vm7 = vmpackc.low %vm257_vm6, %vm249_vm12  ;;  %16900 = vst [vmem:[#allocation137_spill] sm:$0xff] %v9840_v23  ;;  %v6449_v47 = vsel %vm259_vm13, 1.0, %v16794_v12  ;;  %vm256_vm6 = vcmp.eq.s32.totalorder %v9821_v7, %v9117_v21  ;;  %vm16907_vm12 = vcmp.eq.s32.totalorder %v9810_v25, %v9117_v21 }
  0x83   :  { %v16898_v45 = vsel %vm9836_vm7, 4294967295, %v16897_v45  ;;  %7355 = vmatprep.subr.msk.bf16.mxu0 %vm9836_vm7, %v16773_v10  ;;  %v9848_v58 = vsub.f32 %v6447_v15, %v6447_v15  ;;  %vm9851_vm14 = vmpackc.low %vm259_vm13, %vm251_vm15  ;;  %16905 = vst [vmem:[#allocation140_spill] sm:$0xff] %v9855_v48  ;;  %v9862_v24 = vsub.f32 %v6449_v47, %v6449_v47  ;;  %v6438_v15 = vsel %vm16907_vm12, 1.0, %v16794_v12 }
  0x84   :  { %16899 = vst [vmem:[#allocation136_spill] sm:$0xff] %v16898_v45  ;;  %v16903_v51 = vsel %vm9851_vm14, 4294967295, %v16902_v51  ;;  %7739 = vmatprep.subr.msk.bf16.mxu1 %vm9851_vm14, %v16773_v10  ;;  %v6446_v45 = vsel %vm256_vm6, 1.0, %v16794_v12  ;;  %vm16908_vm15 = vmmov %vm16907_vm12  ;;  %vm250_vm7 = vcmp.eq.s32.totalorder %v9810_v25, %v9119_v22  ;;  %v9881_v47 = vsub.f32 %v6438_v15, %v6438_v15 }
  0x85   :  { %16901 = vst [vmem:[#allocation138_spill] sm:$0xff] %v9848_v58  ;;  %16904 = vst [vmem:[#allocation139_spill] sm:$0xff] %v16903_v51  ;;  %v9883_v51 = vsub.f32 %v6446_v45, %v6446_v45  ;;  %vm258_vm12 = vcmp.eq.s32.totalorder %v9821_v7, %v9119_v22  ;;  %v16914_v58 = vmov 0  ;;  %v9899_v15 = vadd.s32 168, %v9071_v1 }
  0x86   :  { %16906 = vst [vmem:[#allocation141_spill] sm:$0xff] %v9862_v24  ;;  %vm9872_vm13 = vmpackc.low %vm256_vm6, %vm16908_vm15  ;;  %v6440_v24 = vsel %vm250_vm7, 1.0, %v16794_v12  ;;  %v6448_v48 = vsel %vm258_vm12, 1.0, %v16794_v12 }
  0x87   :  { %v16910_v26 = vsel %vm9872_vm13, 4294967295, %v16909_v26  ;;  %7357 = vmatpush1.bf16.msk.msra.mxu0 %vm9872_vm13, %v16773_v10  ;;  %16912 = vst [vmem:[#allocation143_spill] sm:$0xff] %v9881_v47  ;;  %16913 = vst [vmem:[#allocation144_spill] sm:$0xff] %v9883_v51  ;;  %v9893_v25 = vsub.f32 %v6440_v24, %v6440_v24  ;;  %v9906_v23 = vsub.f32 %v6448_v48, %v6448_v48  ;;  %v16927_v51 = vmov 0 }
  0x88   :  { %16911 = vst [vmem:[#allocation142_spill] sm:$0xff] %v16910_v26  ;;  %vm9889_vm6 = vmpackc.low %vm258_vm12, %vm250_vm7  ;;  %v9896_v26 = vadd.s32 160, %v9071_v1  ;;  %vm273_vm15 = vcmp.eq.s32.totalorder %v9899_v15, %v9113_v19  ;;  %vm275_vm13 = vcmp.eq.s32.totalorder %v9899_v15, %v9115_v20 }
  0x89   :  { %v16915_v58 = vsel %vm9889_vm6, 4294967295, %v16914_v58  ;;  %16917 = vst [vmem:[#allocation146_spill] sm:$0xff] %v9893_v25  ;;  %16919 = vst [vmem:[#allocation148_spill] sm:$0xff] %v9899_v15  ;;  %7741 = vmatpush1.bf16.msk.msra.mxu1 %vm9889_vm6, %v16773_v10  ;;  %v6463_v48 = vsel %vm273_vm15, 1.0, %v16794_v12 }
  0x8a   :  { %16916 = vst [vmem:[#allocation145_spill] sm:$0xff] %v16915_v58  ;;  %16918 = vst [vmem:[#allocation147_spill] sm:$0xff] %v9896_v26  ;;  %vm265_vm7 = vcmp.eq.s32.totalorder %v9896_v26, %v9113_v19  ;;  %vm267_vm12 = vcmp.eq.s32.totalorder %v9896_v26, %v9115_v20  ;;  %v16922_v58 = vmov 0  ;;  %v9932_v25 = vsub.f32 %v6463_v48, %v6463_v48 }
  0x8b   :  { %16920 = vst [vmem:[#allocation149_spill] sm:$0xff] %v9906_v23  ;;  %16921 = vst [vmem:[#allocation150_spill] sm:$0xff] %v9909_v2  ;;  %v6455_v45 = vsel %vm265_vm7, 1.0, %v16794_v12  ;;  %v6457_v7 = vsel %vm267_vm12, 1.0, %v16794_v12  ;;  %v6465_v23 = vsel %vm275_vm13, 1.0, %v16794_v12 }
  0x8c   :  { %vm9921_vm6 = vmpackc.low %vm273_vm15, %vm265_vm7  ;;  %v9930_v24 = vsub.f32 %v6455_v45, %v6455_v45  ;;  %16926 = vst [vmem:[#allocation153_spill] sm:$0xff] %v9932_v25  ;;  %v9943_v47 = vsub.f32 %v6457_v7, %v6457_v7  ;;  %vm264_vm7 = vcmp.eq.s32.totalorder %v9896_v26, %v9117_v21  ;;  %vm272_vm15 = vcmp.eq.s32.totalorder %v9899_v15, %v9117_v21 }
  0x8d   :  { %v16923_v58 = vsel %vm9921_vm6, 4294967295, %v16922_v58  ;;  %7359 = vmatprep.subr.msk.bf16.mxu0 %vm9921_vm6, %v16773_v10  ;;  %vm9936_vm14 = vmpackc.low %vm275_vm13, %vm267_vm12  ;;  %v6454_v45 = vsel %vm264_vm7, 1.0, %v16794_v12  ;;  %v6462_v48 = vsel %vm272_vm15, 1.0, %v16794_v12  ;;  %v16932_v25 = vmov 0 }
  0x8e   :  { %16924 = vst [vmem:[#allocation151_spill] sm:$0xff] %v16923_v58  ;;  %16925 = vst [vmem:[#allocation152_spill] sm:$0xff] %v9930_v24  ;;  %v16928_v51 = vsel %vm9936_vm14, 4294967295, %v16927_v51  ;;  %7743 = vmatprep.subr.msk.bf16.mxu1 %vm9936_vm14, %v16773_v10  ;;  %v9945_v58 = vsub.f32 %v6465_v23, %v6465_v23  ;;  %vm266_vm12 = vcmp.eq.s32.totalorder %v9896_v26, %v9119_v22 }
  0x8f   :  { %16929 = vst [vmem:[#allocation154_spill] sm:$0xff] %v16928_v51  ;;  %16930 = vst [vmem:[#allocation155_spill] sm:$0xff] %v9943_v47  ;;  %vm274_vm14 = vcmp.eq.s32.totalorder %v9899_v15, %v9119_v22  ;;  %v9964_v23 = vsub.f32 %v6454_v45, %v6454_v45  ;;  %v9966_v7 = vsub.f32 %v6462_v48, %v6462_v48  ;;  %v6456_v51 = vsel %vm266_vm12, 1.0, %v16794_v12 }
  0x90   :  { %16931 = vst [vmem:[#allocation156_spill] sm:$0xff] %v9945_v58  ;;  %vm9953_vm13 = vmpackc.low %vm272_vm15, %vm264_vm7  ;;  %v6464_v58 = vsel %vm274_vm14, 1.0, %v16794_v12  ;;  %v16937_v47 = vmov 0  ;;  %v9977_v15 = vsub.f32 %v6456_v51, %v6456_v51  ;;  %v9982_v45 = vadd.s32 184, %v9071_v1 }
  0x91   :  { %v16933_v25 = vsel %vm9953_vm13, 4294967295, %v16932_v25  ;;  %7361 = vmatpush1.bf16.msk.msra.mxu0 %vm9953_vm13, %v16773_v10  ;;  %16935 = vst [vmem:[#allocation158_spill] sm:$0xff] %v9964_v23  ;;  %16936 = vst [vmem:[#allocation159_spill] sm:$0xff] %v9966_v7  ;;  %v9979_v26 = vsub.f32 %v6464_v58, %v6464_v58  ;;  %vm281_vm15 = vcmp.eq.s32.totalorder %v9909_v2, %v9113_v19  ;;  %v16944_v48 = vmov 0 }
  0x92   :  { %16934 = vst [vmem:[#allocation157_spill] sm:$0xff] %v16933_v25  ;;  %vm9970_vm7 = vmpackc.low %vm274_vm14, %vm266_vm12  ;;  %v6471_v24 = vsel %vm281_vm15, 1.0, %v16794_v12  ;;  %vm283_vm14 = vcmp.eq.s32.totalorder %v9909_v2, %v9115_v20  ;;  %vm289_vm12 = vcmp.eq.s32.totalorder %v9982_v45, %v9113_v19  ;;  %vm291_vm13 = vcmp.eq.s32.totalorder %v9982_v45, %v9115_v20 }
  0x93   :  { %v16938_v47 = vsel %vm9970_vm7, 4294967295, %v16937_v47  ;;  %7745 = vmatpush1.bf16.msk.msra.mxu1 %vm9970_vm7, %v16773_v10  ;;  %16940 = vst [vmem:[#allocation161_spill] sm:$0xff] %v9977_v15  ;;  %16941 = vst [vmem:[#allocation162_spill] sm:$0xff] %v9979_v26  ;;  %v6479_v17 = vsel %vm289_vm12, 1.0, %v16794_v12  ;;  %v6473_v25 = vsel %vm283_vm14, 1.0, %v16794_v12  ;;  %vm280_vm6 = vcmp.eq.s32.totalorder %v9909_v2, %v9117_v21 }
  0x94   :  { %16939 = vst [vmem:[#allocation160_spill] sm:$0xff] %v16938_v47  ;;  %16942 = vst [vmem:[#allocation163_spill] sm:$0xff] %v9982_v45  ;;  %v9995_v47 = vsub.f32 %v6471_v24, %v6471_v24  ;;  %v10010_v24 = vsub.f32 %v6479_v17, %v6479_v17  ;;  %v6481_v58 = vsel %vm291_vm13, 1.0, %v16794_v12  ;;  %v16948_v51 = vmov 0 }
  0x95   :  { %vm9998_vm7 = vmpackc.low %vm289_vm12, %vm281_vm15  ;;  %vm288_vm12 = vcmp.eq.s32.totalorder %v9982_v45, %v9117_v21  ;;  %v10024_v26 = vsub.f32 %v6481_v58, %v6481_v58  ;;  %v6470_v17 = vsel %vm280_vm6, 1.0, %v16794_v12  ;;  %v10065_v7 = vadd.s32 208, %v9071_v1 }
  0x96   :  { %16943 = vst [vmem:[#allocation164_spill] sm:$0xff] %v9995_v47  ;;  %v16945_v48 = vsel %vm9998_vm7, 4294967295, %v16944_v48  ;;  %7363 = vmatprep.subr.msk.bf16.mxu0 %vm9998_vm7, %v16773_v10  ;;  %16947 = vst [vmem:[#allocation166_spill] sm:$0xff] %v10010_v24  ;;  %v10017_v47 = vsub.f32 %v6473_v25, %v6473_v25  ;;  %v16953_v24 = vmov 0  ;;  %v10037_v25 = vsub.f32 %v6470_v17, %v6470_v17 }
  0x97   :  { %16946 = vst [vmem:[#allocation165_spill] sm:$0xff] %v16945_v48  ;;  %vm10013_vm15 = vmpackc.low %vm291_vm13, %vm283_vm14  ;;  %v6478_v48 = vsel %vm288_vm12, 1.0, %v16794_v12  ;;  %vm282_vm13 = vcmp.eq.s32.totalorder %v9909_v2, %v9119_v22  ;;  %vm290_vm14 = vcmp.eq.s32.totalorder %v9982_v45, %v9119_v22  ;;  %v10055_v17 = vadd.s32 200, %v9071_v1 }
  0x98   :  { %v16949_v51 = vsel %vm10013_vm15, 4294967295, %v16948_v51  ;;  %16951 = vst [vmem:[#allocation168_spill] sm:$0xff] %v10017_v47  ;;  %7747 = vmatprep.subr.msk.bf16.mxu1 %vm10013_vm15, %v16773_v10  ;;  %16952 = vst [vmem:[#allocation169_spill] sm:$0xff] %v10024_v26  ;;  %v6472_v58 = vsel %vm282_vm13, 1.0, %v16794_v12  ;;  %v6480_v26 = vsel %vm290_vm14, 1.0, %v16794_v12  ;;  %v16958_v47 = vmov 0 }
  0x99   :  { %16950 = vst [vmem:[#allocation167_spill] sm:$0xff] %v16949_v51  ;;  %vm10028_vm7 = vmpackc.low %vm288_vm12, %vm280_vm6  ;;  %v10039_v51 = vsub.f32 %v6478_v48, %v6478_v48  ;;  %v10049_v2 = vsub.f32 %v6472_v58, %v6472_v58  ;;  %v10062_v15 = vsub.f32 %v6480_v26, %v6480_v26 }
  0x9a   :  { %v16954_v24 = vsel %vm10028_vm7, 4294967295, %v16953_v24  ;;  %7365 = vmatpush1.bf16.msk.msra.mxu0 %vm10028_vm7, %v16773_v10  ;;  %16956 = vst [vmem:[#allocation171_spill] sm:$0xff] %v10037_v25  ;;  %vm10045_vm6 = vmpackc.low %vm290_vm14, %vm282_vm13  ;;  %vm305_vm13 = vcmp.eq.s32.totalorder %v10055_v17, %v9113_v19  ;;  %vm307_vm7 = vcmp.eq.s32.totalorder %v10055_v17, %v9115_v20 }
  0x9b   :  { %16955 = vst [vmem:[#allocation170_spill] sm:$0xff] %v16954_v24  ;;  %16957 = vst [vmem:[#allocation172_spill] sm:$0xff] %v10039_v51  ;;  %v16959_v47 = vsel %vm10045_vm6, 4294967295, %v16958_v47  ;;  %v10052_v24 = vadd.s32 192, %v9071_v1  ;;  %7749 = vmatpush1.bf16.msk.msra.mxu1 %vm10045_vm6, %v16773_v10  ;;  %v6495_v26 = vsel %vm305_vm13, 1.0, %v16794_v12  ;;  %v16971_v51 = vmov 0 }
  0x9c   :  { %16960 = vst [vmem:[#allocation173_spill] sm:$0xff] %v16959_v47  ;;  %16961 = vst [vmem:[#allocation174_spill] sm:$0xff] %v10049_v2  ;;  %v16966_v47 = vmov 0  ;;  %v10088_v2 = vsub.f32 %v6495_v26, %v6495_v26 }
  0x9d   :  { %16962 = vst [vmem:[#allocation175_spill] sm:$0xff] %v10052_v24  ;;  %16963 = vst [vmem:[#allocation176_spill] sm:$0xff] %v10055_v17  ;;  %vm297_vm12 = vcmp.eq.s32.totalorder %v10052_v24, %v9113_v19  ;;  %vm299_vm14 = vcmp.eq.s32.totalorder %v10052_v24, %v9115_v20 }
  0x9e   :  { %16964 = vst [vmem:[#allocation177_spill] sm:$0xff] %v10062_v15  ;;  %16965 = vst [vmem:[#allocation178_spill] sm:$0xff] %v10065_v7  ;;  %v6487_v48 = vsel %vm297_vm12, 1.0, %v16794_v12  ;;  %v6489_v45 = vsel %vm299_vm14, 1.0, %v16794_v12  ;;  %v6497_v15 = vsel %vm307_vm7, 1.0, %v16794_v12 }
  0x9f   :  { %vm10077_vm6 = vmpackc.low %vm305_vm13, %vm297_vm12  ;;  %v10086_v58 = vsub.f32 %v6487_v48, %v6487_v48  ;;  %16970 = vst [vmem:[#allocation181_spill] sm:$0xff] %v10088_v2  ;;  %v10099_v25 = vsub.f32 %v6489_v45, %v6489_v45  ;;  %vm296_vm12 = vcmp.eq.s32.totalorder %v10052_v24, %v9117_v21  ;;  %vm304_vm13 = vcmp.eq.s32.totalorder %v10055_v17, %v9117_v21 }
  0xa0   :  { %v16967_v47 = vsel %vm10077_vm6, 4294967295, %v16966_v47  ;;  %7367 = vmatprep.subr.msk.bf16.mxu0 %vm10077_vm6, %v16773_v10  ;;  %vm10092_vm15 = vmpackc.low %vm307_vm7, %vm299_vm14  ;;  %v6486_v48 = vsel %vm296_vm12, 1.0, %v16794_v12  ;;  %v6494_v26 = vsel %vm304_vm13, 1.0, %v16794_v12  ;;  %v16976_v2 = vmov 0 }
  0xa1   :  { %16968 = vst [vmem:[#allocation179_spill] sm:$0xff] %v16967_v47  ;;  %16969 = vst [vmem:[#allocation180_spill] sm:$0xff] %v10086_v58  ;;  %v16972_v51 = vsel %vm10092_vm15, 4294967295, %v16971_v51  ;;  %7751 = vmatprep.subr.msk.bf16.mxu1 %vm10092_vm15, %v16773_v10  ;;  %v10101_v47 = vsub.f32 %v6497_v15, %v6497_v15  ;;  %vm298_vm14 = vcmp.eq.s32.totalorder %v10052_v24, %v9119_v22 }
  0xa2   :  { %16973 = vst [vmem:[#allocation182_spill] sm:$0xff] %v16972_v51  ;;  %16974 = vst [vmem:[#allocation183_spill] sm:$0xff] %v10099_v25  ;;  %vm306_vm15 = vcmp.eq.s32.totalorder %v10055_v17, %v9119_v22  ;;  %v10120_v15 = vsub.f32 %v6486_v48, %v6486_v48  ;;  %v10122_v45 = vsub.f32 %v6494_v26, %v6494_v26  ;;  %v6488_v51 = vsel %vm298_vm14, 1.0, %v16794_v12 }
  0xa3   :  { %16975 = vst [vmem:[#allocation184_spill] sm:$0xff] %v10101_v47  ;;  %vm10109_vm7 = vmpackc.low %vm304_vm13, %vm296_vm12  ;;  %v6496_v47 = vsel %vm306_vm15, 1.0, %v16794_v12  ;;  %v16981_v25 = vmov 0  ;;  %v10133_v17 = vsub.f32 %v6488_v51, %v6488_v51  ;;  %v10138_v48 = vadd.s32 216, %v9071_v1 }
  0xa4   :  { %v16977_v2 = vsel %vm10109_vm7, 4294967295, %v16976_v2  ;;  %7369 = vmatpush1.bf16.msk.msra.mxu0 %vm10109_vm7, %v16773_v10  ;;  %16979 = vst [vmem:[#allocation186_spill] sm:$0xff] %v10120_v15  ;;  %16980 = vst [vmem:[#allocation187_spill] sm:$0xff] %v10122_v45  ;;  %v10135_v24 = vsub.f32 %v6496_v47, %v6496_v47  ;;  %vm313_vm13 = vcmp.eq.s32.totalorder %v10065_v7, %v9113_v19  ;;  %v16988_v26 = vmov 0 }
  0xa5   :  { %16978 = vst [vmem:[#allocation185_spill] sm:$0xff] %v16977_v2  ;;  %vm10126_vm12 = vmpackc.low %vm306_vm15, %vm298_vm14  ;;  %v6503_v58 = vsel %vm313_vm13, 1.0, %v16794_v12  ;;  %vm315_vm15 = vcmp.eq.s32.totalorder %v10065_v7, %v9115_v20  ;;  %vm321_vm14 = vcmp.eq.s32.totalorder %v10138_v48, %v9113_v19  ;;  %vm323_vm7 = vcmp.eq.s32.totalorder %v10138_v48, %v9115_v20 }
  0xa6   :  { %v16982_v25 = vsel %vm10126_vm12, 4294967295, %v16981_v25  ;;  %7753 = vmatpush1.bf16.msk.msra.mxu1 %vm10126_vm12, %v16773_v10  ;;  %16984 = vst [vmem:[#allocation189_spill] sm:$0xff] %v10133_v17  ;;  %16985 = vst [vmem:[#allocation190_spill] sm:$0xff] %v10135_v24  ;;  %v6511_v23 = vsel %vm321_vm14, 1.0, %v16794_v12  ;;  %v6505_v2 = vsel %vm315_vm15, 1.0, %v16794_v12  ;;  %vm312_vm6 = vcmp.eq.s32.totalorder %v10065_v7, %v9117_v21 }
  0xa7   :  { %16983 = vst [vmem:[#allocation188_spill] sm:$0xff] %v16982_v25  ;;  %16986 = vst [vmem:[#allocation191_spill] sm:$0xff] %v10138_v48  ;;  %v10151_v25 = vsub.f32 %v6503_v58, %v6503_v58  ;;  %v10166_v58 = vsub.f32 %v6511_v23, %v6511_v23  ;;  %v6513_v47 = vsel %vm323_vm7, 1.0, %v16794_v12  ;;  %v16992_v51 = vmov 0 }
  0xa8   :  { %vm10154_vm12 = vmpackc.low %vm321_vm14, %vm313_vm13  ;;  %vm320_vm14 = vcmp.eq.s32.totalorder %v10138_v48, %v9117_v21  ;;  %v10180_v24 = vsub.f32 %v6513_v47, %v6513_v47  ;;  %v6502_v23 = vsel %vm312_vm6, 1.0, %v16794_v12  ;;  %v10221_v45 = vadd.s32 240, %v9071_v1 }
  0xa9   :  { %16987 = vst [vmem:[#allocation192_spill] sm:$0xff] %v10151_v25  ;;  %v16989_v26 = vsel %vm10154_vm12, 4294967295, %v16988_v26  ;;  %7371 = vmatprep.subr.msk.bf16.mxu0 %vm10154_vm12, %v16773_v10  ;;  %16991 = vst [vmem:[#allocation194_spill] sm:$0xff] %v10166_v58  ;;  %v10173_v25 = vsub.f32 %v6505_v2, %v6505_v2  ;;  %v16997_v58 = vmov 0  ;;  %v10193_v2 = vsub.f32 %v6502_v23, %v6502_v23 }
  0xaa   :  { %16990 = vst [vmem:[#allocation193_spill] sm:$0xff] %v16989_v26  ;;  %vm10169_vm13 = vmpackc.low %vm323_vm7, %vm315_vm15  ;;  %v6510_v26 = vsel %vm320_vm14, 1.0, %v16794_v12  ;;  %vm314_vm7 = vcmp.eq.s32.totalorder %v10065_v7, %v9119_v22  ;;  %vm322_vm15 = vcmp.eq.s32.totalorder %v10138_v48, %v9119_v22  ;;  %v10211_v23 = vadd.s32 232, %v9071_v1 }
  0xab   :  { %v16993_v51 = vsel %vm10169_vm13, 4294967295, %v16992_v51  ;;  %16995 = vst [vmem:[#allocation196_spill] sm:$0xff] %v10173_v25  ;;  %7755 = vmatprep.subr.msk.bf16.mxu1 %vm10169_vm13, %v16773_v10  ;;  %16996 = vst [vmem:[#allocation197_spill] sm:$0xff] %v10180_v24  ;;  %v6504_v47 = vsel %vm314_vm7, 1.0, %v16794_v12  ;;  %v6512_v24 = vsel %vm322_vm15, 1.0, %v16794_v12  ;;  %v17002_v25 = vmov 0 }
  0xac   :  { %16994 = vst [vmem:[#allocation195_spill] sm:$0xff] %v16993_v51  ;;  %vm10184_vm12 = vmpackc.low %vm320_vm14, %vm312_vm6  ;;  %v10195_v51 = vsub.f32 %v6510_v26, %v6510_v26  ;;  %v10205_v7 = vsub.f32 %v6504_v47, %v6504_v47  ;;  %v10218_v17 = vsub.f32 %v6512_v24, %v6512_v24 }
  0xad   :  { %v16998_v58 = vsel %vm10184_vm12, 4294967295, %v16997_v58  ;;  %7373 = vmatpush1.bf16.msk.msra.mxu0 %vm10184_vm12, %v16773_v10  ;;  %17000 = vst [vmem:[#allocation199_spill] sm:$0xff] %v10193_v2  ;;  %vm10201_vm6 = vmpackc.low %vm322_vm15, %vm314_vm7  ;;  %vm337_vm7 = vcmp.eq.s32.totalorder %v10211_v23, %v9113_v19  ;;  %vm339_vm12 = vcmp.eq.s32.totalorder %v10211_v23, %v9115_v20 }
  0xae   :  { %16999 = vst [vmem:[#allocation198_spill] sm:$0xff] %v16998_v58  ;;  %17001 = vst [vmem:[#allocation200_spill] sm:$0xff] %v10195_v51  ;;  %v17003_v25 = vsel %vm10201_vm6, 4294967295, %v17002_v25  ;;  %v10208_v58 = vadd.s32 224, %v9071_v1  ;;  %7757 = vmatpush1.bf16.msk.msra.mxu1 %vm10201_vm6, %v16773_v10  ;;  %v6527_v24 = vsel %vm337_vm7, 1.0, %v16794_v12  ;;  %v17015_v51 = vmov 0 }
  0xaf   :  { %17004 = vst [vmem:[#allocation201_spill] sm:$0xff] %v17003_v25  ;;  %17005 = vst [vmem:[#allocation202_spill] sm:$0xff] %v10205_v7  ;;  %v17010_v25 = vmov 0  ;;  %v10244_v7 = vsub.f32 %v6527_v24, %v6527_v24 }
  0xb0   :  { %17006 = vst [vmem:[#allocation203_spill] sm:$0xff] %v10208_v58  ;;  %17007 = vst [vmem:[#allocation204_spill] sm:$0xff] %v10211_v23  ;;  %vm329_vm14 = vcmp.eq.s32.totalorder %v10208_v58, %v9113_v19  ;;  %vm331_vm15 = vcmp.eq.s32.totalorder %v10208_v58, %v9115_v20 }
  0xb1   :  { %17008 = vst [vmem:[#allocation205_spill] sm:$0xff] %v10218_v17  ;;  %17009 = vst [vmem:[#allocation206_spill] sm:$0xff] %v10221_v45  ;;  %v6519_v26 = vsel %vm329_vm14, 1.0, %v16794_v12  ;;  %v6521_v48 = vsel %vm331_vm15, 1.0, %v16794_v12  ;;  %v6529_v17 = vsel %vm339_vm12, 1.0, %v16794_v12 }
  0xb2   :  { %vm10233_vm6 = vmpackc.low %vm337_vm7, %vm329_vm14  ;;  %v10242_v47 = vsub.f32 %v6519_v26, %v6519_v26  ;;  %17014 = vst [vmem:[#allocation209_spill] sm:$0xff] %v10244_v7  ;;  %v10255_v2 = vsub.f32 %v6521_v48, %v6521_v48  ;;  %vm328_vm14 = vcmp.eq.s32.totalorder %v10208_v58, %v9117_v21  ;;  %vm336_vm7 = vcmp.eq.s32.totalorder %v10211_v23, %v9117_v21 }
  0xb3   :  { %v17011_v25 = vsel %vm10233_vm6, 4294967295, %v17010_v25  ;;  %7375 = vmatprep.subr.msk.bf16.mxu0 %vm10233_vm6, %v16773_v10  ;;  %vm10248_vm13 = vmpackc.low %vm339_vm12, %vm331_vm15  ;;  %v6518_v26 = vsel %vm328_vm14, 1.0, %v16794_v12  ;;  %v6526_v24 = vsel %vm336_vm7, 1.0, %v16794_v12  ;;  %v17020_v7 = vmov 0 }
  0xb4   :  { %17012 = vst [vmem:[#allocation207_spill] sm:$0xff] %v17011_v25  ;;  %17013 = vst [vmem:[#allocation208_spill] sm:$0xff] %v10242_v47  ;;  %v17016_v51 = vsel %vm10248_vm13, 4294967295, %v17015_v51  ;;  %7759 = vmatprep.subr.msk.bf16.mxu1 %vm10248_vm13, %v16773_v10  ;;  %v10257_v25 = vsub.f32 %v6529_v17, %v6529_v17  ;;  %vm330_vm15 = vcmp.eq.s32.totalorder %v10208_v58, %v9119_v22 }
  0xb5   :  { %17017 = vst [vmem:[#allocation210_spill] sm:$0xff] %v17016_v51  ;;  %17018 = vst [vmem:[#allocation211_spill] sm:$0xff] %v10255_v2  ;;  %vm338_vm13 = vcmp.eq.s32.totalorder %v10211_v23, %v9119_v22  ;;  %v10276_v17 = vsub.f32 %v6518_v26, %v6518_v26  ;;  %v10278_v48 = vsub.f32 %v6526_v24, %v6526_v24  ;;  %v6520_v51 = vsel %vm330_vm15, 1.0, %v16794_v12 }
  0xb6   :  { %17019 = vst [vmem:[#allocation212_spill] sm:$0xff] %v10257_v25  ;;  %vm10265_vm12 = vmpackc.low %vm336_vm7, %vm328_vm14  ;;  %v6528_v25 = vsel %vm338_vm13, 1.0, %v16794_v12  ;;  %v17025_v2 = vmov 0  ;;  %v10289_v23 = vsub.f32 %v6520_v51, %v6520_v51  ;;  %v10294_v26 = vadd.s32 248, %v9071_v1 }
  0xb7   :  { %v17021_v7 = vsel %vm10265_vm12, 4294967295, %v17020_v7  ;;  %7377 = vmatpush1.bf16.msk.msra.mxu0 %vm10265_vm12, %v16773_v10  ;;  %17023 = vst [vmem:[#allocation214_spill] sm:$0xff] %v10276_v17  ;;  %17024 = vst [vmem:[#allocation215_spill] sm:$0xff] %v10278_v48  ;;  %v10291_v58 = vsub.f32 %v6528_v25, %v6528_v25  ;;  %vm345_vm7 = vcmp.eq.s32.totalorder %v10221_v45, %v9113_v19  ;;  %v17032_v24 = vmov 0 }
  0xb8   :  { %17022 = vst [vmem:[#allocation213_spill] sm:$0xff] %v17021_v7  ;;  %vm10282_vm14 = vmpackc.low %vm338_vm13, %vm330_vm15  ;;  %v6535_v47 = vsel %vm345_vm7, 1.0, %v16794_v12  ;;  %vm347_vm13 = vcmp.eq.s32.totalorder %v10221_v45, %v9115_v20  ;;  %vm353_vm15 = vcmp.eq.s32.totalorder %v10294_v26, %v9113_v19  ;;  %vm355_vm12 = vcmp.eq.s32.totalorder %v10294_v26, %v9115_v20  ;;  %v873_v20 = vld [vmem:[#allocation5 + $0x8] sm:$0xff] }
  0xb9   :  { %v17026_v2 = vsel %vm10282_vm14, 4294967295, %v17025_v2  ;;  %7761 = vmatpush1.bf16.msk.msra.mxu1 %vm10282_vm14, %v16773_v10  ;;  %17028 = vst [vmem:[#allocation217_spill] sm:$0xff] %v10289_v23  ;;  %17029 = vst [vmem:[#allocation218_spill] sm:$0xff] %v10291_v58  ;;  %v10307_v1 = vsub.f32 %v6535_v47, %v6535_v47  ;;  %v6537_v7 = vsel %vm347_vm13, 1.0, %v16794_v12  ;;  %vm344_vm6 = vcmp.eq.s32.totalorder %v10221_v45, %v9117_v21 }
  0xba   :  { %17027 = vst [vmem:[#allocation216_spill] sm:$0xff] %v17026_v2  ;;  %17030 = vst [vmem:[#allocation219_spill] sm:$0xff] %v10294_v26  ;;  %v6543_v2 = vsel %vm353_vm15, 1.0, %v16794_v12  ;;  %v6545_v47 = vsel %vm355_vm12, 1.0, %v16794_v12  ;;  %v17036_v25 = vmov 0  ;;  %v10329_v51 = vsub.f32 %v6537_v7, %v6537_v7 }
  0xbb   :  { %17031 = vst [vmem:[#allocation220_spill] sm:$0xff] %v10307_v1  ;;  %vm10310_vm14 = vmpackc.low %vm353_vm15, %vm345_vm7  ;;  %v10322_v19 = vsub.f32 %v6543_v2, %v6543_v2  ;;  %vm352_vm15 = vcmp.eq.s32.totalorder %v10294_v26, %v9117_v21  ;;  %v6534_v2 = vsel %vm344_vm6, 1.0, %v16794_v12  ;;  %v17041_v1 = vmov 0 }
  0xbc   :  { %v17033_v24 = vsel %vm10310_vm14, 4294967295, %v17032_v24  ;;  %7379 = vmatprep.subr.msk.bf16.mxu0 %vm10310_vm14, %v16773_v10  ;;  %vm10325_vm7 = vmpackc.low %vm355_vm12, %vm347_vm13  ;;  %17039 = vst [vmem:[#allocation224_spill] sm:$0xff] %v10329_v51  ;;  %vm346_vm13 = vcmp.eq.s32.totalorder %v10221_v45, %v9119_v22  ;;  %v10349_v21 = vsub.f32 %v6534_v2, %v6534_v2  ;;  %v10363_v51 = vand.u32 4294901760, %v873_v20 }
  0xbd   :  { %17034 = vst [vmem:[#allocation221_spill] sm:$0xff] %v17033_v24  ;;  %17035 = vst [vmem:[#allocation222_spill] sm:$0xff] %v10322_v19  ;;  %v17037_v25 = vsel %vm10325_vm7, 4294967295, %v17036_v25  ;;  %7763 = vmatprep.subr.msk.bf16.mxu1 %vm10325_vm7, %v16773_v10  ;;  %v10336_v24 = vsub.f32 %v6545_v47, %v6545_v47  ;;  %v6542_v19 = vsel %vm352_vm15, 1.0, %v16794_v12  ;;  %vm354_vm7 = vcmp.eq.s32.totalorder %v10294_v26, %v9119_v22 }
  0xbe   :  { %17038 = vst [vmem:[#allocation223_spill] sm:$0xff] %v17037_v25  ;;  %vm10340_vm12 = vmpackc.low %vm352_vm15, %vm344_vm6  ;;  %v10351_v7 = vsub.f32 %v6542_v19, %v6542_v19  ;;  %v6536_v47 = vsel %vm346_vm13, 1.0, %v16794_v12  ;;  %v6544_v25 = vsel %vm354_vm7, 1.0, %v16794_v12  ;;  %v15795_v2 = vand.u32 4294901760, %v9152_v34 }
  0xbf   :  { %17040 = vst [vmem:[#allocation225_spill] sm:$0xff] %v10336_v24  ;;  %v17042_v1 = vsel %vm10340_vm12, 4294967295, %v17041_v1  ;;  %7381 = vmatpush1.bf16.msk.msra.mxu0 %vm10340_vm12, %v16773_v10  ;;  %17044 = vst [vmem:[#allocation227_spill] sm:$0xff] %v10349_v21  ;;  %v17046_v24 = vmov 0  ;;  %v10361_v45 = vsub.f32 %v6536_v47, %v6536_v47  ;;  %v10371_v22 = vsub.f32 %v6544_v25, %v6544_v25 }
  0xc0   :  { %17043 = vst [vmem:[#allocation226_spill] sm:$0xff] %v17042_v1  ;;  %17045 = vst [vmem:[#allocation228_spill] sm:$0xff] %v10351_v7  ;;  %v872_v1 = vld [vmem:[#allocation5] sm:$0xff]  ;;  %v15802_v26 = vand.u32 4294901760, %v9154_v35  ;;  %v10376_v12 = vsub.f32 %v873_v20, %v10363_v51  ;;  %v1040_v23 = vsub.f32 %v9152_v34, %v15795_v2  ;;  %v15809_v19 = vand.u32 4294901760, %v9160_v37 }
  0xc1   :  { %vm10357_vm6 = vmpackc.low %vm354_vm7, %vm346_vm13  ;;  %17049 = vst [vmem:[#allocation230_spill] sm:$0xff] %v10361_v45  ;;  %v17056_v58 = vand.u32 4294901760, %v9236_v60  ;;  %v17058_v45 = vand.u32 4294901760, %v9241_v61  ;;  %v15815_v60 = vand.u32 4294901760, %v9251_v63 }
  0xc2   :  { %v17047_v24 = vsel %vm10357_vm6, 4294967295, %v17046_v24  ;;  %17050 = vst [vmem:[#allocation231_spill] sm:$0xff] %v10363_v51  ;;  %7765 = vmatpush1.bf16.msk.msra.mxu1 %vm10357_vm6, %v16773_v10  ;;  %17051 = vst [vmem:[#allocation232_spill] sm:$0xff] %v10371_v22  ;;  %v1052_v25 = vsub.f32 %v9154_v35, %v15802_v26  ;;  %v10387_v10 = vand.u32 4294901760, %v872_v1  ;;  %v10390_v47 = vand.u32 4294901760, %v10376_v12 }
  0xc3   :  { %17048 = vst [vmem:[#allocation229_spill] sm:$0xff] %v17047_v24  ;;  %17052 = vst [vmem:[#allocation233_spill] sm:$0xff] %v10376_v12  ;;  %v15810_v24 = vand.u32 4294901760, %v9162_v38  ;;  %v1041_v20 = vand.u32 4294901760, %v1040_v23  ;;  %v2386_v2 = vsub.f32 %v9160_v37, %v15809_v19  ;;  %v17055_v51 = vand.u32 4294901760, %v9231_v59 }
  0xc4   :  { %17053 = vst [vmem:[#allocation234_spill] sm:$0xff] %v10387_v10  ;;  %17054 = vst [vmem:[#allocation235_spill] sm:$0xff] %v10390_v47  ;;  %v1053_v22 = vand.u32 4294901760, %v1052_v25  ;;  %v10403_v35 = vsub.f32 %v872_v1, %v10387_v10  ;;  %v17059_v23 = vand.u32 4294901760, %v9246_v62  ;;  %v1007_v19 = vsub.f32 %v10376_v12, %v10390_v47 }
  0xc5   :  { %v7384_v34 = vpack.c.bf16 %v17056_v58, %v17055_v51  ;;  %v2398_v26 = vsub.f32 %v9162_v38, %v15810_v24  ;;  %v2387_v59 = vand.u32 4294901760, %v2386_v2  ;;  %v15813_v58 = vand.u32 4294901760, %v9253_v0 }
  0xc6   :  { %17057 = vst [vmem:[#allocation236_spill] sm:$0xff] %v10403_v35  ;;  %v7768_v7 = vpack.c.bf16 %v17059_v23, %v17058_v45  ;;  %v7382_v51 = vpack.c.bf16 %v1053_v22, %v1041_v20  ;;  %v10414_v24 = vand.u32 4294901760, %v10403_v35  ;;  %v15814_v1 = vand.u32 4294901760, %v9255_v3 }
  0xc7   :  { %v2399_v25 = vand.u32 4294901760, %v2398_v26  ;;  %v10417_v10 = vand.u32 4294901760, %v1007_v19  ;;  %v1064_v61 = vsub.f32 %v9251_v63, %v15815_v60  ;;  %v1076_v62 = vsub.f32 %v9253_v0, %v15813_v58 }
  0xc8   :  { %17060 = vst [vmem:[#allocation237_spill] sm:$0xff] %v10414_v24  ;;  %v15824_v45 = vand.u32 4294901760, %v9257_v4  ;;  %7383 = vmatprep.subr.bf16.mxu0 %v7382_v51  ;;  %v1013_v26 = vsub.f32 %v10403_v35, %v10414_v24  ;;  %v2410_v19 = vsub.f32 %v9255_v3, %v15814_v1  ;;  %v17062_v22 = vand.u32 4294901760, %v9282_v42 }
  0xc9   :  { %17061 = vst [vmem:[#allocation238_spill] sm:$0xff] %v10417_v10  ;;  %v7766_v2 = vpack.c.bf16 %v2399_v25, %v2387_v59  ;;  %1009 = vmatprep.mubr.f32.mxu0 %v10417_v10  ;;  %2355 = vmatprep.mubr.f32.mxu1 %v10417_v10  ;;  %v1065_v23 = vand.u32 4294901760, %v1064_v61  ;;  %v1077_v58 = vand.u32 4294901760, %v1076_v62  ;;  %v17063_v51 = vand.u32 4294901760, %v9284_v43 }
  0xca   :  { %v1070_v20 = vsub.f32 %v9282_v42, %v17062_v22  ;;  %v2422_v59 = vsub.f32 %v9257_v4, %v15824_v45  ;;  %v10442_v1 = vand.u32 4294901760, %v1013_v26  ;;  %v2411_v60 = vand.u32 4294901760, %v2410_v19 }
  0xcb   :  { %v1082_v25 = vsub.f32 %v9284_v43, %v17063_v51  ;;  %7767 = vmatprep.subr.bf16.mxu1 %v7766_v2  ;;  %v17065_v22 = vand.u32 4294901760, %v9290_v55  ;;  %v7386_v10 = vpack.c.bf16 %v1077_v58, %v1065_v23  ;;  %v17066_v35 = vand.u32 4294901760, %v9292_v56 }
  0xcc   :  { %17064 = vst [vmem:[#allocation239_spill] sm:$0xff] %v10442_v1  ;;  %v1071_v24 = vand.u32 4294901760, %v1070_v20  ;;  %v2423_v61 = vand.u32 4294901760, %v2422_v59  ;;  %1015 = vmatmul.mubr.f32.vlgmr.msra.gmra.mrb[0].mxu0 %v10442_v1  ;;  %2361 = vmatmul.mubr.f32.vlgmr.msra.gmra.mrb[0].mxu1 %v10442_v1  ;;  %v15827_v26 = vand.u32 4294901760, %v9324_v39  ;;  %v15826_v19 = vand.u32 4294901760, %v9326_v29 }
  0xcd   :  { %v2416_v47 = vsub.f32 %v9290_v55, %v17065_v22  ;;  %v1083_v62 = vand.u32 4294901760, %v1082_v25  ;;  %v2428_v45 = vsub.f32 %v9292_v56, %v17066_v35  ;;  %v15825_v20 = vand.u32 4294901760, %v9331_v57  ;;  %7385 = vmatpush1.bf16.msra.mxu0 %v7384_v34  ;;  %7769 = vmatpush1.bf16.msra.mxu1 %v7768_v7 }
  0xce   :  { %v7770_v58 = vpack.c.bf16 %v2423_v61, %v2411_v60  ;;  %v15828_v51 = vand.u32 4294901760, %v9333_v28  ;;  %7387 = vmatprep.subr.bf16.mxu0 %v7386_v10  ;;  %v1088_v35 = vsub.f32 %v9324_v39, %v15827_v26  ;;  %v17067_v34 = vand.u32 4294901760, %v9354_v6 }
  0xcf   :  { %v2417_v2 = vand.u32 4294901760, %v2416_v47  ;;  %v7388_v23 = vpack.c.bf16 %v1083_v62, %v1071_v24  ;;  %v2429_v59 = vand.u32 4294901760, %v2428_v45  ;;  %v1100_v47 = vsub.f32 %v9326_v29, %v15826_v19 }
  0xd0   :  { %v2434_v25 = vsub.f32 %v9331_v57, %v15825_v20  ;;  %v1094_v24 = vsub.f32 %v9354_v6, %v17067_v34  ;;  %7771 = vmatprep.subr.bf16.mxu1 %v7770_v58  ;;  %v2446_v10 = vsub.f32 %v9333_v28, %v15828_v51  ;;  %v17068_v60 = vand.u32 4294901760, %v9356_v5 }
  0xd1   :  { %v7772_v7 = vpack.c.bf16 %v2429_v59, %v2417_v2  ;;  %v17069_v22 = vand.u32 4294901760, %v9362_v9  ;;  %v1089_v62 = vand.u32 4294901760, %v1088_v35  ;;  %v1101_v20 = vand.u32 4294901760, %v1100_v47  ;;  %7389 = vmatpush1.bf16.msra.mxu0 %v7388_v23 }
  0xd2   :  { %v1106_v45 = vsub.f32 %v9356_v5, %v17068_v60  ;;  %v2435_v19 = vand.u32 4294901760, %v2434_v25  ;;  %v1095_v26 = vand.u32 4294901760, %v1094_v24  ;;  %v2447_v58 = vand.u32 4294901760, %v2446_v10 }
  0xd3   :  { %v2440_v61 = vsub.f32 %v9362_v9, %v17069_v22  ;;  %7773 = vmatpush1.bf16.msra.mxu1 %v7772_v7  ;;  %v17070_v34 = vand.u32 4294901760, %v9364_v8  ;;  %v7390_v1 = vpack.c.bf16 %v1101_v20, %v1089_v62  ;;  %v15840_v60 = vand.u32 4294901760, %v9396_v49 }
  0xd4   :  { %v1107_v2 = vand.u32 4294901760, %v1106_v45  ;;  %v15839_v12 = vand.u32 4294901760, %v9398_v50  ;;  %v15833_v22 = vand.u32 4294901760, %v9403_v31  ;;  %v7774_v35 = vpack.c.bf16 %v2447_v58, %v2435_v19 }
  0xd5   :  { %v2441_v59 = vand.u32 4294901760, %v2440_v61  ;;  %v2452_v51 = vsub.f32 %v9364_v8, %v17070_v34  ;;  %v15834_v23 = vand.u32 4294901760, %v9405_v33  ;;  %7391 = vmatprep.subr.bf16.mxu0 %v7390_v1  ;;  %v1112_v24 = vsub.f32 %v9396_v49, %v15840_v60 }
  0xd6   :  { %v7392_v47 = vpack.c.bf16 %v1107_v2, %v1095_v26  ;;  %v1124_v20 = vsub.f32 %v9398_v50, %v15839_v12  ;;  %v2458_v7 = vsub.f32 %v9403_v31, %v15833_v22  ;;  %v17071_v10 = vand.u32 4294901760, %v9426_v11  ;;  %7775 = vmatprep.subr.bf16.mxu1 %v7774_v35 }
  0xd7   :  { %v2453_v25 = vand.u32 4294901760, %v2452_v51  ;;  %v2470_v1 = vsub.f32 %v9405_v33, %v15834_v23  ;;  %v17072_v51 = vand.u32 4294901760, %v9428_v40  ;;  %v15837_v61 = vand.u32 4294901760, %v9468_v14 }
  0xd8   :  { %v1118_v26 = vsub.f32 %v9426_v11, %v17071_v10  ;;  %7393 = vmatpush1.bf16.msra.mxu0 %v7392_v47  ;;  %v1113_v62 = vand.u32 4294901760, %v1112_v24  ;;  %v1125_v58 = vand.u32 4294901760, %v1124_v20  ;;  %v2459_v2 = vand.u32 4294901760, %v2458_v7 }
  0xd9   :  { %v7776_v19 = vpack.c.bf16 %v2453_v25, %v2441_v59  ;;  %v1130_v45 = vsub.f32 %v9428_v40, %v17072_v51  ;;  %v2471_v22 = vand.u32 4294901760, %v2470_v1  ;;  %v17073_v35 = vand.u32 4294901760, %v9434_v54 }
  0xda   :  { %v1119_v34 = vand.u32 4294901760, %v1118_v26  ;;  %v17074_v47 = vand.u32 4294901760, %v9436_v32  ;;  %v7394_v23 = vpack.c.bf16 %v1125_v58, %v1113_v62  ;;  %v1136_v51 = vsub.f32 %v9468_v14, %v15837_v61  ;;  %v17079_v61 = vld [vmem:[#allocation88_spill] sm:$0xff] }
  0xdb   :  { %7777 = vmatpush1.bf16.msra.mxu1 %v7776_v19  ;;  %v1131_v10 = vand.u32 4294901760, %v1130_v45  ;;  %v2464_v59 = vsub.f32 %v9434_v54, %v17073_v35  ;;  %v15836_v24 = vand.u32 4294901760, %v9470_v53  ;;  %v15835_v20 = vand.u32 4294901760, %v9475_v46 }
  0xdc   :  { %v2476_v25 = vsub.f32 %v9436_v32, %v17074_v47  ;;  %v7778_v7 = vpack.c.bf16 %v2471_v22, %v2459_v2  ;;  %7395 = vmatprep.subr.bf16.mxu0 %v7394_v23  ;;  %v1137_v45 = vand.u32 4294901760, %v1136_v51  ;;  %v15838_v58 = vand.u32 4294901760, %v9477_v27 }
  0xdd   :  { %v7396_v26 = vpack.c.bf16 %v1131_v10, %v1119_v34  ;;  %v2465_v19 = vand.u32 4294901760, %v2464_v59  ;;  %v1148_v35 = vsub.f32 %v9470_v53, %v15836_v24  ;;  %v2482_v62 = vsub.f32 %v9475_v46, %v15835_v20  ;;  %v17138_v53 = vld [vmem:[#allocation156_spill] sm:$0xff] }
  0xde   :  { %v2477_v1 = vand.u32 4294901760, %v2476_v25  ;;  %7779 = vmatprep.subr.bf16.mxu1 %v7778_v7  ;;  %v17075_v22 = vand.u32 4294901760, %v9498_v13  ;;  %v17076_v23 = vand.u32 4294901760, %v9500_v41  ;;  %v15845_v10 = vand.u32 4294901760, %v9540_v52 }
  0xdf   :  { %7397 = vmatpush1.bf16.msra.mxu0 %v7396_v26  ;;  %v1149_v59 = vand.u32 4294901760, %v1148_v35  ;;  %v2483_v25 = vand.u32 4294901760, %v2482_v62  ;;  %v2494_v51 = vsub.f32 %v9477_v27, %v15838_v58  ;;  %v17077_v7 = vand.u32 4294901760, %v9506_v36 }
  0xe0   :  { %v7780_v47 = vpack.c.bf16 %v2477_v1, %v2465_v19  ;;  %v1142_v2 = vsub.f32 %v9498_v13, %v17075_v22  ;;  %v1154_v34 = vsub.f32 %v9500_v41, %v17076_v23  ;;  %v17078_v22 = vand.u32 4294901760, %v9508_v30 }
  0xe1   :  { %v2488_v26 = vsub.f32 %v9506_v36, %v17077_v7  ;;  %v1160_v35 = vsub.f32 %v9540_v52, %v15845_v10  ;;  %v7398_v62 = vpack.c.bf16 %v1149_v59, %v1137_v45  ;;  %v2495_v23 = vand.u32 4294901760, %v2494_v51  ;;  %v17080_v7 = vld [vmem:[#allocation89_spill] sm:$0xff] }
  0xe2   :  { %7781 = vmatpush1.bf16.msra.mxu1 %v7780_v47  ;;  %v1143_v19 = vand.u32 4294901760, %v1142_v2  ;;  %v1155_v1 = vand.u32 4294901760, %v1154_v34  ;;  %v2500_v20 = vsub.f32 %v9508_v30, %v17078_v22  ;;  %v15847_v58 = vand.u32 4294901760, %v17079_v61  ;;  %v17081_v22 = vld [vmem:[#allocation90_spill] sm:$0xff] }
  0xe3   :  { %v2489_v24 = vand.u32 4294901760, %v2488_v26  ;;  %v1161_v41 = vand.u32 4294901760, %v1160_v35  ;;  %v15846_v47 = vand.u32 4294901760, %v17080_v7  ;;  %7399 = vmatprep.subr.bf16.mxu0 %v7398_v62  ;;  %v7782_v2 = vpack.c.bf16 %v2495_v23, %v2483_v25  ;;  %v17084_v26 = vld [vmem:[#allocation95_spill] sm:$0xff] }
  0xe4   :  { %v7400_v12 = vpack.c.bf16 %v1155_v1, %v1143_v19  ;;  %v2501_v60 = vand.u32 4294901760, %v2500_v20  ;;  %v1172_v34 = vsub.f32 %v17079_v61, %v15847_v58  ;;  %v15854_v30 = vand.u32 4294901760, %v17081_v22  ;;  %v17091_v61 = vld [vmem:[#allocation102_spill] sm:$0xff] }
  0xe5   :  { %v17082_v10 = vand.u32 4294901760, %v9570_v16  ;;  %v2506_v20 = vsub.f32 %v17080_v7, %v15846_v47  ;;  %v17083_v51 = vand.u32 4294901760, %v9572_v44  ;;  %v17085_v19 = vand.u32 4294901760, %v17084_v26  ;;  %7783 = vmatprep.subr.bf16.mxu1 %v7782_v2  ;;  %v17089_v2 = vld [vmem:[#allocation100_spill] sm:$0xff] }
  0xe6   :  { %7401 = vmatpush1.bf16.msra.mxu0 %v7400_v12  ;;  %v7784_v59 = vpack.c.bf16 %v2501_v60, %v2489_v24  ;;  %v1173_v35 = vand.u32 4294901760, %v1172_v34  ;;  %v17086_v60 = vld [vmem:[#allocation96_spill] sm:$0xff]  ;;  %v15857_v34 = vand.u32 4294901760, %v17089_v2  ;;  %v15917_v14 = vand.u32 4294901760, %v17138_v53 }
  0xe7   :  { %v1166_v45 = vsub.f32 %v9570_v16, %v17082_v10  ;;  %v1178_v25 = vsub.f32 %v9572_v44, %v17083_v51  ;;  %v2512_v1 = vsub.f32 %v17084_v26, %v17085_v19  ;;  %v2518_v10 = vsub.f32 %v17081_v22, %v15854_v30  ;;  %v17088_v51 = vld [vmem:[#allocation99_spill] sm:$0xff]  ;;  %v17090_v30 = vld [vmem:[#allocation101_spill] sm:$0xff] }
  0xe8   :  { %v17087_v24 = vand.u32 4294901760, %v17086_v60  ;;  %7785 = vmatpush1.bf16.msra.mxu1 %v7784_v59  ;;  %v2507_v23 = vand.u32 4294901760, %v2506_v20  ;;  %v15859_v44 = vand.u32 4294901760, %v17088_v51  ;;  %v7402_v16 = vpack.c.bf16 %v1173_v35, %v1161_v41 }
  0xe9   :  { %v1167_v12 = vand.u32 4294901760, %v1166_v45  ;;  %v1179_v47 = vand.u32 4294901760, %v1178_v25  ;;  %v2513_v58 = vand.u32 4294901760, %v2512_v1  ;;  %v2519_v7 = vand.u32 4294901760, %v2518_v10 }
  0xea   :  { %v2524_v62 = vsub.f32 %v17086_v60, %v17087_v24  ;;  %v1184_v45 = vsub.f32 %v17088_v51, %v15859_v44  ;;  %v15858_v22 = vand.u32 4294901760, %v17090_v30  ;;  %v15862_v24 = vand.u32 4294901760, %v17091_v61  ;;  %7403 = vmatprep.subr.bf16.mxu0 %v7402_v16 }
  0xeb   :  { %v7404_v26 = vpack.c.bf16 %v1179_v47, %v1167_v12  ;;  %v7786_v59 = vpack.c.bf16 %v2519_v7, %v2507_v23  ;;  %v1196_v41 = vsub.f32 %v17089_v2, %v15857_v34  ;;  %v17092_v25 = vand.u32 4294901760, %v9642_v18  ;;  %v17093_v7 = vld [vmem:[#allocation105_spill] sm:$0xff]  ;;  %v17095_v23 = vld [vmem:[#allocation107_spill] sm:$0xff] }
  0xec   :  { %v2525_v19 = vand.u32 4294901760, %v2524_v62  ;;  %v1185_v47 = vand.u32 4294901760, %v1184_v45  ;;  %v2530_v35 = vsub.f32 %v17090_v30, %v15858_v22  ;;  %v2542_v16 = vsub.f32 %v17091_v61, %v15862_v24  ;;  %v17097_v45 = vld [vmem:[#allocation108_spill] sm:$0xff]  ;;  %v17099_v24 = vld [vmem:[#allocation111_spill] sm:$0xff] }
  0xed   :  { %v1190_v1 = vsub.f32 %v9642_v18, %v17092_v25  ;;  %7405 = vmatpush1.bf16.msra.mxu0 %v7404_v26  ;;  %7787 = vmatprep.subr.bf16.mxu1 %v7786_v59  ;;  %v1197_v12 = vand.u32 4294901760, %v1196_v41  ;;  %v17098_v25 = vand.u32 4294901760, %v17097_v45  ;;  %v15871_v61 = vand.u32 4294901760, %v17099_v24  ;;  %v17100_v59 = vld [vmem:[#allocation112_spill] sm:$0xff] }
  0xee   :  { %v7788_v20 = vpack.c.bf16 %v2525_v19, %v2513_v58  ;;  %v17094_v58 = vand.u32 4294901760, %v17093_v7  ;;  %v17096_v19 = vand.u32 4294901760, %v17095_v23  ;;  %v2531_v22 = vand.u32 4294901760, %v2530_v35 }
  0xef   :  { %v1191_v62 = vand.u32 4294901760, %v1190_v1  ;;  %v2548_v34 = vsub.f32 %v17097_v45, %v17098_v25  ;;  %v2543_v44 = vand.u32 4294901760, %v2542_v16  ;;  %v7406_v30 = vpack.c.bf16 %v1197_v12, %v1185_v47  ;;  %v17102_v16 = vld [vmem:[#allocation114_spill] sm:$0xff] }
  0xf0   :  { %v1202_v10 = vsub.f32 %v17093_v7, %v17094_v58  ;;  %v2536_v26 = vsub.f32 %v17095_v23, %v17096_v19  ;;  %7789 = vmatpush1.bf16.msra.mxu1 %v7788_v20  ;;  %v15869_v41 = vand.u32 4294901760, %v17100_v59  ;;  %v1208_v19 = vsub.f32 %v17099_v24, %v15871_v61  ;;  %v17101_v23 = vld [vmem:[#allocation113_spill] sm:$0xff] }
  0xf1   :  { %v2549_v58 = vand.u32 4294901760, %v2548_v34  ;;  %v7790_v1 = vpack.c.bf16 %v2543_v44, %v2531_v22  ;;  %v15870_v51 = vand.u32 4294901760, %v17101_v23  ;;  %7407 = vmatprep.subr.bf16.mxu0 %v7406_v30  ;;  %v15877_v47 = vand.u32 4294901760, %v17102_v16  ;;  %v17105_v22 = vld [vmem:[#allocation117_spill] sm:$0xff] }
  0xf2   :  { %v1203_v18 = vand.u32 4294901760, %v1202_v10  ;;  %v2537_v2 = vand.u32 4294901760, %v2536_v26  ;;  %v1220_v35 = vsub.f32 %v17100_v59, %v15869_v41  ;;  %v17103_v10 = vld [vmem:[#allocation116_spill] sm:$0xff]  ;;  %v17106_v30 = vand.u32 4294901760, %v17105_v22 }
  0xf3   :  { %v17104_v34 = vand.u32 4294901760, %v17103_v10  ;;  %7791 = vmatprep.subr.bf16.mxu1 %v7790_v1  ;;  %v2554_v44 = vsub.f32 %v17101_v23, %v15870_v51  ;;  %v2566_v1 = vsub.f32 %v17102_v16, %v15877_v47  ;;  %v17111_v23 = vld [vmem:[#allocation123_spill] sm:$0xff] }
  0xf4   :  { %v7408_v7 = vpack.c.bf16 %v1203_v18, %v1191_v62  ;;  %v7792_v20 = vpack.c.bf16 %v2549_v58, %v2537_v2  ;;  %v1209_v18 = vand.u32 4294901760, %v1208_v19  ;;  %v1226_v2 = vsub.f32 %v17105_v22, %v17106_v30  ;;  %v17107_v62 = vld [vmem:[#allocation119_spill] sm:$0xff]  ;;  %v17109_v19 = vld [vmem:[#allocation120_spill] sm:$0xff] }
  0xf5   :  { %v1214_v12 = vsub.f32 %v17103_v10, %v17104_v34  ;;  %v17108_v26 = vand.u32 4294901760, %v17107_v62  ;;  %v1221_v58 = vand.u32 4294901760, %v1220_v35  ;;  %v17110_v34 = vand.u32 4294901760, %v17109_v19  ;;  %v17114_v16 = vld [vmem:[#allocation127_spill] sm:$0xff] }
  0xf6   :  { %7409 = vmatpush1.bf16.msra.mxu0 %v7408_v7  ;;  %7793 = vmatpush1.bf16.msra.mxu1 %v7792_v20  ;;  %v2555_v51 = vand.u32 4294901760, %v2554_v44  ;;  %v1227_v61 = vand.u32 4294901760, %v1226_v2  ;;  %v15882_v30 = vand.u32 4294901760, %v17111_v23  ;;  %v2567_v59 = vand.u32 4294901760, %v2566_v1 }
  0xf7   :  { %v2560_v25 = vsub.f32 %v17107_v62, %v17108_v26  ;;  %v1215_v7 = vand.u32 4294901760, %v1214_v12  ;;  %v2572_v41 = vsub.f32 %v17109_v19, %v17110_v34  ;;  %v7410_v22 = vpack.c.bf16 %v1221_v58, %v1209_v18  ;;  %v17112_v26 = vld [vmem:[#allocation125_spill] sm:$0xff]  ;;  %v17113_v12 = vld [vmem:[#allocation124_spill] sm:$0xff] }
  0xf8   :  { %v15881_v20 = vand.u32 4294901760, %v17112_v26  ;;  %v1232_v47 = vsub.f32 %v17111_v23, %v15882_v30  ;;  %v15883_v62 = vand.u32 4294901760, %v17113_v12  ;;  %v15886_v45 = vand.u32 4294901760, %v17114_v16  ;;  %v17119_v34 = vld [vmem:[#allocation133_spill] sm:$0xff] }
  0xf9   :  { %v2561_v10 = vand.u32 4294901760, %v2560_v25  ;;  %v2573_v24 = vand.u32 4294901760, %v2572_v41  ;;  %v7412_v35 = vpack.c.bf16 %v1227_v61, %v1215_v7  ;;  %7411 = vmatprep.subr.bf16.mxu0 %v7410_v22  ;;  %v7794_v44 = vpack.c.bf16 %v2567_v59, %v2555_v51  ;;  %v17115_v25 = vld [vmem:[#allocation129_spill] sm:$0xff]  ;;  %v17117_v51 = vld [vmem:[#allocation130_spill] sm:$0xff] }
  0xfa   :  { %v1244_v18 = vsub.f32 %v17112_v26, %v15881_v20  ;;  %v17116_v41 = vand.u32 4294901760, %v17115_v25  ;;  %v1233_v61 = vand.u32 4294901760, %v1232_v47  ;;  %v2578_v1 = vsub.f32 %v17113_v12, %v15883_v62  ;;  %v17121_v47 = vld [vmem:[#allocation134_spill] sm:$0xff] }
  0xfb   :  { %v7796_v2 = vpack.c.bf16 %v2573_v24, %v2561_v10  ;;  %7413 = vmatpush1.bf16.msra.mxu0 %v7412_v35  ;;  %v2590_v22 = vsub.f32 %v17114_v16, %v15886_v45  ;;  %v17118_v24 = vand.u32 4294901760, %v17117_v51  ;;  %7795 = vmatprep.subr.bf16.mxu1 %v7794_v44  ;;  %v17120_v20 = vand.u32 4294901760, %v17119_v34  ;;  %v17123_v45 = vld [vmem:[#allocation137_spill] sm:$0xff]  ;;  %v17124_v44 = vld [vmem:[#allocation138_spill] sm:$0xff] }
  0xfc   :  { %v1238_v58 = vsub.f32 %v17115_v25, %v17116_v41  ;;  %v1245_v10 = vand.u32 4294901760, %v1244_v18  ;;  %v17122_v41 = vand.u32 4294901760, %v17121_v47  ;;  %v2579_v62 = vand.u32 4294901760, %v2578_v1 }
  0xfd   :  { %v1250_v59 = vsub.f32 %v17117_v51, %v17118_v24  ;;  %v2584_v35 = vsub.f32 %v17119_v34, %v17120_v20  ;;  %7797 = vmatpush1.bf16.msra.mxu1 %v7796_v2  ;;  %v2591_v25 = vand.u32 4294901760, %v2590_v22  ;;  %v15898_v60 = vand.u32 4294901760, %v17123_v45  ;;  %v17125_v34 = vld [vmem:[#allocation140_spill] sm:$0xff]  ;;  %v17126_v22 = vld [vmem:[#allocation141_spill] sm:$0xff] }
  0xfe   :  { %v1239_v7 = vand.u32 4294901760, %v1238_v58  ;;  %v2596_v30 = vsub.f32 %v17121_v47, %v17122_v41  ;;  %v7414_v52 = vpack.c.bf16 %v1245_v10, %v1233_v61  ;;  %v15896_v18 = vand.u32 4294901760, %v17124_v44  ;;  %v17135_v47 = vld [vmem:[#allocation152_spill] sm:$0xff] }
  0xff   :  { %v1251_v19 = vand.u32 4294901760, %v1250_v59  ;;  %v2585_v36 = vand.u32 4294901760, %v2584_v35  ;;  %v7798_v58 = vpack.c.bf16 %v2591_v25, %v2579_v62  ;;  %v1256_v20 = vsub.f32 %v17123_v45, %v15898_v60  ;;  %v17127_v59 = vld [vmem:[#allocation143_spill] sm:$0xff]  ;;  %v17129_v25 = vld [vmem:[#allocation144_spill] sm:$0xff] }
 0x100   :  { %v2597_v24 = vand.u32 4294901760, %v2596_v30  ;;  %v15897_v13 = vand.u32 4294901760, %v17125_v34  ;;  %7415 = vmatprep.subr.bf16.mxu0 %v7414_v52  ;;  %v1268_v1 = vsub.f32 %v17124_v44, %v15896_v18  ;;  %v15906_v61 = vand.u32 4294901760, %v17126_v22 }
 0x101   :  { %v7416_v51 = vpack.c.bf16 %v1251_v19, %v1239_v7  ;;  %v17128_v30 = vand.u32 4294901760, %v17127_v59  ;;  %7799 = vmatprep.subr.bf16.mxu1 %v7798_v58  ;;  %v1257_v62 = vand.u32 4294901760, %v1256_v20  ;;  %v17130_v52 = vand.u32 4294901760, %v17129_v25  ;;  %v17131_v7 = vld [vmem:[#allocation146_spill] sm:$0xff]  ;;  %v17133_v20 = vld [vmem:[#allocation149_spill] sm:$0xff] }
 0x102   :  { %v7800_v2 = vpack.c.bf16 %v2597_v24, %v2585_v36  ;;  %v2602_v19 = vsub.f32 %v17125_v34, %v15897_v13  ;;  %v17132_v35 = vand.u32 4294901760, %v17131_v7  ;;  %v1269_v24 = vand.u32 4294901760, %v1268_v1 }
 0x103   :  { %v1262_v10 = vsub.f32 %v17127_v59, %v17128_v30  ;;  %7417 = vmatpush1.bf16.msra.mxu0 %v7416_v51  ;;  %v1274_v36 = vsub.f32 %v17129_v25, %v17130_v52  ;;  %v2614_v58 = vsub.f32 %v17126_v22, %v15906_v61  ;;  %v17134_v30 = vand.u32 4294901760, %v17133_v20 }
 0x104   :  { %v2608_v41 = vsub.f32 %v17131_v7, %v17132_v35  ;;  %7801 = vmatpush1.bf16.msra.mxu1 %v7800_v2  ;;  %v2603_v13 = vand.u32 4294901760, %v2602_v19  ;;  %v15913_v52 = vand.u32 4294901760, %v17135_v47  ;;  %v7418_v25 = vpack.c.bf16 %v1269_v24, %v1257_v62  ;;  %v17136_v35 = vld [vmem:[#allocation153_spill] sm:$0xff] }
 0x105   :  { %v1263_v51 = vand.u32 4294901760, %v1262_v10  ;;  %v2620_v18 = vsub.f32 %v17133_v20, %v17134_v30  ;;  %v1275_v60 = vand.u32 4294901760, %v1274_v36  ;;  %v2615_v27 = vand.u32 4294901760, %v2614_v58  ;;  %v17137_v10 = vld [vmem:[#allocation155_spill] sm:$0xff]  ;;  %v17143_v30 = vld [vmem:[#allocation161_spill] sm:$0xff] }
 0x106   :  { %v2609_v59 = vand.u32 4294901760, %v2608_v41  ;;  %v15912_v2 = vand.u32 4294901760, %v17136_v35  ;;  %v1280_v61 = vsub.f32 %v17135_v47, %v15913_v52  ;;  %v15914_v7 = vand.u32 4294901760, %v17137_v10  ;;  %7419 = vmatprep.subr.bf16.mxu0 %v7418_v25  ;;  %v17139_v41 = vld [vmem:[#allocation158_spill] sm:$0xff] }
 0x107   :  { %v2621_v46 = vand.u32 4294901760, %v2620_v18  ;;  %v7420_v1 = vpack.c.bf16 %v1275_v60, %v1263_v51  ;;  %v7802_v19 = vpack.c.bf16 %v2615_v27, %v2603_v13  ;;  %v17140_v18 = vand.u32 4294901760, %v17139_v41  ;;  %v17141_v13 = vld [vmem:[#allocation159_spill] sm:$0xff] }
 0x108   :  { %v1292_v62 = vsub.f32 %v17136_v35, %v15912_v2  ;;  %v1281_v60 = vand.u32 4294901760, %v1280_v61  ;;  %v2626_v58 = vsub.f32 %v17137_v10, %v15914_v7  ;;  %v2638_v25 = vsub.f32 %v17138_v53, %v15917_v14  ;;  %v17145_v61 = vld [vmem:[#allocation162_spill] sm:$0xff]  ;;  %v17147_v14 = vld [vmem:[#allocation164_spill] sm:$0xff] }
 0x109   :  { %v7804_v36 = vpack.c.bf16 %v2621_v46, %v2609_v59  ;;  %v1286_v24 = vsub.f32 %v17139_v41, %v17140_v18  ;;  %7421 = vmatpush1.bf16.msra.mxu0 %v7420_v1  ;;  %v17142_v27 = vand.u32 4294901760, %v17141_v13  ;;  %7803 = vmatprep.subr.bf16.mxu1 %v7802_v19  ;;  %v17144_v2 = vand.u32 4294901760, %v17143_v30  ;;  %v17148_v19 = vld [vmem:[#allocation166_spill] sm:$0xff] }
 0x10a   :  { %v1293_v59 = vand.u32 4294901760, %v1292_v62  ;;  %v17146_v18 = vand.u32 4294901760, %v17145_v61  ;;  %v2627_v7 = vand.u32 4294901760, %v2626_v58  ;;  %v2639_v41 = vand.u32 4294901760, %v2638_v25  ;;  %v17150_v25 = vld [vmem:[#allocation169_spill] sm:$0xff] }
 0x10b   :  { %v1298_v46 = vsub.f32 %v17141_v13, %v17142_v27  ;;  %v1287_v51 = vand.u32 4294901760, %v1286_v24  ;;  %v2632_v1 = vsub.f32 %v17143_v30, %v17144_v2  ;;  %7805 = vmatpush1.bf16.msra.mxu1 %v7804_v36  ;;  %v15930_v32 = vand.u32 4294901760, %v17147_v14  ;;  %v17149_v30 = vld [vmem:[#allocation168_spill] sm:$0xff] }
 0x10c   :  { %v2644_v52 = vsub.f32 %v17145_v61, %v17146_v18  ;;  %v7422_v54 = vpack.c.bf16 %v1293_v59, %v1281_v60  ;;  %v15928_v62 = vand.u32 4294901760, %v17148_v19  ;;  %v7806_v24 = vpack.c.bf16 %v2639_v41, %v2627_v7  ;;  %v17153_v41 = vld [vmem:[#allocation172_spill] sm:$0xff] }
 0x10d   :  { %v1299_v20 = vand.u32 4294901760, %v1298_v46  ;;  %v2633_v40 = vand.u32 4294901760, %v2632_v1  ;;  %v1304_v2 = vsub.f32 %v17147_v14, %v15930_v32  ;;  %v15929_v11 = vand.u32 4294901760, %v17149_v30  ;;  %v17151_v46 = vld [vmem:[#allocation171_spill] sm:$0xff]  ;;  %v17159_v61 = vld [vmem:[#allocation180_spill] sm:$0xff] }
 0x10e   :  { %v2645_v27 = vand.u32 4294901760, %v2644_v52  ;;  %7423 = vmatprep.subr.bf16.mxu0 %v7422_v54  ;;  %v1316_v58 = vsub.f32 %v17148_v19, %v15928_v62  ;;  %v15937_v60 = vand.u32 4294901760, %v17150_v25  ;;  %v17152_v52 = vand.u32 4294901760, %v17151_v46  ;;  %7807 = vmatprep.subr.bf16.mxu1 %v7806_v24 }
 0x10f   :  { %v7424_v13 = vpack.c.bf16 %v1299_v20, %v1287_v51  ;;  %v1305_v7 = vand.u32 4294901760, %v1304_v2  ;;  %v2650_v20 = vsub.f32 %v17149_v30, %v15929_v11  ;;  %v17154_v54 = vand.u32 4294901760, %v17153_v41  ;;  %v17155_v51 = vld [vmem:[#allocation174_spill] sm:$0xff]  ;;  %v17157_v2 = vld [vmem:[#allocation177_spill] sm:$0xff] }
 0x110   :  { %v7808_v36 = vpack.c.bf16 %v2645_v27, %v2633_v40  ;;  %v1310_v59 = vsub.f32 %v17151_v46, %v17152_v52  ;;  %v17156_v1 = vand.u32 4294901760, %v17155_v51  ;;  %v1317_v27 = vand.u32 4294901760, %v1316_v58 }
 0x111   :  { %7425 = vmatpush1.bf16.msra.mxu0 %v7424_v13  ;;  %v1322_v40 = vsub.f32 %v17153_v41, %v17154_v54  ;;  %v2662_v24 = vsub.f32 %v17150_v25, %v15937_v60  ;;  %v17158_v52 = vand.u32 4294901760, %v17157_v2  ;;  %v2651_v11 = vand.u32 4294901760, %v2650_v20  ;;  %v17162_v25 = vld [vmem:[#allocation184_spill] sm:$0xff] }
 0x112   :  { %v2656_v18 = vsub.f32 %v17155_v51, %v17156_v1  ;;  %7809 = vmatpush1.bf16.msra.mxu1 %v7808_v36  ;;  %v1311_v13 = vand.u32 4294901760, %v1310_v59  ;;  %v15944_v54 = vand.u32 4294901760, %v17159_v61  ;;  %v7426_v41 = vpack.c.bf16 %v1317_v27, %v1305_v7  ;;  %v17160_v1 = vld [vmem:[#allocation181_spill] sm:$0xff]  ;;  %v17161_v59 = vld [vmem:[#allocation183_spill] sm:$0xff] }
 0x113   :  { %v2668_v62 = vsub.f32 %v17157_v2, %v17158_v52  ;;  %v1323_v32 = vand.u32 4294901760, %v1322_v40  ;;  %v2663_v30 = vand.u32 4294901760, %v2662_v24  ;;  %v15942_v36 = vand.u32 4294901760, %v17160_v1 }
 0x114   :  { %v2657_v46 = vand.u32 4294901760, %v2656_v18  ;;  %v1328_v60 = vsub.f32 %v17159_v61, %v15944_v54  ;;  %v15943_v51 = vand.u32 4294901760, %v17161_v59  ;;  %v15947_v31 = vand.u32 4294901760, %v17162_v25  ;;  %7427 = vmatprep.subr.bf16.mxu0 %v7426_v41 }
 0x115   :  { %v2669_v33 = vand.u32 4294901760, %v2668_v62  ;;  %v7428_v58 = vpack.c.bf16 %v1323_v32, %v1311_v13  ;;  %v7810_v20 = vpack.c.bf16 %v2663_v30, %v2651_v11  ;;  %v1340_v7 = vsub.f32 %v17160_v1, %v15942_v36  ;;  %v17164_v11 = vld [vmem:[#allocation187_spill] sm:$0xff]  ;;  %v17166_v13 = vld [vmem:[#allocation189_spill] sm:$0xff] }
 0x116   :  { %v17163_v62 = vand.u32 4294901760, %v10120_v15  ;;  %v1329_v32 = vand.u32 4294901760, %v1328_v60  ;;  %v2674_v27 = vsub.f32 %v17161_v59, %v15943_v51  ;;  %v2686_v41 = vsub.f32 %v17162_v25, %v15947_v31  ;;  %v17168_v60 = vld [vmem:[#allocation190_spill] sm:$0xff]  ;;  %v17170_v31 = vld [vmem:[#allocation192_spill] sm:$0xff] }
 0x117   :  { %v7812_v40 = vpack.c.bf16 %v2669_v33, %v2657_v46  ;;  %7429 = vmatpush1.bf16.msra.mxu0 %v7428_v58  ;;  %v17165_v33 = vand.u32 4294901760, %v17164_v11  ;;  %7811 = vmatprep.subr.bf16.mxu1 %v7810_v20  ;;  %v1341_v46 = vand.u32 4294901760, %v1340_v7  ;;  %v17167_v52 = vand.u32 4294901760, %v17166_v13  ;;  %v17171_v20 = vld [vmem:[#allocation194_spill] sm:$0xff] }
 0x118   :  { %v1334_v18 = vsub.f32 %v10120_v15, %v17163_v62  ;;  %v17169_v62 = vand.u32 4294901760, %v17168_v60  ;;  %v2675_v51 = vand.u32 4294901760, %v2674_v27  ;;  %v2687_v54 = vand.u32 4294901760, %v2686_v41  ;;  %v17173_v41 = vld [vmem:[#allocation197_spill] sm:$0xff] }
 0x119   :  { %v1346_v30 = vsub.f32 %v17164_v11, %v17165_v33  ;;  %v2680_v58 = vsub.f32 %v17166_v13, %v17167_v52  ;;  %7813 = vmatpush1.bf16.msra.mxu1 %v7812_v40  ;;  %v15956_v2 = vand.u32 4294901760, %v17170_v31  ;;  %v7430_v25 = vpack.c.bf16 %v1341_v46, %v1329_v32  ;;  %v17172_v13 = vld [vmem:[#allocation196_spill] sm:$0xff] }
 0x11a   :  { %v1335_v24 = vand.u32 4294901760, %v1334_v18  ;;  %v2692_v36 = vsub.f32 %v17168_v60, %v17169_v62  ;;  %v15954_v7 = vand.u32 4294901760, %v17171_v20  ;;  %v7814_v18 = vpack.c.bf16 %v2687_v54, %v2675_v51  ;;  %v17176_v54 = vld [vmem:[#allocation200_spill] sm:$0xff] }
 0x11b   :  { %v1347_v15 = vand.u32 4294901760, %v1346_v30  ;;  %v2681_v59 = vand.u32 4294901760, %v2680_v58  ;;  %v1352_v52 = vsub.f32 %v17170_v31, %v15956_v2  ;;  %v15955_v1 = vand.u32 4294901760, %v17172_v13  ;;  %7431 = vmatprep.subr.bf16.mxu0 %v7430_v25  ;;  %v17174_v30 = vld [vmem:[#allocation199_spill] sm:$0xff]  ;;  %v17182_v60 = vld [vmem:[#allocation208_spill] sm:$0xff] }
 0x11c   :  { %v2693_v33 = vand.u32 4294901760, %v2692_v36  ;;  %v1364_v27 = vsub.f32 %v17171_v20, %v15954_v7  ;;  %v15962_v32 = vand.u32 4294901760, %v17173_v41  ;;  %v17175_v36 = vand.u32 4294901760, %v17174_v30  ;;  %7815 = vmatprep.subr.bf16.mxu1 %v7814_v18 }
 0x11d   :  { %v7432_v11 = vpack.c.bf16 %v1347_v15, %v1335_v24  ;;  %v1353_v15 = vand.u32 4294901760, %v1352_v52  ;;  %v2698_v51 = vsub.f32 %v17172_v13, %v15955_v1  ;;  %v17177_v25 = vand.u32 4294901760, %v17176_v54  ;;  %v17178_v24 = vld [vmem:[#allocation202_spill] sm:$0xff]  ;;  %v17180_v52 = vld [vmem:[#allocation205_spill] sm:$0xff] }
 0x11e   :  { %v7816_v40 = vpack.c.bf16 %v2693_v33, %v2681_v59  ;;  %v1358_v46 = vsub.f32 %v17174_v30, %v17175_v36  ;;  %v17179_v58 = vand.u32 4294901760, %v17178_v24  ;;  %v1365_v33 = vand.u32 4294901760, %v1364_v27 }
 0x11f   :  { %7433 = vmatpush1.bf16.msra.mxu0 %v7432_v11  ;;  %v1370_v59 = vsub.f32 %v17176_v54, %v17177_v25  ;;  %v2710_v18 = vsub.f32 %v17173_v41, %v15962_v32  ;;  %v17181_v36 = vand.u32 4294901760, %v17180_v52  ;;  %v2699_v1 = vand.u32 4294901760, %v2698_v51  ;;  %v17185_v41 = vld [vmem:[#allocation212_spill] sm:$0xff] }
 0x120   :  { %v2704_v62 = vsub.f32 %v17178_v24, %v17179_v58  ;;  %7817 = vmatpush1.bf16.msra.mxu1 %v7816_v40  ;;  %v1359_v11 = vand.u32 4294901760, %v1358_v46  ;;  %v15968_v25 = vand.u32 4294901760, %v17182_v60  ;;  %v7434_v54 = vpack.c.bf16 %v1365_v33, %v1353_v15  ;;  %v17183_v58 = vld [vmem:[#allocation209_spill] sm:$0xff]  ;;  %v17184_v46 = vld [vmem:[#allocation211_spill] sm:$0xff] }
 0x121   :  { %v2716_v7 = vsub.f32 %v17180_v52, %v17181_v36  ;;  %v1371_v2 = vand.u32 4294901760, %v1370_v59  ;;  %v2711_v13 = vand.u32 4294901760, %v2710_v18  ;;  %v15966_v40 = vand.u32 4294901760, %v17183_v58 }
 0x122   :  { %v2705_v30 = vand.u32 4294901760, %v2704_v62  ;;  %v1376_v32 = vsub.f32 %v17182_v60, %v15968_v25  ;;  %v15967_v24 = vand.u32 4294901760, %v17184_v46  ;;  %v15971_v31 = vand.u32 4294901760, %v17185_v41  ;;  %7435 = vmatprep.subr.bf16.mxu0 %v7434_v54 }
 0x123   :  { %v2717_v20 = vand.u32 4294901760, %v2716_v7  ;;  %v7436_v27 = vpack.c.bf16 %v1371_v2, %v1359_v11  ;;  %v7818_v51 = vpack.c.bf16 %v2711_v13, %v2699_v1  ;;  %v1388_v15 = vsub.f32 %v17183_v58, %v15966_v40  ;;  %v875_v2 = vld [vmem:[#allocation5 + $0x18] sm:$0xff]  ;;  %v17188_v11 = vld [vmem:[#allocation217_spill] sm:$0xff] }
 0x124   :  { %v17186_v7 = vand.u32 4294901760, %v10276_v17  ;;  %v1377_v33 = vand.u32 4294901760, %v1376_v32  ;;  %v2722_v18 = vsub.f32 %v17184_v46, %v15967_v24  ;;  %v2734_v1 = vsub.f32 %v17185_v41, %v15971_v31  ;;  %v17190_v32 = vld [vmem:[#allocation218_spill] sm:$0xff] }
 0x125   :  { %v7820_v59 = vpack.c.bf16 %v2717_v20, %v2705_v30  ;;  %7437 = vmatpush1.bf16.msra.mxu0 %v7436_v27  ;;  %v17187_v13 = vand.u32 4294901760, %v10278_v48  ;;  %7819 = vmatprep.subr.bf16.mxu1 %v7818_v51  ;;  %v1389_v30 = vand.u32 4294901760, %v1388_v15  ;;  %v17189_v36 = vand.u32 4294901760, %v17188_v11  ;;  %v17193_v51 = vld [vmem:[#allocation220_spill] sm:$0xff] }
 0x126   :  { %v1382_v62 = vsub.f32 %v10276_v17, %v17186_v7  ;;  %v17191_v7 = vand.u32 4294901760, %v17190_v32  ;;  %v2723_v24 = vand.u32 4294901760, %v2722_v18  ;;  %v2735_v25 = vand.u32 4294901760, %v2734_v1  ;;  %v17196_v1 = vld [vmem:[#allocation224_spill] sm:$0xff] }
 0x127   :  { %v1394_v20 = vsub.f32 %v10278_v48, %v17187_v13  ;;  %v2728_v27 = vsub.f32 %v17188_v11, %v17189_v36  ;;  %7821 = vmatpush1.bf16.msra.mxu1 %v7820_v59  ;;  %v10816_v31 = vand.u32 4294901760, %v875_v2  ;;  %v7438_v52 = vpack.c.bf16 %v1389_v30, %v1377_v33  ;;  %v17195_v11 = vld [vmem:[#allocation222_spill] sm:$0xff]  ;;  %v17201_v30 = vld [vmem:[#allocation228_spill] sm:$0xff] }
 0x128   :  { %v1383_v54 = vand.u32 4294901760, %v1382_v62  ;;  %v2740_v40 = vsub.f32 %v17190_v32, %v17191_v7  ;;  %v15980_v15 = vand.u32 4294901760, %v17193_v51  ;;  %v874_v62 = vld [vmem:[#allocation5 + $0x10] sm:$0xff]  ;;  %v7822_v48 = vpack.c.bf16 %v2735_v25, %v2723_v24 }
 0x129   :  { %v1395_v17 = vand.u32 4294901760, %v1394_v20  ;;  %17192 = vst [vmem:[#allocation123_spill] sm:$0xff] %v10816_v31  ;;  %v2729_v41 = vand.u32 4294901760, %v2728_v27  ;;  %v10820_v36 = vsub.f32 %v875_v2, %v10816_v31  ;;  %v15979_v58 = vand.u32 4294901760, %v17195_v11  ;;  %7439 = vmatprep.subr.bf16.mxu0 %v7438_v52  ;;  %v17197_v20 = vld [vmem:[#allocation225_spill] sm:$0xff] }
 0x12a   :  { %v2741_v13 = vand.u32 4294901760, %v2740_v40  ;;  %v1400_v18 = vsub.f32 %v17193_v51, %v15980_v15  ;;  %v15981_v33 = vand.u32 4294901760, %v17196_v1  ;;  %v15985_v40 = vand.u32 4294901760, %v17197_v20  ;;  %7823 = vmatprep.subr.bf16.mxu1 %v7822_v48 }
 0x12b   :  { %v7440_v46 = vpack.c.bf16 %v1395_v17, %v1383_v54  ;;  %17194 = vst [vmem:[#allocation125_spill] sm:$0xff] %v10820_v36  ;;  %v10829_v24 = vand.u32 4294901760, %v10820_v36  ;;  %v1412_v17 = vsub.f32 %v17195_v11, %v15979_v58  ;;  %v10834_v25 = vand.u32 4294901760, %v874_v62 }
 0x12c   :  { %v7824_v59 = vpack.c.bf16 %v2741_v13, %v2729_v41  ;;  %v17200_v41 = vand.u32 4294901760, %v10349_v21  ;;  %v1401_v2 = vand.u32 4294901760, %v1400_v18  ;;  %v2746_v48 = vsub.f32 %v17196_v1, %v15981_v33  ;;  %v17204_v33 = vld [vmem:[#allocation230_spill] sm:$0xff] }
 0x12d   :  { %7441 = vmatpush1.bf16.msra.mxu0 %v7440_v46  ;;  %17198 = vst [vmem:[#allocation124_spill] sm:$0xff] %v10829_v24  ;;  %17199 = vst [vmem:[#allocation127_spill] sm:$0xff] %v10834_v25  ;;  %v2758_v46 = vsub.f32 %v17197_v20, %v15985_v40  ;;  %v17202_v54 = vand.u32 4294901760, %v17201_v30  ;;  %v1023_v7 = vsub.f32 %v10820_v36, %v10829_v24  ;;  %v1413_v13 = vand.u32 4294901760, %v1412_v17 }
 0x12e   :  { %v1406_v52 = vsub.f32 %v10349_v21, %v17200_v41  ;;  %7825 = vmatpush1.bf16.msra.mxu1 %v7824_v59  ;;  %v10851_v41 = vsub.f32 %v874_v62, %v10834_v25  ;;  %v2747_v18 = vand.u32 4294901760, %v2746_v48  ;;  %v17205_v21 = vand.u32 4294901760, %v17204_v33  ;;  %v17210_v48 = vld [vmem:[#allocation29_spill] sm:$0xff] }
 0x12f   :  { %v1418_v27 = vsub.f32 %v17201_v30, %v17202_v54  ;;  %v2759_v58 = vand.u32 4294901760, %v2758_v46  ;;  %v10856_v40 = vand.u32 4294901760, %v1023_v7  ;;  %v7442_v20 = vpack.c.bf16 %v1413_v13, %v1401_v2  ;;  %v17208_v30 = vld [vmem:[#allocation232_spill] sm:$0xff]  ;;  %v17211_v46 = vld [vmem:[#allocation30_spill] sm:$0xff] }
 0x130   :  { %17203 = vst [vmem:[#allocation137_spill] sm:$0xff] %v10851_v41  ;;  %v1407_v59 = vand.u32 4294901760, %v1406_v52  ;;  %v2752_v32 = vsub.f32 %v17204_v33, %v17205_v21  ;;  %v10859_v54 = vand.u32 4294901760, %v10851_v41  ;;  %v17209_v24 = vand.u32 4294901760, %v17208_v30 }
 0x131   :  { %v1419_v15 = vand.u32 4294901760, %v1418_v27  ;;  %17206 = vst [vmem:[#allocation138_spill] sm:$0xff] %v10856_v40  ;;  %v7826_v62 = vpack.c.bf16 %v2759_v58, %v2747_v18  ;;  %v7446_v27 = vpack.c.bf16 %v17211_v46, %v17210_v48  ;;  %1025 = vmatprep.mubr.f32.mxu0 %v10856_v40  ;;  %7443 = vmatprep.subr.bf16.mxu0 %v7442_v20  ;;  %v17215_v20 = vld [vmem:[#allocation34_spill] sm:$0xff]  ;;  %v17217_v18 = vld [vmem:[#allocation37_spill] sm:$0xff] }
 0x132   :  { %17207 = vst [vmem:[#allocation140_spill] sm:$0xff] %v10859_v54  ;;  %v2764_v17 = vsub.f32 %v17208_v30, %v17209_v24  ;;  %v2753_v52 = vand.u32 4294901760, %v2752_v32  ;;  %v1029_v21 = vsub.f32 %v10851_v41, %v10859_v54  ;;  %2371 = vmatprep.mubr.f32.mxu1 %v10856_v40  ;;  %v7830_v58 = vpack.c.bf16 %v9162_v38, %v9160_v37  ;;  %v17213_v32 = vld [vmem:[#allocation231_spill] sm:$0xff]  ;;  %v17229_v54 = vld [vmem:[#allocation72_spill] sm:$0xff] }
 0x133   :  { %v7444_v36 = vpack.c.bf16 %v1419_v15, %v1407_v59  ;;  %7827 = vmatprep.subr.bf16.mxu1 %v7826_v62  ;;  %v17214_v15 = vld [vmem:[#allocation33_spill] sm:$0xff]  ;;  %v17216_v59 = vld [vmem:[#allocation36_spill] sm:$0xff]  ;;  %v7834_v62 = vpack.c.bf16 %v9257_v4, %v9255_v3 }
 0x134   :  { %v2765_v2 = vand.u32 4294901760, %v2764_v17  ;;  %v10870_v7 = vand.u32 4294901760, %v1029_v21  ;;  %v7448_v13 = vpack.c.bf16 %v17215_v20, %v17214_v15  ;;  %v7832_v17 = vpack.c.bf16 %v17217_v18, %v17216_v59  ;;  %v17251_v4 = vld [vmem:[#allocation92_spill] sm:$0xff] }
 0x135   :  { %7445 = vmatpush1.bf16.msra.mxu0 %v7444_v36  ;;  %v7450_v36 = vpack.c.bf16 %v9253_v0, %v9251_v63  ;;  %v7836_v21 = vpack.c.bf16 %v9292_v56, %v9290_v55  ;;  %v17243_v56 = vld [vmem:[#allocation80_spill] sm:$0xff] }
 0x136   :  { %17212 = vst [vmem:[#allocation141_spill] sm:$0xff] %v10870_v7  ;;  %v7828_v24 = vpack.c.bf16 %v2765_v2, %v2753_v52  ;;  %7447 = vmatprep.subr.bf16.mxu0 %v7446_v27  ;;  %1031 = vmatmul.mubr.f32.gmra.mrb[2].mxu0 %v10870_v7  ;;  %v17218_v52 = vld [vmem:[#allocation234_spill] sm:$0xff]  ;;  %v7452_v27 = vpack.c.bf16 %v9284_v43, %v9282_v42  ;;  %v17249_v43 = vld [vmem:[#allocation89_spill] sm:$0xff]  ;;  %v17254_v3 = vld [vmem:[#allocation96_spill] sm:$0xff] }
 0x137   :  { %2377 = vmatmul.mubr.f32.gmra.mrb[2].mxu1 %v10870_v7  ;;  %1422 = vmatprep.mubr.f32.mxu0 %v17213_v32  ;;  %v7454_v2 = vpack.c.bf16 %v9326_v29, %v9324_v39  ;;  %v17226_v7 = vld [vmem:[#allocation68_spill] sm:$0xff]  ;;  %v17236_v39 = vld [vmem:[#allocation209_spill] sm:$0xff]  ;;  %v17250_v42 = vld [vmem:[#allocation90_spill] sm:$0xff] }
 0x138   :  { %7829 = vmatpush1.bf16.msra.mxu1 %v7828_v24  ;;  %2768 = vmatprep.mubr.f32.mxu1 %v17213_v32  ;;  %v7838_v24 = vpack.c.bf16 %v9333_v28, %v9331_v57  ;;  %v17231_v28 = vld [vmem:[#allocation194_spill] sm:$0xff]  ;;  %v17233_v57 = vld [vmem:[#allocation197_spill] sm:$0xff]  ;;  %v17234_v32 = vld [vmem:[#allocation75_spill] sm:$0xff] }
 0x139   :  { %7831 = vmatprep.subr.bf16.mxu1 %v7830_v58  ;;  %v17219_v58 = vld [vmem:[#allocation65_spill] sm:$0xff] }
 0x13a   :  { %1424 = vmatmul.mubr.f32.vlgmr.msra.gmra.mrb[0].mxu0 %v17218_v52 }
 0x13b   :  { %2770 = vmatmul.mubr.f32.vlgmr.msra.gmra.mrb[0].mxu1 %v17218_v52  ;;  %7449 = vmatpush1.bf16.msra.mxu0 %v7448_v13  ;;  %v7456_v13 = vpack.c.bf16 %v9356_v5, %v9354_v6  ;;  %v17223_v52 = vld [vmem:[#allocation181_spill] sm:$0xff]  ;;  %v17224_v5 = vld [vmem:[#allocation183_spill] sm:$0xff]  ;;  %v17225_v6 = vld [vmem:[#allocation184_spill] sm:$0xff] }
 0x13c   :  { %7833 = vmatpush1.bf16.msra.mxu1 %v7832_v17  ;;  %7451 = vmatprep.subr.bf16.mxu0 %v7450_v36  ;;  %v7840_v17 = vpack.c.bf16 %v9364_v8, %v9362_v9  ;;  %v7458_v36 = vpack.c.bf16 %v9398_v50, %v9396_v49  ;;  %v17228_v9 = vld [vmem:[#allocation71_spill] sm:$0xff]  ;;  %v17230_v49 = vld [vmem:[#allocation192_spill] sm:$0xff] }
 0x13d   :  { %7835 = vmatprep.subr.bf16.mxu1 %v7834_v62  ;;  %1430 = vmatprep.mubr.f32.mxu0 %v10816_v31  ;;  %v17220_v62 = vld [vmem:[#allocation66_spill] sm:$0xff]  ;;  %v7844_v50 = vpack.c.bf16 %v17229_v54, %v17228_v9  ;;  %v17235_v8 = vld [vmem:[#allocation76_spill] sm:$0xff]  ;;  %v17239_v54 = vld [vmem:[#allocation77_spill] sm:$0xff] }
 0x13e   :  { %2776 = vmatprep.mubr.f32.mxu1 %v10816_v31  ;;  %v7842_v40 = vpack.c.bf16 %v17220_v62, %v17219_v58  ;;  %v17221_v31 = vld [vmem:[#allocation168_spill] sm:$0xff]  ;;  %1432 = vmatmul.mubr.f32.gmra.mrb[2].mxu0 %v10834_v25  ;;  %v7462_v29 = vpack.c.bf16 %v17235_v8, %v17234_v32  ;;  %v17240_v62 = vld [vmem:[#allocation78_spill] sm:$0xff]  ;;  %v17244_v8 = vld [vmem:[#allocation81_spill] sm:$0xff] }
 0x13f   :  { %7453 = vmatpush1.bf16.msra.mxu0 %v7452_v27  ;;  %v17222_v27 = vld [vmem:[#allocation169_spill] sm:$0xff]  ;;  %v17232_v58 = vld [vmem:[#allocation196_spill] sm:$0xff]  ;;  %2778 = vmatmul.mubr.f32.gmra.mrb[2].mxu1 %v10834_v25  ;;  %v7846_v9 = vpack.c.bf16 %v17240_v62, %v17239_v54  ;;  %v7464_v55 = vpack.c.bf16 %v17244_v8, %v17243_v56  ;;  %v17247_v62 = vld [vmem:[#allocation87_spill] sm:$0xff] }
 0x140   :  { %7837 = vmatpush1.bf16.msra.mxu1 %v7836_v21  ;;  %7455 = vmatprep.subr.bf16.mxu0 %v7454_v2  ;;  %v17227_v2 = vld [vmem:[#allocation69_spill] sm:$0xff]  ;;  %v17248_v54 = vld [vmem:[#allocation88_spill] sm:$0xff]  ;;  %v17255_v8 = vld [vmem:[#allocation99_spill] sm:$0xff] }
 0x141   :  { %7839 = vmatprep.subr.bf16.mxu1 %v7838_v24  ;;  %v7460_v24 = vpack.c.bf16 %v17227_v2, %v17226_v7  ;;  %v17237_v2 = vld [vmem:[#allocation211_spill] sm:$0xff]  ;;  %v17238_v7 = vld [vmem:[#allocation212_spill] sm:$0xff]  ;;  %v17242_v25 = vld [vmem:[#allocation233_spill] sm:$0xff]  ;;  %v7466_v21 = vpack.c.bf16 %v17248_v54, %v17247_v62 }
 0x142   :  { %1632 = vmatprep.mubr.f32.mxu0 %v17242_v25  ;;  %2978 = vmatprep.mubr.f32.mxu1 %v17242_v25  ;;  %v17252_v25 = vld [vmem:[#allocation93_spill] sm:$0xff]  ;;  %v17259_v54 = vld [vmem:[#allocation104_spill] sm:$0xff] }
 0x143   :  { %7457 = vmatpush1.bf16.msra.mxu0 %v7456_v13  ;;  %v17241_v13 = vld [vmem:[#allocation225_spill] sm:$0xff] }
 0x144   :  { %7841 = vmatpush1.bf16.msra.mxu1 %v7840_v17  ;;  %7459 = vmatprep.subr.bf16.mxu0 %v7458_v36  ;;  %v17245_v36 = vld [vmem:[#allocation83_spill] sm:$0xff]  ;;  %v7850_v17 = vpack.c.bf16 %v17250_v42, %v17249_v43  ;;  %v17260_v42 = vld [vmem:[#allocation105_spill] sm:$0xff]  ;;  %v17262_v43 = vld [vmem:[#allocation108_spill] sm:$0xff] }
 0x145   :  { %7843 = vmatprep.subr.bf16.mxu1 %v7842_v40  ;;  %v17246_v40 = vld [vmem:[#allocation84_spill] sm:$0xff] }
 0x146   :  { %v7848_v32 = vpack.c.bf16 %v17246_v40, %v17245_v36  ;;  %v17256_v40 = vld [vmem:[#allocation100_spill] sm:$0xff]  ;;  %v17258_v36 = vld [vmem:[#allocation102_spill] sm:$0xff] }
 0x147   :  { %7461 = vmatpush1.bf16.msra.mxu0 %v7460_v24  ;;  %v7468_v24 = vpack.c.bf16 %v17252_v25, %v17251_v4  ;;  %v17263_v25 = vld [vmem:[#allocation111_spill] sm:$0xff] }
 0x148   :  { %7845 = vmatpush1.bf16.msra.mxu1 %v7844_v50  ;;  %7463 = vmatprep.subr.bf16.mxu0 %v7462_v29  ;;  %v17253_v50 = vld [vmem:[#allocation95_spill] sm:$0xff]  ;;  %v7470_v29 = vpack.c.bf16 %v17256_v40, %v17255_v8  ;;  %v17267_v40 = vld [vmem:[#allocation116_spill] sm:$0xff] }
 0x149   :  { %7847 = vmatprep.subr.bf16.mxu1 %v7846_v9  ;;  %v7852_v0 = vpack.c.bf16 %v17254_v3, %v17253_v50  ;;  %v17257_v9 = vld [vmem:[#allocation101_spill] sm:$0xff]  ;;  %v17264_v3 = vld [vmem:[#allocation112_spill] sm:$0xff]  ;;  %v17266_v50 = vld [vmem:[#allocation114_spill] sm:$0xff] }
 0x14a   :  { %v7854_v56 = vpack.c.bf16 %v17258_v36, %v17257_v9  ;;  %v17268_v36 = vld [vmem:[#allocation117_spill] sm:$0xff]  ;;  %v17270_v9 = vld [vmem:[#allocation120_spill] sm:$0xff] }
 0x14b   :  { %7465 = vmatpush1.bf16.msra.mxu0 %v7464_v55  ;;  %v7472_v55 = vpack.c.bf16 %v17260_v42, %v17259_v54 }
 0x14c   :  { %7849 = vmatpush1.bf16.msra.mxu1 %v7848_v32  ;;  %7467 = vmatprep.subr.bf16.mxu0 %v7466_v21  ;;  %v17261_v32 = vld [vmem:[#allocation107_spill] sm:$0xff]  ;;  %v7474_v21 = vpack.c.bf16 %v17264_v3, %v17263_v25  ;;  %v17274_v3 = vld [vmem:[#allocation134_spill] sm:$0xff] }
 0x14d   :  { %7851 = vmatprep.subr.bf16.mxu1 %v7850_v17  ;;  %v7856_v62 = vpack.c.bf16 %v17262_v43, %v17261_v32  ;;  %v17265_v17 = vld [vmem:[#allocation113_spill] sm:$0xff] }
 0x14e   :  { %v7858_v4 = vpack.c.bf16 %v17266_v50, %v17265_v17  ;;  %v17273_v32 = vld [vmem:[#allocation133_spill] sm:$0xff] }
 0x14f   :  { %7469 = vmatpush1.bf16.msra.mxu0 %v7468_v24  ;;  %v7476_v24 = vpack.c.bf16 %v17268_v36, %v17267_v40  ;;  %v7864_v25 = vpack.c.bf16 %v17274_v3, %v17273_v32  ;;  %v17282_v3 = vpack.c.bf16 %v17126_v22, %v17125_v34  ;;  %v17286_v32 = vld [vmem:[#allocation162_spill] sm:$0xff] }
 0x150   :  { %7853 = vmatpush1.bf16.msra.mxu1 %v7852_v0  ;;  %7471 = vmatprep.subr.bf16.mxu0 %v7470_v29  ;;  %v17269_v0 = vld [vmem:[#allocation119_spill] sm:$0xff]  ;;  %v17271_v29 = vld [vmem:[#allocation129_spill] sm:$0xff] }
 0x151   :  { %7855 = vmatprep.subr.bf16.mxu1 %v7854_v56  ;;  %v7860_v8 = vpack.c.bf16 %v17270_v9, %v17269_v0  ;;  %v17272_v56 = vld [vmem:[#allocation130_spill] sm:$0xff]  ;;  %v17280_v9 = vld [vmem:[#allocation149_spill] sm:$0xff] }
 0x152   :  { %v7480_v43 = vpack.c.bf16 %v17272_v56, %v17271_v29  ;;  %v17281_v56 = vpack.c.bf16 %v17124_v44, %v17123_v45 }
 0x153   :  { %7473 = vmatpush1.bf16.msra.mxu0 %v7472_v55  ;;  %v17275_v55 = vpack.c.bf16 %v17112_v26, %v17111_v23 }
 0x154   :  { %7857 = vmatpush1.bf16.msra.mxu1 %v7856_v62  ;;  %7475 = vmatprep.subr.bf16.mxu0 %v7474_v21  ;;  %v17276_v62 = vpack.c.bf16 %v17114_v16, %v17113_v12  ;;  %v17277_v21 = vld [vmem:[#allocation143_spill] sm:$0xff] }
 0x155   :  { %7859 = vmatprep.subr.bf16.mxu1 %v7858_v4  ;;  %v17278_v4 = vld [vmem:[#allocation144_spill] sm:$0xff] }
 0x157   :  { %7477 = vmatpush1.bf16.msra.mxu0 %v7476_v24  ;;  %v7484_v24 = vpack.c.bf16 %v17278_v4, %v17277_v21  ;;  %v17287_v4 = vpack.c.bf16 %v17136_v35, %v17135_v47 }
 0x158   :  { %7861 = vmatpush1.bf16.msra.mxu1 %v7860_v8  ;;  %7479 = vmatprep.subr.bf16.mxu0 %v17275_v55  ;;  %v17279_v8 = vld [vmem:[#allocation146_spill] sm:$0xff] }
 0x159   :  { %7863 = vmatprep.subr.bf16.mxu1 %v17276_v62  ;;  %v7868_v0 = vpack.c.bf16 %v17280_v9, %v17279_v8  ;;  %v17283_v55 = vld [vmem:[#allocation158_spill] sm:$0xff]  ;;  %v17284_v62 = vld [vmem:[#allocation159_spill] sm:$0xff]  ;;  %v17288_v9 = vpack.c.bf16 %v17138_v53, %v17137_v10  ;;  %v17292_v8 = vld [vmem:[#allocation177_spill] sm:$0xff] }
 0x15b   :  { %7481 = vmatpush1.bf16.msra.mxu0 %v7480_v43  ;;  %v7488_v43 = vpack.c.bf16 %v17284_v62, %v17283_v55  ;;  %v17293_v62 = vpack.c.bf16 %v17148_v19, %v17147_v14 }
 0x15c   :  { %7865 = vmatpush1.bf16.msra.mxu1 %v7864_v25  ;;  %7483 = vmatprep.subr.bf16.mxu0 %v17281_v56  ;;  %v17285_v25 = vld [vmem:[#allocation161_spill] sm:$0xff]  ;;  %v17289_v56 = vld [vmem:[#allocation171_spill] sm:$0xff] }
 0x15d   :  { %7867 = vmatprep.subr.bf16.mxu1 %v17282_v3  ;;  %v7872_v29 = vpack.c.bf16 %v17286_v32, %v17285_v25  ;;  %v17290_v3 = vld [vmem:[#allocation172_spill] sm:$0xff]  ;;  %v17294_v32 = vpack.c.bf16 %v17222_v27, %v17221_v31  ;;  %v17298_v25 = vld [vmem:[#allocation190_spill] sm:$0xff] }
 0x15f   :  { %7485 = vmatpush1.bf16.msra.mxu0 %v7484_v24  ;;  %v7492_v24 = vpack.c.bf16 %v17290_v3, %v17289_v56  ;;  %v17299_v3 = vpack.c.bf16 %v17223_v52, %v17159_v61 }
 0x160   :  { %7869 = vmatpush1.bf16.msra.mxu1 %v7868_v0  ;;  %7487 = vmatprep.subr.bf16.mxu0 %v17287_v4  ;;  %v17291_v0 = vld [vmem:[#allocation174_spill] sm:$0xff] }
 0x161   :  { %7871 = vmatprep.subr.bf16.mxu1 %v17288_v9  ;;  %v7876_v21 = vpack.c.bf16 %v17292_v8, %v17291_v0  ;;  %v17295_v4 = vld [vmem:[#allocation186_spill] sm:$0xff]  ;;  %v17296_v9 = vld [vmem:[#allocation187_spill] sm:$0xff]  ;;  %v17300_v8 = vpack.c.bf16 %v17225_v6, %v17224_v5  ;;  %v17304_v0 = vld [vmem:[#allocation205_spill] sm:$0xff] }
 0x163   :  { %7489 = vmatpush1.bf16.msra.mxu0 %v7488_v43  ;;  %v7496_v43 = vpack.c.bf16 %v17296_v9, %v17295_v4  ;;  %v17305_v9 = vpack.c.bf16 %v17231_v28, %v17230_v49 }
 0x164   :  { %7873 = vmatpush1.bf16.msra.mxu1 %v7872_v29  ;;  %7491 = vmatprep.subr.bf16.mxu0 %v17293_v62  ;;  %v17297_v29 = vld [vmem:[#allocation189_spill] sm:$0xff]  ;;  %v17301_v62 = vld [vmem:[#allocation199_spill] sm:$0xff] }
 0x165   :  { %7875 = vmatprep.subr.bf16.mxu1 %v17294_v32  ;;  %v7880_v55 = vpack.c.bf16 %v17298_v25, %v17297_v29  ;;  %v17302_v32 = vld [vmem:[#allocation200_spill] sm:$0xff]  ;;  %v17306_v25 = vpack.c.bf16 %v17233_v57, %v17232_v58  ;;  %v17310_v29 = vld [vmem:[#allocation218_spill] sm:$0xff] }
 0x167   :  { %7493 = vmatpush1.bf16.msra.mxu0 %v7492_v24  ;;  %v7500_v24 = vpack.c.bf16 %v17302_v32, %v17301_v62  ;;  %v17311_v32 = vpack.c.bf16 %v17236_v39, %v17182_v60 }
 0x168   :  { %7877 = vmatpush1.bf16.msra.mxu1 %v7876_v21  ;;  %7495 = vmatprep.subr.bf16.mxu0 %v17299_v3  ;;  %v17303_v21 = vld [vmem:[#allocation202_spill] sm:$0xff] }
 0x169   :  { %7879 = vmatprep.subr.bf16.mxu1 %v17300_v8  ;;  %v7884_v56 = vpack.c.bf16 %v17304_v0, %v17303_v21  ;;  %v17307_v3 = vld [vmem:[#allocation214_spill] sm:$0xff]  ;;  %v17308_v8 = vld [vmem:[#allocation215_spill] sm:$0xff]  ;;  %v17312_v0 = vpack.c.bf16 %v17238_v7, %v17237_v2 }
 0x16b   :  { %7497 = vmatpush1.bf16.msra.mxu0 %v7496_v43  ;;  %v7504_v43 = vpack.c.bf16 %v17308_v8, %v17307_v3  ;;  %v17315_v8 = vpack.c.bf16 %v17195_v11, %v17193_v51  ;;  %v17517_v11 = vld [vmem:[#allocation90_spill] sm:$0xff]  ;;  %v17521_v51 = vld [vmem:[#allocation93_spill] sm:$0xff]  ;;  %v17529_v3 = vld [vmem:[#allocation100_spill] sm:$0xff] }
 0x16c   :  { %7881 = vmatpush1.bf16.msra.mxu1 %v7880_v55  ;;  %7499 = vmatprep.subr.bf16.mxu0 %v17305_v9  ;;  %v17309_v55 = vld [vmem:[#allocation217_spill] sm:$0xff]  ;;  %v17313_v9 = vld [vmem:[#allocation227_spill] sm:$0xff] }
 0x16d   :  { %7883 = vmatprep.subr.bf16.mxu1 %v17306_v25  ;;  %v7888_v4 = vpack.c.bf16 %v17310_v29, %v17309_v55  ;;  %v17314_v25 = vld [vmem:[#allocation228_spill] sm:$0xff]  ;;  %v17316_v29 = vpack.c.bf16 %v17241_v13, %v17196_v1  ;;  %v17507_v13 = vld [vmem:[#allocation83_spill] sm:$0xff] }
 0x16e   :  { %v17513_v1 = vld [vmem:[#allocation88_spill] sm:$0xff] }
 0x16f   :  { %7501 = vmatpush1.bf16.msra.mxu0 %v7500_v24  ;;  %v7508_v24 = vpack.c.bf16 %v17314_v25, %v17313_v9  ;;  %v17451_v9 = vld [vmem:[#allocation237_spill] sm:$0xff]  ;;  %v17525_v55 = vld [vmem:[#allocation96_spill] sm:$0xff] }
 0x170   :  { %7885 = vmatpush1.bf16.msra.mxu1 %v7884_v56  ;;  %7503 = vmatprep.subr.bf16.mxu0 %v17311_v32  ;;  %v7892_v56 = vpack.c.bf16 %v17208_v30, %v17204_v33  ;;  %v17317_v32 = vmov 1.0|1.0  }
 0x171   :  { %7887 = vmatprep.subr.bf16.mxu1 %v17312_v0  ;;  %v17437_v0 = vand.u32 4294901760, %v9162_v38  ;;  %v17444_v38 = vand.u32 4294901760, %v9251_v63  ;;  %v17456_v63 = vld [vmem:[#allocation47_spill] sm:$0xff] }
 0x173   :  { %7505 = vmatpush1.bf16.msra.mxu0 %v7504_v43  ;;  %v17320_v43 = vld [vmem:[#allocation236_spill] sm:$0xff] }
 0x174   :  { %7889 = vmatpush1.bf16.msra.mxu1 %v7888_v4  ;;  %7507 = vmatprep.subr.bf16.mxu0 %v17315_v8  ;;  %v17325_v4 = vld [vmem:[#allocation125_spill] sm:$0xff] }
 0x175   :  { %7891 = vmatprep.subr.bf16.mxu1 %v17316_v29  ;;  %v17335_v29 = vld [vmem:[#allocation61_spill] sm:$0xff] }
 0x176   :  { %vm17336_vm13 = vnez %v17335_v29  ;;  %v17347_v29 = vld [vmem:[#allocation79_spill] sm:$0xff] }
 0x177   :  { %7509 = vmatpush1.bf16.msra.mxu0 %v7508_v24  ;;  %v17337_v24 = vld [vmem:[#allocation62_spill] sm:$0xff] }
 0x178   :  { %7893 = vmatpush1.bf16.msra.mxu1 %v7892_v56  ;;  %7511 = vmatprep.subr.msk.bf16.mxu0 %vm9143_vm4, %v17317_v32  ;;  %v17339_v56 = vld [vmem:[#allocation67_spill] sm:$0xff] }
 0x179   :  { %7895 = vmatprep.subr.msk.bf16.mxu1 %vm9156_vm5, %v17317_v32 }
 0x17a   :  { %1635 = vmatmul.mubr.f32.vlgmr.msra.gmra.mrb[0].mxu0 %v17320_v43 }
 0x17b   :  { %2981 = vmatmul.mubr.f32.vlgmr.msra.gmra.mrb[0].mxu1 %v17320_v43  ;;  %7513 = vmatpush1.bf16.msk.msra.mxu0 %vm9177_vm10, %v17317_v32  ;;  %v17333_v43 = vld [vmem:[#allocation58_spill] sm:$0xff] }
 0x17c   :  { %7897 = vmatpush1.bf16.msk.msra.mxu1 %vm9190_vm11, %v17317_v32  ;;  %7515 = vmatprep.subr.msk.bf16.mxu0 %vm9213_vm0, %v17317_v32  ;;  %vm17334_vm15 = vnez %v17333_v43  ;;  %v17345_v43 = vld [vmem:[#allocation74_spill] sm:$0xff] }
 0x17d   :  { %7899 = vmatprep.subr.msk.bf16.mxu1 %vm9224_vm1, %v17317_v32  ;;  %1642 = vmatprep.mubr.f32.mxu0 %v17325_v4 }
 0x17e   :  { %2988 = vmatprep.mubr.f32.mxu1 %v17325_v4  ;;  %1645 = vmatmul.mubr.f32.gmra.mrb[2].mxu0 %v10851_v41  ;;  %v17330_v4 = vld [vmem:[#allocation235_spill] sm:$0xff] }
 0x17f   :  { %2991 = vmatmul.mubr.f32.gmra.mrb[2].mxu1 %v10851_v41  ;;  %7517 = vmatpush1.bf16.msk.msra.mxu0 %vm9273_vm8, %v17317_v32  ;;  %v17331_v41 = vld [vmem:[#allocation55_spill] sm:$0xff] }
 0x180   :  { %7901 = vmatpush1.bf16.msk.msra.mxu1 %vm9286_vm9, %v17317_v32  ;;  %7519 = vmatprep.subr.msk.bf16.mxu0 %vm9309_vm2, %v17317_v32  ;;  %vm17332_vm7 = vnez %v17331_v41  ;;  %vm17338_vm2 = vnez %v17337_v24  ;;  %v17343_v41 = vld [vmem:[#allocation73_spill] sm:$0xff]  ;;  %v17349_v24 = vld [vmem:[#allocation82_spill] sm:$0xff] }
 0x181   :  { %7903 = vmatprep.subr.msk.bf16.mxu1 %vm9320_vm3, %v17317_v32  ;;  %1782 = vmatprep.mubr.f32.mxu0 %v17330_v4  ;;  %vm17340_vm3 = vnez %v17339_v56  ;;  %v17351_v56 = vld [vmem:[#allocation85_spill] sm:$0xff] }
 0x182   :  { %3128 = vmatprep.mubr.f32.mxu1 %v17330_v4  ;;  %v17341_v4 = vld [vmem:[#allocation70_spill] sm:$0xff] }
 0x183   :  { %7521 = vmatpush1.bf16.msk.msra.mxu0 %vm17332_vm7, %v17317_v32  ;;  %vm17342_vm9 = vnez %v17341_v4  ;;  %vm17344_vm7 = vnez %v17343_v41  ;;  %v17353_v4 = vld [vmem:[#allocation86_spill] sm:$0xff]  ;;  %v17355_v41 = vld [vmem:[#allocation91_spill] sm:$0xff] }
 0x184   :  { %7905 = vmatpush1.bf16.msk.msra.mxu1 %vm17334_vm15, %v17317_v32  ;;  %7523 = vmatprep.subr.msk.bf16.mxu0 %vm17336_vm13, %v17317_v32  ;;  %vm17346_vm15 = vnez %v17345_v43  ;;  %vm17348_vm13 = vnez %v17347_v29  ;;  %v17357_v43 = vld [vmem:[#allocation94_spill] sm:$0xff]  ;;  %v17359_v29 = vld [vmem:[#allocation97_spill] sm:$0xff] }
 0x185   :  { %7907 = vmatprep.subr.msk.bf16.mxu1 %vm17338_vm2, %v17317_v32  ;;  %vm17350_vm2 = vnez %v17349_v24  ;;  %v17361_v24 = vld [vmem:[#allocation98_spill] sm:$0xff] }
 0x187   :  { %7525 = vmatpush1.bf16.msk.msra.mxu0 %vm17340_vm3, %v17317_v32  ;;  %vm17352_vm3 = vnez %v17351_v56  ;;  %v17363_v56 = vld [vmem:[#allocation103_spill] sm:$0xff] }
 0x188   :  { %7909 = vmatpush1.bf16.msk.msra.mxu1 %vm17342_vm9, %v17317_v32  ;;  %7527 = vmatprep.subr.msk.bf16.mxu0 %vm17344_vm7, %v17317_v32  ;;  %vm17354_vm9 = vnez %v17353_v4  ;;  %vm17356_vm7 = vnez %v17355_v41  ;;  %v17365_v4 = vld [vmem:[#allocation106_spill] sm:$0xff]  ;;  %v17367_v41 = vld [vmem:[#allocation109_spill] sm:$0xff] }
 0x189   :  { %7911 = vmatprep.subr.msk.bf16.mxu1 %vm17346_vm15, %v17317_v32  ;;  %vm17358_vm15 = vnez %v17357_v43  ;;  %v17369_v43 = vld [vmem:[#allocation110_spill] sm:$0xff] }
 0x18b   :  { %7529 = vmatpush1.bf16.msk.msra.mxu0 %vm17348_vm13, %v17317_v32  ;;  %vm17360_vm13 = vnez %v17359_v29  ;;  %v17371_v29 = vld [vmem:[#allocation115_spill] sm:$0xff] }
 0x18c   :  { %7913 = vmatpush1.bf16.msk.msra.mxu1 %vm17350_vm2, %v17317_v32  ;;  %7531 = vmatprep.subr.msk.bf16.mxu0 %vm17352_vm3, %v17317_v32  ;;  %vm17362_vm2 = vnez %v17361_v24  ;;  %vm17364_vm3 = vnez %v17363_v56  ;;  %v17373_v24 = vld [vmem:[#allocation118_spill] sm:$0xff] }
 0x18d   :  { %7915 = vmatprep.subr.msk.bf16.mxu1 %vm17354_vm9, %v17317_v32  ;;  %vm17366_vm9 = vnez %v17365_v4  ;;  %v17375_v56 = vld [vmem:[#allocation122_spill] sm:$0xff] }
 0x18e   :  { %v17377_v4 = vld [vmem:[#allocation126_spill] sm:$0xff] }
 0x18f   :  { %7533 = vmatpush1.bf16.msk.msra.mxu0 %vm17356_vm7, %v17317_v32  ;;  %vm17368_vm7 = vnez %v17367_v41  ;;  %v17379_v41 = vld [vmem:[#allocation128_spill] sm:$0xff] }
 0x190   :  { %7917 = vmatpush1.bf16.msk.msra.mxu1 %vm17358_vm15, %v17317_v32  ;;  %7535 = vmatprep.subr.msk.bf16.mxu0 %vm17360_vm13, %v17317_v32  ;;  %vm17370_vm15 = vnez %v17369_v43  ;;  %vm17372_vm13 = vnez %v17371_v29  ;;  %v17381_v43 = vld [vmem:[#allocation131_spill] sm:$0xff]  ;;  %v17383_v29 = vld [vmem:[#allocation136_spill] sm:$0xff] }
 0x191   :  { %7919 = vmatprep.subr.msk.bf16.mxu1 %vm17362_vm2, %v17317_v32  ;;  %vm17374_vm2 = vnez %v17373_v24  ;;  %v17385_v24 = vld [vmem:[#allocation139_spill] sm:$0xff] }
 0x193   :  { %7537 = vmatpush1.bf16.msk.msra.mxu0 %vm17364_vm3, %v17317_v32  ;;  %vm17376_vm3 = vnez %v17375_v56  ;;  %v17387_v56 = vld [vmem:[#allocation142_spill] sm:$0xff] }
 0x194   :  { %7921 = vmatpush1.bf16.msk.msra.mxu1 %vm17366_vm9, %v17317_v32  ;;  %7539 = vmatprep.subr.msk.bf16.mxu0 %vm17368_vm7, %v17317_v32  ;;  %vm17378_vm9 = vnez %v17377_v4  ;;  %vm17380_vm7 = vnez %v17379_v41  ;;  %v17389_v4 = vld [vmem:[#allocation145_spill] sm:$0xff]  ;;  %v17391_v41 = vld [vmem:[#allocation151_spill] sm:$0xff] }
 0x195   :  { %7923 = vmatprep.subr.msk.bf16.mxu1 %vm17370_vm15, %v17317_v32  ;;  %vm17382_vm15 = vnez %v17381_v43  ;;  %v17393_v43 = vld [vmem:[#allocation154_spill] sm:$0xff] }
 0x197   :  { %7541 = vmatpush1.bf16.msk.msra.mxu0 %vm17372_vm13, %v17317_v32  ;;  %vm17384_vm13 = vnez %v17383_v29  ;;  %v17395_v29 = vld [vmem:[#allocation157_spill] sm:$0xff] }
 0x198   :  { %7925 = vmatpush1.bf16.msk.msra.mxu1 %vm17374_vm2, %v17317_v32  ;;  %7543 = vmatprep.subr.msk.bf16.mxu0 %vm17376_vm3, %v17317_v32  ;;  %vm17386_vm2 = vnez %v17385_v24  ;;  %vm17388_vm3 = vnez %v17387_v56  ;;  %v17397_v24 = vld [vmem:[#allocation160_spill] sm:$0xff]  ;;  %v17399_v56 = vld [vmem:[#allocation165_spill] sm:$0xff] }
 0x199   :  { %7927 = vmatprep.subr.msk.bf16.mxu1 %vm17378_vm9, %v17317_v32  ;;  %vm17390_vm9 = vnez %v17389_v4  ;;  %v17401_v4 = vld [vmem:[#allocation167_spill] sm:$0xff] }
 0x19b   :  { %7545 = vmatpush1.bf16.msk.msra.mxu0 %vm17380_vm7, %v17317_v32  ;;  %vm17392_vm7 = vnez %v17391_v41  ;;  %v17403_v41 = vld [vmem:[#allocation170_spill] sm:$0xff] }
 0x19c   :  { %7929 = vmatpush1.bf16.msk.msra.mxu1 %vm17382_vm15, %v17317_v32  ;;  %7547 = vmatprep.subr.msk.bf16.mxu0 %vm17384_vm13, %v17317_v32  ;;  %vm17394_vm15 = vnez %v17393_v43  ;;  %vm17396_vm13 = vnez %v17395_v29  ;;  %v17405_v43 = vld [vmem:[#allocation173_spill] sm:$0xff]  ;;  %v17407_v29 = vld [vmem:[#allocation179_spill] sm:$0xff] }
 0x19d   :  { %7931 = vmatprep.subr.msk.bf16.mxu1 %vm17386_vm2, %v17317_v32  ;;  %vm17398_vm2 = vnez %v17397_v24  ;;  %v17409_v24 = vld [vmem:[#allocation182_spill] sm:$0xff] }
 0x19f   :  { %7549 = vmatpush1.bf16.msk.msra.mxu0 %vm17388_vm3, %v17317_v32  ;;  %vm17400_vm3 = vnez %v17399_v56  ;;  %v17411_v56 = vld [vmem:[#allocation185_spill] sm:$0xff] }
 0x1a0   :  { %7933 = vmatpush1.bf16.msk.msra.mxu1 %vm17390_vm9, %v17317_v32  ;;  %7551 = vmatprep.subr.msk.bf16.mxu0 %vm17392_vm7, %v17317_v32  ;;  %vm17402_vm9 = vnez %v17401_v4  ;;  %vm17404_vm7 = vnez %v17403_v41  ;;  %v17413_v4 = vld [vmem:[#allocation188_spill] sm:$0xff]  ;;  %v17415_v41 = vld [vmem:[#allocation193_spill] sm:$0xff] }
 0x1a1   :  { %7935 = vmatprep.subr.msk.bf16.mxu1 %vm17394_vm15, %v17317_v32  ;;  %vm17406_vm15 = vnez %v17405_v43  ;;  %v17417_v43 = vld [vmem:[#allocation195_spill] sm:$0xff] }
 0x1a3   :  { %7553 = vmatpush1.bf16.msk.msra.mxu0 %vm17396_vm13, %v17317_v32  ;;  %vm17408_vm13 = vnez %v17407_v29  ;;  %v17419_v29 = vld [vmem:[#allocation198_spill] sm:$0xff] }
 0x1a4   :  { %7937 = vmatpush1.bf16.msk.msra.mxu1 %vm17398_vm2, %v17317_v32  ;;  %7555 = vmatprep.subr.msk.bf16.mxu0 %vm17400_vm3, %v17317_v32  ;;  %vm17410_vm2 = vnez %v17409_v24  ;;  %vm17412_vm3 = vnez %v17411_v56  ;;  %v17421_v24 = vld [vmem:[#allocation201_spill] sm:$0xff]  ;;  %v17423_v56 = vld [vmem:[#allocation207_spill] sm:$0xff] }
 0x1a5   :  { %7939 = vmatprep.subr.msk.bf16.mxu1 %vm17402_vm9, %v17317_v32  ;;  %vm17414_vm9 = vnez %v17413_v4  ;;  %v17425_v4 = vld [vmem:[#allocation210_spill] sm:$0xff] }
 0x1a7   :  { %7557 = vmatpush1.bf16.msk.msra.mxu0 %vm17404_vm7, %v17317_v32  ;;  %vm17416_vm7 = vnez %v17415_v41  ;;  %v17427_v41 = vld [vmem:[#allocation213_spill] sm:$0xff] }
 0x1a8   :  { %7941 = vmatpush1.bf16.msk.msra.mxu1 %vm17406_vm15, %v17317_v32  ;;  %7559 = vmatprep.subr.msk.bf16.mxu0 %vm17408_vm13, %v17317_v32  ;;  %vm17418_vm15 = vnez %v17417_v43  ;;  %vm17420_vm13 = vnez %v17419_v29  ;;  %v17429_v43 = vld [vmem:[#allocation216_spill] sm:$0xff] }
 0x1a9   :  { %7943 = vmatprep.subr.msk.bf16.mxu1 %vm17410_vm2, %v17317_v32  ;;  %vm17422_vm2 = vnez %v17421_v24  ;;  %v17432_v24 = vld [vmem:[#allocation223_spill] sm:$0xff] }
 0x1ab   :  { %7561 = vmatpush1.bf16.msk.msra.mxu0 %vm17412_vm3, %v17317_v32  ;;  %vm17424_vm3 = vnez %v17423_v56  ;;  %v17434_v56 = vand.u32 4294901760, %v17210_v48  ;;  %v17441_v48 = vand.u32 4294901760, %v17215_v20  ;;  %v17452_v20 = vld [vmem:[#allocation44_spill] sm:$0xff] }
 0x1ac   :  { %7945 = vmatpush1.bf16.msk.msra.mxu1 %vm17414_vm9, %v17317_v32  ;;  %7563 = vmatprep.subr.msk.bf16.mxu0 %vm17416_vm7, %v17317_v32  ;;  %vm17426_vm9 = vnez %v17425_v4  ;;  %vm17428_vm7 = vnez %v17427_v41  ;;  %v17435_v4 = vand.u32 4294901760, %v17211_v46  ;;  %v17436_v41 = vand.u32 4294901760, %v9160_v37 }
 0x1ad   :  { %7947 = vmatprep.subr.msk.bf16.mxu1 %vm17418_vm15, %v17317_v32  ;;  %vm17430_vm15 = vnez %v17429_v43  ;;  %v17442_v46 = vand.u32 4294901760, %v17216_v59  ;;  %v17443_v37 = vand.u32 4294901760, %v17217_v18  ;;  %v17447_v43 = vld [vmem:[#allocation41_spill] sm:$0xff]  ;;  %v17453_v59 = vand.u32 4294901760, %v17452_v20 }
 0x1ae   :  { %v7574_v8 = vpack.c.bf16 %v17435_v4, %v17434_v56  ;;  %v7958_v30 = vpack.c.bf16 %v17437_v0, %v17436_v41  ;;  %v17445_v41 = vld [vmem:[#allocation40_spill] sm:$0xff]  ;;  %v17448_v29 = vand.u32 4294901760, %v17447_v43  ;;  %v17454_v18 = vld [vmem:[#allocation45_spill] sm:$0xff] }
 0x1af   :  { %7565 = vmatpush1.bf16.msk.msra.mxu0 %vm17420_vm13, %v17317_v32  ;;  %v7960_v4 = vpack.c.bf16 %v17443_v37, %v17442_v46  ;;  %v17446_v0 = vand.u32 4294901760, %v17445_v41  ;;  %v17462_v43 = vld [vmem:[#allocation52_spill] sm:$0xff]  ;;  %v17464_v41 = vld [vmem:[#allocation53_spill] sm:$0xff] }
 0x1b0   :  { %7949 = vmatpush1.bf16.msk.msra.mxu1 %vm17422_vm2, %v17317_v32  ;;  %7567 = vmatprep.subr.msk.bf16.mxu0 %vm17424_vm3, %v17317_v32  ;;  %vm17433_vm2 = vnez %v17432_v24  ;;  %v17440_v24 = vand.u32 4294901760, %v17214_v15 }
 0x1b1   :  { %7951 = vmatprep.subr.msk.bf16.mxu1 %vm17426_vm9, %v17317_v32  ;;  %v7578_v56 = vpack.c.bf16 %v17446_v0, %v17444_v38 }
 0x1b2   :  { %v7576_v33 = vpack.c.bf16 %v17441_v48, %v17440_v24  ;;  %v17457_v24 = vand.u32 4294901760, %v17456_v63  ;;  %v17458_v48 = vld [vmem:[#allocation48_spill] sm:$0xff] }
 0x1b3   :  { %7569 = vmatpush1.bf16.msk.msra.mxu0 %vm17428_vm7, %v17317_v32  ;;  %v17459_v46 = vand.u32 4294901760, %v17458_v48 }
 0x1b4   :  { %7953 = vmatpush1.bf16.msk.msra.mxu1 %vm17430_vm15, %v17317_v32  ;;  %7571 = vmatprep.subr.msk.bf16.mxu0 %vm10310_vm14, %v17317_v32 }
 0x1b5   :  { %7955 = vmatprep.subr.msk.bf16.mxu1 %vm17433_vm2, %v17317_v32  ;;  %v7964_v37 = vpack.c.bf16 %v17459_v46, %v17457_v24  ;;  %v17474_v24 = vld [vmem:[#allocation59_spill] sm:$0xff]  ;;  %v17476_v46 = vld [vmem:[#allocation60_spill] sm:$0xff] }
 0x1b6   :  { %v17475_v48 = vand.u32 4294901760, %v17474_v24  ;;  %v17491_v24 = vld [vmem:[#allocation71_spill] sm:$0xff] }
 0x1b7   :  { %7573 = vmatpush1.bf16.msk.msra.mxu0 %vm10340_vm12, %v17317_v32 }
 0x1b8   :  { %7957 = vmatpush1.bf16.msk.msra.mxu1 %vm10357_vm6, %v17317_v32  ;;  %7575 = vmatprep.subr.bf16.mxu0 %v7574_v8  ;;  %v17449_v32 = vld [vmem:[#allocation42_spill] sm:$0xff] }
 0x1b9   :  { %7959 = vmatprep.subr.bf16.mxu1 %v7958_v30  ;;  %v17450_v25 = vand.u32 4294901760, %v17449_v32  ;;  %v17455_v30 = vand.u32 4294901760, %v17454_v18  ;;  %v17460_v32 = vld [vmem:[#allocation51_spill] sm:$0xff]  ;;  %v17472_v18 = vld [vmem:[#allocation57_spill] sm:$0xff] }
 0x1ba   :  { %1786 = vmatmul.mubr.f32.vlgmr.msra.gmra.mrb[0].mxu0 %v17451_v9 }
 0x1bb   :  { %v7962_v15 = vpack.c.bf16 %v17450_v25, %v17448_v29  ;;  %3132 = vmatmul.mubr.f32.vlgmr.msra.gmra.mrb[0].mxu1 %v17451_v9  ;;  %7577 = vmatpush1.bf16.msra.mxu0 %v7576_v33  ;;  %v7580_v8 = vpack.c.bf16 %v17455_v30, %v17453_v59  ;;  %v17461_v25 = vand.u32 4294901760, %v17460_v32  ;;  %v17463_v29 = vand.u32 4294901760, %v17462_v43  ;;  %v17468_v9 = vld [vmem:[#allocation124_spill] sm:$0xff]  ;;  %v17478_v43 = vld [vmem:[#allocation63_spill] sm:$0xff] }
 0x1bc   :  { %7961 = vmatpush1.bf16.msra.mxu1 %v7960_v4  ;;  %7579 = vmatprep.subr.bf16.mxu0 %v7578_v56  ;;  %v17465_v33 = vand.u32 4294901760, %v17464_v41  ;;  %v17466_v4 = vld [vmem:[#allocation54_spill] sm:$0xff]  ;;  %v17469_v59 = vld [vmem:[#allocation140_spill] sm:$0xff]  ;;  %v17473_v30 = vand.u32 4294901760, %v17472_v18  ;;  %v17477_v32 = vand.u32 4294901760, %v17476_v46 }
 0x1bd   :  { %7963 = vmatprep.subr.bf16.mxu1 %v7962_v15  ;;  %v7582_v38 = vpack.c.bf16 %v17463_v29, %v17461_v25  ;;  %v17467_v0 = vand.u32 4294901760, %v17466_v4  ;;  %1794 = vmatprep.mubr.f32.mxu0 %v17468_v9  ;;  %v17470_v56 = vld [vmem:[#allocation56_spill] sm:$0xff]  ;;  %v17479_v29 = vand.u32 4294901760, %v17478_v43 }
 0x1be   :  { %3140 = vmatprep.mubr.f32.mxu1 %v17468_v9  ;;  %1798 = vmatmul.mubr.f32.gmra.mrb[2].mxu0 %v17469_v59  ;;  %v17471_v15 = vand.u32 4294901760, %v17470_v56  ;;  %v7968_v25 = vpack.c.bf16 %v17477_v32, %v17475_v48  ;;  %v17480_v41 = vld [vmem:[#allocation64_spill] sm:$0xff]  ;;  %v17486_v9 = vld [vmem:[#allocation231_spill] sm:$0xff]  ;;  %v17492_v48 = vand.u32 4294901760, %v17491_v24 }
 0x1bf   :  { %v7966_v20 = vpack.c.bf16 %v17467_v0, %v17465_v33  ;;  %3144 = vmatmul.mubr.f32.gmra.mrb[2].mxu1 %v17469_v59  ;;  %7581 = vmatpush1.bf16.msra.mxu0 %v7580_v8  ;;  %v17481_v33 = vand.u32 4294901760, %v17480_v41  ;;  %v17482_v0 = vld [vmem:[#allocation65_spill] sm:$0xff]  ;;  %v17493_v46 = vld [vmem:[#allocation72_spill] sm:$0xff] }
 0x1c0   :  { %7965 = vmatpush1.bf16.msra.mxu1 %v7964_v37  ;;  %v7584_v63 = vpack.c.bf16 %v17473_v30, %v17471_v15  ;;  %7583 = vmatprep.subr.bf16.mxu0 %v7582_v38  ;;  %v17483_v8 = vand.u32 4294901760, %v17482_v0  ;;  %v17484_v37 = vld [vmem:[#allocation66_spill] sm:$0xff]  ;;  %v17487_v15 = vld [vmem:[#allocation68_spill] sm:$0xff]  ;;  %v17489_v38 = vld [vmem:[#allocation69_spill] sm:$0xff]  ;;  %v17494_v32 = vand.u32 4294901760, %v17493_v46  ;;  %v17508_v46 = vand.u32 4294901760, %v17507_v13 }
 0x1c1   :  { %7967 = vmatprep.subr.bf16.mxu1 %v7966_v20  ;;  %v7586_v4 = vpack.c.bf16 %v17481_v33, %v17479_v29  ;;  %v17485_v59 = vand.u32 4294901760, %v17484_v37  ;;  %2061 = vmatprep.mubr.f32.mxu0 %v17486_v9  ;;  %v17488_v18 = vand.u32 4294901760, %v17487_v15  ;;  %v17490_v20 = vand.u32 4294901760, %v17489_v38  ;;  %v17495_v29 = vld [vmem:[#allocation75_spill] sm:$0xff]  ;;  %v17497_v41 = vld [vmem:[#allocation76_spill] sm:$0xff] }
 0x1c2   :  { %3407 = vmatprep.mubr.f32.mxu1 %v17486_v9  ;;  %v7972_v43 = vpack.c.bf16 %v17494_v32, %v17492_v48  ;;  %v17498_v33 = vand.u32 4294901760, %v17497_v41  ;;  %v17503_v9 = vld [vmem:[#allocation80_spill] sm:$0xff]  ;;  %v17511_v32 = vld [vmem:[#allocation87_spill] sm:$0xff]  ;;  %v17514_v41 = vand.u32 4294901760, %v17513_v1  ;;  %v17530_v1 = vand.u32 4294901760, %v17529_v3 }
 0x1c3   :  { %v7970_v56 = vpack.c.bf16 %v17485_v59, %v17483_v8  ;;  %7585 = vmatpush1.bf16.msra.mxu0 %v7584_v63  ;;  %v7588_v30 = vpack.c.bf16 %v17490_v20, %v17488_v18  ;;  %v17496_v59 = vand.u32 4294901760, %v17495_v29  ;;  %v17499_v8 = vld [vmem:[#allocation77_spill] sm:$0xff]  ;;  %v17504_v38 = vand.u32 4294901760, %v17503_v9  ;;  %v17509_v48 = vld [vmem:[#allocation84_spill] sm:$0xff]  ;;  %v17541_v3 = vld [vmem:[#allocation111_spill] sm:$0xff] }
 0x1c4   :  { %7969 = vmatpush1.bf16.msra.mxu1 %v7968_v25  ;;  %7587 = vmatprep.subr.bf16.mxu0 %v7586_v4  ;;  %v17500_v63 = vand.u32 4294901760, %v17499_v8  ;;  %v17501_v25 = vld [vmem:[#allocation78_spill] sm:$0xff]  ;;  %v17505_v18 = vld [vmem:[#allocation81_spill] sm:$0xff]  ;;  %v17510_v4 = vand.u32 4294901760, %v17509_v48  ;;  %v17512_v29 = vand.u32 4294901760, %v17511_v32  ;;  %v17526_v48 = vand.u32 4294901760, %v17525_v55 }
 0x1c5   :  { %7971 = vmatprep.subr.bf16.mxu1 %v7970_v56  ;;  %v7590_v0 = vpack.c.bf16 %v17498_v33, %v17496_v59  ;;  %v17502_v37 = vand.u32 4294901760, %v17501_v25  ;;  %v17506_v20 = vand.u32 4294901760, %v17505_v18  ;;  %v17515_v33 = vld [vmem:[#allocation89_spill] sm:$0xff]  ;;  %v17518_v25 = vand.u32 4294901760, %v17517_v11 }
 0x1c6   :  { %v7976_v56 = vpack.c.bf16 %v17510_v4, %v17508_v46  ;;  %v7594_v59 = vpack.c.bf16 %v17514_v41, %v17512_v29  ;;  %v17516_v8 = vand.u32 4294901760, %v17515_v33  ;;  %v17522_v18 = vand.u32 4294901760, %v17521_v51  ;;  %v17527_v4 = vld [vmem:[#allocation99_spill] sm:$0xff]  ;;  %v17531_v41 = vld [vmem:[#allocation101_spill] sm:$0xff]  ;;  %v17533_v33 = vld [vmem:[#allocation102_spill] sm:$0xff] }
 0x1c7   :  { %v7974_v15 = vpack.c.bf16 %v17502_v37, %v17500_v63  ;;  %v7592_v24 = vpack.c.bf16 %v17506_v20, %v17504_v38  ;;  %v17519_v37 = vld [vmem:[#allocation92_spill] sm:$0xff]  ;;  %v17523_v20 = vld [vmem:[#allocation95_spill] sm:$0xff]  ;;  %v17528_v32 = vand.u32 4294901760, %v17527_v4  ;;  %7589 = vmatpush1.bf16.msra.mxu0 %v7588_v30  ;;  %v17532_v11 = vand.u32 4294901760, %v17531_v41 }
 0x1c8   :  { %v7978_v63 = vpack.c.bf16 %v17518_v25, %v17516_v8  ;;  %v17520_v9 = vand.u32 4294901760, %v17519_v37  ;;  %v17524_v13 = vand.u32 4294901760, %v17523_v20  ;;  %7973 = vmatpush1.bf16.msra.mxu1 %v7972_v43  ;;  %v17534_v8 = vand.u32 4294901760, %v17533_v33  ;;  %v17539_v20 = vld [vmem:[#allocation108_spill] sm:$0xff]  ;;  %7591 = vmatprep.subr.bf16.mxu0 %v7590_v0 }
 0x1c9   :  { %v7598_v29 = vpack.c.bf16 %v17530_v1, %v17528_v32  ;;  %v17535_v51 = vand.u32 4294901760, %v17259_v54  ;;  %v17536_v37 = vand.u32 4294901760, %v17260_v42  ;;  %7975 = vmatprep.subr.bf16.mxu1 %v7974_v15  ;;  %v17542_v30 = vand.u32 4294901760, %v17541_v3  ;;  %v17543_v43 = vld [vmem:[#allocation112_spill] sm:$0xff]  ;;  %v17559_v3 = vld [vmem:[#allocation130_spill] sm:$0xff] }
 0x1ca   :  { %v7596_v38 = vpack.c.bf16 %v17522_v18, %v17520_v9  ;;  %v7980_v46 = vpack.c.bf16 %v17526_v48, %v17524_v13  ;;  %v7982_v25 = vpack.c.bf16 %v17534_v8, %v17532_v11  ;;  %v17537_v18 = vld [vmem:[#allocation107_spill] sm:$0xff]  ;;  %v17540_v13 = vand.u32 4294901760, %v17539_v20  ;;  %v17551_v0 = vld [vmem:[#allocation120_spill] sm:$0xff] }
 0x1cb   :  { %v7600_v9 = vpack.c.bf16 %v17536_v37, %v17535_v51  ;;  %v17538_v55 = vand.u32 4294901760, %v17537_v18  ;;  %v17544_v4 = vand.u32 4294901760, %v17543_v43  ;;  %v17545_v1 = vand.u32 4294901760, %v17265_v17  ;;  %v17549_v8 = vld [vmem:[#allocation119_spill] sm:$0xff]  ;;  %7593 = vmatpush1.bf16.msra.mxu0 %v7592_v24 }
 0x1cc   :  { %v17546_v41 = vand.u32 4294901760, %v17266_v50  ;;  %v17547_v42 = vand.u32 4294901760, %v17267_v40  ;;  %v17548_v11 = vand.u32 4294901760, %v17268_v36  ;;  %v17550_v51 = vand.u32 4294901760, %v17549_v8  ;;  %v17557_v36 = vld [vmem:[#allocation129_spill] sm:$0xff]  ;;  %7977 = vmatpush1.bf16.msra.mxu1 %v7976_v56  ;;  %7595 = vmatprep.subr.bf16.mxu0 %v7594_v59 }
 0x1cd   :  { %v7984_v48 = vpack.c.bf16 %v17540_v13, %v17538_v55  ;;  %v7602_v32 = vpack.c.bf16 %v17544_v4, %v17542_v30  ;;  %v17552_v15 = vand.u32 4294901760, %v17551_v0  ;;  %v17553_v18 = vand.u32 4294901760, %v17111_v23  ;;  %v17561_v4 = vld [vmem:[#allocation133_spill] sm:$0xff]  ;;  %v17569_v0 = vld [vmem:[#allocation11_spill] sm:$0xff]  ;;  %7979 = vmatprep.subr.bf16.mxu1 %v7978_v63 }
 0x1ce   :  { %v7986_v54 = vpack.c.bf16 %v17546_v41, %v17545_v1  ;;  %v11390_v33 = vpack.c.bf16 %v17548_v11, %v17547_v42  ;;  %v17554_v55 = vand.u32 4294901760, %v17112_v26  ;;  %v17555_v50 = vand.u32 4294901760, %v17113_v12  ;;  %v17563_v41 = vld [vmem:[#allocation134_spill] sm:$0xff] }
 0x1cf   :  { %v11396_v37 = vpack.c.bf16 %v17552_v15, %v17550_v51  ;;  %v17556_v40 = vand.u32 4294901760, %v17114_v16  ;;  %v17558_v13 = vand.u32 4294901760, %v17557_v36  ;;  %v17560_v30 = vand.u32 4294901760, %v17559_v3  ;;  %7597 = vmatpush1.bf16.msra.mxu0 %v7596_v38  ;;  %v17612_v38 = vld [vmem:[#allocation190_spill] sm:$0xff] }
 0x1d0   :  { %v11402_v17 = vpack.c.bf16 %v17554_v55, %v17553_v18  ;;  %v17562_v1 = vand.u32 4294901760, %v17561_v4  ;;  %v17564_v23 = vand.u32 4294901760, %v17563_v41  ;;  %v17565_v26 = vand.u32 4294901760, %v17123_v45  ;;  %v17570_v18 = vld [vmem:[#allocation143_spill] sm:$0xff]  ;;  %v17574_v45 = vld [vmem:[#allocation146_spill] sm:$0xff]  ;;  %7981 = vmatpush1.bf16.msra.mxu1 %v7980_v46  ;;  %7599 = vmatprep.subr.bf16.mxu0 %v7598_v29 }
 0x1d1   :  { %v11408_v20 = vpack.c.bf16 %v17556_v40, %v17555_v50  ;;  %v11414_v43 = vpack.c.bf16 %v17560_v30, %v17558_v13  ;;  %v17566_v12 = vand.u32 4294901760, %v17124_v44  ;;  %v17567_v16 = vand.u32 4294901760, %v17125_v34  ;;  %v17572_v50 = vld [vmem:[#allocation144_spill] sm:$0xff]  ;;  %v17576_v13 = vld [vmem:[#allocation149_spill] sm:$0xff]  ;;  %7983 = vmatprep.subr.bf16.mxu1 %v7982_v25 }
 0x1d2   :  { %v11420_v42 = vpack.c.bf16 %v17564_v23, %v17562_v1  ;;  %v17568_v8 = vand.u32 4294901760, %v17126_v22  ;;  %v94_v15 = vsub.s32 5, %v17569_v0  ;;  %v17571_v55 = vand.u32 4294901760, %v17570_v18  ;;  %v17582_v23 = vld [vmem:[#allocation158_spill] sm:$0xff]  ;;  %v17619_v25 = vld [vmem:[#allocation200_spill] sm:$0xff] }
 0x1d3   :  { %v11426_v11 = vpack.c.bf16 %v17566_v12, %v17565_v26  ;;  %v17573_v40 = vand.u32 4294901760, %v17572_v50  ;;  %v17575_v44 = vand.u32 4294901760, %v17574_v45  ;;  %v17577_v3 = vand.u32 4294901760, %v17576_v13  ;;  %v17584_v12 = vld [vmem:[#allocation159_spill] sm:$0xff]  ;;  %v17588_v18 = vld [vmem:[#allocation162_spill] sm:$0xff]  ;;  %7601 = vmatpush1.bf16.msra.mxu0 %v7600_v9  ;;  %v17638_v9 = vld [vmem:[#allocation220_spill] sm:$0xff] }
 0x1d4   :  { %v11432_v51 = vpack.c.bf16 %v17568_v8, %v17567_v16  ;;  %v17578_v34 = vand.u32 4294901760, %v17135_v47  ;;  %v17579_v22 = vand.u32 4294901760, %v17136_v35  ;;  %v102_v24 = vsub.s32 7, %v17569_v0  ;;  %v17586_v47 = vld [vmem:[#allocation161_spill] sm:$0xff]  ;;  %7985 = vmatpush1.bf16.msra.mxu1 %v7984_v48  ;;  %7603 = vmatprep.subr.bf16.mxu0 %v7602_v32 }
 0x1d5   :  { %v11439_v36 = vpack.c.bf16 %v17573_v40, %v17571_v55  ;;  %v11445_v30 = vpack.c.bf16 %v17577_v3, %v17575_v44  ;;  %v17580_v56 = vand.u32 4294901760, %v17137_v10  ;;  %v17581_v1 = vand.u32 4294901760, %v17138_v53  ;;  %v17594_v44 = vld [vmem:[#allocation171_spill] sm:$0xff]  ;;  %v17596_v3 = vld [vmem:[#allocation172_spill] sm:$0xff]  ;;  %7987 = vmatprep.subr.bf16.mxu1 %v7986_v54 }
 0x1d6   :  { %v11451_v4 = vpack.c.bf16 %v17579_v22, %v17578_v34  ;;  %v17583_v26 = vand.u32 4294901760, %v17582_v23  ;;  %v17585_v16 = vand.u32 4294901760, %v17584_v12  ;;  %v17587_v35 = vand.u32 4294901760, %v17586_v47  ;;  %v17600_v23 = vld [vmem:[#allocation177_spill] sm:$0xff]  ;;  %v17646_v54 = vld [vmem:[#allocation227_spill] sm:$0xff] }
 0x1d7   :  { %v11458_v41 = vpack.c.bf16 %v17581_v1, %v17580_v56  ;;  %v17589_v55 = vand.u32 4294901760, %v17588_v18  ;;  %v17590_v59 = vand.u32 4294901760, %v17147_v14  ;;  %v17591_v10 = vand.u32 4294901760, %v17148_v19  ;;  %v17598_v1 = vld [vmem:[#allocation174_spill] sm:$0xff]  ;;  %7605 = vmatpush1.bf16.msra.mxu0 %v11390_v33 }
 0x1d8   :  { %v11464_v8 = vpack.c.bf16 %v17585_v16, %v17583_v26  ;;  %v17592_v53 = vand.u32 4294901760, %v17221_v31  ;;  %v17593_v40 = vand.u32 4294901760, %v17222_v27  ;;  %v17595_v13 = vand.u32 4294901760, %v17594_v44  ;;  %v8943_v16 = vld [vmem:[#allocation2] sm:$0xff]  ;;  %7989 = vmatpush1.bf16.msra.mxu1 %v11396_v37  ;;  %7607 = vmatprep.subr.bf16.mxu0 %v11402_v17 }
 0x1d9   :  { %v11470_v50 = vpack.c.bf16 %v17589_v55, %v17587_v35  ;;  %v11476_v63 = vpack.c.bf16 %v17591_v10, %v17590_v59  ;;  %v17597_v34 = vand.u32 4294901760, %v17596_v3  ;;  %v90_v56 = vsub.s32 4, %v17569_v0  ;;  %v17606_v10 = vld [vmem:[#allocation186_spill] sm:$0xff]  ;;  %7991 = vmatprep.subr.bf16.mxu1 %v11408_v20 }
 0x1da   :  { %v11482_v45 = vpack.c.bf16 %v17593_v40, %v17592_v53  ;;  %v17599_v14 = vand.u32 4294901760, %v17598_v1  ;;  %v17601_v19 = vand.u32 4294901760, %v17600_v23  ;;  %v17602_v31 = vand.u32 4294901760, %v17159_v61  ;;  %v17608_v61 = vld [vmem:[#allocation187_spill] sm:$0xff]  ;;  %v17658_v17 = vld [vmem:[#allocation14_spill] sm:$0xff] }
 0x1db   :  { %v11488_v22 = vpack.c.bf16 %v17597_v34, %v17595_v13  ;;  %v17603_v27 = vand.u32 4294901760, %v17223_v52  ;;  %v11503_v47 = vrot.slane %v8943_v16, %v94_v15  ;;  %v98_v35 = vsub.s32 6, %v17569_v0  ;;  %v17610_v15 = vld [vmem:[#allocation189_spill] sm:$0xff]  ;;  %7609 = vmatpush1.bf16.msra.mxu0 %v11414_v43 }
 0x1dc   :  { %v11495_v26 = vpack.c.bf16 %v17601_v19, %v17599_v14  ;;  %v17604_v18 = vand.u32 4294901760, %v17224_v5  ;;  %v17605_v55 = vand.u32 4294901760, %v17225_v6  ;;  %v17607_v53 = vand.u32 4294901760, %v17606_v10  ;;  %7993 = vmatpush1.bf16.msra.mxu1 %v11420_v42  ;;  %7611 = vmatprep.subr.bf16.mxu0 %v11426_v11 }
 0x1dd   :  { %v11501_v12 = vpack.c.bf16 %v17603_v27, %v17602_v31  ;;  %v17609_v40 = vand.u32 4294901760, %v17608_v61  ;;  %v11518_v44 = vrot.slane %v8943_v16, %v102_v24  ;;  %v17611_v13 = vand.u32 4294901760, %v17610_v15  ;;  %v17622_v27 = vld [vmem:[#allocation205_spill] sm:$0xff]  ;;  %v17628_v61 = vld [vmem:[#allocation214_spill] sm:$0xff]  ;;  %7995 = vmatprep.subr.bf16.mxu1 %v11432_v51 }
 0x1de   :  { %v11510_v59 = vpack.c.bf16 %v17605_v55, %v17604_v18  ;;  %v17613_v46 = vand.u32 4294901760, %v17612_v38  ;;  %v17614_v5 = vand.u32 4294901760, %v17230_v49  ;;  %v17615_v6 = vand.u32 4294901760, %v17231_v28 }
 0x1df   :  { %v11516_v52 = vpack.c.bf16 %v17609_v40, %v17607_v53  ;;  %v17616_v1 = vand.u32 4294901760, %v17232_v58  ;;  %v17617_v14 = vand.u32 4294901760, %v17233_v57  ;;  %v17618_v29 = vand.u32 4294901760, %v17301_v62  ;;  %v17630_v40 = vld [vmem:[#allocation215_spill] sm:$0xff]  ;;  %7613 = vmatpush1.bf16.msra.mxu0 %v11439_v36 }
 0x1e0   :  { %v11524_v3 = vpack.c.bf16 %v17613_v46, %v17611_v13  ;;  %v11530_v34 = vpack.c.bf16 %v17615_v6, %v17614_v5  ;;  %v17620_v23 = vand.u32 4294901760, %v17619_v25  ;;  %v17621_v31 = vand.u32 4294901760, %v17303_v21  ;;  %v17636_v46 = vld [vmem:[#allocation12_spill] sm:$0xff]  ;;  %v17644_v25 = vld [vmem:[#allocation225_spill] sm:$0xff]  ;;  %7997 = vmatpush1.bf16.msra.mxu1 %v11445_v30  ;;  %7615 = vmatprep.subr.bf16.mxu0 %v11451_v4 }
 0x1e1   :  { %v11536_v24 = vpack.c.bf16 %v17617_v14, %v17616_v1  ;;  %v17623_v49 = vand.u32 4294901760, %v17622_v27  ;;  %v17624_v28 = vand.u32 4294901760, %v17182_v60  ;;  %v17625_v58 = vand.u32 4294901760, %v17236_v39  ;;  %v17632_v60 = vld [vmem:[#allocation217_spill] sm:$0xff]  ;;  %v17642_v14 = vld [vmem:[#allocation224_spill] sm:$0xff]  ;;  %7999 = vmatprep.subr.bf16.mxu1 %v11458_v41 }
 0x1e2   :  { %v11542_v19 = vpack.c.bf16 %v17620_v23, %v17618_v29  ;;  %v11556_v57 = vrot.slane %v8943_v16, %v90_v56  ;;  %v17626_v62 = vand.u32 4294901760, %v17237_v2  ;;  %v17627_v10 = vand.u32 4294901760, %v17238_v7  ;;  %v17634_v2 = vld [vmem:[#allocation218_spill] sm:$0xff] }
 0x1e3   :  { %v11548_v18 = vpack.c.bf16 %v17623_v49, %v17621_v31  ;;  %v11554_v55 = vpack.c.bf16 %v17625_v58, %v17624_v28  ;;  %v17629_v21 = vand.u32 4294901760, %v17628_v61  ;;  %v17631_v15 = vand.u32 4294901760, %v17630_v40  ;;  %v17648_v28 = vld [vmem:[#allocation228_spill] sm:$0xff]  ;;  %7617 = vmatpush1.bf16.msra.mxu0 %v11464_v8 }
 0x1e4   :  { %v11562_v53 = vpack.c.bf16 %v17627_v10, %v17626_v62  ;;  %vm16044_vm6 = vcmp.eq.s32.totalorder %v17569_v0, %v11503_v47  ;;  %v11572_v39 = vrot.slane %v8943_v16, %v98_v35  ;;  %v17633_v56 = vand.u32 4294901760, %v17632_v60  ;;  %v17640_v16 = vld [vmem:[#allocation222_spill] sm:$0xff]  ;;  %8001 = vmatpush1.bf16.msra.mxu1 %v11470_v50  ;;  %7619 = vmatprep.subr.bf16.mxu0 %v11476_v63 }
 0x1e5   :  { %v11568_v13 = vpack.c.bf16 %v17631_v15, %v17629_v21  ;;  %v17635_v38 = vand.u32 4294901760, %v17634_v2  ;;  %vm16043_vm12 = vcmp.eq.s32.totalorder %v17636_v46, %v11503_v47  ;;  %v17637_v5 = vmov 0.0   ;;  %v17650_v10 = vld [vmem:[#allocation230_spill] sm:$0xff]  ;;  %v17652_v21 = vld [vmem:[#allocation232_spill] sm:$0xff]  ;;  %8003 = vmatprep.subr.bf16.mxu1 %v11482_v45 }
 0x1e6   :  { %v6299_v6 = vsel %vm16044_vm6, 1.0, %v17637_v5  ;;  %vm16045_vm2 = vcmp.eq.s32.totalorder %v17569_v0, %v11518_v44  ;;  %v17639_v48 = vand.u32 4294901760, %v17638_v9  ;;  %v17641_v35 = vand.u32 4294901760, %v17640_v16 }
 0x1e7   :  { %v11578_v7 = vpack.c.bf16 %v17635_v38, %v17633_v56  ;;  %v17643_v29 = vand.u32 4294901760, %v17642_v14  ;;  %v17645_v23 = vand.u32 4294901760, %v17644_v25  ;;  %v6307_v27 = vsel %vm16043_vm12, 1.0, %v17637_v5  ;;  %7621 = vmatpush1.bf16.msra.mxu0 %v11488_v22 }
 0x1e8   :  { %v11592_v1 = vpack.c.bf16 %v17641_v35, %v17639_v48  ;;  %v6301_v32 = vsel %vm16045_vm2, 1.0, %v17637_v5  ;;  %v17647_v49 = vand.u32 4294901760, %v17646_v54  ;;  %v17649_v58 = vand.u32 4294901760, %v17648_v28  ;;  %v17657_v48 = vld [vmem:[#allocation13_spill] sm:$0xff]  ;;  %8005 = vmatpush1.bf16.msra.mxu1 %v11495_v26  ;;  %7623 = vmatprep.subr.bf16.mxu0 %v11501_v12 }
 0x1e9   :  { %v11598_v31 = vpack.c.bf16 %v17645_v23, %v17643_v29  ;;  %v17651_v61 = vand.u32 4294901760, %v17650_v10  ;;  %v17653_v40 = vand.u32 4294901760, %v17652_v21  ;;  %vm16047_vm12 = vcmp.eq.s32.totalorder %v17636_v46, %v11518_v44  ;;  %v17670_v21 = vld [vmem:[#allocation16_spill] sm:$0xff]  ;;  %8007 = vmatprep.subr.bf16.mxu1 %v11510_v59 }
 0x1ea   :  { %v11612_v62 = vpack.c.bf16 %v17649_v58, %v17647_v49  ;;  %vm16048_vm6 = vcmp.eq.s32.totalorder %v17569_v0, %v11556_v57  ;;  %v11624_v60 = vsub.f32 %v6299_v6, %v6299_v6  ;;  %v6309_v56 = vsel %vm16047_vm12, 1.0, %v17637_v5 }
 0x1eb   :  { %v11618_v15 = vpack.c.bf16 %v17653_v40, %v17651_v61  ;;  %vm16049_vm2 = vcmp.eq.s32.totalorder %v17636_v46, %v11556_v57  ;;  %vm16050_vm14 = vcmp.eq.s32.totalorder %v17569_v0, %v11572_v39  ;;  %v11636_v2 = vsub.f32 %v6307_v27, %v6307_v27  ;;  %v17669_v61 = vld [vmem:[#allocation15_spill] sm:$0xff]  ;;  %7625 = vmatpush1.bf16.msra.mxu0 %v11516_v52 }
 0x1ec   :  { %17654 = vst [vmem:[#allocation152_spill] sm:$0xff] %v11624_v60  ;;  %v11638_v38 = vsub.f32 %v6301_v32, %v6301_v32  ;;  %v6298_v6 = vsel %vm16048_vm6, 1.0, %v17637_v5  ;;  %vm16067_vm12 = vcmp.eq.s32.totalorder %v17636_v46, %v11572_v39  ;;  %v6306_v33 = vsel %vm16049_vm2, 1.0, %v17637_v5  ;;  %8009 = vmatpush1.bf16.msra.mxu1 %v11524_v3  ;;  %7627 = vmatprep.subr.bf16.mxu0 %v11530_v34 }
 0x1ed   :  { %17655 = vst [vmem:[#allocation153_spill] sm:$0xff] %v11636_v2  ;;  %v6300_v37 = vsel %vm16050_vm14, 1.0, %v17637_v5  ;;  %v6308_v9 = vsel %vm16067_vm12, 1.0, %v17637_v5  ;;  %vm16051_vm6 = vcmp.eq.s32.totalorder %v17657_v48, %v11503_v47  ;;  %vm16056_vm15 = vcmp.eq.s32.totalorder %v17658_v17, %v11503_v47  ;;  %8011 = vmatprep.subr.bf16.mxu1 %v11536_v24 }
 0x1ee   :  { %17656 = vst [vmem:[#allocation155_spill] sm:$0xff] %v11638_v38  ;;  %v6315_v20 = vsel %vm16051_vm6, 1.0, %v17637_v5  ;;  %vm16054_vm2 = vcmp.eq.s32.totalorder %v17657_v48, %v11518_v44  ;;  %vm16052_vm14 = vcmp.eq.s32.totalorder %v17658_v17, %v11518_v44  ;;  %v6323_v16 = vsel %vm16056_vm15, 1.0, %v17637_v5 }
 0x1ef   :  { %v6317_v35 = vsel %vm16054_vm2, 1.0, %v17637_v5  ;;  %v6325_v14 = vsel %vm16052_vm14, 1.0, %v17637_v5  ;;  %vm16053_vm6 = vcmp.eq.s32.totalorder %v17657_v48, %v11556_v57  ;;  %v11688_v29 = vsub.f32 %v6309_v56, %v6309_v56  ;;  %7629 = vmatpush1.bf16.msra.mxu0 %v11542_v19 }
 0x1f0   :  { %v11690_v25 = vsub.f32 %v6298_v6, %v6298_v6  ;;  %v11692_v23 = vsub.f32 %v6306_v33, %v6306_v33  ;;  %v6314_v27 = vsel %vm16053_vm6, 1.0, %v17637_v5  ;;  %v11700_v32 = vsub.f32 %v6300_v37, %v6300_v37  ;;  %8013 = vmatpush1.bf16.msra.mxu1 %v11548_v18  ;;  %7631 = vmatprep.subr.bf16.mxu0 %v11554_v55 }
 0x1f1   :  { %17659 = vst [vmem:[#allocation156_spill] sm:$0xff] %v11688_v29  ;;  %v11702_v43 = vsub.f32 %v6308_v9, %v6308_v9  ;;  %v11704_v42 = vsub.f32 %v6315_v20, %v6315_v20  ;;  %v11706_v54 = vsub.f32 %v6323_v16, %v6323_v16  ;;  %v11708_v49 = vsub.f32 %v6317_v35, %v6317_v35 }
 0x1f2   :  { %17660 = vst [vmem:[#allocation164_spill] sm:$0xff] %v11690_v25  ;;  %17661 = vst [vmem:[#allocation166_spill] sm:$0xff] %v11692_v23  ;;  %v11710_v28 = vsub.f32 %v6325_v14, %v6325_v14  ;;  %vm16055_vm14 = vcmp.eq.s32.totalorder %v17658_v17, %v11556_v57  ;;  %v11718_v51 = vsub.f32 %v6314_v27, %v6314_v27  ;;  %v17680_v27 = vld [vmem:[#allocation17_spill] sm:$0xff]  ;;  %8015 = vmatprep.subr.bf16.mxu1 %v11562_v53 }
 0x1f3   :  { %17662 = vst [vmem:[#allocation180_spill] sm:$0xff] %v11700_v32  ;;  %17663 = vst [vmem:[#allocation208_spill] sm:$0xff] %v11702_v43  ;;  %v6322_v11 = vsel %vm16055_vm14, 1.0, %v17637_v5  ;;  %vm16058_vm6 = vcmp.eq.s32.totalorder %v17657_v48, %v11572_v39  ;;  %vm16057_vm2 = vcmp.eq.s32.totalorder %v17658_v17, %v11572_v39  ;;  %vm16059_vm14 = vcmp.eq.s32.totalorder %v17669_v61, %v11503_v47 }
 0x1f4   :  { %17664 = vst [vmem:[#allocation29_spill] sm:$0xff] %v11704_v42  ;;  %17665 = vst [vmem:[#allocation30_spill] sm:$0xff] %v11706_v54  ;;  %v6316_v58 = vsel %vm16058_vm6, 1.0, %v17637_v5  ;;  %v6324_v10 = vsel %vm16057_vm2, 1.0, %v17637_v5  ;;  %vm16060_vm15 = vcmp.eq.s32.totalorder %v17670_v21, %v11503_v47  ;;  %v6331_v36 = vsel %vm16059_vm14, 1.0, %v17637_v5  ;;  %7633 = vmatpush1.bf16.msra.mxu0 %v11568_v13  ;;  %8017 = vmatpush1.bf16.msra.mxu1 %v11578_v7 }
 0x1f5   :  { %17666 = vst [vmem:[#allocation33_spill] sm:$0xff] %v11708_v49  ;;  %17667 = vst [vmem:[#allocation34_spill] sm:$0xff] %v11710_v28  ;;  %v6339_v30 = vsel %vm16060_vm15, 1.0, %v17637_v5  ;;  %vm16066_vm2 = vcmp.eq.s32.totalorder %v17669_v61, %v11518_v44  ;;  %vm16061_vm6 = vcmp.eq.s32.totalorder %v17670_v21, %v11518_v44  ;;  %vm16064_vm14 = vcmp.eq.s32.totalorder %v17669_v61, %v11556_v57 }
 0x1f6   :  { %17668 = vst [vmem:[#allocation36_spill] sm:$0xff] %v11718_v51  ;;  %v6333_v4 = vsel %vm16066_vm2, 1.0, %v17637_v5  ;;  %v6341_v41 = vsel %vm16061_vm6, 1.0, %v17637_v5  ;;  %vm16062_vm15 = vcmp.eq.s32.totalorder %v17670_v21, %v11556_v57  ;;  %v11764_v40 = vsub.f32 %v6322_v11, %v6322_v11  ;;  %v17682_v11 = vld [vmem:[#allocation18_spill] sm:$0xff]  ;;  %7635 = vmatprep.subr.bf16.mxu0 %v11592_v1  ;;  %8019 = vmatprep.subr.bf16.mxu1 %v11598_v31 }
 0x1f7   :  { %v6330_v56 = vsel %vm16064_vm14, 1.0, %v17637_v5  ;;  %v6338_v6 = vsel %vm16062_vm15, 1.0, %v17637_v5  ;;  %vm16063_vm6 = vcmp.eq.s32.totalorder %v17669_v61, %v11572_v39  ;;  %v11778_v33 = vsub.f32 %v6316_v58, %v6316_v58 }
 0x1f8   :  { %17671 = vst [vmem:[#allocation37_spill] sm:$0xff] %v11764_v40  ;;  %v11780_v37 = vsub.f32 %v6324_v10, %v6324_v10  ;;  %v11782_v9 = vsub.f32 %v6331_v36, %v6331_v36  ;;  %v6332_v20 = vsel %vm16063_vm6, 1.0, %v17637_v5  ;;  %v11790_v16 = vsub.f32 %v6339_v30, %v6339_v30  ;;  %v17683_v36 = vld [vmem:[#allocation19_spill] sm:$0xff]  ;;  %7637 = vmatpush1.bf16.msra.mxu0 %v11612_v62 }
 0x1f9   :  { %17672 = vst [vmem:[#allocation168_spill] sm:$0xff] %v11778_v33  ;;  %v11792_v8 = vsub.f32 %v6333_v4, %v6333_v4  ;;  %v11794_v50 = vsub.f32 %v6341_v41, %v6341_v41  ;;  %v11796_v35 = vsub.f32 %v6330_v56, %v6330_v56  ;;  %v11798_v14 = vsub.f32 %v6338_v6, %v6338_v6  ;;  %v17684_v41 = vld [vmem:[#allocation20_spill] sm:$0xff] }
 0x1fa   :  { %17673 = vst [vmem:[#allocation169_spill] sm:$0xff] %v11780_v37  ;;  %17674 = vst [vmem:[#allocation181_spill] sm:$0xff] %v11782_v9  ;;  %vm16065_vm15 = vcmp.eq.s32.totalorder %v17670_v21, %v11572_v39  ;;  %vm16070_vm6 = vcmp.eq.s32.totalorder %v17680_v27, %v11503_v47  ;;  %v11808_v45 = vsub.f32 %v6332_v20, %v6332_v20  ;;  %8021 = vmatpush1.bf16.msra.mxu1 %v11618_v15 }
 0x1fb   :  { %17675 = vst [vmem:[#allocation183_spill] sm:$0xff] %v11790_v16  ;;  %17676 = vst [vmem:[#allocation184_spill] sm:$0xff] %v11792_v8  ;;  %v6340_v63 = vsel %vm16065_vm15, 1.0, %v17637_v5  ;;  %vm16068_vm14 = vcmp.eq.s32.totalorder %v17682_v11, %v11503_v47  ;;  %v6347_v58 = vsel %vm16070_vm6, 1.0, %v17637_v5  ;;  %vm16069_vm15 = vcmp.eq.s32.totalorder %v17680_v27, %v11518_v44 }
 0x1fc   :  { %17677 = vst [vmem:[#allocation192_spill] sm:$0xff] %v11794_v50  ;;  %17678 = vst [vmem:[#allocation194_spill] sm:$0xff] %v11796_v35  ;;  %v6355_v10 = vsel %vm16068_vm14, 1.0, %v17637_v5  ;;  %vm16071_vm2 = vcmp.eq.s32.totalorder %v17682_v11, %v11518_v44  ;;  %vm16084_vm12 = vcmp.eq.s32.totalorder %v17680_v27, %v11556_v57  ;;  %v6349_v22 = vsel %vm16069_vm15, 1.0, %v17637_v5 }
 0x1fd   :  { %17679 = vst [vmem:[#allocation196_spill] sm:$0xff] %v11798_v14  ;;  %17681 = vst [vmem:[#allocation197_spill] sm:$0xff] %v11808_v45  ;;  %v6357_v26 = vsel %vm16071_vm2, 1.0, %v17637_v5  ;;  %vm16072_vm14 = vcmp.eq.s32.totalorder %v17682_v11, %v11556_v57  ;;  %v6346_v12 = vsel %vm16084_vm12, 1.0, %v17637_v5  ;;  %vm16081_vm15 = vcmp.eq.s32.totalorder %v17680_v27, %v11572_v39 }
 0x1fe   :  { %v6354_v59 = vsel %vm16072_vm14, 1.0, %v17637_v5  ;;  %vm16080_vm6 = vcmp.eq.s32.totalorder %v17682_v11, %v11572_v39  ;;  %vm16079_vm2 = vcmp.eq.s32.totalorder %v17683_v36, %v11503_v47  ;;  %v6348_v30 = vsel %vm16081_vm15, 1.0, %v17637_v5 }
 0x1ff   :  { %v6356_v4 = vsel %vm16080_vm6, 1.0, %v17637_v5  ;;  %vm16078_vm14 = vcmp.eq.s32.totalorder %v17684_v41, %v11503_v47  ;;  %v6363_v56 = vsel %vm16079_vm2, 1.0, %v17637_v5  ;;  %v11870_v6 = vsub.f32 %v6340_v63, %v6340_v63 }
 0x200   :  { %v11872_v20 = vsub.f32 %v6347_v58, %v6347_v58  ;;  %v11874_v45 = vsub.f32 %v6355_v10, %v6355_v10  ;;  %v6371_v14 = vsel %vm16078_vm14, 1.0, %v17637_v5  ;;  %v11882_v35 = vsub.f32 %v6349_v22, %v6349_v22  ;;  %v17697_v22 = vld [vmem:[#allocation22_spill] sm:$0xff] }
 0x201   :  { %17685 = vst [vmem:[#allocation209_spill] sm:$0xff] %v11870_v6  ;;  %v11884_v52 = vsub.f32 %v6357_v26, %v6357_v26  ;;  %v11886_v3 = vsub.f32 %v6346_v12, %v6346_v12  ;;  %v11888_v63 = vsub.f32 %v6354_v59, %v6354_v59  ;;  %v11890_v58 = vsub.f32 %v6348_v30, %v6348_v30 }
 0x202   :  { %17686 = vst [vmem:[#allocation211_spill] sm:$0xff] %v11872_v20  ;;  %17687 = vst [vmem:[#allocation212_spill] sm:$0xff] %v11874_v45  ;;  %v11892_v10 = vsub.f32 %v6356_v4, %v6356_v4  ;;  %v11894_v45 = vsub.f32 %v6363_v56, %v6363_v56  ;;  %v11896_v20 = vsub.f32 %v6371_v14, %v6371_v14  ;;  %v17696_v14 = vld [vmem:[#allocation21_spill] sm:$0xff] }
 0x203   :  { %17688 = vst [vmem:[#allocation104_spill] sm:$0xff] %v11882_v35  ;;  %17689 = vst [vmem:[#allocation105_spill] sm:$0xff] %v11884_v52  ;;  %vm16083_vm14 = vcmp.eq.s32.totalorder %v17683_v36, %v11518_v44  ;;  %vm16082_vm2 = vcmp.eq.s32.totalorder %v17684_v41, %v11518_v44  ;;  %vm16087_vm6 = vcmp.eq.s32.totalorder %v17683_v36, %v11556_v57 }
 0x204   :  { %17690 = vst [vmem:[#allocation113_spill] sm:$0xff] %v11886_v3  ;;  %17691 = vst [vmem:[#allocation114_spill] sm:$0xff] %v11888_v63  ;;  %v6365_v34 = vsel %vm16083_vm14, 1.0, %v17637_v5  ;;  %v6373_v24 = vsel %vm16082_vm2, 1.0, %v17637_v5  ;;  %vm16085_vm15 = vcmp.eq.s32.totalorder %v17684_v41, %v11556_v57  ;;  %v6362_v19 = vsel %vm16087_vm6, 1.0, %v17637_v5 }
 0x205   :  { %17692 = vst [vmem:[#allocation116_spill] sm:$0xff] %v11890_v58  ;;  %17693 = vst [vmem:[#allocation117_spill] sm:$0xff] %v11892_v10  ;;  %v6370_v18 = vsel %vm16085_vm15, 1.0, %v17637_v5  ;;  %vm16086_vm2 = vcmp.eq.s32.totalorder %v17683_v36, %v11572_v39  ;;  %vm16088_vm14 = vcmp.eq.s32.totalorder %v17684_v41, %v11572_v39  ;;  %vm16314_vm12 = vcmp.eq.s32.totalorder %v17696_v14, %v11503_v47 }
 0x206   :  { %17694 = vst [vmem:[#allocation199_spill] sm:$0xff] %v11894_v45  ;;  %17695 = vst [vmem:[#allocation202_spill] sm:$0xff] %v11896_v20  ;;  %v6364_v55 = vsel %vm16086_vm2, 1.0, %v17637_v5  ;;  %v6372_v53 = vsel %vm16088_vm14, 1.0, %v17637_v5  ;;  %vm16089_vm15 = vcmp.eq.s32.totalorder %v17697_v22, %v11503_v47  ;;  %v6379_v26 = vsel %vm16314_vm12, 1.0, %v17637_v5 }
 0x207   :  { %v6387_v12 = vsel %vm16089_vm15, 1.0, %v17637_v5  ;;  %vm16313_vm2 = vcmp.eq.s32.totalorder %v17696_v14, %v11518_v44  ;;  %vm16096_vm6 = vcmp.eq.s32.totalorder %v17697_v22, %v11518_v44  ;;  %vm16095_vm14 = vcmp.eq.s32.totalorder %v17696_v14, %v11556_v57 }
 0x208   :  { %v6381_v59 = vsel %vm16313_vm2, 1.0, %v17637_v5  ;;  %v6389_v30 = vsel %vm16096_vm6, 1.0, %v17637_v5  ;;  %vm16094_vm15 = vcmp.eq.s32.totalorder %v17697_v22, %v11556_v57  ;;  %v6378_v13 = vsel %vm16095_vm14, 1.0, %v17637_v5 }
 0x209   :  { %v11974_v7 = vsub.f32 %v6365_v34, %v6365_v34  ;;  %v11976_v4 = vsub.f32 %v6373_v24, %v6373_v24  ;;  %v11978_v56 = vsub.f32 %v6362_v19, %v6362_v19  ;;  %v6386_v20 = vsel %vm16094_vm15, 1.0, %v17637_v5 }
 0x20a   :  { %v11984_v45 = vsub.f32 %v6370_v18, %v6370_v18  ;;  %v11986_v10 = vsub.f32 %v6364_v55, %v6364_v55  ;;  %v11988_v58 = vsub.f32 %v6372_v53, %v6372_v53  ;;  %v11990_v1 = vsub.f32 %v6379_v26, %v6379_v26 }
 0x20b   :  { %17698 = vst [vmem:[#allocation40_spill] sm:$0xff] %v11974_v7  ;;  %17699 = vst [vmem:[#allocation41_spill] sm:$0xff] %v11976_v4  ;;  %v11992_v31 = vsub.f32 %v6387_v12, %v6387_v12  ;;  %v11994_v34 = vsub.f32 %v6381_v59, %v6381_v59  ;;  %v11996_v24 = vsub.f32 %v6389_v30, %v6389_v30  ;;  %v17710_v55 = vmov 1.0|1.0   ;;  %v17714_v12 = vld [vmem:[#allocation24_spill] sm:$0xff]  ;;  %v17747_v7 = vld [vmem:[#allocation121_spill] sm:$0xff] }
 0x20c   :  { %17700 = vst [vmem:[#allocation42_spill] sm:$0xff] %v11978_v56  ;;  %17701 = vst [vmem:[#allocation44_spill] sm:$0xff] %v11984_v45  ;;  %v11998_v19 = vsub.f32 %v6378_v13, %v6378_v13  ;;  %v12002_v18 = vsub.f32 %v6386_v20, %v6386_v20  ;;  %vm16310_vm15 = vcmp.eq.s32.totalorder %v17696_v14, %v11572_v39  ;;  %7639 = vmatprep.subr.msk.bf16.mxu0 %vm9143_vm4, %v17710_v55  ;;  %v17713_v20 = vld [vmem:[#allocation23_spill] sm:$0xff]  ;;  %v17715_v13 = vld [vmem:[#allocation234_spill] sm:$0xff] }
 0x20d   :  { %17702 = vst [vmem:[#allocation45_spill] sm:$0xff] %v11986_v10  ;;  %17703 = vst [vmem:[#allocation47_spill] sm:$0xff] %v11988_v58  ;;  %vm16097_vm14 = vcmp.eq.s32.totalorder %v17697_v22, %v11572_v39  ;;  %8023 = vmatprep.subr.msk.bf16.mxu1 %vm9156_vm5, %v17710_v55  ;;  %v6380_v62 = vsel %vm16310_vm15, 1.0, %v17637_v5  ;;  %vm16099_vm6 = vcmp.eq.s32.totalorder %v17713_v20, %v11503_v47  ;;  %2063 = vmatmul.mubr.f32.vlgmr.msra.gmra.mrb[0].mxu0 %v17715_v13  ;;  %v17724_v10 = vld [vmem:[#allocation123_spill] sm:$0xff] }
 0x20e   :  { %17704 = vst [vmem:[#allocation48_spill] sm:$0xff] %v11990_v1  ;;  %17705 = vst [vmem:[#allocation51_spill] sm:$0xff] %v11992_v31  ;;  %v6388_v15 = vsel %vm16097_vm14, 1.0, %v17637_v5  ;;  %vm16098_vm4 = vcmp.eq.s32.totalorder %v17714_v12, %v11503_v47  ;;  %v6395_v59 = vsel %vm16099_vm6, 1.0, %v17637_v5  ;;  %vm16300_vm5 = vcmp.eq.s32.totalorder %v17713_v20, %v11518_v44  ;;  %3409 = vmatmul.mubr.f32.vlgmr.msra.gmra.mrb[0].mxu1 %v17715_v13 }
 0x20f   :  { %17706 = vst [vmem:[#allocation52_spill] sm:$0xff] %v11994_v34  ;;  %17707 = vst [vmem:[#allocation53_spill] sm:$0xff] %v11996_v24  ;;  %v6403_v30 = vsel %vm16098_vm4, 1.0, %v17637_v5  ;;  %vm16105_vm14 = vcmp.eq.s32.totalorder %v17714_v12, %v11518_v44  ;;  %v6397_v53 = vsel %vm16300_vm5, 1.0, %v17637_v5  ;;  %vm16299_vm4 = vcmp.eq.s32.totalorder %v17713_v20, %v11556_v57  ;;  %7641 = vmatpush1.bf16.msk.msra.mxu0 %vm9177_vm10, %v17710_v55 }
 0x210   :  { %17708 = vst [vmem:[#allocation54_spill] sm:$0xff] %v11998_v19  ;;  %17709 = vst [vmem:[#allocation56_spill] sm:$0xff] %v12002_v18  ;;  %v6405_v26 = vsel %vm16105_vm14, 1.0, %v17637_v5  ;;  %vm16282_vm6 = vcmp.eq.s32.totalorder %v17714_v12, %v11556_v57  ;;  %8025 = vmatpush1.bf16.msk.msra.mxu1 %vm9190_vm11, %v17710_v55  ;;  %v12058_v24 = vsub.f32 %v6380_v62, %v6380_v62  ;;  %v6394_v34 = vsel %vm16299_vm4, 1.0, %v17637_v5 }
 0x211   :  { %v6402_v31 = vsel %vm16282_vm6, 1.0, %v17637_v5  ;;  %vm16114_vm14 = vcmp.eq.s32.totalorder %v17713_v20, %v11572_v39  ;;  %7643 = vmatprep.subr.msk.bf16.mxu0 %vm9213_vm0, %v17710_v55  ;;  %8027 = vmatprep.subr.msk.bf16.mxu1 %vm9224_vm1, %v17710_v55  ;;  %v12076_v62 = vsub.f32 %v6388_v15, %v6388_v15  ;;  %v12080_v1 = vsub.f32 %v6403_v30, %v6403_v30  ;;  %v17727_v15 = vld [vmem:[#allocation127_spill] sm:$0xff] }
 0x212   :  { %17718 = vst [vmem:[#allocation57_spill] sm:$0xff] %v12058_v24  ;;  %v12078_v24 = vsub.f32 %v6395_v59, %v6395_v59  ;;  %v6396_v58 = vsel %vm16114_vm14, 1.0, %v17637_v5  ;;  %2069 = vmatprep.mubr.f32.mxu0 %v17724_v10  ;;  %3415 = vmatprep.mubr.f32.mxu1 %v17724_v10  ;;  %v12088_v18 = vsub.f32 %v6397_v53, %v6397_v53  ;;  %v17730_v53 = vld [vmem:[#allocation25_spill] sm:$0xff] }
 0x213   :  { %17721 = vst [vmem:[#allocation59_spill] sm:$0xff] %v12076_v62  ;;  %17723 = vst [vmem:[#allocation63_spill] sm:$0xff] %v12080_v1  ;;  %v12090_v45 = vsub.f32 %v6405_v26, %v6405_v26  ;;  %vm16113_vm10 = vcmp.eq.s32.totalorder %v17714_v12, %v11572_v39  ;;  %2071 = vmatmul.mubr.f32.gmra.mrb[2].mxu0 %v17727_v15  ;;  %3417 = vmatmul.mubr.f32.gmra.mrb[2].mxu1 %v17727_v15  ;;  %v17736_v26 = vld [vmem:[#allocation49_spill] sm:$0xff]  ;;  %v17741_v1 = vld [vmem:[#allocation27_spill] sm:$0xff] }
 0x214   :  { %17722 = vst [vmem:[#allocation60_spill] sm:$0xff] %v12078_v24  ;;  %17725 = vst [vmem:[#allocation64_spill] sm:$0xff] %v12088_v18  ;;  %v12096_v59 = vsub.f32 %v6394_v34, %v6394_v34  ;;  %v12098_v30 = vsub.f32 %v6402_v31, %v6402_v31  ;;  %v6404_v19 = vsel %vm16113_vm10, 1.0, %v17637_v5  ;;  %vm16126_vm11 = vcmp.eq.s32.totalorder %v17730_v53, %v11503_v47  ;;  %v17735_v31 = vld [vmem:[#allocation26_spill] sm:$0xff]  ;;  %v17742_v24 = vld [vmem:[#allocation55_spill] sm:$0xff] }
 0x215   :  { %17726 = vst [vmem:[#allocation65_spill] sm:$0xff] %v12090_v45  ;;  %7645 = vmatpush1.bf16.msk.msra.mxu0 %vm9273_vm8, %v17710_v55  ;;  %v17732_v45 = vld [vmem:[#allocation46_spill] sm:$0xff]  ;;  %v12112_v34 = vsub.f32 %v6396_v58, %v6396_v58  ;;  %vm16119_vm1 = vcmp.eq.s32.totalorder %v17735_v31, %v11503_v47  ;;  %vm16117_vm10 = vcmp.eq.s32.totalorder %v17730_v53, %v11518_v44 }
 0x216   :  { %17728 = vst [vmem:[#allocation66_spill] sm:$0xff] %v12096_v59  ;;  %17729 = vst [vmem:[#allocation68_spill] sm:$0xff] %v12098_v30  ;;  %vm17733_vm0 = vnez %v17732_v45  ;;  %v6411_v30 = vsel %vm16126_vm11, 1.0, %v17637_v5  ;;  %vm17737_vm8 = vnez %v17736_v26  ;;  %v17738_v45 = vld [vmem:[#allocation50_spill] sm:$0xff]  ;;  %v6419_v58 = vsel %vm16119_vm1, 1.0, %v17637_v5  ;;  %v17740_v26 = vld [vmem:[#allocation231_spill] sm:$0xff] }
 0x217   :  { %8029 = vmatpush1.bf16.msk.msra.mxu1 %vm17733_vm0, %v17710_v55  ;;  %17734 = vst [vmem:[#allocation69_spill] sm:$0xff] %v12112_v34  ;;  %7647 = vmatprep.subr.msk.bf16.mxu0 %vm17737_vm8, %v17710_v55  ;;  %vm17739_vm0 = vnez %v17738_v45  ;;  %vm16122_vm14 = vcmp.eq.s32.totalorder %v17735_v31, %v11518_v44  ;;  %v6413_v34 = vsel %vm16117_vm10, 1.0, %v17637_v5  ;;  %vm16124_vm8 = vcmp.eq.s32.totalorder %v17730_v53, %v11556_v57  ;;  %v17744_v62 = vld [vmem:[#allocation58_spill] sm:$0xff] }
 0x218   :  { %8031 = vmatprep.subr.msk.bf16.mxu1 %vm17739_vm0, %v17710_v55  ;;  %2206 = vmatprep.mubr.f32.mxu0 %v17740_v26  ;;  %v6421_v45 = vsel %vm16122_vm14, 1.0, %v17637_v5  ;;  %vm16141_vm0 = vcmp.eq.s32.totalorder %v17735_v31, %v11556_v57  ;;  %v6410_v59 = vsel %vm16124_vm8, 1.0, %v17637_v5  ;;  %vm16130_vm10 = vcmp.eq.s32.totalorder %v17730_v53, %v11572_v39  ;;  %v17748_v53 = vld [vmem:[#allocation61_spill] sm:$0xff] }
 0x219   :  { %3552 = vmatprep.mubr.f32.mxu1 %v17740_v26  ;;  %v6418_v26 = vsel %vm16141_vm0, 1.0, %v17637_v5  ;;  %vm16140_vm1 = vcmp.eq.s32.totalorder %v17735_v31, %v11572_v39  ;;  %v6412_v18 = vsel %vm16130_vm10, 1.0, %v17637_v5  ;;  %vm16139_vm14 = vcmp.eq.s32.totalorder %v17741_v1, %v11503_v47 }
 0x21a   :  { %vm17743_vm8 = vnez %v17742_v24  ;;  %vm17745_vm11 = vnez %v17744_v62  ;;  %v12172_v56 = vsub.f32 %v6404_v19, %v6404_v19  ;;  %v6420_v4 = vsel %vm16140_vm1, 1.0, %v17637_v5  ;;  %v17750_v62 = vld [vmem:[#allocation62_spill] sm:$0xff] }
 0x21b   :  { %7649 = vmatpush1.bf16.msk.msra.mxu0 %vm17743_vm8, %v17710_v55  ;;  %8033 = vmatpush1.bf16.msk.msra.mxu1 %vm17745_vm11, %v17710_v55  ;;  %vm16138_vm10 = vcmp.eq.s32.totalorder %v17747_v7, %v11503_v47  ;;  %v6427_v24 = vsel %vm16139_vm14, 1.0, %v17637_v5  ;;  %vm17749_vm8 = vnez %v17748_v53  ;;  %vm17751_vm11 = vnez %v17750_v62 }
 0x21c   :  { %17746 = vst [vmem:[#allocation71_spill] sm:$0xff] %v12172_v56  ;;  %7651 = vmatprep.subr.msk.bf16.mxu0 %vm17749_vm8, %v17710_v55  ;;  %8035 = vmatprep.subr.msk.bf16.mxu1 %vm17751_vm11, %v17710_v55  ;;  %v12190_v19 = vsub.f32 %v6411_v30, %v6411_v30  ;;  %v12192_v56 = vsub.f32 %v6419_v58, %v6419_v58  ;;  %v6435_v12 = vsel %vm16138_vm10, 1.0, %v17637_v5 }
 0x21d   :  { %v12194_v31 = vsub.f32 %v6413_v34, %v6413_v34  ;;  %v12200_v20 = vsub.f32 %v6421_v45, %v6421_v45  ;;  %v12202_v63 = vsub.f32 %v6410_v59, %v6410_v59  ;;  %v12204_v53 = vsub.f32 %v6418_v26, %v6418_v26  ;;  %v17761_v34 = vld [vmem:[#allocation67_spill] sm:$0xff]  ;;  %v17763_v59 = vld [vmem:[#allocation70_spill] sm:$0xff]  ;;  %v17766_v26 = vld [vmem:[#allocation73_spill] sm:$0xff] }
 0x21e   :  { %17752 = vst [vmem:[#allocation72_spill] sm:$0xff] %v12190_v19  ;;  %17753 = vst [vmem:[#allocation75_spill] sm:$0xff] %v12192_v56  ;;  %v12206_v3 = vsub.f32 %v6412_v18, %v6412_v18  ;;  %v12208_v62 = vsub.f32 %v6420_v4, %v6420_v4  ;;  %v12210_v30 = vsub.f32 %v6427_v24, %v6427_v24  ;;  %vm17762_vm10 = vnez %v17761_v34 }
 0x21f   :  { %17754 = vst [vmem:[#allocation76_spill] sm:$0xff] %v12194_v31  ;;  %17755 = vst [vmem:[#allocation77_spill] sm:$0xff] %v12200_v20  ;;  %vm16143_vm8 = vcmp.eq.s32.totalorder %v17741_v1, %v11518_v44  ;;  %vm16142_vm11 = vcmp.eq.s32.totalorder %v17747_v7, %v11518_v44  ;;  %7653 = vmatpush1.bf16.msk.msra.mxu0 %vm17762_vm10, %v17710_v55  ;;  %vm17764_vm14 = vnez %v17763_v59  ;;  %vm17767_vm10 = vnez %v17766_v26  ;;  %v17770_v26 = vld [vmem:[#allocation132_spill] sm:$0xff] }
 0x220   :  { %17756 = vst [vmem:[#allocation78_spill] sm:$0xff] %v12202_v63  ;;  %17757 = vst [vmem:[#allocation80_spill] sm:$0xff] %v12204_v53  ;;  %8037 = vmatpush1.bf16.msk.msra.mxu1 %vm17764_vm14, %v17710_v55  ;;  %v12222_v18 = vsub.f32 %v6435_v12, %v6435_v12  ;;  %v6429_v4 = vsel %vm16143_vm8, 1.0, %v17637_v5  ;;  %v6437_v58 = vsel %vm16142_vm11, 1.0, %v17637_v5  ;;  %vm16150_vm1 = vcmp.eq.s32.totalorder %v17741_v1, %v11556_v57  ;;  %v17768_v12 = vld [vmem:[#allocation74_spill] sm:$0xff] }
 0x221   :  { %17758 = vst [vmem:[#allocation81_spill] sm:$0xff] %v12206_v3  ;;  %17759 = vst [vmem:[#allocation83_spill] sm:$0xff] %v12208_v62  ;;  %7655 = vmatprep.subr.msk.bf16.mxu0 %vm17767_vm10, %v17710_v55  ;;  %vm17769_vm14 = vnez %v17768_v12  ;;  %vm16145_vm0 = vcmp.eq.s32.totalorder %v17747_v7, %v11556_v57  ;;  %v6426_v45 = vsel %vm16150_vm1, 1.0, %v17637_v5  ;;  %vm16146_vm11 = vcmp.eq.s32.totalorder %v17741_v1, %v11572_v39  ;;  %v17771_v12 = vld [vmem:[#allocation135_spill] sm:$0xff]  ;;  %v17774_v62 = vld [vmem:[#allocation82_spill] sm:$0xff] }
 0x222   :  { %17760 = vst [vmem:[#allocation84_spill] sm:$0xff] %v12210_v30  ;;  %17765 = vst [vmem:[#allocation87_spill] sm:$0xff] %v12222_v18  ;;  %8039 = vmatprep.subr.msk.bf16.mxu1 %vm17769_vm14, %v17710_v55  ;;  %vm16148_vm8 = vcmp.eq.s32.totalorder %v17747_v7, %v11572_v39  ;;  %v6434_v24 = vsel %vm16145_vm0, 1.0, %v17637_v5  ;;  %v6428_v34 = vsel %vm16146_vm11, 1.0, %v17637_v5  ;;  %vm16173_vm10 = vcmp.eq.s32.totalorder %v17770_v26, %v11503_v47  ;;  %v17772_v30 = vld [vmem:[#allocation79_spill] sm:$0xff]  ;;  %v17778_v63 = vld [vmem:[#allocation86_spill] sm:$0xff] }
 0x223   :  { %v6436_v59 = vsel %vm16148_vm8, 1.0, %v17637_v5  ;;  %vm16154_vm14 = vcmp.eq.s32.totalorder %v17771_v12, %v11503_v47  ;;  %v6443_v18 = vsel %vm16173_vm10, 1.0, %v17637_v5  ;;  %vm16164_vm0 = vcmp.eq.s32.totalorder %v17770_v26, %v11518_v44 }
 0x224   :  { %vm16163_vm11 = vcmp.eq.s32.totalorder %v17771_v12, %v11518_v44  ;;  %vm17773_vm8 = vnez %v17772_v30  ;;  %vm17775_vm1 = vnez %v17774_v62  ;;  %v6451_v3 = vsel %vm16154_vm14, 1.0, %v17637_v5  ;;  %v17776_v62 = vld [vmem:[#allocation85_spill] sm:$0xff] }
 0x225   :  { %7657 = vmatpush1.bf16.msk.msra.mxu0 %vm17773_vm8, %v17710_v55  ;;  %8041 = vmatpush1.bf16.msk.msra.mxu1 %vm17775_vm1, %v17710_v55  ;;  %v6445_v53 = vsel %vm16164_vm0, 1.0, %v17637_v5  ;;  %v6453_v30 = vsel %vm16163_vm11, 1.0, %v17637_v5  ;;  %vm16162_vm8 = vcmp.eq.s32.totalorder %v17770_v26, %v11556_v57  ;;  %vm17777_vm1 = vnez %v17776_v62 }
 0x226   :  { %7659 = vmatprep.subr.msk.bf16.mxu0 %vm17777_vm1, %v17710_v55  ;;  %vm17779_vm14 = vnez %v17778_v63  ;;  %v12300_v20 = vsub.f32 %v6429_v4, %v6429_v4  ;;  %v12302_v31 = vsub.f32 %v6437_v58, %v6437_v58  ;;  %v12304_v56 = vsub.f32 %v6426_v45, %v6426_v45  ;;  %v17790_v45 = vld [vmem:[#allocation91_spill] sm:$0xff] }
 0x227   :  { %8043 = vmatprep.subr.msk.bf16.mxu1 %vm17779_vm14, %v17710_v55  ;;  %v6442_v19 = vsel %vm16162_vm8, 1.0, %v17637_v5  ;;  %v12310_v7 = vsub.f32 %v6434_v24, %v6434_v24  ;;  %v12312_v1 = vsub.f32 %v6428_v34, %v6428_v34  ;;  %v12314_v62 = vsub.f32 %v6436_v59, %v6436_v59  ;;  %v17792_v24 = vld [vmem:[#allocation94_spill] sm:$0xff] }
 0x228   :  { %17780 = vst [vmem:[#allocation88_spill] sm:$0xff] %v12300_v20  ;;  %17781 = vst [vmem:[#allocation89_spill] sm:$0xff] %v12302_v31  ;;  %v12316_v22 = vsub.f32 %v6443_v18, %v6443_v18  ;;  %v12318_v63 = vsub.f32 %v6451_v3, %v6451_v3  ;;  %v12320_v4 = vsub.f32 %v6445_v53, %v6445_v53  ;;  %vm17791_vm1 = vnez %v17790_v45  ;;  %v17795_v18 = vld [vmem:[#allocation97_spill] sm:$0xff]  ;;  %v17797_v34 = vld [vmem:[#allocation98_spill] sm:$0xff] }
 0x229   :  { %17782 = vst [vmem:[#allocation90_spill] sm:$0xff] %v12304_v56  ;;  %17783 = vst [vmem:[#allocation92_spill] sm:$0xff] %v12310_v7  ;;  %v12322_v58 = vsub.f32 %v6453_v30, %v6453_v30  ;;  %vm16165_vm14 = vcmp.eq.s32.totalorder %v17771_v12, %v11556_v57  ;;  %7661 = vmatpush1.bf16.msk.msra.mxu0 %vm17791_vm1, %v17710_v55  ;;  %vm17793_vm8 = vnez %v17792_v24  ;;  %vm17796_vm1 = vnez %v17795_v18  ;;  %v17799_v30 = vld [vmem:[#allocation147_spill] sm:$0xff]  ;;  %v17800_v45 = vld [vmem:[#allocation148_spill] sm:$0xff] }
 0x22a   :  { %17784 = vst [vmem:[#allocation93_spill] sm:$0xff] %v12312_v1  ;;  %17785 = vst [vmem:[#allocation95_spill] sm:$0xff] %v12314_v62  ;;  %8045 = vmatpush1.bf16.msk.msra.mxu1 %vm17793_vm8, %v17710_v55  ;;  %v6450_v3 = vsel %vm16165_vm14, 1.0, %v17637_v5  ;;  %v12336_v53 = vsub.f32 %v6442_v19, %v6442_v19  ;;  %vm16171_vm11 = vcmp.eq.s32.totalorder %v17770_v26, %v11572_v39  ;;  %7663 = vmatprep.subr.msk.bf16.mxu0 %vm17796_vm1, %v17710_v55  ;;  %v17818_v20 = vld [vmem:[#allocation150_spill] sm:$0xff] }
 0x22b   :  { %17786 = vst [vmem:[#allocation96_spill] sm:$0xff] %v12316_v22  ;;  %17787 = vst [vmem:[#allocation99_spill] sm:$0xff] %v12318_v63  ;;  %vm16166_vm0 = vcmp.eq.s32.totalorder %v17771_v12, %v11572_v39  ;;  %vm17798_vm8 = vnez %v17797_v34  ;;  %v6444_v19 = vsel %vm16171_vm11, 1.0, %v17637_v5  ;;  %vm16168_vm14 = vcmp.eq.s32.totalorder %v17799_v30, %v11503_v47 }
 0x22c   :  { %17788 = vst [vmem:[#allocation100_spill] sm:$0xff] %v12320_v4  ;;  %17789 = vst [vmem:[#allocation101_spill] sm:$0xff] %v12322_v58  ;;  %8047 = vmatprep.subr.msk.bf16.mxu1 %vm17798_vm8, %v17710_v55  ;;  %v6452_v59 = vsel %vm16166_vm0, 1.0, %v17637_v5  ;;  %vm16169_vm1 = vcmp.eq.s32.totalorder %v17800_v45, %v11503_v47  ;;  %v6459_v24 = vsel %vm16168_vm14, 1.0, %v17637_v5  ;;  %vm16177_vm8 = vcmp.eq.s32.totalorder %v17799_v30, %v11518_v44  ;;  %v17801_v58 = vld [vmem:[#allocation103_spill] sm:$0xff]  ;;  %v17803_v4 = vld [vmem:[#allocation106_spill] sm:$0xff] }
 0x22d   :  { %17794 = vst [vmem:[#allocation102_spill] sm:$0xff] %v12336_v53  ;;  %v6467_v18 = vsel %vm16169_vm1, 1.0, %v17637_v5  ;;  %vm16176_vm0 = vcmp.eq.s32.totalorder %v17800_v45, %v11518_v44  ;;  %v6461_v34 = vsel %vm16177_vm8, 1.0, %v17637_v5  ;;  %vm16190_vm14 = vcmp.eq.s32.totalorder %v17799_v30, %v11556_v57 }
 0x22e   :  { %v6469_v53 = vsel %vm16176_vm0, 1.0, %v17637_v5  ;;  %vm16189_vm1 = vcmp.eq.s32.totalorder %v17800_v45, %v11556_v57  ;;  %vm17802_vm11 = vnez %v17801_v58  ;;  %vm17804_vm10 = vnez %v17803_v4  ;;  %v17805_v58 = vld [vmem:[#allocation109_spill] sm:$0xff]  ;;  %v17807_v4 = vld [vmem:[#allocation110_spill] sm:$0xff] }
 0x22f   :  { %7665 = vmatpush1.bf16.msk.msra.mxu0 %vm17802_vm11, %v17710_v55  ;;  %8049 = vmatpush1.bf16.msk.msra.mxu1 %vm17804_vm10, %v17710_v55  ;;  %v6458_v63 = vsel %vm16190_vm14, 1.0, %v17637_v5  ;;  %v6466_v22 = vsel %vm16189_vm1, 1.0, %v17637_v5  ;;  %vm16188_vm0 = vcmp.eq.s32.totalorder %v17799_v30, %v11572_v39  ;;  %vm16187_vm11 = vcmp.eq.s32.totalorder %v17800_v45, %v11572_v39  ;;  %v17819_v45 = vld [vmem:[#allocation115_spill] sm:$0xff] }
 0x230   :  { %vm17806_vm8 = vnez %v17805_v58  ;;  %vm17808_vm10 = vnez %v17807_v4  ;;  %v12408_v62 = vsub.f32 %v6450_v3, %v6450_v3  ;;  %v12410_v1 = vsub.f32 %v6444_v19, %v6444_v19 }
 0x231   :  { %7667 = vmatprep.subr.msk.bf16.mxu0 %vm17806_vm8, %v17710_v55  ;;  %8051 = vmatprep.subr.msk.bf16.mxu1 %vm17808_vm10, %v17710_v55  ;;  %v6460_v7 = vsel %vm16188_vm0, 1.0, %v17637_v5  ;;  %v6468_v56 = vsel %vm16187_vm11, 1.0, %v17637_v5  ;;  %v12420_v58 = vsub.f32 %v6452_v59, %v6452_v59  ;;  %v12422_v31 = vsub.f32 %v6459_v24, %v6459_v24  ;;  %v17821_v59 = vld [vmem:[#allocation118_spill] sm:$0xff] }
 0x232   :  { %17809 = vst [vmem:[#allocation107_spill] sm:$0xff] %v12408_v62  ;;  %17810 = vst [vmem:[#allocation108_spill] sm:$0xff] %v12410_v1  ;;  %v12424_v4 = vsub.f32 %v6467_v18, %v6467_v18  ;;  %v12426_v3 = vsub.f32 %v6461_v34, %v6461_v34  ;;  %v12428_v19 = vsub.f32 %v6469_v53, %v6469_v53  ;;  %vm17820_vm10 = vnez %v17819_v45  ;;  %v17828_v53 = vld [vmem:[#allocation126_spill] sm:$0xff] }
 0x233   :  { %17811 = vst [vmem:[#allocation111_spill] sm:$0xff] %v12420_v58  ;;  %17812 = vst [vmem:[#allocation112_spill] sm:$0xff] %v12422_v31  ;;  %v12430_v1 = vsub.f32 %v6458_v63, %v6458_v63  ;;  %v12432_v62 = vsub.f32 %v6466_v22, %v6466_v22  ;;  %vm16195_vm8 = vcmp.eq.s32.totalorder %v17818_v20, %v11503_v47  ;;  %7669 = vmatpush1.bf16.msk.msra.mxu0 %vm17820_vm10, %v17710_v55  ;;  %v17825_v63 = vld [vmem:[#allocation163_spill] sm:$0xff]  ;;  %v17826_v22 = vld [vmem:[#allocation122_spill] sm:$0xff] }
 0x234   :  { %17813 = vst [vmem:[#allocation119_spill] sm:$0xff] %v12424_v4  ;;  %17814 = vst [vmem:[#allocation120_spill] sm:$0xff] %v12426_v3  ;;  %vm17822_vm11 = vnez %v17821_v59  ;;  %v12442_v24 = vsub.f32 %v6460_v7, %v6460_v7  ;;  %v12444_v18 = vsub.f32 %v6468_v56, %v6468_v56  ;;  %vm16193_vm0 = vcmp.eq.s32.totalorder %v17825_v63, %v11503_v47 }
 0x235   :  { %17815 = vst [vmem:[#allocation129_spill] sm:$0xff] %v12428_v19  ;;  %17816 = vst [vmem:[#allocation130_spill] sm:$0xff] %v12430_v1  ;;  %8053 = vmatpush1.bf16.msk.msra.mxu1 %vm17822_vm11, %v17710_v55  ;;  %vm17827_vm1 = vnez %v17826_v22  ;;  %vm17829_vm14 = vnez %v17828_v53  ;;  %v6475_v45 = vsel %vm16195_vm8, 1.0, %v17637_v5  ;;  %v6483_v7 = vsel %vm16193_vm0, 1.0, %v17637_v5  ;;  %v17830_v53 = vld [vmem:[#allocation128_spill] sm:$0xff]  ;;  %v17834_v1 = vld [vmem:[#allocation175_spill] sm:$0xff] }
 0x236   :  { %17817 = vst [vmem:[#allocation133_spill] sm:$0xff] %v12432_v62  ;;  %17823 = vst [vmem:[#allocation134_spill] sm:$0xff] %v12442_v24  ;;  %7671 = vmatprep.subr.msk.bf16.mxu0 %vm17827_vm1, %v17710_v55  ;;  %8055 = vmatprep.subr.msk.bf16.mxu1 %vm17829_vm14, %v17710_v55  ;;  %vm16191_vm11 = vcmp.eq.s32.totalorder %v17818_v20, %v11518_v44  ;;  %vm16192_vm1 = vcmp.eq.s32.totalorder %v17825_v63, %v11518_v44  ;;  %vm17831_vm0 = vnez %v17830_v53  ;;  %v17835_v53 = vld [vmem:[#allocation176_spill] sm:$0xff] }
 0x237   :  { %17824 = vst [vmem:[#allocation11_spill] sm:$0xff] %v12444_v18  ;;  %v6477_v56 = vsel %vm16191_vm11, 1.0, %v17637_v5  ;;  %v6485_v34 = vsel %vm16192_vm1, 1.0, %v17637_v5  ;;  %vm16201_vm14 = vcmp.eq.s32.totalorder %v17818_v20, %v11556_v57  ;;  %vm16199_vm10 = vcmp.eq.s32.totalorder %v17825_v63, %v11556_v57  ;;  %7673 = vmatpush1.bf16.msk.msra.mxu0 %vm17831_vm0, %v17710_v55  ;;  %v17832_v18 = vld [vmem:[#allocation131_spill] sm:$0xff]  ;;  %v17836_v19 = vld [vmem:[#allocation136_spill] sm:$0xff] }
 0x238   :  { %v6474_v59 = vsel %vm16201_vm14, 1.0, %v17637_v5  ;;  %v6482_v22 = vsel %vm16199_vm10, 1.0, %v17637_v5  ;;  %vm16219_vm11 = vcmp.eq.s32.totalorder %v17818_v20, %v11572_v39  ;;  %vm16205_vm1 = vcmp.eq.s32.totalorder %v17825_v63, %v11572_v39 }
 0x239   :  { %vm17833_vm8 = vnez %v17832_v18  ;;  %v6476_v24 = vsel %vm16219_vm11, 1.0, %v17637_v5  ;;  %v6484_v62 = vsel %vm16205_vm1, 1.0, %v17637_v5  ;;  %vm16214_vm10 = vcmp.eq.s32.totalorder %v17834_v1, %v11503_v47  ;;  %v17838_v18 = vld [vmem:[#allocation139_spill] sm:$0xff] }
 0x23a   :  { %8057 = vmatpush1.bf16.msk.msra.mxu1 %vm17833_vm8, %v17710_v55  ;;  %vm16213_vm0 = vcmp.eq.s32.totalorder %v17835_v53, %v11503_v47  ;;  %vm17837_vm14 = vnez %v17836_v19  ;;  %vm17839_vm8 = vnez %v17838_v18  ;;  %v12514_v3 = vsub.f32 %v6475_v45, %v6475_v45 }
 0x23b   :  { %7675 = vmatprep.subr.msk.bf16.mxu0 %vm17837_vm14, %v17710_v55  ;;  %8059 = vmatprep.subr.msk.bf16.mxu1 %vm17839_vm8, %v17710_v55  ;;  %v6491_v4 = vsel %vm16214_vm10, 1.0, %v17637_v5  ;;  %v6499_v31 = vsel %vm16213_vm0, 1.0, %v17637_v5  ;;  %vm16212_vm1 = vcmp.eq.s32.totalorder %v17834_v1, %v11518_v44  ;;  %v12526_v19 = vsub.f32 %v6483_v7, %v6483_v7  ;;  %v17848_v7 = vld [vmem:[#allocation142_spill] sm:$0xff] }
 0x23c   :  { %17840 = vst [vmem:[#allocation143_spill] sm:$0xff] %v12514_v3  ;;  %v12528_v58 = vsub.f32 %v6477_v56, %v6477_v56  ;;  %v12530_v18 = vsub.f32 %v6485_v34, %v6485_v34  ;;  %v6493_v45 = vsel %vm16212_vm1, 1.0, %v17637_v5  ;;  %v12536_v3 = vsub.f32 %v6474_v59, %v6474_v59  ;;  %v17850_v56 = vld [vmem:[#allocation145_spill] sm:$0xff] }
 0x23d   :  { %17841 = vst [vmem:[#allocation144_spill] sm:$0xff] %v12526_v19  ;;  %v12538_v63 = vsub.f32 %v6482_v22, %v6482_v22  ;;  %v12540_v20 = vsub.f32 %v6476_v24, %v6476_v24  ;;  %v12542_v30 = vsub.f32 %v6484_v62, %v6484_v62  ;;  %vm17849_vm14 = vnez %v17848_v7  ;;  %v17854_v24 = vld [vmem:[#allocation151_spill] sm:$0xff]  ;;  %v17856_v62 = vld [vmem:[#allocation154_spill] sm:$0xff] }
 0x23e   :  { %17842 = vst [vmem:[#allocation146_spill] sm:$0xff] %v12528_v58  ;;  %17843 = vst [vmem:[#allocation149_spill] sm:$0xff] %v12530_v18  ;;  %7677 = vmatpush1.bf16.msk.msra.mxu0 %vm17849_vm14, %v17710_v55  ;;  %vm17851_vm8 = vnez %v17850_v56  ;;  %v12550_v34 = vsub.f32 %v6491_v4, %v6491_v4  ;;  %v12552_v18 = vsub.f32 %v6499_v31, %v6499_v31  ;;  %vm17855_vm0 = vnez %v17854_v24  ;;  %v17859_v56 = vld [vmem:[#allocation178_spill] sm:$0xff]  ;;  %v17860_v24 = vld [vmem:[#allocation191_spill] sm:$0xff] }
 0x23f   :  { %17844 = vst [vmem:[#allocation158_spill] sm:$0xff] %v12536_v3  ;;  %17845 = vst [vmem:[#allocation159_spill] sm:$0xff] %v12538_v63  ;;  %8061 = vmatpush1.bf16.msk.msra.mxu1 %vm17851_vm8, %v17710_v55  ;;  %vm16217_vm1 = vcmp.eq.s32.totalorder %v17835_v53, %v11518_v44  ;;  %7679 = vmatprep.subr.msk.bf16.mxu0 %vm17855_vm0, %v17710_v55  ;;  %vm17857_vm10 = vnez %v17856_v62  ;;  %v12566_v4 = vsub.f32 %v6493_v45, %v6493_v45  ;;  %v17861_v62 = vld [vmem:[#allocation157_spill] sm:$0xff] }
 0x240   :  { %17846 = vst [vmem:[#allocation161_spill] sm:$0xff] %v12540_v20  ;;  %17847 = vst [vmem:[#allocation162_spill] sm:$0xff] %v12542_v30  ;;  %8063 = vmatprep.subr.msk.bf16.mxu1 %vm17857_vm10, %v17710_v55  ;;  %v6501_v59 = vsel %vm16217_vm1, 1.0, %v17637_v5  ;;  %vm16215_vm14 = vcmp.eq.s32.totalorder %v17834_v1, %v11556_v57  ;;  %vm16216_vm8 = vcmp.eq.s32.totalorder %v17835_v53, %v11556_v57  ;;  %vm17862_vm1 = vnez %v17861_v62  ;;  %v17865_v62 = vld [vmem:[#allocation165_spill] sm:$0xff] }
 0x241   :  { %17852 = vst [vmem:[#allocation171_spill] sm:$0xff] %v12550_v34  ;;  %17853 = vst [vmem:[#allocation172_spill] sm:$0xff] %v12552_v18  ;;  %v6490_v31 = vsel %vm16215_vm14, 1.0, %v17637_v5  ;;  %v6498_v22 = vsel %vm16216_vm8, 1.0, %v17637_v5  ;;  %vm16223_vm10 = vcmp.eq.s32.totalorder %v17834_v1, %v11572_v39  ;;  %vm16222_vm0 = vcmp.eq.s32.totalorder %v17835_v53, %v11572_v39 }
 0x242   :  { %17858 = vst [vmem:[#allocation174_spill] sm:$0xff] %v12566_v4  ;;  %v6492_v45 = vsel %vm16223_vm10, 1.0, %v17637_v5  ;;  %v6500_v7 = vsel %vm16222_vm0, 1.0, %v17637_v5  ;;  %vm16243_vm14 = vcmp.eq.s32.totalorder %v17859_v56, %v11503_v47  ;;  %vm16227_vm8 = vcmp.eq.s32.totalorder %v17860_v24, %v11503_v47  ;;  %7681 = vmatpush1.bf16.msk.msra.mxu0 %vm17862_vm1, %v17710_v55  ;;  %v17863_v4 = vld [vmem:[#allocation160_spill] sm:$0xff] }
 0x243   :  { %vm17864_vm11 = vnez %v17863_v4  ;;  %v6507_v18 = vsel %vm16243_vm14, 1.0, %v17637_v5  ;;  %v6515_v34 = vsel %vm16227_vm8, 1.0, %v17637_v5  ;;  %vm16235_vm0 = vcmp.eq.s32.totalorder %v17859_v56, %v11518_v44  ;;  %v17867_v4 = vld [vmem:[#allocation167_spill] sm:$0xff] }
 0x244   :  { %8065 = vmatpush1.bf16.msk.msra.mxu1 %vm17864_vm11, %v17710_v55  ;;  %vm16232_vm1 = vcmp.eq.s32.totalorder %v17860_v24, %v11518_v44  ;;  %vm17866_vm10 = vnez %v17865_v62  ;;  %vm17868_vm11 = vnez %v17867_v4  ;;  %v12620_v30 = vsub.f32 %v6501_v59, %v6501_v59 }
 0x245   :  { %7683 = vmatprep.subr.msk.bf16.mxu0 %vm17866_vm10, %v17710_v55  ;;  %8067 = vmatprep.subr.msk.bf16.mxu1 %vm17868_vm11, %v17710_v55  ;;  %v6509_v20 = vsel %vm16235_vm0, 1.0, %v17637_v5  ;;  %v6517_v63 = vsel %vm16232_vm1, 1.0, %v17637_v5  ;;  %vm16234_vm8 = vcmp.eq.s32.totalorder %v17859_v56, %v11556_v57  ;;  %v12632_v62 = vsub.f32 %v6490_v31, %v6490_v31  ;;  %v17876_v31 = vld [vmem:[#allocation170_spill] sm:$0xff] }
 0x246   :  { %17869 = vst [vmem:[#allocation177_spill] sm:$0xff] %v12620_v30  ;;  %v12634_v3 = vsub.f32 %v6498_v22, %v6498_v22  ;;  %v12636_v4 = vsub.f32 %v6492_v45, %v6492_v45  ;;  %v6506_v59 = vsel %vm16234_vm8, 1.0, %v17637_v5  ;;  %v12642_v30 = vsub.f32 %v6500_v7, %v6500_v7  ;;  %v17878_v22 = vld [vmem:[#allocation173_spill] sm:$0xff]  ;;  %v17884_v7 = vld [vmem:[#allocation182_spill] sm:$0xff] }
 0x247   :  { %17870 = vst [vmem:[#allocation186_spill] sm:$0xff] %v12632_v62  ;;  %v12644_v58 = vsub.f32 %v6507_v18, %v6507_v18  ;;  %v12646_v19 = vsub.f32 %v6515_v34, %v6515_v34  ;;  %vm16236_vm10 = vcmp.eq.s32.totalorder %v17860_v24, %v11556_v57  ;;  %vm17877_vm11 = vnez %v17876_v31  ;;  %v17882_v34 = vld [vmem:[#allocation179_spill] sm:$0xff] }
 0x248   :  { %17871 = vst [vmem:[#allocation187_spill] sm:$0xff] %v12634_v3  ;;  %17872 = vst [vmem:[#allocation189_spill] sm:$0xff] %v12636_v4  ;;  %7685 = vmatpush1.bf16.msk.msra.mxu0 %vm17877_vm11, %v17710_v55  ;;  %vm17879_vm1 = vnez %v17878_v22  ;;  %v12656_v45 = vsub.f32 %v6509_v20, %v6509_v20  ;;  %v12658_v4 = vsub.f32 %v6517_v63, %v6517_v63  ;;  %v6514_v18 = vsel %vm16236_vm10, 1.0, %v17637_v5  ;;  %v17887_v31 = vld [vmem:[#allocation203_spill] sm:$0xff] }
 0x249   :  { %17873 = vst [vmem:[#allocation190_spill] sm:$0xff] %v12642_v30  ;;  %17874 = vst [vmem:[#allocation200_spill] sm:$0xff] %v12644_v58  ;;  %8069 = vmatpush1.bf16.msk.msra.mxu1 %vm17879_vm1, %v17710_v55  ;;  %vm16237_vm8 = vcmp.eq.s32.totalorder %v17859_v56, %v11572_v39  ;;  %vm17883_vm0 = vnez %v17882_v34  ;;  %vm17885_vm11 = vnez %v17884_v7  ;;  %v12672_v20 = vsub.f32 %v6506_v59, %v6506_v59  ;;  %v17888_v34 = vld [vmem:[#allocation204_spill] sm:$0xff] }
 0x24a   :  { %17875 = vst [vmem:[#allocation205_spill] sm:$0xff] %v12646_v19  ;;  %17880 = vst [vmem:[#allocation214_spill] sm:$0xff] %v12656_v45  ;;  %7687 = vmatprep.subr.msk.bf16.mxu0 %vm17883_vm0, %v17710_v55  ;;  %8071 = vmatprep.subr.msk.bf16.mxu1 %vm17885_vm11, %v17710_v55  ;;  %vm16239_vm1 = vcmp.eq.s32.totalorder %v17860_v24, %v11572_v39  ;;  %v6508_v63 = vsel %vm16237_vm8, 1.0, %v17637_v5  ;;  %vm16241_vm10 = vcmp.eq.s32.totalorder %v17887_v31, %v11503_v47  ;;  %v17891_v45 = vld [vmem:[#allocation188_spill] sm:$0xff] }
 0x24b   :  { %17881 = vst [vmem:[#allocation215_spill] sm:$0xff] %v12658_v4  ;;  %17886 = vst [vmem:[#allocation217_spill] sm:$0xff] %v12672_v20  ;;  %v6516_v22 = vsel %vm16239_vm1, 1.0, %v17637_v5  ;;  %vm16245_vm0 = vcmp.eq.s32.totalorder %v17888_v34, %v11503_v47  ;;  %v6523_v59 = vsel %vm16241_vm10, 1.0, %v17637_v5  ;;  %vm16247_vm11 = vcmp.eq.s32.totalorder %v17887_v31, %v11518_v44  ;;  %v17889_v4 = vld [vmem:[#allocation185_spill] sm:$0xff] }
 0x24c   :  { %v6531_v7 = vsel %vm16245_vm0, 1.0, %v17637_v5  ;;  %vm16275_vm8 = vcmp.eq.s32.totalorder %v17888_v34, %v11518_v44  ;;  %v6525_v20 = vsel %vm16247_vm11, 1.0, %v17637_v5  ;;  %vm16250_vm1 = vcmp.eq.s32.totalorder %v17887_v31, %v11556_v57 }
 0x24d   :  { %vm17890_vm10 = vnez %v17889_v4  ;;  %vm17892_vm14 = vnez %v17891_v45  ;;  %v6533_v19 = vsel %vm16275_vm8, 1.0, %v17637_v5  ;;  %vm16274_vm0 = vcmp.eq.s32.totalorder %v17888_v34, %v11556_v57  ;;  %v17893_v4 = vld [vmem:[#allocation193_spill] sm:$0xff]  ;;  %v17895_v45 = vld [vmem:[#allocation195_spill] sm:$0xff] }
 0x24e   :  { %7689 = vmatpush1.bf16.msk.msra.mxu0 %vm17890_vm10, %v17710_v55  ;;  %8073 = vmatpush1.bf16.msk.msra.mxu1 %vm17892_vm14, %v17710_v55  ;;  %v6522_v58 = vsel %vm16250_vm1, 1.0, %v17637_v5  ;;  %vm16270_vm10 = vcmp.eq.s32.totalorder %v17887_v31, %v11572_v39  ;;  %vm17894_vm11 = vnez %v17893_v4  ;;  %vm17896_vm14 = vnez %v17895_v45 }
 0x24f   :  { %7691 = vmatprep.subr.msk.bf16.mxu0 %vm17894_vm11, %v17710_v55  ;;  %8075 = vmatprep.subr.msk.bf16.mxu1 %vm17896_vm14, %v17710_v55  ;;  %v12730_v30 = vsub.f32 %v6514_v18, %v6514_v18  ;;  %v6530_v3 = vsel %vm16274_vm0, 1.0, %v17637_v5  ;;  %vm16269_vm1 = vcmp.eq.s32.totalorder %v17888_v34, %v11572_v39  ;;  %v6524_v4 = vsel %vm16270_vm10, 1.0, %v17637_v5 }
 0x250   :  { %v12742_v62 = vsub.f32 %v6508_v63, %v6508_v63  ;;  %v12744_v24 = vsub.f32 %v6516_v22, %v6516_v22  ;;  %v12746_v45 = vsub.f32 %v6523_v59, %v6523_v59  ;;  %v6532_v18 = vsel %vm16269_vm1, 1.0, %v17637_v5  ;;  %v17906_v22 = vld [vmem:[#allocation201_spill] sm:$0xff]  ;;  %v17914_v63 = vld [vmem:[#allocation219_spill] sm:$0xff] }
 0x251   :  { %17897 = vst [vmem:[#allocation218_spill] sm:$0xff] %v12730_v30  ;;  %v12752_v30 = vsub.f32 %v6531_v7, %v6531_v7  ;;  %v12754_v56 = vsub.f32 %v6525_v20, %v6525_v20  ;;  %v12756_v53 = vsub.f32 %v6533_v19, %v6533_v19  ;;  %v12758_v1 = vsub.f32 %v6522_v58, %v6522_v58  ;;  %v17910_v7 = vld [vmem:[#allocation206_spill] sm:$0xff]  ;;  %v17918_v58 = vld [vmem:[#allocation221_spill] sm:$0xff] }
 0x252   :  { %17898 = vst [vmem:[#allocation12_spill] sm:$0xff] %v12742_v62  ;;  %17899 = vst [vmem:[#allocation220_spill] sm:$0xff] %v12744_v24  ;;  %7693 = vmatpush1.bf16.msk.msra.mxu0 %vm17420_vm13, %v17710_v55  ;;  %vm17907_vm11 = vnez %v17906_v22  ;;  %v12766_v59 = vsub.f32 %v6530_v3, %v6530_v3  ;;  %vm16267_vm14 = vcmp.eq.s32.totalorder %v17910_v7, %v11503_v47  ;;  %v18334_v24 = vld [vmem:[#allocation84_spill] sm:$0xff] }
 0x253   :  { %17900 = vst [vmem:[#allocation222_spill] sm:$0xff] %v12746_v45  ;;  %17901 = vst [vmem:[#allocation224_spill] sm:$0xff] %v12752_v30  ;;  %8077 = vmatpush1.bf16.msk.msra.mxu1 %vm17907_vm11, %v17710_v55  ;;  %v12768_v45 = vsub.f32 %v6524_v4, %v6524_v4  ;;  %7695 = vmatprep.subr.msk.bf16.mxu0 %vm17424_vm3, %v17710_v55  ;;  %v12778_v20 = vsub.f32 %v6532_v18, %v6532_v18  ;;  %v6539_v3 = vsel %vm16267_vm14, 1.0, %v17637_v5 }
 0x254   :  { %17902 = vst [vmem:[#allocation225_spill] sm:$0xff] %v12754_v56  ;;  %17903 = vst [vmem:[#allocation227_spill] sm:$0xff] %v12756_v53  ;;  %8079 = vmatprep.subr.msk.bf16.mxu1 %vm17426_vm9, %v17710_v55  ;;  %vm16260_vm13 = vcmp.eq.s32.totalorder %v17914_v63, %v11503_v47  ;;  %vm16266_vm11 = vcmp.eq.s32.totalorder %v17910_v7, %v11518_v44  ;;  %vm16264_vm9 = vcmp.eq.s32.totalorder %v17914_v63, %v11518_v44 }
 0x255   :  { %17904 = vst [vmem:[#allocation228_spill] sm:$0xff] %v12758_v1  ;;  %17908 = vst [vmem:[#allocation230_spill] sm:$0xff] %v12766_v59  ;;  %v6547_v4 = vsel %vm16260_vm13, 1.0, %v17637_v5  ;;  %v6541_v18 = vsel %vm16266_vm11, 1.0, %v17637_v5  ;;  %v6549_v22 = vsel %vm16264_vm9, 1.0, %v17637_v5  ;;  %vm16265_vm3 = vcmp.eq.s32.totalorder %v17910_v7, %v11556_v57 }
 0x256   :  { %17909 = vst [vmem:[#allocation232_spill] sm:$0xff] %v12768_v45  ;;  %17913 = vst [vmem:[#allocation13_spill] sm:$0xff] %v12778_v20  ;;  %7697 = vmatpush1.bf16.msk.msra.mxu0 %vm17428_vm7, %v17710_v55  ;;  %v17916_v45 = vld [vmem:[#allocation216_spill] sm:$0xff]  ;;  %v6538_v59 = vsel %vm16265_vm3, 1.0, %v17637_v5  ;;  %vm17919_vm9 = vnez %v17918_v58  ;;  %v17920_v20 = vld [vmem:[#allocation223_spill] sm:$0xff]  ;;  %vm17923_vm3 = vcmp.eq.s32.totalorder %v17636_v46, %v11503_v47  ;;  %v12835_v53 = vsub.f32 %v6539_v3, %v6539_v3 }
 0x257   :  { %vm17917_vm13 = vnez %v17916_v45  ;;  %7699 = vmatprep.subr.msk.bf16.mxu0 %vm17919_vm9, %v17710_v55  ;;  %vm17921_vm7 = vnez %v17920_v20  ;;  %v17924_v45 = vmov 0  ;;  %v12837_v19 = vsub.f32 %v6547_v4, %v6547_v4 }
 0x258   :  { %8081 = vmatpush1.bf16.msk.msra.mxu1 %vm17917_vm13, %v17710_v55  ;;  %vm17922_vm13 = vcmp.eq.s32.totalorder %v17569_v0, %v11503_v47  ;;  %17927 = vst [vmem:[#allocation15_spill] sm:$0xff] %v12835_v53  ;;  %vm17929_vm9 = vcmp.eq.s32.totalorder %v17569_v0, %v11518_v44  ;;  %v17931_v20 = vmov 0  ;;  %v12851_v56 = vsub.f32 %v6541_v18, %v6541_v18  ;;  %v18303_v53 = vld [vmem:[#allocation81_spill] sm:$0xff] }
 0x259   :  { %8083 = vmatprep.subr.msk.bf16.mxu1 %vm17921_vm7, %v17710_v55  ;;  %vm12831_vm11 = vmpackc.low %vm17923_vm3, %vm17922_vm13  ;;  %17928 = vst [vmem:[#allocation16_spill] sm:$0xff] %v12837_v19  ;;  %vm17930_vm7 = vcmp.eq.s32.totalorder %v17636_v46, %v11518_v44  ;;  %v12853_v3 = vsub.f32 %v6549_v22, %v6549_v22  ;;  %vm16291_vm3 = vcmp.eq.s32.totalorder %v17914_v63, %v11556_v57  ;;  %v17938_v1 = vmov 0  ;;  %v17946_v19 = vld [vmem:[#allocation229_spill] sm:$0xff] }
 0x25a   :  { %v17925_v45 = vsel %vm12831_vm11, 4294967295, %v17924_v45  ;;  %vm12847_vm14 = vmpackc.low %vm17930_vm7, %vm17929_vm9  ;;  %17934 = vst [vmem:[#allocation18_spill] sm:$0xff] %v12851_v56  ;;  %vm17936_vm13 = vcmp.eq.s32.totalorder %v17569_v0, %v11556_v57  ;;  %vm17937_vm1 = vcmp.eq.s32.totalorder %v17636_v46, %v11556_v57  ;;  %v12868_v58 = vsub.f32 %v6538_v59, %v6538_v59  ;;  %v17944_v56 = vld [vmem:[#allocation226_spill] sm:$0xff] }
 0x25b   :  { %17926 = vst [vmem:[#allocation14_spill] sm:$0xff] %v17925_v45  ;;  %v17932_v20 = vsel %vm12847_vm14, 4294967295, %v17931_v20  ;;  %17935 = vst [vmem:[#allocation19_spill] sm:$0xff] %v12853_v3  ;;  %vm16294_vm9 = vcmp.eq.s32.totalorder %v17910_v7, %v11572_v39  ;;  %v17942_v18 = vand.u32 4294901760, %v11624_v60  ;;  %v17943_v4 = vand.u32 4294901760, %v11636_v2 }
 0x25c   :  { %17933 = vst [vmem:[#allocation17_spill] sm:$0xff] %v17932_v20  ;;  %vm12864_vm10 = vmpackc.low %vm17937_vm1, %vm17936_vm13  ;;  %vm17945_vm7 = vnez %v17944_v56  ;;  %vm17947_vm1 = vnez %v17946_v19  ;;  %vm17948_vm13 = vcmp.eq.s32.totalorder %v17569_v0, %v11572_v39  ;;  %vm17949_vm0 = vcmp.eq.s32.totalorder %v17636_v46, %v11572_v39 }
 0x25d   :  { %v17939_v1 = vsel %vm12864_vm10, 4294967295, %v17938_v1  ;;  %17941 = vst [vmem:[#allocation21_spill] sm:$0xff] %v12868_v58  ;;  %v3732_v22 = vsub.f32 %v11624_v60, %v17942_v18  ;;  %v3744_v3 = vsub.f32 %v11636_v2, %v17943_v4  ;;  %7701 = vmatpush1.bf16.msk.msra.mxu0 %vm17945_vm7, %v17710_v55  ;;  %8085 = vmatpush1.bf16.msk.msra.mxu1 %vm17947_vm1, %v17710_v55  ;;  %vm12890_vm8 = vmpackc.low %vm17949_vm0, %vm17948_vm13  ;;  %v17950_v59 = vmov 0  ;;  %v18301_v58 = vld [vmem:[#allocation78_spill] sm:$0xff] }
 0x25e   :  { %17940 = vst [vmem:[#allocation20_spill] sm:$0xff] %v17939_v1  ;;  %v17951_v59 = vsel %vm12890_vm8, 4294967295, %v17950_v59  ;;  %v17953_v4 = vand.u32 4294901760, %v11638_v38  ;;  %v17954_v56 = vand.u32 4294901760, %v11688_v29  ;;  %v17955_v19 = vand.u32 4294901760, %v11690_v25  ;;  %8087 = vmatprep.subr.msk.bf16.mxu0 %vm12831_vm11, %v17710_v55  ;;  %8471 = vmatprep.subr.msk.bf16.mxu1 %vm12847_vm14, %v17710_v55 }
 0x25f   :  { %17952 = vst [vmem:[#allocation28_spill] sm:$0xff] %v17951_v59  ;;  %vm17956_vm0 = vcmp.eq.s32.totalorder %v17657_v48, %v11503_v47  ;;  %vm17957_vm7 = vcmp.eq.s32.totalorder %v17658_v17, %v11503_v47  ;;  %v17958_v0 = vmov 0  ;;  %v6546_v46 = vsel %vm16291_vm3, 1.0, %v17637_v5 }
 0x260   :  { %v5078_v18 = vsub.f32 %v11638_v38, %v17953_v4  ;;  %v5090_v2 = vsub.f32 %v11688_v29, %v17954_v56  ;;  %v3738_v60 = vsub.f32 %v11690_v25, %v17955_v19  ;;  %vm12915_vm1 = vmpackc.low %vm17957_vm7, %vm17956_vm0  ;;  %vm16298_vm13 = vcmp.eq.s32.totalorder %v17914_v63, %v11572_v39  ;;  %2208 = vmatmul.mubr.f32.vlgmr.msra.gmra.mrb[0].mxu0 %v17715_v13 }
 0x261   :  { %v17959_v0 = vsel %vm12915_vm1, 4294967295, %v17958_v0  ;;  %v17961_v4 = vand.u32 4294901760, %v11692_v23  ;;  %v17962_v19 = vand.u32 4294901760, %v11700_v32  ;;  %vm17963_vm0 = vcmp.eq.s32.totalorder %v17657_v48, %v11518_v44  ;;  %3554 = vmatmul.mubr.f32.vlgmr.msra.gmra.mrb[0].mxu1 %v17715_v13  ;;  %8089 = vmatpush1.bf16.msk.msra.mxu0 %vm12864_vm10, %v17710_v55 }
 0x262   :  { %17960 = vst [vmem:[#allocation31_spill] sm:$0xff] %v17959_v0  ;;  %vm17964_vm7 = vcmp.eq.s32.totalorder %v17658_v17, %v11518_v44  ;;  %v17965_v45 = vmov 0  ;;  %v17968_v25 = vand.u32 4294901760, %v11702_v43  ;;  %8473 = vmatpush1.bf16.msk.msra.mxu1 %vm12890_vm8, %v17710_v55  ;;  %v17976_v13 = vmov 0  ;;  %2214 = vmatprep.mubr.f32.mxu0 %v17724_v10 }
 0x263   :  { %v3750_v56 = vsub.f32 %v11692_v23, %v17961_v4  ;;  %v5084_v20 = vsub.f32 %v11700_v32, %v17962_v19  ;;  %vm12937_vm6 = vmpackc.low %vm17964_vm7, %vm17963_vm0  ;;  %vm17969_vm0 = vcmp.eq.s32.totalorder %v17657_v48, %v11556_v57  ;;  %vm17970_vm7 = vcmp.eq.s32.totalorder %v17658_v17, %v11556_v57  ;;  %3560 = vmatprep.mubr.f32.mxu1 %v17724_v10  ;;  %v18045_v10 = vld [vmem:[#allocation212_spill] sm:$0xff] }
 0x264   :  { %v17966_v45 = vsel %vm12937_vm6, 4294967295, %v17965_v45  ;;  %v5096_v29 = vsub.f32 %v11702_v43, %v17968_v25  ;;  %vm12955_vm3 = vmpackc.low %vm17970_vm7, %vm17969_vm0  ;;  %v17971_v32 = vmov 0  ;;  %v6540_v25 = vsel %vm16294_vm9, 1.0, %v17637_v5  ;;  %8091 = vmatprep.subr.msk.bf16.mxu0 %vm12915_vm1, %v17710_v55  ;;  %8475 = vmatprep.subr.msk.bf16.mxu1 %vm12937_vm6, %v17710_v55 }
 0x265   :  { %17967 = vst [vmem:[#allocation32_spill] sm:$0xff] %v17966_v45  ;;  %v17972_v32 = vsel %vm12955_vm3, 4294967295, %v17971_v32  ;;  %v6548_v19 = vsel %vm16298_vm13, 1.0, %v17637_v5  ;;  %v3733_v23 = vand.u32 4294901760, %v3732_v22  ;;  %vm17974_vm0 = vcmp.eq.s32.totalorder %v17657_v48, %v11572_v39  ;;  %2216 = vmatmul.mubr.f32.gmra.mrb[2].mxu0 %v17727_v15  ;;  %3562 = vmatmul.mubr.f32.gmra.mrb[2].mxu1 %v17727_v15 }
 0x266   :  { %17973 = vst [vmem:[#allocation35_spill] sm:$0xff] %v17972_v32  ;;  %vm17975_vm7 = vcmp.eq.s32.totalorder %v17658_v17, %v11572_v39  ;;  %v3745_v5 = vand.u32 4294901760, %v3744_v3  ;;  %v5079_v22 = vand.u32 4294901760, %v5078_v18  ;;  %v5091_v4 = vand.u32 4294901760, %v5090_v2  ;;  %8093 = vmatpush1.bf16.msk.msra.mxu0 %vm12955_vm3, %v17710_v55  ;;  %v18038_v32 = vld [vmem:[#allocation197_spill] sm:$0xff] }
 0x267   :  { %vm12980_vm9 = vmpackc.low %vm17975_vm7, %vm17974_vm0  ;;  %v3739_v43 = vand.u32 4294901760, %v3738_v60  ;;  %vm17979_vm13 = vcmp.eq.s32.totalorder %v17669_v61, %v11503_v47  ;;  %vm17980_vm4 = vcmp.eq.s32.totalorder %v17670_v21, %v11503_v47  ;;  %v17981_v48 = vmov 0 }
 0x268   :  { %v17977_v13 = vsel %vm12980_vm9, 4294967295, %v17976_v13  ;;  %vm12992_vm5 = vmpackc.low %vm17980_vm4, %vm17979_vm13  ;;  %v3751_v17 = vand.u32 4294901760, %v3750_v56  ;;  %v5085_v59 = vand.u32 4294901760, %v5084_v20  ;;  %vm17984_vm4 = vcmp.eq.s32.totalorder %v17669_v61, %v11518_v44  ;;  %8477 = vmatpush1.bf16.msk.msra.mxu1 %vm12980_vm9, %v17710_v55 }
 0x269   :  { %17978 = vst [vmem:[#allocation38_spill] sm:$0xff] %v17977_v13  ;;  %v17982_v48 = vsel %vm12992_vm5, 4294967295, %v17981_v48  ;;  %vm17985_vm13 = vcmp.eq.s32.totalorder %v17670_v21, %v11518_v44  ;;  %v17986_v2 = vmov 0  ;;  %v5097_v20 = vand.u32 4294901760, %v5096_v29  ;;  %8095 = vmatprep.subr.msk.bf16.mxu0 %vm12992_vm5, %v17710_v55  ;;  %v18044_v13 = vld [vmem:[#allocation211_spill] sm:$0xff] }
 0x26a   :  { %17983 = vst [vmem:[#allocation39_spill] sm:$0xff] %v17982_v48  ;;  %vm13010_vm0 = vmpackc.low %vm17985_vm13, %vm17984_vm4  ;;  %v17989_v18 = vand.u32 4294901760, %v11704_v42  ;;  %v17990_v60 = vand.u32 4294901760, %v11706_v54  ;;  %v17991_v45 = vand.u32 4294901760, %v11708_v49  ;;  %vm17992_vm7 = vcmp.eq.s32.totalorder %v17669_v61, %v11556_v57 }
 0x26b   :  { %v17987_v2 = vsel %vm13010_vm0, 4294967295, %v17986_v2  ;;  %vm17993_vm4 = vcmp.eq.s32.totalorder %v17670_v21, %v11556_v57  ;;  %v17994_v29 = vmov 0  ;;  %v13071_v15 = vpack.c.bf16 %v5091_v4, %v5079_v22  ;;  %8479 = vmatprep.subr.msk.bf16.mxu1 %vm13010_vm0, %v17710_v55 }
 0x26c   :  { %17988 = vst [vmem:[#allocation43_spill] sm:$0xff] %v17987_v2  ;;  %v13017_v56 = vsub.f32 %v11704_v42, %v17989_v18  ;;  %v13022_v3 = vsub.f32 %v11706_v54, %v17990_v60  ;;  %v13027_v0 = vsub.f32 %v11708_v49, %v17991_v45  ;;  %vm13037_vm13 = vmpackc.low %vm17993_vm4, %vm17992_vm7  ;;  %v13041_v60 = vsub.f32 %v6546_v46, %v6546_v46  ;;  %v18126_v54 = vld [vmem:[#allocation202_spill] sm:$0xff] }
 0x26d   :  { %v17995_v29 = vsel %vm13037_vm13, 4294967295, %v17994_v29  ;;  %v13043_v18 = vsub.f32 %v6540_v25, %v6540_v25  ;;  %v17999_v45 = vand.u32 4294901760, %v11710_v28  ;;  %vm18000_vm7 = vcmp.eq.s32.totalorder %v17669_v61, %v11572_v39  ;;  %8097 = vmatpush1.bf16.msk.msra.mxu0 %vm13037_vm13, %v17710_v55 }
 0x26e   :  { %17996 = vst [vmem:[#allocation46_spill] sm:$0xff] %v17995_v29  ;;  %17997 = vst [vmem:[#allocation49_spill] sm:$0xff] %v13041_v60  ;;  %vm18001_vm4 = vcmp.eq.s32.totalorder %v17670_v21, %v11572_v39  ;;  %v18002_v46 = vmov 0  ;;  %v13067_v25 = vsub.f32 %v6548_v19, %v6548_v19  ;;  %v13090_v61 = vpack.c.bf16 %v3751_v17, %v3739_v43  ;;  %v18018_v43 = vld [vmem:[#allocation238_spill] sm:$0xff]  ;;  %v18037_v29 = vld [vmem:[#allocation196_spill] sm:$0xff] }
 0x26f   :  { %17998 = vst [vmem:[#allocation50_spill] sm:$0xff] %v13043_v18  ;;  %v13048_v1 = vsub.f32 %v11710_v28, %v17999_v45  ;;  %vm13063_vm15 = vmpackc.low %vm18001_vm4, %vm18000_vm7  ;;  %v13069_v45 = vpack.c.bf16 %v3745_v5, %v3733_v23  ;;  %vm18006_vm7 = vcmp.eq.s32.totalorder %v17680_v27, %v11503_v47  ;;  %vm18007_vm4 = vcmp.eq.s32.totalorder %v17682_v11, %v11503_v47  ;;  %v18087_v28 = vld [vmem:[#allocation117_spill] sm:$0xff] }
 0x270   :  { %v18003_v46 = vsel %vm13063_vm15, 4294967295, %v18002_v46  ;;  %18005 = vst [vmem:[#allocation58_spill] sm:$0xff] %v13067_v25  ;;  %vm13086_vm2 = vmpackc.low %vm18007_vm4, %vm18006_vm7  ;;  %v18008_v23 = vmov 0  ;;  %v18011_v21 = vand.u32 4294901760, %v11718_v51  ;;  %v18012_v19 = vand.u32 4294901760, %v11764_v40  ;;  %3701 = vmatprep.mubr.f32.mxu0 %v18018_v43  ;;  %5047 = vmatprep.mubr.f32.mxu1 %v18018_v43 }
 0x271   :  { %18004 = vst [vmem:[#allocation55_spill] sm:$0xff] %v18003_v46  ;;  %v18009_v23 = vsel %vm13086_vm2, 4294967295, %v18008_v23  ;;  %vm18013_vm12 = vcmp.eq.s32.totalorder %v17680_v27, %v11518_v44  ;;  %vm18014_vm7 = vcmp.eq.s32.totalorder %v17682_v11, %v11518_v44  ;;  %v18015_v22 = vmov 0  ;;  %8481 = vmatpush1.bf16.msk.msra.mxu1 %vm13063_vm15, %v17710_v55  ;;  %v18031_v46 = vld [vmem:[#allocation194_spill] sm:$0xff]  ;;  %8099 = vmatprep.subr.msk.bf16.mxu0 %vm13086_vm2, %v17710_v55 }
 0x272   :  { %18010 = vst [vmem:[#allocation61_spill] sm:$0xff] %v18009_v23  ;;  %v13095_v4 = vsub.f32 %v11718_v51, %v18011_v21  ;;  %v13100_v5 = vsub.f32 %v11764_v40, %v18012_v19  ;;  %vm13108_vm4 = vmpackc.low %vm18014_vm7, %vm18013_vm12  ;;  %v13114_v17 = vpack.c.bf16 %v5097_v20, %v5085_v59  ;;  %vm18019_vm0 = vcmp.eq.s32.totalorder %v17680_v27, %v11556_v57 }
 0x273   :  { %v18016_v22 = vsel %vm13108_vm4, 4294967295, %v18015_v22  ;;  %vm18020_vm12 = vcmp.eq.s32.totalorder %v17682_v11, %v11556_v57  ;;  %v18021_v2 = vmov 0  ;;  %v18024_v59 = vand.u32 4294901760, %v11778_v33  ;;  %8483 = vmatprep.subr.msk.bf16.mxu1 %vm13108_vm4, %v17710_v55 }
 0x274   :  { %18017 = vst [vmem:[#allocation62_spill] sm:$0xff] %v18016_v22  ;;  %vm13125_vm7 = vmpackc.low %vm18020_vm12, %vm18019_vm0  ;;  %vm18025_vm0 = vcmp.eq.s32.totalorder %v17680_v27, %v11572_v39  ;;  %vm18026_vm12 = vcmp.eq.s32.totalorder %v17682_v11, %v11572_v39  ;;  %v18030_v43 = vand.u32 4294901760, %v11780_v37  ;;  %v18034_v27 = vmov 0 }
 0x275   :  { %v18022_v2 = vsel %vm13125_vm7, 4294967295, %v18021_v2  ;;  %v13133_v20 = vsub.f32 %v11778_v33, %v18024_v59  ;;  %vm13149_vm5 = vmpackc.low %vm18026_vm12, %vm18025_vm0  ;;  %v18027_v59 = vmov 0  ;;  %vm18032_vm0 = vcmp.eq.s32.totalorder %v17683_v36, %v11503_v47  ;;  %8101 = vmatpush1.bf16.msk.msra.mxu0 %vm13125_vm7, %v17710_v55 }
 0x276   :  { %18023 = vst [vmem:[#allocation67_spill] sm:$0xff] %v18022_v2  ;;  %v18028_v59 = vsel %vm13149_vm5, 4294967295, %v18027_v59  ;;  %v13156_v21 = vsub.f32 %v11780_v37, %v18030_v43  ;;  %vm18033_vm12 = vcmp.eq.s32.totalorder %v17684_v41, %v11503_v47  ;;  %vm18039_vm4 = vcmp.eq.s32.totalorder %v17683_v36, %v11518_v44  ;;  %8485 = vmatpush1.bf16.msk.msra.mxu1 %vm13149_vm5, %v17710_v55 }
 0x277   :  { %18029 = vst [vmem:[#allocation70_spill] sm:$0xff] %v18028_v59  ;;  %vm13173_vm15 = vmpackc.low %vm18033_vm12, %vm18032_vm0  ;;  %vm18040_vm2 = vcmp.eq.s32.totalorder %v17684_v41, %v11518_v44  ;;  %v18041_v22 = vmov 0  ;;  %vm18046_vm0 = vcmp.eq.s32.totalorder %v17683_v36, %v11556_v57  ;;  %vm18047_vm12 = vcmp.eq.s32.totalorder %v17684_v41, %v11556_v57 }
 0x278   :  { %v18035_v27 = vsel %vm13173_vm15, 4294967295, %v18034_v27  ;;  %vm13187_vm13 = vmpackc.low %vm18040_vm2, %vm18039_vm4  ;;  %v18048_v23 = vmov 0  ;;  %v5109_v37 = vand.u32 4294901760, %v13133_v20  ;;  %v18051_v48 = vand.u32 4294901760, %v11782_v9  ;;  %8103 = vmatprep.subr.msk.bf16.mxu0 %vm13173_vm15, %v17710_v55 }
 0x279   :  { %18036 = vst [vmem:[#allocation73_spill] sm:$0xff] %v18035_v27  ;;  %v18042_v22 = vsel %vm13187_vm13, 4294967295, %v18041_v22  ;;  %vm13201_vm9 = vmpackc.low %vm18047_vm12, %vm18046_vm0  ;;  %v18052_v43 = vand.u32 4294901760, %v11790_v16  ;;  %vm18053_vm2 = vcmp.eq.s32.totalorder %v17683_v36, %v11572_v39  ;;  %vm18054_vm4 = vcmp.eq.s32.totalorder %v17684_v41, %v11572_v39  ;;  %8487 = vmatprep.subr.msk.bf16.mxu1 %vm13187_vm13, %v17710_v55  ;;  %v18062_v41 = vld [vmem:[#allocation22_spill] sm:$0xff] }
 0x27a   :  { %18043 = vst [vmem:[#allocation74_spill] sm:$0xff] %v18042_v22  ;;  %v18049_v23 = vsel %vm13201_vm9, 4294967295, %v18048_v23  ;;  %v13209_v11 = vsub.f32 %v11782_v9, %v18051_v48  ;;  %vm13227_vm0 = vmpackc.low %vm18054_vm4, %vm18053_vm2  ;;  %v18055_v48 = vmov 0  ;;  %v5121_v20 = vand.u32 4294901760, %v13156_v21  ;;  %v18069_v22 = vld [vmem:[#allocation113_spill] sm:$0xff]  ;;  %8105 = vmatpush1.bf16.msk.msra.mxu0 %vm13201_vm9, %v17710_v55 }
 0x27b   :  { %18050 = vst [vmem:[#allocation132_spill] sm:$0xff] %v18049_v23  ;;  %v3792_v19 = vsub.f32 %v11790_v16, %v18052_v43  ;;  %v18056_v48 = vsel %vm13227_vm0, 4294967295, %v18055_v48  ;;  %v18058_v43 = vand.u32 4294901760, %v11792_v8  ;;  %v18059_v2 = vand.u32 4294901760, %v11794_v50  ;;  %8489 = vmatpush1.bf16.msk.msra.mxu1 %vm13227_vm0, %v17710_v55 }
 0x27c   :  { %18057 = vst [vmem:[#allocation135_spill] sm:$0xff] %v18056_v48  ;;  %v18060_v16 = vand.u32 4294901760, %v18031_v46  ;;  %vm18061_vm12 = vcmp.eq.s32.totalorder %v17696_v14, %v11503_v47  ;;  %vm18063_vm2 = vcmp.eq.s32.totalorder %v18062_v41, %v11503_v47  ;;  %vm18071_vm13 = vcmp.eq.s32.totalorder %v17696_v14, %v11518_v44 }
 0x27d   :  { %v5126_v33 = vsub.f32 %v11792_v8, %v18058_v43  ;;  %v5138_v59 = vsub.f32 %v11794_v50, %v18059_v2  ;;  %vm13253_vm4 = vmpackc.low %vm18063_vm2, %vm18061_vm12  ;;  %v18064_v2 = vmov 0  ;;  %v18068_v43 = vand.u32 4294901760, %v18038_v32  ;;  %v18070_v50 = vld [vmem:[#allocation114_spill] sm:$0xff] }
 0x27e   :  { %v3786_v36 = vsub.f32 %v18031_v46, %v18060_v16  ;;  %v18065_v2 = vsel %vm13253_vm4, 4294967295, %v18064_v2  ;;  %v18067_v16 = vand.u32 4294901760, %v18037_v29  ;;  %vm18072_vm12 = vcmp.eq.s32.totalorder %v18062_v41, %v11518_v44  ;;  %8107 = vmatprep.subr.msk.bf16.mxu0 %vm13253_vm4, %v17710_v55 }
 0x27f   :  { %18066 = vst [vmem:[#allocation79_spill] sm:$0xff] %v18065_v2  ;;  %v5132_v27 = vsub.f32 %v18038_v32, %v18068_v43  ;;  %vm13271_vm2 = vmpackc.low %vm18072_vm12, %vm18071_vm13  ;;  %v18073_v9 = vmov 0  ;;  %v18077_v43 = vand.u32 4294901760, %v18044_v13  ;;  %v18078_v8 = vand.u32 4294901760, %v18045_v10 }
 0x280   :  { %v3798_v21 = vsub.f32 %v18037_v29, %v18067_v16  ;;  %v18074_v9 = vsel %vm13271_vm2, 4294967295, %v18073_v9  ;;  %v18076_v16 = vand.u32 4294901760, %v11870_v6  ;;  %v18079_v40 = vand.u32 4294901760, %v11882_v35  ;;  %8491 = vmatprep.subr.msk.bf16.mxu1 %vm13271_vm2, %v17710_v55 }
 0x281   :  { %18075 = vst [vmem:[#allocation82_spill] sm:$0xff] %v18074_v9  ;;  %v3804_v46 = vsub.f32 %v18044_v13, %v18077_v43  ;;  %v3816_v32 = vsub.f32 %v18045_v10, %v18078_v8  ;;  %vm18080_vm13 = vcmp.eq.s32.totalorder %v17696_v14, %v11556_v57  ;;  %vm18081_vm12 = vcmp.eq.s32.totalorder %v18062_v41, %v11556_v57  ;;  %v18086_v10 = vld [vmem:[#allocation116_spill] sm:$0xff] }
 0x282   :  { %v5144_v29 = vsub.f32 %v11870_v6, %v18076_v16  ;;  %v5150_v51 = vsub.f32 %v11882_v35, %v18079_v40  ;;  %vm13293_vm15 = vmpackc.low %vm18081_vm12, %vm18080_vm13  ;;  %v18082_v16 = vmov 0  ;;  %v3781_v43 = vand.u32 4294901760, %v13209_v11 }
 0x283   :  { %v18083_v16 = vsel %vm13293_vm15, 4294967295, %v18082_v16  ;;  %v18085_v13 = vand.u32 4294901760, %v11884_v52  ;;  %vm18088_vm13 = vcmp.eq.s32.totalorder %v17696_v14, %v11572_v39  ;;  %vm18089_vm12 = vcmp.eq.s32.totalorder %v18062_v41, %v11572_v39  ;;  %v18093_v14 = vld [vmem:[#allocation23_spill] sm:$0xff]  ;;  %v18095_v41 = vld [vmem:[#allocation24_spill] sm:$0xff]  ;;  %8109 = vmatpush1.bf16.msk.msra.mxu0 %vm13293_vm15, %v17710_v55 }
 0x284   :  { %18084 = vst [vmem:[#allocation85_spill] sm:$0xff] %v18083_v16  ;;  %vm13315_vm5 = vmpackc.low %vm18089_vm12, %vm18088_vm13  ;;  %v3793_v11 = vand.u32 4294901760, %v3792_v19  ;;  %v5127_v40 = vand.u32 4294901760, %v5126_v33  ;;  %v5139_v6 = vand.u32 4294901760, %v5138_v59  ;;  %vm18094_vm0 = vcmp.eq.s32.totalorder %v18093_v14, %v11503_v47 }
 0x285   :  { %v5162_v8 = vsub.f32 %v11884_v52, %v18085_v13  ;;  %v18090_v13 = vmov 0  ;;  %v3787_v52 = vand.u32 4294901760, %v3786_v36  ;;  %vm18096_vm13 = vcmp.eq.s32.totalorder %v18095_v41, %v11503_v47  ;;  %8493 = vmatpush1.bf16.msk.msra.mxu1 %vm13315_vm5, %v17710_v55 }
 0x286   :  { %v18091_v13 = vsel %vm13315_vm5, 4294967295, %v18090_v13  ;;  %vm13331_vm12 = vmpackc.low %vm18096_vm13, %vm18094_vm0  ;;  %v18097_v48 = vmov 0  ;;  %v3799_v33 = vand.u32 4294901760, %v3798_v21  ;;  %v5133_v19 = vand.u32 4294901760, %v5132_v27 }
 0x287   :  { %18092 = vst [vmem:[#allocation86_spill] sm:$0xff] %v18091_v13  ;;  %v18098_v48 = vsel %vm13331_vm12, 4294967295, %v18097_v48  ;;  %v18100_v59 = vand.u32 4294901760, %v18069_v22  ;;  %v18101_v2 = vand.u32 4294901760, %v18070_v50  ;;  %vm18102_vm2 = vcmp.eq.s32.totalorder %v18093_v14, %v11518_v44  ;;  %8111 = vmatprep.subr.msk.bf16.mxu0 %vm13331_vm12, %v17710_v55 }
 0x288   :  { %18099 = vst [vmem:[#allocation91_spill] sm:$0xff] %v18098_v48  ;;  %vm18103_vm4 = vcmp.eq.s32.totalorder %v18095_v41, %v11518_v44  ;;  %v18104_v23 = vmov 0  ;;  %v5145_v21 = vand.u32 4294901760, %v5144_v29  ;;  %v3805_v27 = vand.u32 4294901760, %v3804_v46 }
 0x289   :  { %v3810_v36 = vsub.f32 %v18069_v22, %v18100_v59  ;;  %v3822_v9 = vsub.f32 %v18070_v50, %v18101_v2  ;;  %vm13347_vm0 = vmpackc.low %vm18103_vm4, %vm18102_vm2  ;;  %v3817_v35 = vand.u32 4294901760, %v3816_v32  ;;  %v5151_v49 = vand.u32 4294901760, %v5150_v51  ;;  %v18114_v51 = vld [vmem:[#allocation199_spill] sm:$0xff] }
 0x28a   :  { %v18105_v23 = vsel %vm13347_vm0, 4294967295, %v18104_v23  ;;  %vm18107_vm13 = vcmp.eq.s32.totalorder %v18093_v14, %v11556_v57  ;;  %vm18108_vm9 = vcmp.eq.s32.totalorder %v18095_v41, %v11556_v57  ;;  %v18109_v2 = vmov 0  ;;  %8495 = vmatprep.subr.msk.bf16.mxu1 %vm13347_vm0, %v17710_v55 }
 0x28b   :  { %18106 = vst [vmem:[#allocation94_spill] sm:$0xff] %v18105_v23  ;;  %vm13357_vm7 = vmpackc.low %vm18108_vm9, %vm18107_vm13  ;;  %v5163_v59 = vand.u32 4294901760, %v5162_v8  ;;  %v18112_v50 = vand.u32 4294901760, %v18086_v10  ;;  %v18113_v29 = vand.u32 4294901760, %v18087_v28  ;;  %vm18115_vm9 = vcmp.eq.s32.totalorder %v18093_v14, %v11572_v39 }
 0x28c   :  { %v18110_v2 = vsel %vm13357_vm7, 4294967295, %v18109_v2  ;;  %vm18116_vm4 = vcmp.eq.s32.totalorder %v18095_v41, %v11572_v39  ;;  %v18120_v8 = vand.u32 4294901760, %v13017_v56  ;;  %v18122_v16 = vand.u32 4294901760, %v13027_v0  ;;  %v18127_v0 = vld [vmem:[#allocation25_spill] sm:$0xff]  ;;  %8113 = vmatpush1.bf16.msk.msra.mxu0 %vm13357_vm7, %v17710_v55 }
 0x28d   :  { %18111 = vst [vmem:[#allocation97_spill] sm:$0xff] %v18110_v2  ;;  %v5156_v22 = vsub.f32 %v18086_v10, %v18112_v50  ;;  %v5168_v32 = vsub.f32 %v18087_v28, %v18113_v29  ;;  %vm13380_vm2 = vmpackc.low %vm18116_vm4, %vm18115_vm9  ;;  %v18117_v50 = vmov 0  ;;  %v18121_v29 = vand.u32 4294901760, %v13022_v3  ;;  %v18171_v2 = vld [vmem:[#allocation53_spill] sm:$0xff] }
 0x28e   :  { %v18118_v50 = vsel %vm13380_vm2, 4294967295, %v18117_v50  ;;  %v18123_v13 = vand.u32 4294901760, %v13048_v1  ;;  %v18124_v14 = vand.u32 4294901760, %v13095_v4  ;;  %v18125_v41 = vand.u32 4294901760, %v13100_v5  ;;  %v18129_v1 = vld [vmem:[#allocation26_spill] sm:$0xff]  ;;  %8497 = vmatpush1.bf16.msk.msra.mxu1 %vm13380_vm2, %v17710_v55 }
 0x28f   :  { %18119 = vst [vmem:[#allocation98_spill] sm:$0xff] %v18118_v50  ;;  %v13388_v46 = vpack.c.bf16 %v18121_v29, %v18120_v8  ;;  %v16427_v42 = vand.u32 4294901760, %v18126_v54  ;;  %vm18128_vm13 = vcmp.eq.s32.totalorder %v18127_v0, %v11503_v47  ;;  %vm18130_vm9 = vcmp.eq.s32.totalorder %v18129_v1, %v11503_v47  ;;  %v18170_v50 = vld [vmem:[#allocation52_spill] sm:$0xff] }
 0x290   :  { %v13394_v28 = vpack.c.bf16 %v18123_v13, %v18122_v16  ;;  %v13400_v10 = vpack.c.bf16 %v18125_v41, %v18124_v14  ;;  %vm13415_vm4 = vmpackc.low %vm18130_vm9, %vm18128_vm13  ;;  %v18131_v3 = vmov 0  ;;  %v13419_v56 = vpack.c.bf16 %v5121_v20, %v5109_v37 }
 0x291   :  { %v18132_v3 = vsel %vm13415_vm4, 4294967295, %v18131_v3  ;;  %v13421_v4 = vpack.c.bf16 %v3793_v11, %v3781_v43  ;;  %v3811_v5 = vand.u32 4294901760, %v3810_v36  ;;  %v3823_v16 = vand.u32 4294901760, %v3822_v9  ;;  %8115 = vmatprep.subr.msk.bf16.mxu0 %vm13415_vm4, %v17710_v55 }
 0x292   :  { %18133 = vst [vmem:[#allocation103_spill] sm:$0xff] %v18132_v3  ;;  %vm18134_vm12 = vcmp.eq.s32.totalorder %v18127_v0, %v11518_v44  ;;  %vm18135_vm0 = vcmp.eq.s32.totalorder %v18129_v1, %v11518_v44  ;;  %v18136_v13 = vmov 0  ;;  %v13433_v8 = vpack.c.bf16 %v5139_v6, %v5127_v40  ;;  %v18177_v3 = vld [vmem:[#allocation54_spill] sm:$0xff] }
 0x293   :  { %vm13429_vm5 = vmpackc.low %vm18135_vm0, %vm18134_vm12  ;;  %v13435_v29 = vpack.c.bf16 %v3799_v33, %v3787_v52  ;;  %v13437_v37 = vpack.c.bf16 %v5145_v21, %v5133_v19  ;;  %v13439_v20 = vpack.c.bf16 %v3817_v35, %v3805_v27  ;;  %vm18139_vm13 = vcmp.eq.s32.totalorder %v18127_v0, %v11556_v57  ;;  %v18151_v19 = vld [vmem:[#allocation41_spill] sm:$0xff]  ;;  %v18152_v21 = vld [vmem:[#allocation42_spill] sm:$0xff] }
 0x294   :  { %v18137_v13 = vsel %vm13429_vm5, 4294967295, %v18136_v13  ;;  %vm18140_vm9 = vcmp.eq.s32.totalorder %v18129_v1, %v11556_v57  ;;  %v18141_v9 = vmov 0  ;;  %v13451_v43 = vpack.c.bf16 %v5163_v59, %v5151_v49  ;;  %8499 = vmatprep.subr.msk.bf16.mxu1 %vm13429_vm5, %v17710_v55  ;;  %v18153_v59 = vld [vmem:[#allocation27_spill] sm:$0xff] }
 0x295   :  { %18138 = vst [vmem:[#allocation106_spill] sm:$0xff] %v18137_v13  ;;  %vm13447_vm15 = vmpackc.low %vm18140_vm9, %vm18139_vm13  ;;  %v5157_v6 = vand.u32 4294901760, %v5156_v22  ;;  %v5169_v40 = vand.u32 4294901760, %v5168_v32  ;;  %v18144_v52 = vand.u32 4294901760, %v18114_v51  ;;  %vm18145_vm12 = vcmp.eq.s32.totalorder %v18127_v0, %v11572_v39  ;;  %v18150_v22 = vld [vmem:[#allocation40_spill] sm:$0xff]  ;;  %v18155_v32 = vld [vmem:[#allocation121_spill] sm:$0xff] }
 0x296   :  { %v18142_v9 = vsel %vm13447_vm15, 4294967295, %v18141_v9  ;;  %vm18146_vm0 = vcmp.eq.s32.totalorder %v18129_v1, %v11572_v39  ;;  %v18147_v49 = vmov 0  ;;  %v3840_v35 = vsub.f32 %v18126_v54, %v16427_v42  ;;  %v18160_v0 = vld [vmem:[#allocation44_spill] sm:$0xff]  ;;  %v18162_v27 = vld [vmem:[#allocation47_spill] sm:$0xff]  ;;  %8117 = vmatpush1.bf16.msk.msra.mxu0 %vm13447_vm15, %v17710_v55 }
 0x297   :  { %18143 = vst [vmem:[#allocation109_spill] sm:$0xff] %v18142_v9  ;;  %v3828_v11 = vsub.f32 %v18114_v51, %v18144_v52  ;;  %vm13468_vm13 = vmpackc.low %vm18146_vm0, %vm18145_vm12  ;;  %vm18154_vm9 = vcmp.eq.s32.totalorder %v18153_v59, %v11503_v47  ;;  %vm18156_vm12 = vcmp.eq.s32.totalorder %v18155_v32, %v11503_v47  ;;  %v18157_v14 = vmov 0  ;;  %v18161_v52 = vld [vmem:[#allocation45_spill] sm:$0xff]  ;;  %v18168_v13 = vld [vmem:[#allocation48_spill] sm:$0xff] }
 0x298   :  { %v18148_v49 = vsel %vm13468_vm13, 4294967295, %v18147_v49  ;;  %vm13490_vm0 = vmpackc.low %vm18156_vm12, %vm18154_vm9  ;;  %v13494_v41 = vpack.c.bf16 %v3823_v16, %v3811_v5  ;;  %vm18163_vm5 = vcmp.eq.s32.totalorder %v18153_v59, %v11518_v44  ;;  %vm18164_vm4 = vcmp.eq.s32.totalorder %v18155_v32, %v11518_v44  ;;  %v18169_v5 = vld [vmem:[#allocation51_spill] sm:$0xff]  ;;  %v18178_v16 = vld [vmem:[#allocation56_spill] sm:$0xff]  ;;  %8501 = vmatpush1.bf16.msk.msra.mxu1 %vm13468_vm13, %v17710_v55 }
 0x299   :  { %18149 = vst [vmem:[#allocation110_spill] sm:$0xff] %v18148_v49  ;;  %v18158_v14 = vsel %vm13490_vm0, 4294967295, %v18157_v14  ;;  %vm13505_vm2 = vmpackc.low %vm18164_vm4, %vm18163_vm5  ;;  %v18165_v33 = vmov 0  ;;  %vm18172_vm9 = vcmp.eq.s32.totalorder %v18153_v59, %v11556_v57  ;;  %vm18173_vm12 = vcmp.eq.s32.totalorder %v18155_v32, %v11556_v57  ;;  %8119 = vmatprep.subr.msk.bf16.mxu0 %vm13490_vm0, %v17710_v55 }
 0x29a   :  { %18159 = vst [vmem:[#allocation115_spill] sm:$0xff] %v18158_v14  ;;  %v18166_v33 = vsel %vm13505_vm2, 4294967295, %v18165_v33  ;;  %vm13519_vm7 = vmpackc.low %vm18173_vm12, %vm18172_vm9  ;;  %v18174_v36 = vmov 0  ;;  %v13523_v23 = vpack.c.bf16 %v5169_v40, %v5157_v6  ;;  %v3829_v48 = vand.u32 4294901760, %v3828_v11  ;;  %8503 = vmatprep.subr.msk.bf16.mxu1 %vm13505_vm2, %v17710_v55 }
 0x29b   :  { %18167 = vst [vmem:[#allocation118_spill] sm:$0xff] %v18166_v33  ;;  %v18175_v36 = vsel %vm13519_vm7, 4294967295, %v18174_v36  ;;  %vm18179_vm5 = vcmp.eq.s32.totalorder %v18153_v59, %v11572_v39  ;;  %vm18180_vm4 = vcmp.eq.s32.totalorder %v18155_v32, %v11572_v39  ;;  %v18181_v6 = vmov 0  ;;  %8121 = vmatpush1.bf16.msk.msra.mxu0 %vm13519_vm7, %v17710_v55 }
 0x29c   :  { %18176 = vst [vmem:[#allocation122_spill] sm:$0xff] %v18175_v36  ;;  %vm13539_vm9 = vmpackc.low %vm18180_vm4, %vm18179_vm5  ;;  %v3841_v40 = vand.u32 4294901760, %v3840_v35  ;;  %v18184_v11 = vand.u32 4294901760, %v18150_v22  ;;  %v18185_v54 = vand.u32 4294901760, %v18151_v19  ;;  %v18186_v1 = vand.u32 4294901760, %v18152_v21  ;;  %v18218_v36 = vld [vmem:[#allocation60_spill] sm:$0xff] }
 0x29d   :  { %v18182_v6 = vsel %vm13539_vm9, 4294967295, %v18181_v6  ;;  %vm18187_vm12 = vcmp.eq.s32.totalorder %v17770_v26, %v11503_v47  ;;  %vm18188_vm5 = vcmp.eq.s32.totalorder %v17771_v12, %v11503_v47  ;;  %v18192_v35 = vand.u32 4294901760, %v18160_v0  ;;  %8505 = vmatpush1.bf16.msk.msra.mxu1 %vm13539_vm9, %v17710_v55 }
 0x29e   :  { %18183 = vst [vmem:[#allocation126_spill] sm:$0xff] %v18182_v6  ;;  %v5174_v51 = vsub.f32 %v18150_v22, %v18184_v11  ;;  %v5186_v42 = vsub.f32 %v18151_v19, %v18185_v54  ;;  %v3834_v59 = vsub.f32 %v18152_v21, %v18186_v1  ;;  %vm13564_vm4 = vmpackc.low %vm18188_vm5, %vm18187_vm12  ;;  %v18189_v54 = vmov 0 }
 0x29f   :  { %v18190_v54 = vsel %vm13564_vm4, 4294967295, %v18189_v54  ;;  %v3846_v32 = vsub.f32 %v18160_v0, %v18192_v35  ;;  %v18193_v1 = vand.u32 4294901760, %v18161_v52  ;;  %v18194_v33 = vand.u32 4294901760, %v18162_v27  ;;  %8123 = vmatprep.subr.msk.bf16.mxu0 %vm13564_vm4, %v17710_v55 }
 0x2a0   :  { %18191 = vst [vmem:[#allocation128_spill] sm:$0xff] %v18190_v54  ;;  %vm18195_vm2 = vcmp.eq.s32.totalorder %v17770_v26, %v11518_v44  ;;  %vm18196_vm12 = vcmp.eq.s32.totalorder %v17771_v12, %v11518_v44  ;;  %v18197_v49 = vmov 0  ;;  %v18200_v35 = vand.u32 4294901760, %v18168_v13 }
 0x2a1   :  { %v5180_v11 = vsub.f32 %v18161_v52, %v18193_v1  ;;  %v5192_v14 = vsub.f32 %v18162_v27, %v18194_v33  ;;  %vm13583_vm5 = vmpackc.low %vm18196_vm12, %vm18195_vm2  ;;  %v18201_v1 = vand.u32 4294901760, %v18169_v5  ;;  %v18202_v33 = vand.u32 4294901760, %v18170_v50 }
 0x2a2   :  { %v18198_v49 = vsel %vm13583_vm5, 4294967295, %v18197_v49  ;;  %v3852_v9 = vsub.f32 %v18168_v13, %v18200_v35  ;;  %v18203_v0 = vand.u32 4294901760, %v18171_v2  ;;  %vm18204_vm2 = vcmp.eq.s32.totalorder %v17770_v26, %v11556_v57  ;;  %v18211_v13 = vld [vmem:[#allocation57_spill] sm:$0xff]  ;;  %8507 = vmatprep.subr.msk.bf16.mxu1 %vm13583_vm5, %v17710_v55 }
 0x2a3   :  { %18199 = vst [vmem:[#allocation131_spill] sm:$0xff] %v18198_v49  ;;  %v3864_v52 = vsub.f32 %v18169_v5, %v18201_v1  ;;  %v5198_v27 = vsub.f32 %v18170_v50, %v18202_v33  ;;  %vm18205_vm12 = vcmp.eq.s32.totalorder %v17771_v12, %v11556_v57  ;;  %v18206_v35 = vmov 0 }
 0x2a4   :  { %v5210_v21 = vsub.f32 %v18171_v2, %v18203_v0  ;;  %vm13605_vm0 = vmpackc.low %vm18205_vm12, %vm18204_vm2  ;;  %v18209_v1 = vand.u32 4294901760, %v18177_v3  ;;  %v18210_v33 = vand.u32 4294901760, %v18178_v16  ;;  %v18212_v2 = vld [vmem:[#allocation59_spill] sm:$0xff]  ;;  %vm18213_vm2 = vcmp.eq.s32.totalorder %v17770_v26, %v11572_v39 }
 0x2a5   :  { %v18207_v35 = vsel %vm13605_vm0, 4294967295, %v18206_v35  ;;  %vm18214_vm12 = vcmp.eq.s32.totalorder %v17771_v12, %v11572_v39  ;;  %v5175_v19 = vand.u32 4294901760, %v5174_v51  ;;  %v5187_v0 = vand.u32 4294901760, %v5186_v42  ;;  %v18219_v26 = vld [vmem:[#allocation147_spill] sm:$0xff]  ;;  %v18221_v12 = vld [vmem:[#allocation148_spill] sm:$0xff]  ;;  %8125 = vmatpush1.bf16.msk.msra.mxu0 %vm13605_vm0, %v17710_v55 }
 0x2a6   :  { %18208 = vst [vmem:[#allocation136_spill] sm:$0xff] %v18207_v35  ;;  %v3858_v5 = vsub.f32 %v18177_v3, %v18209_v1  ;;  %v3870_v50 = vsub.f32 %v18178_v16, %v18210_v33  ;;  %vm13629_vm13 = vmpackc.low %vm18214_vm12, %vm18213_vm2  ;;  %v18215_v1 = vmov 0  ;;  %v13633_v33 = vpack.c.bf16 %v3841_v40, %v3829_v48  ;;  %v18246_v35 = vld [vmem:[#allocation65_spill] sm:$0xff] }
 0x2a7   :  { %v18216_v1 = vsel %vm13629_vm13, 4294967295, %v18215_v1  ;;  %vm18220_vm2 = vcmp.eq.s32.totalorder %v18219_v26, %v11503_v47  ;;  %vm18222_vm12 = vcmp.eq.s32.totalorder %v18221_v12, %v11503_v47  ;;  %v18223_v48 = vmov 0  ;;  %8509 = vmatpush1.bf16.msk.msra.mxu1 %vm13629_vm13, %v17710_v55 }
 0x2a8   :  { %18217 = vst [vmem:[#allocation139_spill] sm:$0xff] %v18216_v1  ;;  %vm13648_vm9 = vmpackc.low %vm18222_vm12, %vm18220_vm2  ;;  %v3835_v42 = vand.u32 4294901760, %v3834_v59  ;;  %v3847_v51 = vand.u32 4294901760, %v3846_v32  ;;  %v5181_v40 = vand.u32 4294901760, %v5180_v11  ;;  %v5193_v16 = vand.u32 4294901760, %v5192_v14 }
 0x2a9   :  { %v18224_v48 = vsel %vm13648_vm9, 4294967295, %v18223_v48  ;;  %vm18226_vm4 = vcmp.eq.s32.totalorder %v18219_v26, %v11518_v44  ;;  %vm18227_vm5 = vcmp.eq.s32.totalorder %v18221_v12, %v11518_v44  ;;  %v18228_v49 = vmov 0  ;;  %8127 = vmatprep.subr.msk.bf16.mxu0 %vm13648_vm9, %v17710_v55 }
 0x2aa   :  { %18225 = vst [vmem:[#allocation142_spill] sm:$0xff] %v18224_v48  ;;  %vm13658_vm7 = vmpackc.low %vm18227_vm5, %vm18226_vm4  ;;  %v3853_v54 = vand.u32 4294901760, %v3852_v9  ;;  %v3865_v6 = vand.u32 4294901760, %v3864_v52  ;;  %v5199_v3 = vand.u32 4294901760, %v5198_v27  ;;  %v5211_v22 = vand.u32 4294901760, %v5210_v21  ;;  %v18255_v48 = vld [vmem:[#allocation68_spill] sm:$0xff] }
 0x2ab   :  { %v18229_v49 = vsel %vm13658_vm7, 4294967295, %v18228_v49  ;;  %vm18231_vm2 = vcmp.eq.s32.totalorder %v18219_v26, %v11556_v57  ;;  %vm18232_vm12 = vcmp.eq.s32.totalorder %v18221_v12, %v11556_v57  ;;  %v18233_v14 = vmov 0  ;;  %8511 = vmatprep.subr.msk.bf16.mxu1 %vm13658_vm7, %v17710_v55 }
 0x2ac   :  { %18230 = vst [vmem:[#allocation145_spill] sm:$0xff] %v18229_v49  ;;  %vm13668_vm15 = vmpackc.low %vm18232_vm12, %vm18231_vm2  ;;  %v3859_v59 = vand.u32 4294901760, %v3858_v5  ;;  %v3871_v32 = vand.u32 4294901760, %v3870_v50  ;;  %v18236_v11 = vand.u32 4294901760, %v18211_v13  ;;  %v18237_v9 = vand.u32 4294901760, %v18212_v2  ;;  %v18244_v5 = vld [vmem:[#allocation63_spill] sm:$0xff] }
 0x2ad   :  { %v18234_v14 = vsel %vm13668_vm15, 4294967295, %v18233_v14  ;;  %vm18238_vm4 = vcmp.eq.s32.totalorder %v18219_v26, %v11572_v39  ;;  %vm18239_vm5 = vcmp.eq.s32.totalorder %v18221_v12, %v11572_v39  ;;  %v18240_v50 = vmov 0  ;;  %v18247_v26 = vld [vmem:[#allocation150_spill] sm:$0xff]  ;;  %v18249_v12 = vld [vmem:[#allocation163_spill] sm:$0xff]  ;;  %8129 = vmatpush1.bf16.msk.msra.mxu0 %vm13668_vm15, %v17710_v55 }
 0x2ae   :  { %18235 = vst [vmem:[#allocation151_spill] sm:$0xff] %v18234_v14  ;;  %v5204_v38 = vsub.f32 %v18211_v13, %v18236_v11  ;;  %v5216_v21 = vsub.f32 %v18212_v2, %v18237_v9  ;;  %vm13690_vm2 = vmpackc.low %vm18239_vm5, %vm18238_vm4  ;;  %v18243_v27 = vand.u32 4294901760, %v18218_v36  ;;  %v18245_v9 = vld [vmem:[#allocation64_spill] sm:$0xff]  ;;  %vm18248_vm12 = vcmp.eq.s32.totalorder %v18247_v26, %v11503_v47  ;;  %v18254_v2 = vld [vmem:[#allocation66_spill] sm:$0xff] }
 0x2af   :  { %v18241_v50 = vsel %vm13690_vm2, 4294967295, %v18240_v50  ;;  %vm18250_vm4 = vcmp.eq.s32.totalorder %v18249_v12, %v11503_v47  ;;  %v13718_v1 = vpack.c.bf16 %v5187_v0, %v5175_v19  ;;  %v18256_v13 = vld [vmem:[#allocation69_spill] sm:$0xff]  ;;  %vm18257_vm7 = vcmp.eq.s32.totalorder %v18247_v26, %v11518_v44  ;;  %v18262_v11 = vld [vmem:[#allocation71_spill] sm:$0xff]  ;;  %8513 = vmatpush1.bf16.msk.msra.mxu1 %vm13690_vm2, %v17710_v55 }
 0x2b0   :  { %18242 = vst [vmem:[#allocation154_spill] sm:$0xff] %v18241_v50  ;;  %v13697_v52 = vsub.f32 %v18218_v36, %v18243_v27  ;;  %vm13714_vm5 = vmpackc.low %vm18250_vm4, %vm18248_vm12  ;;  %v18251_v27 = vmov 0  ;;  %vm18258_vm9 = vcmp.eq.s32.totalorder %v18249_v12, %v11518_v44  ;;  %v18259_v49 = vmov 0 }
 0x2b1   :  { %v18252_v27 = vsel %vm13714_vm5, 4294967295, %v18251_v27  ;;  %vm13729_vm13 = vmpackc.low %vm18258_vm9, %vm18257_vm7  ;;  %v13733_v18 = vpack.c.bf16 %v3847_v51, %v3835_v42  ;;  %v13735_v19 = vpack.c.bf16 %v5193_v16, %v5181_v40  ;;  %v13737_v0 = vpack.c.bf16 %v3865_v6, %v3853_v54  ;;  %8131 = vmatprep.subr.msk.bf16.mxu0 %vm13714_vm5, %v17710_v55 }
 0x2b2   :  { %18253 = vst [vmem:[#allocation157_spill] sm:$0xff] %v18252_v27  ;;  %v18260_v49 = vsel %vm13729_vm13, 4294967295, %v18259_v49  ;;  %vm18263_vm12 = vcmp.eq.s32.totalorder %v18247_v26, %v11556_v57  ;;  %vm18264_vm4 = vcmp.eq.s32.totalorder %v18249_v12, %v11556_v57  ;;  %v18265_v25 = vmov 0  ;;  %8515 = vmatprep.subr.msk.bf16.mxu1 %vm13729_vm13, %v17710_v55  ;;  %v18286_v27 = vld [vmem:[#allocation72_spill] sm:$0xff] }
 0x2b3   :  { %18261 = vst [vmem:[#allocation160_spill] sm:$0xff] %v18260_v49  ;;  %vm13746_vm0 = vmpackc.low %vm18264_vm4, %vm18263_vm12  ;;  %v13750_v60 = vpack.c.bf16 %v5211_v22, %v5199_v3  ;;  %v13752_v42 = vpack.c.bf16 %v3871_v32, %v3859_v59  ;;  %v5205_v16 = vand.u32 4294901760, %v5204_v38  ;;  %v5217_v51 = vand.u32 4294901760, %v5216_v21  ;;  %v18276_v21 = vld [vmem:[#allocation175_spill] sm:$0xff] }
 0x2b4   :  { %v18266_v25 = vsel %vm13746_vm0, 4294967295, %v18265_v25  ;;  %vm18268_vm7 = vcmp.eq.s32.totalorder %v18247_v26, %v11572_v39  ;;  %vm18269_vm9 = vcmp.eq.s32.totalorder %v18249_v12, %v11572_v39  ;;  %v18270_v3 = vmov 0  ;;  %8133 = vmatpush1.bf16.msk.msra.mxu0 %vm13746_vm0, %v17710_v55 }
 0x2b5   :  { %18267 = vst [vmem:[#allocation165_spill] sm:$0xff] %v18266_v25  ;;  %vm13766_vm12 = vmpackc.low %vm18269_vm9, %vm18268_vm7  ;;  %v3877_v38 = vand.u32 4294901760, %v13697_v52  ;;  %v18273_v22 = vand.u32 4294901760, %v18244_v5  ;;  %v18274_v54 = vand.u32 4294901760, %v18245_v9  ;;  %v18275_v59 = vand.u32 4294901760, %v18246_v35  ;;  %v18278_v52 = vld [vmem:[#allocation176_spill] sm:$0xff] }
 0x2b6   :  { %v18271_v3 = vsel %vm13766_vm12, 4294967295, %v18270_v3  ;;  %vm18277_vm4 = vcmp.eq.s32.totalorder %v18276_v21, %v11503_v47  ;;  %vm18279_vm7 = vcmp.eq.s32.totalorder %v18278_v52, %v11503_v47  ;;  %v18280_v26 = vmov 0  ;;  %8517 = vmatpush1.bf16.msk.msra.mxu1 %vm13766_vm12, %v17710_v55 }
 0x2b7   :  { %18272 = vst [vmem:[#allocation167_spill] sm:$0xff] %v18271_v3  ;;  %v3888_v6 = vsub.f32 %v18244_v5, %v18273_v22  ;;  %v5222_v40 = vsub.f32 %v18245_v9, %v18274_v54  ;;  %v5234_v32 = vsub.f32 %v18246_v35, %v18275_v59  ;;  %vm13792_vm9 = vmpackc.low %vm18279_vm7, %vm18277_vm4  ;;  %v18283_v12 = vand.u32 4294901760, %v18254_v2  ;;  %v18294_v35 = vld [vmem:[#allocation76_spill] sm:$0xff] }
 0x2b8   :  { %v18281_v26 = vsel %vm13792_vm9, 4294967295, %v18280_v26  ;;  %v18284_v54 = vand.u32 4294901760, %v18255_v48  ;;  %v18285_v36 = vand.u32 4294901760, %v18256_v13  ;;  %vm18287_vm4 = vcmp.eq.s32.totalorder %v18276_v21, %v11518_v44  ;;  %8135 = vmatprep.subr.msk.bf16.mxu0 %vm13792_vm9, %v17710_v55 }
 0x2b9   :  { %18282 = vst [vmem:[#allocation170_spill] sm:$0xff] %v18281_v26  ;;  %v3882_v22 = vsub.f32 %v18254_v2, %v18283_v12  ;;  %vm18288_vm7 = vcmp.eq.s32.totalorder %v18278_v52, %v11518_v44  ;;  %v18289_v14 = vmov 0  ;;  %v18292_v12 = vand.u32 4294901760, %v18262_v11 }
 0x2ba   :  { %v3894_v59 = vsub.f32 %v18255_v48, %v18284_v54  ;;  %v5228_v49 = vsub.f32 %v18256_v13, %v18285_v36  ;;  %vm13812_vm13 = vmpackc.low %vm18288_vm7, %vm18287_vm4  ;;  %v18293_v48 = vld [vmem:[#allocation75_spill] sm:$0xff]  ;;  %v18295_v13 = vld [vmem:[#allocation77_spill] sm:$0xff]  ;;  %vm18296_vm5 = vcmp.eq.s32.totalorder %v18276_v21, %v11556_v57  ;;  %vm18297_vm2 = vcmp.eq.s32.totalorder %v18278_v52, %v11556_v57 }
 0x2bb   :  { %v18290_v14 = vsel %vm13812_vm13, 4294967295, %v18289_v14  ;;  %v5240_v54 = vsub.f32 %v18262_v11, %v18292_v12  ;;  %vm13828_vm4 = vmpackc.low %vm18297_vm2, %vm18296_vm5  ;;  %v18298_v9 = vmov 0  ;;  %v13832_v5 = vpack.c.bf16 %v5217_v51, %v5205_v16  ;;  %v18302_v11 = vld [vmem:[#allocation80_spill] sm:$0xff]  ;;  %v18309_v12 = vld [vmem:[#allocation83_spill] sm:$0xff]  ;;  %8519 = vmatprep.subr.msk.bf16.mxu1 %vm13812_vm13, %v17710_v55 }
 0x2bc   :  { %18291 = vst [vmem:[#allocation173_spill] sm:$0xff] %v18290_v14  ;;  %v18299_v9 = vsel %vm13828_vm4, 4294967295, %v18298_v9  ;;  %vm18304_vm2 = vcmp.eq.s32.totalorder %v18276_v21, %v11572_v39  ;;  %vm18305_vm5 = vcmp.eq.s32.totalorder %v18278_v52, %v11572_v39  ;;  %v18306_v16 = vmov 0  ;;  %v18310_v21 = vld [vmem:[#allocation178_spill] sm:$0xff]  ;;  %v18312_v52 = vld [vmem:[#allocation191_spill] sm:$0xff]  ;;  %8137 = vmatpush1.bf16.msk.msra.mxu0 %vm13828_vm4, %v17710_v55 }
 0x2bd   :  { %18300 = vst [vmem:[#allocation179_spill] sm:$0xff] %v18299_v9  ;;  %vm13849_vm7 = vmpackc.low %vm18305_vm5, %vm18304_vm2  ;;  %v3889_v51 = vand.u32 4294901760, %v3888_v6  ;;  %v5223_v36 = vand.u32 4294901760, %v5222_v40  ;;  %v5235_v2 = vand.u32 4294901760, %v5234_v32  ;;  %vm18311_vm12 = vcmp.eq.s32.totalorder %v18310_v21, %v11503_v47 }
 0x2be   :  { %v18307_v16 = vsel %vm13849_vm7, 4294967295, %v18306_v16  ;;  %vm18313_vm2 = vcmp.eq.s32.totalorder %v18312_v52, %v11503_v47  ;;  %v18314_v6 = vmov 0  ;;  %v3883_v40 = vand.u32 4294901760, %v3882_v22  ;;  %8521 = vmatpush1.bf16.msk.msra.mxu1 %vm13849_vm7, %v17710_v55 }
 0x2bf   :  { %18308 = vst [vmem:[#allocation182_spill] sm:$0xff] %v18307_v16  ;;  %vm13866_vm5 = vmpackc.low %vm18313_vm2, %vm18311_vm12  ;;  %v3895_v32 = vand.u32 4294901760, %v3894_v59  ;;  %v5229_v50 = vand.u32 4294901760, %v5228_v49  ;;  %v18317_v26 = vand.u32 4294901760, %v18286_v27  ;;  %vm18318_vm13 = vcmp.eq.s32.totalorder %v18310_v21, %v11518_v44  ;;  %v18341_v16 = vld [vmem:[#allocation87_spill] sm:$0xff] }
 0x2c0   :  { %v18315_v6 = vsel %vm13866_vm5, 4294967295, %v18314_v6  ;;  %vm18319_vm9 = vcmp.eq.s32.totalorder %v18312_v52, %v11518_v44  ;;  %v18320_v14 = vmov 0  ;;  %v5241_v25 = vand.u32 4294901760, %v5240_v54  ;;  %8139 = vmatprep.subr.msk.bf16.mxu0 %vm13866_vm5, %v17710_v55 }
 0x2c1   :  { %18316 = vst [vmem:[#allocation203_spill] sm:$0xff] %v18315_v6  ;;  %v3900_v3 = vsub.f32 %v18286_v27, %v18317_v26  ;;  %vm13879_vm0 = vmpackc.low %vm18319_vm9, %vm18318_vm13  ;;  %v18323_v30 = vand.u32 4294901760, %v18293_v48  ;;  %v18324_v49 = vand.u32 4294901760, %v18294_v35  ;;  %v18325_v26 = vand.u32 4294901760, %v18295_v13 }
 0x2c2   :  { %v18321_v14 = vsel %vm13879_vm0, 4294967295, %v18320_v14  ;;  %vm18326_vm12 = vcmp.eq.s32.totalorder %v18310_v21, %v11556_v57  ;;  %vm18327_vm13 = vcmp.eq.s32.totalorder %v18312_v52, %v11556_v57  ;;  %v18328_v54 = vmov 0  ;;  %8523 = vmatprep.subr.msk.bf16.mxu1 %vm13879_vm0, %v17710_v55 }
 0x2c3   :  { %18322 = vst [vmem:[#allocation204_spill] sm:$0xff] %v18321_v14  ;;  %v3912_v22 = vsub.f32 %v18293_v48, %v18323_v30  ;;  %v5246_v59 = vsub.f32 %v18294_v35, %v18324_v49  ;;  %v5258_v27 = vsub.f32 %v18295_v13, %v18325_v26  ;;  %vm13898_vm9 = vmpackc.low %vm18327_vm13, %vm18326_vm12  ;;  %v18331_v30 = vand.u32 4294901760, %v18301_v58 }
 0x2c4   :  { %v18329_v54 = vsel %vm13898_vm9, 4294967295, %v18328_v54  ;;  %v18332_v49 = vand.u32 4294901760, %v18302_v11  ;;  %v18333_v26 = vand.u32 4294901760, %v18303_v53  ;;  %vm18335_vm2 = vcmp.eq.s32.totalorder %v18310_v21, %v11572_v39  ;;  %v18349_v21 = vld [vmem:[#allocation89_spill] sm:$0xff]  ;;  %8141 = vmatpush1.bf16.msk.msra.mxu0 %vm13898_vm9, %v17710_v55 }
 0x2c5   :  { %18330 = vst [vmem:[#allocation185_spill] sm:$0xff] %v18329_v54  ;;  %v3906_v48 = vsub.f32 %v18301_v58, %v18331_v30  ;;  %vm18336_vm12 = vcmp.eq.s32.totalorder %v18312_v52, %v11572_v39  ;;  %v18337_v30 = vmov 0  ;;  %v18340_v62 = vand.u32 4294901760, %v18309_v12  ;;  %v18385_v54 = vld [vmem:[#allocation96_spill] sm:$0xff] }
 0x2c6   :  { %v3918_v35 = vsub.f32 %v18302_v11, %v18332_v49  ;;  %v5252_v13 = vsub.f32 %v18303_v53, %v18333_v26  ;;  %vm13924_vm13 = vmpackc.low %vm18336_vm12, %vm18335_vm2  ;;  %v13928_v49 = vpack.c.bf16 %v3889_v51, %v3877_v38  ;;  %v13930_v26 = vpack.c.bf16 %v5235_v2, %v5223_v36  ;;  %v18348_v36 = vld [vmem:[#allocation88_spill] sm:$0xff] }
 0x2c7   :  { %v18338_v30 = vsel %vm13924_vm13, 4294967295, %v18337_v30  ;;  %v5264_v9 = vsub.f32 %v18309_v12, %v18340_v62  ;;  %vm18342_vm2 = vcmp.eq.s32.totalorder %v17887_v31, %v11503_v47  ;;  %vm18343_vm12 = vcmp.eq.s32.totalorder %v17888_v34, %v11503_v47  ;;  %8525 = vmatpush1.bf16.msk.msra.mxu1 %vm13924_vm13, %v17710_v55 }
 0x2c8   :  { %18339 = vst [vmem:[#allocation188_spill] sm:$0xff] %v18338_v30  ;;  %vm13948_vm7 = vmpackc.low %vm18343_vm12, %vm18342_vm2  ;;  %v18344_v2 = vmov 0  ;;  %v13952_v62 = vpack.c.bf16 %v3895_v32, %v3883_v40  ;;  %v3901_v38 = vand.u32 4294901760, %v3900_v3  ;;  %vm18350_vm0 = vcmp.eq.s32.totalorder %v17887_v31, %v11518_v44 }
 0x2c9   :  { %v18345_v2 = vsel %vm13948_vm7, 4294967295, %v18344_v2  ;;  %vm18351_vm5 = vcmp.eq.s32.totalorder %v17888_v34, %v11518_v44  ;;  %v18352_v53 = vmov 0  ;;  %v13966_v14 = vpack.c.bf16 %v5241_v25, %v5229_v50  ;;  %8143 = vmatprep.subr.msk.bf16.mxu0 %vm13948_vm7, %v17710_v55 }
 0x2ca   :  { %18346 = vst [vmem:[#allocation193_spill] sm:$0xff] %v18345_v2  ;;  %18347 = vst [vmem:[#allocation195_spill] sm:$0xff] %v13952_v62  ;;  %v3913_v6 = vand.u32 4294901760, %v3912_v22  ;;  %v5247_v40 = vand.u32 4294901760, %v5246_v59  ;;  %v5259_v32 = vand.u32 4294901760, %v5258_v27  ;;  %vm18356_vm2 = vcmp.eq.s32.totalorder %v17887_v31, %v11556_v57  ;;  %v18369_v22 = vld [vmem:[#allocation92_spill] sm:$0xff] }
 0x2cb   :  { %vm13962_vm4 = vmpackc.low %vm18351_vm5, %vm18350_vm0  ;;  %18355 = vst [vmem:[#allocation201_spill] sm:$0xff] %v13966_v14  ;;  %vm18357_vm12 = vcmp.eq.s32.totalorder %v17888_v34, %v11556_v57  ;;  %v18358_v3 = vmov 0  ;;  %v3907_v52 = vand.u32 4294901760, %v3906_v48  ;;  %v3919_v51 = vand.u32 4294901760, %v3918_v35  ;;  %v18377_v27 = vld [vmem:[#allocation93_spill] sm:$0xff]  ;;  %v18378_v2 = vld [vmem:[#allocation95_spill] sm:$0xff] }
 0x2cc   :  { %v18353_v53 = vsel %vm13962_vm4, 4294967295, %v18352_v53  ;;  %vm13974_vm15 = vmpackc.low %vm18357_vm12, %vm18356_vm2  ;;  %v5253_v12 = vand.u32 4294901760, %v5252_v13  ;;  %v18361_v11 = vand.u32 4294901760, %v18334_v24  ;;  %vm18362_vm0 = vcmp.eq.s32.totalorder %v17887_v31, %v11572_v39  ;;  %8527 = vmatprep.subr.msk.bf16.mxu1 %vm13962_vm4, %v17710_v55  ;;  %v18390_v14 = vld [vmem:[#allocation101_spill] sm:$0xff] }
 0x2cd   :  { %18354 = vst [vmem:[#allocation198_spill] sm:$0xff] %v18353_v53  ;;  %v18359_v3 = vsel %vm13974_vm15, 4294967295, %v18358_v3  ;;  %vm18363_vm5 = vcmp.eq.s32.totalorder %v17888_v34, %v11572_v39  ;;  %v18364_v13 = vmov 0  ;;  %v5265_v35 = vand.u32 4294901760, %v5264_v9  ;;  %8145 = vmatpush1.bf16.msk.msra.mxu0 %vm13974_vm15, %v17710_v55 }
 0x2ce   :  { %18360 = vst [vmem:[#allocation206_spill] sm:$0xff] %v18359_v3  ;;  %v13981_v25 = vsub.f32 %v18334_v24, %v18361_v11  ;;  %vm13995_vm2 = vmpackc.low %vm18363_vm5, %vm18362_vm0  ;;  %v18367_v48 = vand.u32 4294901760, %v18341_v16  ;;  %v18368_v11 = vld [vmem:[#allocation90_spill] sm:$0xff]  ;;  %vm18370_vm12 = vcmp.eq.s32.totalorder %v17910_v7, %v11503_v47  ;;  %vm18371_vm0 = vcmp.eq.s32.totalorder %v17914_v63, %v11503_v47 }
 0x2cf   :  { %v18365_v13 = vsel %vm13995_vm2, 4294967295, %v18364_v13  ;;  %vm14018_vm5 = vmpackc.low %vm18371_vm0, %vm18370_vm12  ;;  %v18372_v31 = vmov 0  ;;  %v18375_v34 = vand.u32 4294901760, %v18348_v36  ;;  %vm18379_vm12 = vcmp.eq.s32.totalorder %v17910_v7, %v11518_v44  ;;  %8529 = vmatpush1.bf16.msk.msra.mxu1 %vm13995_vm2, %v17710_v55 }
 0x2d0   :  { %18366 = vst [vmem:[#allocation207_spill] sm:$0xff] %v18365_v13  ;;  %v14002_v50 = vsub.f32 %v18341_v16, %v18367_v48  ;;  %v18373_v31 = vsel %vm14018_vm5, 4294967295, %v18372_v31  ;;  %v18376_v48 = vand.u32 4294901760, %v18349_v21  ;;  %vm18380_vm0 = vcmp.eq.s32.totalorder %v17914_v63, %v11518_v44  ;;  %v18387_v16 = vld [vmem:[#allocation100_spill] sm:$0xff]  ;;  %8147 = vmatprep.subr.msk.bf16.mxu0 %vm14018_vm5, %v17710_v55 }
 0x2d1   :  { %18374 = vst [vmem:[#allocation210_spill] sm:$0xff] %v18373_v31  ;;  %v14025_v9 = vsub.f32 %v18348_v36, %v18375_v34  ;;  %vm14040_vm4 = vmpackc.low %vm18380_vm0, %vm18379_vm12  ;;  %v18381_v47 = vmov 0  ;;  %v14044_v34 = vpack.c.bf16 %v3913_v6, %v3901_v38  ;;  %v16612_v36 = vand.u32 4294901760, %v18385_v54  ;;  %v18408_v31 = vld [vmem:[#allocation107_spill] sm:$0xff]  ;;  %v18409_v13 = vld [vmem:[#allocation108_spill] sm:$0xff] }
 0x2d2   :  { %v14030_v59 = vsub.f32 %v18349_v21, %v18376_v48  ;;  %v18382_v47 = vsel %vm14040_vm4, 4294967295, %v18381_v47  ;;  %v18386_v48 = vld [vmem:[#allocation99_spill] sm:$0xff]  ;;  %v16613_v53 = vand.u32 4294901760, %v18387_v16  ;;  %v14049_v24 = vpack.c.bf16 %v5259_v32, %v5247_v40  ;;  %8531 = vmatprep.subr.msk.bf16.mxu1 %vm14040_vm4, %v17710_v55 }
 0x2d3   :  { %18383 = vst [vmem:[#allocation219_spill] sm:$0xff] %v18382_v47  ;;  %18384 = vst [vmem:[#allocation213_spill] sm:$0xff] %v14044_v34  ;;  %v16614_v21 = vand.u32 4294901760, %v18386_v48  ;;  %v14051_v30 = vpack.c.bf16 %v3919_v51, %v3907_v52  ;;  %v3925_v58 = vand.u32 4294901760, %v13981_v25  ;;  %vm18391_vm12 = vcmp.eq.s32.totalorder %v17910_v7, %v11556_v57 }
 0x2d4   :  { %18388 = vst [vmem:[#allocation216_spill] sm:$0xff] %v14049_v24  ;;  %vm18392_vm0 = vcmp.eq.s32.totalorder %v17914_v63, %v11556_v57  ;;  %v18393_v6 = vmov 0  ;;  %v14071_v38 = vpack.c.bf16 %v5265_v35, %v5253_v12  ;;  %v3937_v51 = vand.u32 4294901760, %v14002_v50  ;;  %v18412_v24 = vld [vmem:[#allocation119_spill] sm:$0xff] }
 0x2d5   :  { %18389 = vst [vmem:[#allocation221_spill] sm:$0xff] %v14051_v30  ;;  %vm14067_vm7 = vmpackc.low %vm18392_vm0, %vm18391_vm12  ;;  %v18397_v52 = vand.u32 4294901760, %v18368_v11  ;;  %v18398_v32 = vand.u32 4294901760, %v18369_v22  ;;  %vm18399_vm12 = vcmp.eq.s32.totalorder %v17910_v7, %v11572_v39  ;;  %vm18400_vm0 = vcmp.eq.s32.totalorder %v17914_v63, %v11572_v39  ;;  %v18416_v30 = vld [vmem:[#allocation239_spill] sm:$0xff] }
 0x2d6   :  { %v18394_v6 = vsel %vm14067_vm7, 4294967295, %v18393_v6  ;;  %18396 = vst [vmem:[#allocation226_spill] sm:$0xff] %v14071_v38  ;;  %vm14092_vm2 = vmpackc.low %vm18400_vm0, %vm18399_vm12  ;;  %v18401_v57 = vmov 0  ;;  %v5271_v12 = vand.u32 4294901760, %v14025_v9  ;;  %v5283_v35 = vand.u32 4294901760, %v14030_v59  ;;  %v18406_v59 = vld [vmem:[#allocation102_spill] sm:$0xff]  ;;  %8149 = vmatpush1.bf16.msk.msra.mxu0 %vm14067_vm7, %v17710_v55 }
 0x2d7   :  { %18395 = vst [vmem:[#allocation223_spill] sm:$0xff] %v18394_v6  ;;  %v3930_v40 = vsub.f32 %v18368_v11, %v18397_v52  ;;  %v3942_v25 = vsub.f32 %v18369_v22, %v18398_v32  ;;  %v18402_v57 = vsel %vm14092_vm2, 4294967295, %v18401_v57  ;;  %v18404_v50 = vand.u32 4294901760, %v18377_v27  ;;  %v18410_v38 = vld [vmem:[#allocation111_spill] sm:$0xff]  ;;  %8533 = vmatpush1.bf16.msk.msra.mxu1 %vm14092_vm2, %v17710_v55  ;;  %v18411_v9 = vld [vmem:[#allocation112_spill] sm:$0xff]  ;;  %8151 = vmatprep.subr.bf16.mxu0 %v13069_v45  ;;  %v18414_v6 = vld [vmem:[#allocation129_spill] sm:$0xff] }
 0x2d8   :  { %18403 = vst [vmem:[#allocation229_spill] sm:$0xff] %v18402_v57  ;;  %v18405_v32 = vand.u32 4294901760, %v18378_v2  ;;  %v3948_v39 = vsub.f32 %v18385_v54, %v16612_v36  ;;  %v3960_v7 = vsub.f32 %v18386_v48, %v16614_v21  ;;  %v5294_v63 = vsub.f32 %v18387_v16, %v16613_v53  ;;  %8535 = vmatprep.subr.bf16.mxu1 %v13071_v15  ;;  %v18430_v55 = vld [vmem:[#allocation141_spill] sm:$0xff] }
 0x2d9   :  { %v5276_v52 = vsub.f32 %v18377_v27, %v18404_v50  ;;  %v18407_v50 = vand.u32 4294901760, %v18390_v14  ;;  %v3931_v53 = vand.u32 4294901760, %v3930_v40  ;;  %v3943_v21 = vand.u32 4294901760, %v3942_v25  ;;  %3707 = vmatmul.mubr.f32.vlgmr.msra.gmra.mrb[4].mxu0 %v18416_v30 }
 0x2da   :  { %v5288_v44 = vsub.f32 %v18378_v2, %v18405_v32  ;;  %v18413_v32 = vld [vmem:[#allocation120_spill] sm:$0xff]  ;;  %v3961_v16 = vand.u32 4294901760, %v3960_v7  ;;  %v5295_v57 = vand.u32 4294901760, %v5294_v63  ;;  %v18415_v40 = vand.u32 4294901760, %v18406_v59  ;;  %5053 = vmatmul.mubr.f32.vlgmr.msra.gmra.mrb[4].mxu1 %v18416_v30  ;;  %8153 = vmatpush1.bf16.msra.mxu0 %v13090_v61 }
 0x2db   :  { %v5306_v47 = vsub.f32 %v18390_v14, %v18407_v50  ;;  %v16621_v50 = vand.u32 4294901760, %v18412_v24  ;;  %v5277_v3 = vand.u32 4294901760, %v5276_v52  ;;  %v16622_v34 = vand.u32 4294901760, %v18413_v32  ;;  %8537 = vmatpush1.bf16.msra.mxu1 %v13114_v17  ;;  %8155 = vmatprep.subr.bf16.mxu0 %v13388_v46  ;;  %v18428_v46 = vld [vmem:[#allocation138_spill] sm:$0xff] }
 0x2dc   :  { %v5289_v36 = vand.u32 4294901760, %v5288_v44  ;;  %v3949_v14 = vand.u32 4294901760, %v3948_v39  ;;  %v3954_v25 = vsub.f32 %v18406_v59, %v18415_v40  ;;  %v18417_v15 = vand.u32 4294901760, %v18408_v31  ;;  %8539 = vmatprep.subr.bf16.mxu1 %v13394_v28  ;;  %3717 = vmatprep.mubr.f32.mxu0 %v18428_v46 }
 0x2dd   :  { %v5307_v45 = vand.u32 4294901760, %v5306_v47  ;;  %v18418_v52 = vand.u32 4294901760, %v18409_v13  ;;  %v18419_v39 = vand.u32 4294901760, %v18410_v38  ;;  %v14148_v63 = vpack.c.bf16 %v3937_v51, %v3925_v58  ;;  %5063 = vmatprep.mubr.f32.mxu1 %v18428_v46  ;;  %3723 = vmatmul.mubr.f32.gmra.mrb[6].mxu0 %v18430_v55  ;;  %v18438_v46 = vld [vmem:[#allocation149_spill] sm:$0xff] }
 0x2de   :  { %v3966_v44 = vsub.f32 %v18408_v31, %v18417_v15  ;;  %v18421_v30 = vand.u32 4294901760, %v18411_v9  ;;  %v3984_v40 = vsub.f32 %v18412_v24, %v16621_v50  ;;  %v18422_v15 = vld [vmem:[#allocation130_spill] sm:$0xff]  ;;  %v5318_v58 = vsub.f32 %v18413_v32, %v16622_v34  ;;  %5069 = vmatmul.mubr.f32.gmra.mrb[6].mxu1 %v18430_v55  ;;  %8157 = vmatpush1.bf16.msra.mxu0 %v13400_v10  ;;  %v18434_v10 = vld [vmem:[#allocation11_spill] sm:$0xff] }
 0x2df   :  { %v5300_v62 = vsub.f32 %v18409_v13, %v18418_v52  ;;  %v5312_v7 = vsub.f32 %v18410_v38, %v18419_v39  ;;  %18420 = vst [vmem:[#allocation238_spill] sm:$0xff] %v14148_v63  ;;  %v14159_v39 = vpack.c.bf16 %v5283_v35, %v5271_v12  ;;  %v18424_v61 = vand.u32 4294901760, %v18414_v6  ;;  %8541 = vmatpush1.bf16.msra.mxu1 %v13419_v56  ;;  %v18433_v55 = vld [vmem:[#allocation134_spill] sm:$0xff]  ;;  %v18435_v56 = vld [vmem:[#allocation143_spill] sm:$0xff] }
 0x2e0   :  { %v3972_v47 = vsub.f32 %v18411_v9, %v18421_v30  ;;  %v14167_v51 = vpack.c.bf16 %v3943_v21, %v3931_v53  ;;  %v14169_v30 = vpack.c.bf16 %v5289_v36, %v5277_v3  ;;  %v14171_v50 = vpack.c.bf16 %v3961_v16, %v3949_v14  ;;  %v18432_v21 = vld [vmem:[#allocation133_spill] sm:$0xff]  ;;  %8159 = vmatprep.subr.bf16.mxu0 %v13421_v4 }
 0x2e1   :  { %18423 = vst [vmem:[#allocation22_spill] sm:$0xff] %v14159_v39  ;;  %v5330_v17 = vsub.f32 %v18414_v6, %v18424_v61  ;;  %v3955_v52 = vand.u32 4294901760, %v3954_v25  ;;  %v14175_v28 = vpack.c.bf16 %v5307_v45, %v5295_v57  ;;  %v3967_v12 = vand.u32 4294901760, %v3966_v44  ;;  %8543 = vmatprep.subr.bf16.mxu1 %v13433_v8  ;;  %v18441_v8 = vld [vmem:[#allocation158_spill] sm:$0xff]  ;;  %v18443_v3 = vld [vmem:[#allocation161_spill] sm:$0xff] }
 0x2e2   :  { %18425 = vst [vmem:[#allocation23_spill] sm:$0xff] %v14167_v51  ;;  %18426 = vst [vmem:[#allocation24_spill] sm:$0xff] %v14169_v30  ;;  %v5301_v35 = vand.u32 4294901760, %v5300_v62  ;;  %v5313_v34 = vand.u32 4294901760, %v5312_v7  ;;  %v3973_v53 = vand.u32 4294901760, %v3972_v47  ;;  %v3985_v14 = vand.u32 4294901760, %v3984_v40  ;;  %8161 = vmatpush1.bf16.msra.mxu0 %v13435_v29 }
 0x2e3   :  { %18427 = vst [vmem:[#allocation25_spill] sm:$0xff] %v14171_v50  ;;  %18429 = vst [vmem:[#allocation26_spill] sm:$0xff] %v14175_v28  ;;  %v18431_v16 = vand.u32 4294901760, %v18422_v15  ;;  %v5319_v62 = vand.u32 4294901760, %v5318_v58  ;;  %v5331_v57 = vand.u32 4294901760, %v5330_v17  ;;  %v18436_v7 = vld [vmem:[#allocation144_spill] sm:$0xff]  ;;  %v14197_v4 = vpack.c.bf16 %v3967_v12, %v3955_v52  ;;  %8545 = vmatpush1.bf16.msra.mxu1 %v13437_v37  ;;  %8163 = vmatprep.subr.bf16.mxu0 %v13439_v20 }
 0x2e4   :  { %v18437_v40 = vld [vmem:[#allocation146_spill] sm:$0xff]  ;;  %v18439_v28 = vld [vmem:[#allocation231_spill] sm:$0xff]  ;;  %v16625_v58 = vand.u32 4294901760, %v18441_v8  ;;  %v16626_v45 = vand.u32 4294901760, %v18443_v3  ;;  %v14204_v47 = vpack.c.bf16 %v5313_v34, %v5301_v35  ;;  %v14206_v61 = vpack.c.bf16 %v3985_v14, %v3973_v53  ;;  %8547 = vmatprep.subr.bf16.mxu1 %v13451_v43  ;;  %v18460_v50 = vld [vmem:[#allocation177_spill] sm:$0xff] }
 0x2e5   :  { %v14184_v36 = vsub.f32 %v18422_v15, %v18431_v16  ;;  %4114 = vmatprep.mubr.f32.mxu0 %v18439_v28  ;;  %5460 = vmatprep.mubr.f32.mxu1 %v18439_v28  ;;  %18440 = vst [vmem:[#allocation27_spill] sm:$0xff] %v14197_v4  ;;  %v18442_v17 = vld [vmem:[#allocation159_spill] sm:$0xff]  ;;  %v18446_v16 = vand.u32 4294901760, %v18432_v21  ;;  %v18447_v52 = vld [vmem:[#allocation162_spill] sm:$0xff]  ;;  %v14214_v25 = vpack.c.bf16 %v5331_v57, %v5319_v62  ;;  %v18449_v37 = vand.u32 4294901760, %v18433_v55 }
 0x2e6   :  { %18444 = vst [vmem:[#allocation121_spill] sm:$0xff] %v14204_v47  ;;  %18445 = vst [vmem:[#allocation147_spill] sm:$0xff] %v14206_v61  ;;  %v18450_v35 = vand.u32 4294901760, %v18434_v10  ;;  %v18451_v14 = vand.u32 4294901760, %v18435_v56  ;;  %v18452_v20 = vand.u32 4294901760, %v18436_v7  ;;  %v18453_v62 = vand.u32 4294901760, %v18437_v40  ;;  %8165 = vmatpush1.bf16.msra.mxu0 %v13494_v41 }
 0x2e7   :  { %v3990_v44 = vsub.f32 %v18432_v21, %v18446_v16  ;;  %18448 = vst [vmem:[#allocation148_spill] sm:$0xff] %v14214_v25  ;;  %v3979_v29 = vand.u32 4294901760, %v14184_v36  ;;  %v5324_v34 = vsub.f32 %v18433_v55, %v18449_v37  ;;  %v18454_v57 = vand.u32 4294901760, %v18438_v46  ;;  %v18456_v28 = vld [vmem:[#allocation171_spill] sm:$0xff]  ;;  %8549 = vmatpush1.bf16.msra.mxu1 %v13523_v23  ;;  %v18458_v61 = vld [vmem:[#allocation172_spill] sm:$0xff]  ;;  %v18459_v47 = vld [vmem:[#allocation174_spill] sm:$0xff]  ;;  %8167 = vmatprep.subr.bf16.mxu0 %v13633_v33 }
 0x2e8   :  { %v5336_v53 = vsub.f32 %v18434_v10, %v18450_v35  ;;  %v3996_v16 = vsub.f32 %v18435_v56, %v18451_v14  ;;  %v4008_v43 = vsub.f32 %v18436_v7, %v18452_v20  ;;  %v5342_v36 = vsub.f32 %v18437_v40, %v18453_v62  ;;  %8551 = vmatprep.subr.bf16.mxu1 %v13718_v1  ;;  %v18461_v41 = vld [vmem:[#allocation186_spill] sm:$0xff]  ;;  %v18484_v40 = vld [vmem:[#allocation221_spill] sm:$0xff] }
 0x2e9   :  { %v5354_v37 = vsub.f32 %v18438_v46, %v18454_v57  ;;  %v4002_v35 = vsub.f32 %v18441_v8, %v16625_v58  ;;  %v18455_v12 = vand.u32 4294901760, %v18442_v17  ;;  %v5348_v20 = vsub.f32 %v18443_v3, %v16626_v45  ;;  %v18503_v46 = vld [vmem:[#allocation21_spill] sm:$0xff]  ;;  %v18508_v10 = vld [vmem:[#allocation58_spill] sm:$0xff]  ;;  %v18509_v8 = vld [vmem:[#allocation23_spill] sm:$0xff] }
 0x2ea   :  { %v18457_v62 = vand.u32 4294901760, %v18447_v52  ;;  %v3991_v45 = vand.u32 4294901760, %v3990_v44  ;;  %v5325_v25 = vand.u32 4294901760, %v5324_v34  ;;  %v5337_v30 = vand.u32 4294901760, %v5336_v53  ;;  %8169 = vmatpush1.bf16.msra.mxu0 %v13733_v18  ;;  %v18510_v21 = vld [vmem:[#allocation24_spill] sm:$0xff] }
 0x2eb   :  { %v4014_v14 = vsub.f32 %v18442_v17, %v18455_v12  ;;  %v16630_v51 = vand.u32 4294901760, %v18461_v41  ;;  %v3997_v23 = vand.u32 4294901760, %v3996_v16  ;;  %v4009_v39 = vand.u32 4294901760, %v4008_v43  ;;  %8553 = vmatpush1.bf16.msra.mxu1 %v13735_v19  ;;  %8171 = vmatprep.subr.bf16.mxu0 %v13737_v0  ;;  %v18466_v19 = vld [vmem:[#allocation187_spill] sm:$0xff]  ;;  %v18470_v0 = vld [vmem:[#allocation205_spill] sm:$0xff]  ;;  %v18496_v43 = vld [vmem:[#allocation230_spill] sm:$0xff] }
 0x2ec   :  { %v5360_v57 = vsub.f32 %v18447_v52, %v18457_v62  ;;  %v5343_v63 = vand.u32 4294901760, %v5342_v36  ;;  %v5355_v3 = vand.u32 4294901760, %v5354_v37  ;;  %v4003_v62 = vand.u32 4294901760, %v4002_v35  ;;  %8555 = vmatprep.subr.bf16.mxu1 %v13750_v60  ;;  %v18467_v36 = vld [vmem:[#allocation189_spill] sm:$0xff]  ;;  %v18468_v35 = vld [vmem:[#allocation190_spill] sm:$0xff]  ;;  %v18502_v17 = vld [vmem:[#allocation19_spill] sm:$0xff] }
 0x2ed   :  { %v4015_v52 = vand.u32 4294901760, %v4014_v14  ;;  %v5349_v58 = vand.u32 4294901760, %v5348_v20  ;;  %v18462_v4 = vand.u32 4294901760, %v18456_v28  ;;  %v18463_v33 = vand.u32 4294901760, %v18458_v61 }
 0x2ee   :  { %v5361_v1 = vand.u32 4294901760, %v5360_v57  ;;  %v18464_v34 = vand.u32 4294901760, %v18459_v47  ;;  %v18465_v16 = vand.u32 4294901760, %v18460_v50  ;;  %v14283_v18 = vsub.f32 %v18461_v41, %v16630_v51  ;;  %8173 = vmatpush1.bf16.msra.mxu0 %v13752_v42  ;;  %v18500_v41 = vld [vmem:[#allocation16_spill] sm:$0xff] }
 0x2ef   :  { %v14259_v12 = vsub.f32 %v18456_v28, %v18462_v4  ;;  %v14266_v44 = vsub.f32 %v18458_v61, %v18463_v33  ;;  %v16633_v37 = vand.u32 4294901760, %v18467_v36  ;;  %v16631_v14 = vand.u32 4294901760, %v18468_v35  ;;  %v18469_v33 = vld [vmem:[#allocation200_spill] sm:$0xff]  ;;  %8557 = vmatpush1.bf16.msra.mxu1 %v13832_v5  ;;  %8175 = vmatprep.subr.bf16.mxu0 %v13928_v49  ;;  %v18507_v61 = vld [vmem:[#allocation50_spill] sm:$0xff] }
 0x2f0   :  { %v14271_v53 = vsub.f32 %v18459_v47, %v18464_v34  ;;  %v14276_v4 = vsub.f32 %v18460_v50, %v18465_v16  ;;  %v14288_v20 = vpack.c.bf16 %v3991_v45, %v3979_v29  ;;  %v14290_v57 = vpack.c.bf16 %v5337_v30, %v5325_v25  ;;  %8559 = vmatprep.subr.bf16.mxu1 %v13930_v26  ;;  %v18477_v29 = vld [vmem:[#allocation215_spill] sm:$0xff]  ;;  %v18478_v30 = vld [vmem:[#allocation213_spill] sm:$0xff]  ;;  %v18487_v47 = vld [vmem:[#allocation12_spill] sm:$0xff] }
 0x2f1   :  { %v16632_v34 = vand.u32 4294901760, %v18469_v33  ;;  %v16634_v16 = vand.u32 4294901760, %v18470_v0  ;;  %v14294_v60 = vpack.c.bf16 %v4009_v39, %v3997_v23  ;;  %v14296_v50 = vpack.c.bf16 %v5355_v3, %v5343_v63  ;;  %v18475_v63 = vld [vmem:[#allocation195_spill] sm:$0xff]  ;;  %v18490_v23 = vld [vmem:[#allocation22_spill] sm:$0xff]  ;;  %v18497_v28 = vld [vmem:[#allocation232_spill] sm:$0xff] }
 0x2f2   :  { %v14298_v51 = vpack.c.bf16 %v4015_v52, %v4003_v62  ;;  %v14303_v45 = vpack.c.bf16 %v5361_v1, %v5349_v58  ;;  %v18471_v39 = vand.u32 4294901760, %v18466_v19  ;;  %v14319_v5 = vsub.f32 %v18467_v36, %v16633_v37  ;;  %v18472_v58 = vld [vmem:[#allocation214_spill] sm:$0xff]  ;;  %8177 = vmatpush1.bf16.msra.mxu0 %v18475_v63  ;;  %v18480_v37 = vld [vmem:[#allocation217_spill] sm:$0xff]  ;;  %v18488_v63 = vld [vmem:[#allocation220_spill] sm:$0xff] }
 0x2f3   :  { %v14324_v3 = vsub.f32 %v18468_v35, %v16631_v14  ;;  %v14329_v49 = vsub.f32 %v18469_v33, %v16632_v34  ;;  %v14334_v26 = vsub.f32 %v18470_v0, %v16634_v16  ;;  %v18474_v14 = vld [vmem:[#allocation101_spill] sm:$0xff]  ;;  %8179 = vmatprep.subr.bf16.mxu0 %v18478_v30  ;;  %v18479_v34 = vld [vmem:[#allocation216_spill] sm:$0xff]  ;;  %v18485_v1 = vld [vmem:[#allocation226_spill] sm:$0xff]  ;;  %v18505_v7 = vand.u32 4294901760, %v18472_v58 }
 0x2f4   :  { %v14314_v42 = vsub.f32 %v18466_v19, %v18471_v39  ;;  %v18473_v39 = vld [vmem:[#allocation100_spill] sm:$0xff]  ;;  %v18476_v16 = vld [vmem:[#allocation201_spill] sm:$0xff]  ;;  %v18489_v19 = vld [vmem:[#allocation238_spill] sm:$0xff] }
 0x2f5   :  { %8561 = vmatpush1.bf16.msra.mxu1 %v18476_v16  ;;  %v18492_v33 = vld [vmem:[#allocation224_spill] sm:$0xff]  ;;  %v18493_v0 = vld [vmem:[#allocation225_spill] sm:$0xff]  ;;  %v18494_v30 = vld [vmem:[#allocation227_spill] sm:$0xff]  ;;  %v5390_v36 = vsub.f32 %v18472_v58, %v18505_v7  ;;  %v18506_v16 = vand.u32 4294901760, %v18477_v29  ;;  %v4057_v15 = vand.u32 4294901760, %v14334_v26  ;;  %v18519_v26 = vand.u32 4294901760, %v14283_v18 }
 0x2f6   :  { %8563 = vmatprep.subr.bf16.mxu1 %v18479_v34  ;;  %8181 = vmatpush1.bf16.msra.mxu0 %v18484_v40  ;;  %v18486_v34 = vld [vmem:[#allocation218_spill] sm:$0xff]  ;;  %v4039_v62 = vand.u32 4294901760, %v14314_v42  ;;  %v18495_v35 = vld [vmem:[#allocation228_spill] sm:$0xff]  ;;  %v18498_v52 = vld [vmem:[#allocation13_spill] sm:$0xff]  ;;  %v16661_v7 = vand.u32 4294901760, %v18492_v33  ;;  %v18522_v58 = vand.u32 4294901760, %v18487_v47 }
 0x2f7   :  { %8183 = vmatprep.subr.bf16.mxu0 %v18489_v19  ;;  %v18491_v40 = vld [vmem:[#allocation222_spill] sm:$0xff]  ;;  %v18499_v25 = vld [vmem:[#allocation15_spill] sm:$0xff]  ;;  %v18504_v42 = vld [vmem:[#allocation49_spill] sm:$0xff]  ;;  %v5402_v55 = vsub.f32 %v18477_v29, %v18506_v16 }
 0x2f8   :  { %v18501_v19 = vld [vmem:[#allocation18_spill] sm:$0xff]  ;;  %v18513_v16 = vld [vmem:[#allocation25_spill] sm:$0xff]  ;;  %v8200_v6 = vpack.c.bf16 %v4039_v62, %v18519_v26  ;;  %v18525_v18 = vld [vmem:[#allocation148_spill] sm:$0xff]  ;;  %v18526_v62 = vand.u32 4294901760, %v18491_v40  ;;  %v18528_v26 = vand.u32 4294901760, %v18494_v30 }
 0x2f9   :  { %8565 = vmatpush1.bf16.msra.mxu1 %v18485_v1  ;;  %v5373_v1 = vand.u32 4294901760, %v14319_v5  ;;  %v18512_v5 = vand.u32 4294901760, %v18486_v34  ;;  %v18514_v29 = vld [vmem:[#allocation26_spill] sm:$0xff]  ;;  %v5403_v9 = vand.u32 4294901760, %v5402_v55 }
 0x2fa   :  { %8567 = vmatprep.subr.bf16.mxu1 %v18490_v23  ;;  %8185 = vmatpush1.bf16.msra.mxu0 %v18509_v8  ;;  %v18511_v23 = vand.u32 4294901760, %v18480_v37  ;;  %v5385_v8 = vand.u32 4294901760, %v14324_v3  ;;  %v18518_v3 = vand.u32 4294901760, %v14276_v4 }
 0x2fb   :  { %v4062_v32 = vsub.f32 %v18486_v34, %v18512_v5  ;;  %8187 = vmatprep.subr.bf16.mxu0 %v18513_v16  ;;  %v18516_v5 = vand.u32 4294901760, %v14266_v44  ;;  %v18521_v44 = vld [vmem:[#allocation121_spill] sm:$0xff]  ;;  %v5396_v16 = vsub.f32 %v18487_v47, %v18522_v58 }
 0x2fc   :  { %v4050_v56 = vsub.f32 %v18480_v37, %v18511_v23  ;;  %v18515_v37 = vand.u32 4294901760, %v14259_v12  ;;  %v5391_v23 = vand.u32 4294901760, %v5390_v36  ;;  %v18520_v12 = vld [vmem:[#allocation27_spill] sm:$0xff]  ;;  %v8584_v36 = vpack.c.bf16 %v5385_v8, %v5373_v1 }
 0x2fd   :  { %8569 = vmatpush1.bf16.msra.mxu1 %v18510_v21  ;;  %v4045_v21 = vand.u32 4294901760, %v14329_v49  ;;  %v16663_v8 = vand.u32 4294901760, %v18497_v28 }
 0x2fe   :  { %8571 = vmatprep.subr.bf16.mxu1 %v18514_v29  ;;  %v8198_v34 = vpack.c.bf16 %v18516_v5, %v18515_v37  ;;  %v18517_v29 = vand.u32 4294901760, %v14271_v53  ;;  %8189 = vmatpush1.bf16.msra.mxu0 %v18520_v12  ;;  %v4051_v37 = vand.u32 4294901760, %v4050_v56  ;;  %v4063_v5 = vand.u32 4294901760, %v4062_v32 }
 0x2ff   :  { %v18523_v53 = vand.u32 4294901760, %v18488_v63  ;;  %v8202_v55 = vpack.c.bf16 %v4057_v15, %v4045_v21  ;;  %v4080_v32 = vsub.f32 %v18492_v33, %v16661_v7  ;;  %v18527_v56 = vand.u32 4294901760, %v18493_v0 }
 0x300   :  { %v8582_v49 = vpack.c.bf16 %v18518_v3, %v18517_v29  ;;  %v18524_v29 = vld [vmem:[#allocation147_spill] sm:$0xff]  ;;  %v4068_v3 = vsub.f32 %v18491_v40, %v18526_v62  ;;  %v5426_v12 = vsub.f32 %v18494_v30, %v18528_v26  ;;  %v8586_v1 = vpack.c.bf16 %v5403_v9, %v5391_v23 }
 0x301   :  { %8573 = vmatpush1.bf16.msra.mxu1 %v18521_v44  ;;  %v5408_v4 = vsub.f32 %v18488_v63, %v18523_v53  ;;  %8191 = vmatprep.subr.bf16.mxu0 %v18524_v29  ;;  %v5414_v58 = vsub.f32 %v18493_v0, %v18527_v56  ;;  %v16665_v44 = vand.u32 4294901760, %v18495_v35  ;;  %v16664_v15 = vand.u32 4294901760, %v18496_v43 }
 0x302   :  { %8575 = vmatprep.subr.bf16.mxu1 %v18525_v18  ;;  %8193 = vmatpush1.bf16.msra.mxu0 %v14288_v20  ;;  %v8204_v53 = vpack.c.bf16 %v4063_v5, %v4051_v37  ;;  %v5397_v29 = vand.u32 4294901760, %v5396_v16  ;;  %v16662_v62 = vand.u32 4294901760, %v18499_v25  ;;  %v4069_v9 = vand.u32 4294901760, %v4068_v3 }
 0x303   :  { %v5409_v18 = vand.u32 4294901760, %v5408_v4  ;;  %8195 = vmatprep.subr.bf16.mxu0 %v14294_v60  ;;  %v16671_v23 = vand.u32 4294901760, %v18500_v41  ;;  %v16666_v56 = vand.u32 4294901760, %v18501_v19  ;;  %v16670_v26 = vand.u32 4294901760, %v18502_v17 }
 0x304   :  { %v4081_v7 = vand.u32 4294901760, %v4080_v32  ;;  %v5415_v20 = vand.u32 4294901760, %v5414_v58  ;;  %v5427_v21 = vand.u32 4294901760, %v5426_v12  ;;  %v4086_v60 = vsub.f32 %v18496_v43, %v16664_v15 }
 0x305   :  { %8577 = vmatpush1.bf16.msra.mxu1 %v14290_v57  ;;  %v4074_v57 = vsub.f32 %v18495_v35, %v16665_v44  ;;  %v18529_v16 = vand.u32 4294901760, %v18498_v52  ;;  %v16669_v5 = vand.u32 4294901760, %v18503_v46  ;;  %v4092_v4 = vsub.f32 %v18499_v25, %v16662_v62 }
 0x306   :  { %8579 = vmatprep.subr.bf16.mxu1 %v14296_v50  ;;  %v5420_v50 = vsub.f32 %v18497_v28, %v16663_v8  ;;  %8197 = vmatpush1.bf16.msra.mxu0 %v14298_v51  ;;  %v16667_v3 = vand.u32 4294901760, %v18504_v42  ;;  %v16668_v32 = vand.u32 4294901760, %v18507_v61  ;;  %v4104_v12 = vsub.f32 %v18500_v41, %v16671_v23 }
 0x307   :  { %v5432_v37 = vsub.f32 %v18498_v52, %v18529_v16  ;;  %8199 = vmatprep.subr.bf16.mxu0 %v8198_v34  ;;  %v5438_v51 = vsub.f32 %v18501_v19, %v16666_v56  ;;  %v8588_v16 = vpack.c.bf16 %v5409_v18, %v5397_v29  ;;  %v8206_v62 = vpack.c.bf16 %v4081_v7, %v4069_v9 }
 0x308   :  { %v8590_v8 = vpack.c.bf16 %v5427_v21, %v5415_v20  ;;  %v4075_v15 = vand.u32 4294901760, %v4074_v57  ;;  %v4087_v44 = vand.u32 4294901760, %v4086_v60  ;;  %v5421_v58 = vand.u32 4294901760, %v5420_v50 }
 0x309   :  { %8581 = vmatpush1.bf16.msra.mxu1 %v14303_v45  ;;  %v5450_v45 = vsub.f32 %v18502_v17, %v16670_v26  ;;  %v5433_v34 = vand.u32 4294901760, %v5432_v37  ;;  %v4110_v56 = vsub.f32 %v18504_v42, %v16667_v3  ;;  %v5444_v29 = vsub.f32 %v18507_v61, %v16668_v32  ;;  %v18557_v26 = vld [vmem:[#allocation209_spill] sm:$0xff] }
 0x30a   :  { %8583 = vmatprep.subr.bf16.mxu1 %v8582_v49  ;;  %v4098_v49 = vsub.f32 %v18503_v46, %v16669_v5  ;;  %8201 = vmatpush1.bf16.msra.mxu0 %v8200_v6  ;;  %v18530_v7 = vand.u32 4294901760, %v18508_v10  ;;  %v4093_v18 = vand.u32 4294901760, %v4092_v4  ;;  %v4105_v9 = vand.u32 4294901760, %v4104_v12  ;;  %v18531_v4 = vld [vmem:[#allocation152_spill] sm:$0xff]  ;;  %v18532_v12 = vld [vmem:[#allocation153_spill] sm:$0xff] }
 0x30b   :  { %8203 = vmatprep.subr.bf16.mxu0 %v8202_v55  ;;  %v5439_v20 = vand.u32 4294901760, %v5438_v51  ;;  %v5451_v57 = vand.u32 4294901760, %v5450_v45  ;;  %v8208_v6 = vpack.c.bf16 %v4087_v44, %v4075_v15  ;;  %v4111_v50 = vand.u32 4294901760, %v4110_v56  ;;  %v18533_v15 = vld [vmem:[#allocation155_spill] sm:$0xff]  ;;  %v18535_v56 = vld [vmem:[#allocation164_spill] sm:$0xff]  ;;  %v18536_v51 = vld [vmem:[#allocation166_spill] sm:$0xff] }
 0x30c   :  { %v5456_v21 = vsub.f32 %v18508_v10, %v18530_v7  ;;  %v4099_v60 = vand.u32 4294901760, %v4098_v49  ;;  %v5445_v37 = vand.u32 4294901760, %v5444_v29  ;;  %v8210_v32 = vpack.c.bf16 %v4105_v9, %v4093_v18  ;;  %v18538_v45 = vld [vmem:[#allocation208_spill] sm:$0xff]  ;;  %v18542_v49 = vld [vmem:[#allocation34_spill] sm:$0xff]  ;;  %v18545_v18 = vld [vmem:[#allocation37_spill] sm:$0xff] }
 0x30d   :  { %8585 = vmatpush1.bf16.msra.mxu1 %v8584_v36  ;;  %v8592_v36 = vpack.c.bf16 %v5433_v34, %v5421_v58  ;;  %v8594_v5 = vpack.c.bf16 %v5451_v57, %v5439_v20  ;;  %v8214_v44 = vpack.c.bf16 %v18532_v12, %v18531_v4  ;;  %v18539_v34 = vld [vmem:[#allocation29_spill] sm:$0xff]  ;;  %v18543_v7 = vld [vmem:[#allocation234_spill] sm:$0xff]  ;;  %v18546_v20 = vld [vmem:[#allocation168_spill] sm:$0xff] }
 0x30e   :  { %8587 = vmatprep.subr.bf16.mxu1 %v8586_v1  ;;  %8205 = vmatpush1.bf16.msra.mxu0 %v8204_v53  ;;  %v5457_v3 = vand.u32 4294901760, %v5456_v21  ;;  %v8212_v55 = vpack.c.bf16 %v4111_v50, %v4099_v60  ;;  %v18534_v53 = vld [vmem:[#allocation156_spill] sm:$0xff]  ;;  %v18547_v57 = vld [vmem:[#allocation169_spill] sm:$0xff]  ;;  %v18549_v60 = vld [vmem:[#allocation183_spill] sm:$0xff] }
 0x30f   :  { %8207 = vmatprep.subr.bf16.mxu0 %v8206_v62  ;;  %v8598_v58 = vpack.c.bf16 %v18534_v53, %v18533_v15  ;;  %v8216_v62 = vpack.c.bf16 %v18536_v51, %v18535_v56  ;;  %v18544_v21 = vld [vmem:[#allocation36_spill] sm:$0xff] }
 0x310   :  { %v8596_v1 = vpack.c.bf16 %v5457_v3, %v5445_v37  ;;  %v18540_v3 = vld [vmem:[#allocation30_spill] sm:$0xff]  ;;  %v8220_v9 = vpack.c.bf16 %v18545_v18, %v18544_v21  ;;  %v18550_v37 = vld [vmem:[#allocation184_spill] sm:$0xff] }
 0x311   :  { %8589 = vmatpush1.bf16.msra.mxu1 %v8588_v16 }
 0x312   :  { %8591 = vmatprep.subr.bf16.mxu1 %v8590_v8  ;;  %8209 = vmatpush1.bf16.msra.mxu0 %v8208_v6  ;;  %v18537_v8 = vld [vmem:[#allocation180_spill] sm:$0xff]  ;;  %v8604_v6 = vpack.c.bf16 %v18547_v57, %v18546_v20  ;;  %v18562_v57 = vld [vmem:[#allocation233_spill] sm:$0xff]  ;;  %v18574_v20 = vld [vmem:[#allocation47_spill] sm:$0xff] }
 0x313   :  { %8211 = vmatprep.subr.bf16.mxu0 %v8210_v32  ;;  %v8600_v16 = vpack.c.bf16 %v18538_v45, %v18537_v8  ;;  %v8218_v32 = vpack.c.bf16 %v18540_v3, %v18539_v34 }
 0x315   :  { %8593 = vmatpush1.bf16.msra.mxu1 %v8592_v36  ;;  %v18548_v36 = vld [vmem:[#allocation181_spill] sm:$0xff] }
 0x316   :  { %8595 = vmatprep.subr.bf16.mxu1 %v8594_v5  ;;  %8213 = vmatpush1.bf16.msra.mxu0 %v8212_v55  ;;  %v18541_v5 = vld [vmem:[#allocation33_spill] sm:$0xff]  ;;  %v8222_v50 = vpack.c.bf16 %v18549_v60, %v18548_v36  ;;  %v18551_v55 = vld [vmem:[#allocation192_spill] sm:$0xff] }
 0x317   :  { %8215 = vmatprep.subr.bf16.mxu0 %v8214_v44  ;;  %v8602_v29 = vpack.c.bf16 %v18542_v49, %v18541_v5  ;;  %v18552_v44 = vld [vmem:[#allocation123_spill] sm:$0xff]  ;;  %v18560_v60 = vld [vmem:[#allocation104_spill] sm:$0xff]  ;;  %v18561_v36 = vld [vmem:[#allocation105_spill] sm:$0xff] }
 0x319   :  { %8597 = vmatpush1.bf16.msra.mxu1 %v8596_v1  ;;  %4116 = vmatmul.mubr.f32.vlgmr.msra.gmra.mrb[4].mxu0 %v18543_v7  ;;  %v8606_v1 = vpack.c.bf16 %v18551_v55, %v18550_v37  ;;  %v18559_v55 = vld [vmem:[#allocation212_spill] sm:$0xff] }
 0x31a   :  { %8599 = vmatprep.subr.bf16.mxu1 %v8598_v58  ;;  %8217 = vmatpush1.bf16.msra.mxu0 %v8216_v62  ;;  %v18553_v58 = vld [vmem:[#allocation127_spill] sm:$0xff]  ;;  %v18554_v62 = vld [vmem:[#allocation194_spill] sm:$0xff] }
 0x31b   :  { %8219 = vmatprep.subr.bf16.mxu0 %v8218_v32  ;;  %4122 = vmatprep.mubr.f32.mxu0 %v18552_v44 }
 0x31c   :  { %5462 = vmatmul.mubr.f32.vlgmr.msra.gmra.mrb[4].mxu1 %v18543_v7  ;;  %v18558_v7 = vld [vmem:[#allocation211_spill] sm:$0xff] }
 0x31d   :  { %8601 = vmatpush1.bf16.msra.mxu1 %v8600_v16  ;;  %5468 = vmatprep.mubr.f32.mxu1 %v18552_v44  ;;  %v18555_v16 = vld [vmem:[#allocation196_spill] sm:$0xff]  ;;  %v8226_v37 = vpack.c.bf16 %v18559_v55, %v18558_v7  ;;  %v8610_v44 = vpack.c.bf16 %v18561_v36, %v18560_v60  ;;  %v18571_v60 = vld [vmem:[#allocation42_spill] sm:$0xff] }
 0x31e   :  { %8603 = vmatprep.subr.bf16.mxu1 %v8602_v29  ;;  %4124 = vmatmul.mubr.f32.gmra.mrb[6].mxu0 %v18553_v58  ;;  %v8224_v32 = vpack.c.bf16 %v18555_v16, %v18554_v62  ;;  %v18556_v29 = vld [vmem:[#allocation197_spill] sm:$0xff]  ;;  %v18565_v16 = vld [vmem:[#allocation116_spill] sm:$0xff] }
 0x31f   :  { %8221 = vmatpush1.bf16.msra.mxu0 %v8220_v9  ;;  %v8608_v23 = vpack.c.bf16 %v18557_v26, %v18556_v29  ;;  %4324 = vmatprep.mubr.f32.mxu0 %v18562_v57  ;;  %v18563_v9 = vld [vmem:[#allocation113_spill] sm:$0xff]  ;;  %v18569_v7 = vld [vmem:[#allocation40_spill] sm:$0xff] }
 0x320   :  { %5470 = vmatmul.mubr.f32.gmra.mrb[6].mxu1 %v18553_v58  ;;  %8223 = vmatprep.subr.bf16.mxu0 %v8222_v50  ;;  %v18566_v62 = vld [vmem:[#allocation117_spill] sm:$0xff]  ;;  %v18567_v50 = vld [vmem:[#allocation199_spill] sm:$0xff] }
 0x321   :  { %8605 = vmatpush1.bf16.msra.mxu1 %v8604_v6  ;;  %5670 = vmatprep.mubr.f32.mxu1 %v18562_v57  ;;  %v18564_v6 = vld [vmem:[#allocation114_spill] sm:$0xff]  ;;  %v8612_v26 = vpack.c.bf16 %v18566_v62, %v18565_v16  ;;  %v18570_v29 = vld [vmem:[#allocation41_spill] sm:$0xff]  ;;  %v18572_v57 = vld [vmem:[#allocation44_spill] sm:$0xff] }
 0x322   :  { %8607 = vmatprep.subr.bf16.mxu1 %v8606_v1  ;;  %v8228_v58 = vpack.c.bf16 %v18564_v6, %v18563_v9  ;;  %v18568_v1 = vld [vmem:[#allocation202_spill] sm:$0xff]  ;;  %v8614_v36 = vpack.c.bf16 %v18570_v29, %v18569_v7  ;;  %v18575_v6 = vld [vmem:[#allocation48_spill] sm:$0xff]  ;;  %v18576_v62 = vld [vmem:[#allocation51_spill] sm:$0xff] }
 0x323   :  { %8225 = vmatpush1.bf16.msra.mxu0 %v8224_v32  ;;  %v8230_v55 = vpack.c.bf16 %v18568_v1, %v18567_v50  ;;  %v8232_v32 = vpack.c.bf16 %v18572_v57, %v18571_v60  ;;  %v18578_v16 = vld [vmem:[#allocation53_spill] sm:$0xff]  ;;  %v18579_v1 = vld [vmem:[#allocation54_spill] sm:$0xff]  ;;  %v18580_v29 = vld [vmem:[#allocation56_spill] sm:$0xff] }
 0x324   :  { %8227 = vmatprep.subr.bf16.mxu0 %v8226_v37  ;;  %v8234_v37 = vpack.c.bf16 %v18576_v62, %v18575_v6  ;;  %v18582_v7 = vld [vmem:[#allocation59_spill] sm:$0xff]  ;;  %v18583_v57 = vld [vmem:[#allocation60_spill] sm:$0xff]  ;;  %v18587_v62 = vld [vmem:[#allocation66_spill] sm:$0xff] }
 0x325   :  { %8609 = vmatpush1.bf16.msra.mxu1 %v8608_v23  ;;  %v18573_v23 = vld [vmem:[#allocation45_spill] sm:$0xff] }
 0x326   :  { %8611 = vmatprep.subr.bf16.mxu1 %v8610_v44  ;;  %v8616_v18 = vpack.c.bf16 %v18574_v20, %v18573_v23  ;;  %v18577_v44 = vld [vmem:[#allocation52_spill] sm:$0xff]  ;;  %v18584_v20 = vld [vmem:[#allocation63_spill] sm:$0xff]  ;;  %v18586_v23 = vld [vmem:[#allocation65_spill] sm:$0xff] }
 0x327   :  { %8229 = vmatpush1.bf16.msra.mxu0 %v8228_v58  ;;  %v8618_v9 = vpack.c.bf16 %v18578_v16, %v18577_v44  ;;  %v8236_v58 = vpack.c.bf16 %v18580_v29, %v18579_v1  ;;  %v18588_v16 = vld [vmem:[#allocation68_spill] sm:$0xff]  ;;  %v18590_v44 = vld [vmem:[#allocation71_spill] sm:$0xff] }
 0x328   :  { %8231 = vmatprep.subr.bf16.mxu0 %v8230_v55  ;;  %v8238_v55 = vpack.c.bf16 %v18584_v20, %v18583_v57  ;;  %v18591_v29 = vld [vmem:[#allocation72_spill] sm:$0xff]  ;;  %v18595_v20 = vld [vmem:[#allocation78_spill] sm:$0xff] }
 0x329   :  { %8613 = vmatpush1.bf16.msra.mxu1 %v8612_v26  ;;  %v18581_v26 = vld [vmem:[#allocation57_spill] sm:$0xff] }
 0x32a   :  { %8615 = vmatprep.subr.bf16.mxu1 %v8614_v36  ;;  %v8620_v50 = vpack.c.bf16 %v18582_v7, %v18581_v26  ;;  %v18585_v36 = vld [vmem:[#allocation64_spill] sm:$0xff]  ;;  %v18592_v7 = vld [vmem:[#allocation75_spill] sm:$0xff]  ;;  %v18594_v26 = vld [vmem:[#allocation77_spill] sm:$0xff] }
 0x32b   :  { %8233 = vmatpush1.bf16.msra.mxu0 %v8232_v32  ;;  %v8622_v60 = vpack.c.bf16 %v18586_v23, %v18585_v36  ;;  %v8240_v32 = vpack.c.bf16 %v18588_v16, %v18587_v62  ;;  %v18596_v23 = vld [vmem:[#allocation80_spill] sm:$0xff]  ;;  %v18598_v36 = vld [vmem:[#allocation83_spill] sm:$0xff] }
 0x32c   :  { %8235 = vmatprep.subr.bf16.mxu0 %v8234_v37  ;;  %v8242_v37 = vpack.c.bf16 %v18592_v7, %v18591_v29  ;;  %v18599_v16 = vld [vmem:[#allocation84_spill] sm:$0xff] }
 0x32d   :  { %8617 = vmatpush1.bf16.msra.mxu1 %v8616_v18  ;;  %v18589_v18 = vld [vmem:[#allocation69_spill] sm:$0xff] }
 0x32e   :  { %8619 = vmatprep.subr.bf16.mxu1 %v8618_v9  ;;  %v8624_v6 = vpack.c.bf16 %v18590_v44, %v18589_v18  ;;  %v18593_v9 = vld [vmem:[#allocation76_spill] sm:$0xff]  ;;  %v18600_v44 = vld [vmem:[#allocation87_spill] sm:$0xff]  ;;  %v18602_v18 = vld [vmem:[#allocation89_spill] sm:$0xff] }
 0x32f   :  { %8237 = vmatpush1.bf16.msra.mxu0 %v8236_v58  ;;  %v8626_v1 = vpack.c.bf16 %v18594_v26, %v18593_v9  ;;  %v8244_v58 = vpack.c.bf16 %v18596_v23, %v18595_v20 }
 0x330   :  { %8239 = vmatprep.subr.bf16.mxu0 %v8238_v55  ;;  %v8246_v55 = vpack.c.bf16 %v18600_v44, %v18599_v16 }
 0x331   :  { %8621 = vmatpush1.bf16.msra.mxu1 %v8620_v50  ;;  %v18597_v50 = vld [vmem:[#allocation81_spill] sm:$0xff] }
 0x332   :  { %8623 = vmatprep.subr.bf16.mxu1 %v8622_v60  ;;  %v8628_v57 = vpack.c.bf16 %v18598_v36, %v18597_v50  ;;  %v18601_v60 = vld [vmem:[#allocation88_spill] sm:$0xff] }
 0x333   :  { %8241 = vmatpush1.bf16.msra.mxu0 %v8240_v32  ;;  %v8630_v62 = vpack.c.bf16 %v18602_v18, %v18601_v60  ;;  %v18604_v32 = vpack.c.bf16 %v18378_v2, %v18377_v27 }
 0x334   :  { %8243 = vmatprep.subr.bf16.mxu0 %v8242_v37  ;;  %v18606_v37 = vpack.c.bf16 %v18474_v14, %v18473_v39  ;;  %v18618_v39 = vld [vmem:[#allocation134_spill] sm:$0xff] }
 0x335   :  { %8625 = vmatpush1.bf16.msra.mxu1 %v8624_v6  ;;  %v18603_v6 = vpack.c.bf16 %v18369_v22, %v18368_v11 }
 0x336   :  { %8627 = vmatprep.subr.bf16.mxu1 %v8626_v1  ;;  %v18605_v1 = vpack.c.bf16 %v18386_v48, %v18385_v54  ;;  %v18615_v54 = vld [vmem:[#allocation130_spill] sm:$0xff] }
 0x337   :  { %8245 = vmatpush1.bf16.msra.mxu0 %v8244_v58  ;;  %v18609_v58 = vld [vmem:[#allocation112_spill] sm:$0xff] }
 0x338   :  { %8247 = vmatprep.subr.bf16.mxu0 %v8246_v55  ;;  %v18610_v55 = vpack.c.bf16 %v18412_v24, %v18609_v58  ;;  %v18627_v58 = vld [vmem:[#allocation158_spill] sm:$0xff] }
 0x339   :  { %8629 = vmatpush1.bf16.msra.mxu1 %v8628_v57  ;;  %v18607_v57 = vpack.c.bf16 %v18408_v31, %v18406_v59  ;;  %v18621_v59 = vld [vmem:[#allocation143_spill] sm:$0xff] }
 0x33a   :  { %8631 = vmatprep.subr.bf16.mxu1 %v8630_v62  ;;  %v18608_v62 = vpack.c.bf16 %v18410_v38, %v18409_v13  ;;  %v18624_v13 = vld [vmem:[#allocation146_spill] sm:$0xff] }
 0x33b   :  { %8249 = vmatpush1.bf16.msra.mxu0 %v18603_v6  ;;  %v18611_v6 = vld [vmem:[#allocation129_spill] sm:$0xff] }
 0x33c   :  { %8251 = vmatprep.subr.bf16.mxu0 %v18605_v1  ;;  %v18614_v1 = vld [vmem:[#allocation133_spill] sm:$0xff] }
 0x33d   :  { %8633 = vmatpush1.bf16.msra.mxu1 %v18604_v32  ;;  %v18612_v32 = vld [vmem:[#allocation120_spill] sm:$0xff]  ;;  %v18616_v14 = vpack.c.bf16 %v18614_v1, %v18615_v54  ;;  %v18633_v54 = vld [vmem:[#allocation171_spill] sm:$0xff] }
 0x33e   :  { %8635 = vmatprep.subr.bf16.mxu1 %v18606_v37  ;;  %v18613_v48 = vpack.c.bf16 %v18611_v6, %v18612_v32  ;;  %v18617_v37 = vld [vmem:[#allocation11_spill] sm:$0xff]  ;;  %v18630_v32 = vld [vmem:[#allocation161_spill] sm:$0xff] }
 0x33f   :  { %8253 = vmatpush1.bf16.msra.mxu0 %v18607_v57  ;;  %v18619_v31 = vpack.c.bf16 %v18617_v37, %v18618_v39  ;;  %v18620_v57 = vld [vmem:[#allocation144_spill] sm:$0xff]  ;;  %v18636_v39 = vld [vmem:[#allocation174_spill] sm:$0xff] }
 0x340   :  { %8255 = vmatprep.subr.bf16.mxu0 %v18610_v55  ;;  %v18622_v38 = vpack.c.bf16 %v18620_v57, %v18621_v59  ;;  %v18626_v55 = vld [vmem:[#allocation159_spill] sm:$0xff]  ;;  %v18639_v59 = vld [vmem:[#allocation186_spill] sm:$0xff] }
 0x341   :  { %8637 = vmatpush1.bf16.msra.mxu1 %v18608_v62  ;;  %v18623_v62 = vld [vmem:[#allocation149_spill] sm:$0xff]  ;;  %v18628_v6 = vpack.c.bf16 %v18626_v55, %v18627_v58  ;;  %v18645_v58 = vld [vmem:[#allocation200_spill] sm:$0xff] }
 0x342   :  { %8639 = vmatprep.subr.bf16.mxu1 %v18613_v48  ;;  %v18625_v24 = vpack.c.bf16 %v18623_v62, %v18624_v13  ;;  %v18629_v48 = vld [vmem:[#allocation162_spill] sm:$0xff]  ;;  %v18642_v13 = vld [vmem:[#allocation189_spill] sm:$0xff] }
 0x343   :  { %8257 = vmatpush1.bf16.msra.mxu0 %v18616_v14  ;;  %v18631_v1 = vpack.c.bf16 %v18629_v48, %v18630_v32  ;;  %v18632_v14 = vld [vmem:[#allocation172_spill] sm:$0xff]  ;;  %v18648_v32 = vld [vmem:[#allocation214_spill] sm:$0xff] }
 0x344   :  { %8259 = vmatprep.subr.bf16.mxu0 %v18622_v38  ;;  %v18634_v37 = vpack.c.bf16 %v18632_v14, %v18633_v54  ;;  %v18638_v38 = vld [vmem:[#allocation187_spill] sm:$0xff]  ;;  %v18651_v54 = vld [vmem:[#allocation217_spill] sm:$0xff] }
 0x345   :  { %8641 = vmatpush1.bf16.msra.mxu1 %v18619_v31  ;;  %v18635_v31 = vld [vmem:[#allocation177_spill] sm:$0xff]  ;;  %v18640_v62 = vpack.c.bf16 %v18638_v38, %v18639_v59 }
 0x346   :  { %8643 = vmatprep.subr.bf16.mxu1 %v18625_v24  ;;  %v18637_v57 = vpack.c.bf16 %v18635_v31, %v18636_v39  ;;  %v18641_v24 = vld [vmem:[#allocation190_spill] sm:$0xff] }
 0x347   :  { %8261 = vmatpush1.bf16.msra.mxu0 %v18628_v6  ;;  %v18643_v55 = vpack.c.bf16 %v18641_v24, %v18642_v13  ;;  %v18644_v6 = vld [vmem:[#allocation205_spill] sm:$0xff] }
 0x348   :  { %8263 = vmatprep.subr.bf16.mxu0 %v18634_v37  ;;  %v18646_v48 = vpack.c.bf16 %v18644_v6, %v18645_v58  ;;  %v18650_v37 = vld [vmem:[#allocation218_spill] sm:$0xff] }
 0x349   :  { %8645 = vmatpush1.bf16.msra.mxu1 %v18631_v1  ;;  %v18647_v1 = vld [vmem:[#allocation215_spill] sm:$0xff]  ;;  %v18652_v31 = vpack.c.bf16 %v18650_v37, %v18651_v54 }
 0x34a   :  { %8647 = vmatprep.subr.bf16.mxu1 %v18637_v57  ;;  %v18649_v14 = vpack.c.bf16 %v18647_v1, %v18648_v32  ;;  %v18653_v57 = vpack.c.bf16 %v18488_v63, %v18487_v47 }
 0x34b   :  { %8265 = vmatpush1.bf16.msra.mxu0 %v18640_v62  ;;  %v18654_v62 = vpack.c.bf16 %v18492_v33, %v18491_v40 }
 0x34c   :  { %8267 = vmatprep.subr.bf16.mxu0 %v18646_v48  ;;  %v18656_v48 = vpack.c.bf16 %v18496_v43, %v18495_v35  ;;  %v18677_v43 = vld [vmem:[#allocation43_spill] sm:$0xff] }
 0x34d   :  { %8649 = vmatpush1.bf16.msra.mxu1 %v18643_v55  ;;  %v18655_v55 = vpack.c.bf16 %v18494_v30, %v18493_v0 }
 0x34e   :  { %8651 = vmatprep.subr.bf16.mxu1 %v18649_v14  ;;  %v18657_v14 = vpack.c.bf16 %v18498_v52, %v18497_v28 }
 0x34f   :  { %8269 = vmatpush1.bf16.msra.mxu0 %v18652_v31  ;;  %v18658_v31 = vpack.c.bf16 %v18500_v41, %v18499_v25 }
 0x350   :  { %8271 = vmatprep.subr.bf16.mxu0 %v18654_v62  ;;  %v18660_v62 = vpack.c.bf16 %v18504_v42, %v18503_v46 }
 0x351   :  { %8653 = vmatpush1.bf16.msra.mxu1 %v18653_v57  ;;  %v18659_v57 = vpack.c.bf16 %v18502_v17, %v18501_v19 }
 0x352   :  { %8655 = vmatprep.subr.bf16.mxu1 %v18655_v55  ;;  %v18661_v55 = vpack.c.bf16 %v18508_v10, %v18507_v61  ;;  %v3555_v10 = vpop.f32.mrb[0].mxu1 }
 0x353   :  { %8273 = vmatpush1.bf16.msra.mxu0 %v18656_v48  ;;  %v18662_v48 = vmov 1.0|1.0   ;;  %6262 = vst [vmem:[#allocation7 + $0x10] sm:$0xff] %v3555_v10  ;;  %v3557_v61 = vpop.f32.mrb[1].mxu1 }
 0x354   :  { %8275 = vmatprep.subr.bf16.mxu0 %v18658_v31  ;;  %v18665_v31 = vld [vmem:[#allocation236_spill] sm:$0xff]  ;;  %6263 = vst [vmem:[#allocation7 + $0x18] sm:$0xff] %v3557_v61 }
 0x355   :  { %8657 = vmatpush1.bf16.msra.mxu1 %v18657_v14  ;;  %v18670_v14 = vld [vmem:[#allocation125_spill] sm:$0xff] }
 0x356   :  { %8659 = vmatprep.subr.bf16.mxu1 %v18659_v57  ;;  %v18682_v57 = vld [vmem:[#allocation55_spill] sm:$0xff] }
 0x357   :  { %8277 = vmatpush1.bf16.msra.mxu0 %v18660_v62  ;;  %v18673_v62 = vld [vmem:[#allocation38_spill] sm:$0xff] }
 0x358   :  { %8279 = vmatprep.subr.msk.bf16.mxu0 %vm12831_vm11, %v18662_v48  ;;  %vm18674_vm12 = vnez %v18673_v62  ;;  %v18684_v62 = vld [vmem:[#allocation61_spill] sm:$0xff] }
 0x359   :  { %8661 = vmatpush1.bf16.msra.mxu1 %v18661_v55  ;;  %v18675_v55 = vld [vmem:[#allocation39_spill] sm:$0xff] }
 0x35a   :  { %8663 = vmatprep.subr.msk.bf16.mxu1 %vm12847_vm14, %v18662_v48  ;;  %4327 = vmatmul.mubr.f32.vlgmr.msra.gmra.mrb[4].mxu0 %v18665_v31  ;;  %vm18676_vm0 = vnez %v18675_v55  ;;  %v18686_v55 = vld [vmem:[#allocation62_spill] sm:$0xff] }
 0x35b   :  { %8281 = vmatpush1.bf16.msk.msra.mxu0 %vm12864_vm10, %v18662_v48  ;;  %4334 = vmatprep.mubr.f32.mxu0 %v18670_v14 }
 0x35c   :  { %5673 = vmatmul.mubr.f32.vlgmr.msra.gmra.mrb[4].mxu1 %v18665_v31  ;;  %8283 = vmatprep.subr.msk.bf16.mxu0 %vm12915_vm1, %v18662_v48  ;;  %v18671_v31 = vld [vmem:[#allocation137_spill] sm:$0xff] }
 0x35d   :  { %8665 = vmatpush1.bf16.msk.msra.mxu1 %vm12890_vm8, %v18662_v48  ;;  %5680 = vmatprep.mubr.f32.mxu1 %v18670_v14  ;;  %v18679_v14 = vld [vmem:[#allocation235_spill] sm:$0xff] }
 0x35e   :  { %8667 = vmatprep.subr.msk.bf16.mxu1 %vm12937_vm6, %v18662_v48  ;;  %4337 = vmatmul.mubr.f32.gmra.mrb[6].mxu0 %v18671_v31  ;;  %vm18678_vm6 = vnez %v18677_v43  ;;  %v18688_v43 = vld [vmem:[#allocation67_spill] sm:$0xff] }
 0x35f   :  { %8285 = vmatpush1.bf16.msk.msra.mxu0 %vm12955_vm3, %v18662_v48  ;;  %4474 = vmatprep.mubr.f32.mxu0 %v18679_v14  ;;  %vm18683_vm3 = vnez %v18682_v57  ;;  %v18694_v57 = vld [vmem:[#allocation74_spill] sm:$0xff] }
 0x360   :  { %5683 = vmatmul.mubr.f32.gmra.mrb[6].mxu1 %v18671_v31  ;;  %8287 = vmatprep.subr.msk.bf16.mxu0 %vm18676_vm0, %v18662_v48  ;;  %v18680_v31 = vld [vmem:[#allocation46_spill] sm:$0xff]  ;;  %vm18687_vm0 = vnez %v18686_v55  ;;  %v18698_v55 = vld [vmem:[#allocation135_spill] sm:$0xff] }
 0x361   :  { %8669 = vmatpush1.bf16.msk.msra.mxu1 %vm18674_vm12, %v18662_v48  ;;  %5820 = vmatprep.mubr.f32.mxu1 %v18679_v14  ;;  %vm18681_vm1 = vnez %v18680_v31  ;;  %vm18685_vm12 = vnez %v18684_v62  ;;  %v18690_v14 = vld [vmem:[#allocation70_spill] sm:$0xff]  ;;  %v18692_v31 = vld [vmem:[#allocation73_spill] sm:$0xff]  ;;  %v18696_v62 = vld [vmem:[#allocation132_spill] sm:$0xff] }
 0x362   :  { %8671 = vmatprep.subr.msk.bf16.mxu1 %vm18678_vm6, %v18662_v48  ;;  %vm18689_vm6 = vnez %v18688_v43  ;;  %vm18691_vm8 = vnez %v18690_v14  ;;  %v18700_v43 = vld [vmem:[#allocation79_spill] sm:$0xff]  ;;  %v18702_v14 = vld [vmem:[#allocation82_spill] sm:$0xff] }
 0x363   :  { %8289 = vmatpush1.bf16.msk.msra.mxu0 %vm18681_vm1, %v18662_v48  ;;  %vm18693_vm1 = vnez %v18692_v31  ;;  %v2209_v31 = vpop.f32.mrb[0].mxu0 }
 0x364   :  { %8291 = vmatprep.subr.msk.bf16.mxu0 %vm18685_vm12, %v18662_v48  ;;  %vm18697_vm12 = vnez %v18696_v62  ;;  %6260 = vst [vmem:[#allocation7] sm:$0xff] %v2209_v31  ;;  %v18704_v62 = vld [vmem:[#allocation85_spill] sm:$0xff]  ;;  %v3563_v31 = vpop.f32.mrb[2].mxu1 }
 0x365   :  { %8673 = vmatpush1.bf16.msk.msra.mxu1 %vm18683_vm3, %v18662_v48  ;;  %vm18695_vm3 = vnez %v18694_v57  ;;  %v2211_v57 = vpop.f32.mrb[1].mxu0  ;;  %6270 = vst [vmem:[#allocation7 + $0x50] sm:$0xff] %v3563_v31  ;;  %v18722_v31 = vld [vmem:[#allocation110_spill] sm:$0xff] }
 0x366   :  { %8675 = vmatprep.subr.msk.bf16.mxu1 %vm18687_vm0, %v18662_v48  ;;  %vm18699_vm0 = vnez %v18698_v55  ;;  %6261 = vst [vmem:[#allocation7 + $0x8] sm:$0xff] %v2211_v57  ;;  %v18706_v55 = vld [vmem:[#allocation86_spill] sm:$0xff]  ;;  %v2217_v10 = vpop.f32.mrb[2].mxu0  ;;  %v3565_v57 = vpop.f32.mrb[3].mxu1 }
 0x367   :  { %8293 = vmatpush1.bf16.msk.msra.mxu0 %vm18689_vm6, %v18662_v48  ;;  %vm18701_vm6 = vnez %v18700_v43  ;;  %v18708_v43 = vld [vmem:[#allocation91_spill] sm:$0xff]  ;;  %6268 = vst [vmem:[#allocation7 + $0x40] sm:$0xff] %v2217_v10  ;;  %v2219_v61 = vpop.f32.mrb[3].mxu0  ;;  %6271 = vst [vmem:[#allocation7 + $0x58] sm:$0xff] %v3565_v57  ;;  %v18720_v10 = vld [vmem:[#allocation109_spill] sm:$0xff] }
 0x368   :  { %8295 = vmatprep.subr.msk.bf16.mxu0 %vm18693_vm1, %v18662_v48  ;;  %6269 = vst [vmem:[#allocation7 + $0x48] sm:$0xff] %v2219_v61  ;;  %vm18723_vm1 = vnez %v18722_v31  ;;  %v18724_v61 = vld [vmem:[#allocation115_spill] sm:$0xff]  ;;  %v18726_v57 = vld [vmem:[#allocation118_spill] sm:$0xff] }
 0x369   :  { %8677 = vmatpush1.bf16.msk.msra.mxu1 %vm18691_vm8, %v18662_v48  ;;  %vm18703_vm8 = vnez %v18702_v14  ;;  %v18710_v14 = vld [vmem:[#allocation94_spill] sm:$0xff]  ;;  %v18734_v31 = vld [vmem:[#allocation131_spill] sm:$0xff] }
 0x36a   :  { %8679 = vmatprep.subr.msk.bf16.mxu1 %vm18695_vm3, %v18662_v48  ;;  %vm18721_vm3 = vnez %v18720_v10  ;;  %v18732_v10 = vld [vmem:[#allocation128_spill] sm:$0xff] }
 0x36b   :  { %8297 = vmatpush1.bf16.msk.msra.mxu0 %vm18697_vm12, %v18662_v48  ;;  %vm18705_vm12 = vnez %v18704_v62  ;;  %v18712_v62 = vld [vmem:[#allocation97_spill] sm:$0xff] }
 0x36c   :  { %8299 = vmatprep.subr.msk.bf16.mxu0 %vm18701_vm6, %v18662_v48  ;;  %vm18709_vm6 = vnez %v18708_v43  ;;  %v18716_v43 = vld [vmem:[#allocation103_spill] sm:$0xff] }
 0x36d   :  { %8681 = vmatpush1.bf16.msk.msra.mxu1 %vm18699_vm0, %v18662_v48  ;;  %vm18707_vm0 = vnez %v18706_v55  ;;  %v18714_v55 = vld [vmem:[#allocation98_spill] sm:$0xff] }
 0x36e   :  { %8683 = vmatprep.subr.msk.bf16.mxu1 %vm18703_vm8, %v18662_v48  ;;  %vm18711_vm8 = vnez %v18710_v14  ;;  %v18718_v14 = vld [vmem:[#allocation106_spill] sm:$0xff] }
 0x36f   :  { %8301 = vmatpush1.bf16.msk.msra.mxu0 %vm18705_vm12, %v18662_v48  ;;  %vm18713_vm12 = vnez %v18712_v62  ;;  %v18782_v62 = vand.u32 4294901760, %v18534_v53  ;;  %v18790_v53 = vand.u32 4294901760, %v18540_v3  ;;  %v18799_v3 = vld [vmem:[#allocation169_spill] sm:$0xff] }
 0x370   :  { %8303 = vmatprep.subr.msk.bf16.mxu0 %vm18709_vm6, %v18662_v48  ;;  %vm18717_vm6 = vnez %v18716_v43  ;;  %v18728_v43 = vld [vmem:[#allocation122_spill] sm:$0xff] }
 0x371   :  { %8685 = vmatpush1.bf16.msk.msra.mxu1 %vm18707_vm0, %v18662_v48  ;;  %vm18715_vm0 = vnez %v18714_v55 }
 0x372   :  { %8687 = vmatprep.subr.msk.bf16.mxu1 %vm18711_vm8, %v18662_v48  ;;  %vm18719_vm8 = vnez %v18718_v14  ;;  %v18730_v14 = vld [vmem:[#allocation126_spill] sm:$0xff] }
 0x373   :  { %8305 = vmatpush1.bf16.msk.msra.mxu0 %vm18713_vm12, %v18662_v48  ;;  %vm18725_vm12 = vnez %v18724_v61  ;;  %v18736_v61 = vld [vmem:[#allocation136_spill] sm:$0xff] }
 0x374   :  { %8307 = vmatprep.subr.msk.bf16.mxu0 %vm18717_vm6, %v18662_v48  ;;  %vm18729_vm6 = vnez %v18728_v43  ;;  %v18740_v43 = vld [vmem:[#allocation142_spill] sm:$0xff] }
 0x375   :  { %8689 = vmatpush1.bf16.msk.msra.mxu1 %vm18715_vm0, %v18662_v48  ;;  %vm18727_vm0 = vnez %v18726_v57  ;;  %v18738_v57 = vld [vmem:[#allocation139_spill] sm:$0xff] }
 0x376   :  { %8691 = vmatprep.subr.msk.bf16.mxu1 %vm18719_vm8, %v18662_v48  ;;  %vm18731_vm8 = vnez %v18730_v14  ;;  %v18742_v14 = vld [vmem:[#allocation145_spill] sm:$0xff] }
 0x377   :  { %8309 = vmatpush1.bf16.msk.msra.mxu0 %vm18721_vm3, %v18662_v48  ;;  %vm18733_vm3 = vnez %v18732_v10  ;;  %v18744_v10 = vld [vmem:[#allocation151_spill] sm:$0xff] }
 0x378   :  { %8311 = vmatprep.subr.msk.bf16.mxu0 %vm18725_vm12, %v18662_v48  ;;  %vm18737_vm12 = vnez %v18736_v61  ;;  %v18748_v61 = vld [vmem:[#allocation157_spill] sm:$0xff] }
 0x379   :  { %8693 = vmatpush1.bf16.msk.msra.mxu1 %vm18723_vm1, %v18662_v48  ;;  %vm18735_vm1 = vnez %v18734_v31  ;;  %v18746_v31 = vld [vmem:[#allocation154_spill] sm:$0xff] }
 0x37a   :  { %8695 = vmatprep.subr.msk.bf16.mxu1 %vm18727_vm0, %v18662_v48  ;;  %vm18739_vm0 = vnez %v18738_v57  ;;  %v18750_v57 = vld [vmem:[#allocation160_spill] sm:$0xff] }
 0x37b   :  { %8313 = vmatpush1.bf16.msk.msra.mxu0 %vm18729_vm6, %v18662_v48  ;;  %vm18741_vm6 = vnez %v18740_v43  ;;  %v18752_v43 = vld [vmem:[#allocation165_spill] sm:$0xff] }
 0x37c   :  { %8315 = vmatprep.subr.msk.bf16.mxu0 %vm18733_vm3, %v18662_v48  ;;  %vm18745_vm3 = vnez %v18744_v10  ;;  %v18756_v10 = vld [vmem:[#allocation170_spill] sm:$0xff] }
 0x37d   :  { %8697 = vmatpush1.bf16.msk.msra.mxu1 %vm18731_vm8, %v18662_v48  ;;  %vm18743_vm8 = vnez %v18742_v14  ;;  %v18754_v14 = vld [vmem:[#allocation167_spill] sm:$0xff] }
 0x37e   :  { %8699 = vmatprep.subr.msk.bf16.mxu1 %vm18735_vm1, %v18662_v48  ;;  %vm18747_vm1 = vnez %v18746_v31  ;;  %v18758_v31 = vld [vmem:[#allocation173_spill] sm:$0xff] }
 0x37f   :  { %8317 = vmatpush1.bf16.msk.msra.mxu0 %vm18737_vm12, %v18662_v48  ;;  %vm18749_vm12 = vnez %v18748_v61  ;;  %v18760_v61 = vld [vmem:[#allocation179_spill] sm:$0xff] }
 0x380   :  { %8319 = vmatprep.subr.msk.bf16.mxu0 %vm18741_vm6, %v18662_v48  ;;  %vm18753_vm6 = vnez %v18752_v43  ;;  %v18764_v43 = vld [vmem:[#allocation203_spill] sm:$0xff] }
 0x381   :  { %8701 = vmatpush1.bf16.msk.msra.mxu1 %vm18739_vm0, %v18662_v48  ;;  %vm18751_vm0 = vnez %v18750_v57  ;;  %v18762_v57 = vld [vmem:[#allocation182_spill] sm:$0xff] }
 0x382   :  { %8703 = vmatprep.subr.msk.bf16.mxu1 %vm18743_vm8, %v18662_v48  ;;  %vm18755_vm8 = vnez %v18754_v14  ;;  %v18766_v14 = vld [vmem:[#allocation204_spill] sm:$0xff] }
 0x383   :  { %8321 = vmatpush1.bf16.msk.msra.mxu0 %vm18745_vm3, %v18662_v48  ;;  %vm18757_vm3 = vnez %v18756_v10  ;;  %v18792_v10 = vand.u32 4294901760, %v18542_v49 }
 0x384   :  { %8323 = vmatprep.subr.msk.bf16.mxu0 %vm18749_vm12, %v18662_v48  ;;  %vm18761_vm12 = vnez %v18760_v61  ;;  %v18770_v61 = vld [vmem:[#allocation193_spill] sm:$0xff] }
 0x385   :  { %8705 = vmatpush1.bf16.msk.msra.mxu1 %vm18747_vm1, %v18662_v48  ;;  %vm18759_vm1 = vnez %v18758_v31  ;;  %v18785_v31 = vand.u32 4294901760, %v18535_v56 }
 0x386   :  { %8707 = vmatprep.subr.msk.bf16.mxu1 %vm18751_vm0, %v18662_v48  ;;  %vm18763_vm0 = vnez %v18762_v57  ;;  %v18772_v57 = vld [vmem:[#allocation198_spill] sm:$0xff] }
 0x387   :  { %8325 = vmatpush1.bf16.msk.msra.mxu0 %vm18753_vm6, %v18662_v48  ;;  %vm18765_vm6 = vnez %v18764_v43  ;;  %v18781_v43 = vand.u32 4294901760, %v18533_v15  ;;  %v18788_v15 = vand.u32 4294901760, %v18538_v45 }
 0x388   :  { %8327 = vmatprep.subr.msk.bf16.mxu0 %vm18757_vm3, %v18662_v48 }
 0x389   :  { %8709 = vmatpush1.bf16.msk.msra.mxu1 %vm18755_vm8, %v18662_v48  ;;  %vm18767_vm8 = vnez %v18766_v14  ;;  %v18775_v14 = vld [vmem:[#allocation207_spill] sm:$0xff]  ;;  %v8726_v42 = vpack.c.bf16 %v18782_v62, %v18781_v43  ;;  %v18789_v43 = vand.u32 4294901760, %v18539_v34  ;;  %v18797_v34 = vld [vmem:[#allocation168_spill] sm:$0xff] }
 0x38a   :  { %8711 = vmatprep.subr.msk.bf16.mxu1 %vm18759_vm1, %v18662_v48 }
 0x38b   :  { %8329 = vmatpush1.bf16.msk.msra.mxu0 %vm18761_vm12, %v18662_v48  ;;  %vm18771_vm12 = vnez %v18770_v61  ;;  %v18779_v61 = vand.u32 4294901760, %v18531_v4  ;;  %v18786_v4 = vand.u32 4294901760, %v18536_v51  ;;  %v8346_v62 = vpack.c.bf16 %v18790_v53, %v18789_v43  ;;  %v18809_v53 = vld [vmem:[#allocation124_spill] sm:$0xff] }
 0x38c   :  { %8331 = vmatprep.subr.msk.bf16.mxu0 %vm18765_vm6, %v18662_v48  ;;  %v18794_v51 = vand.u32 4294901760, %v18544_v21 }
 0x38d   :  { %8713 = vmatpush1.bf16.msk.msra.mxu1 %vm18763_vm0, %v18662_v48  ;;  %vm18773_vm0 = vnez %v18772_v57  ;;  %v18780_v57 = vand.u32 4294901760, %v18532_v12  ;;  %v8344_v46 = vpack.c.bf16 %v18786_v4, %v18785_v31  ;;  %v18787_v12 = vand.u32 4294901760, %v18537_v8  ;;  %v18795_v8 = vld [vmem:[#allocation37_spill] sm:$0xff] }
 0x38e   :  { %8715 = vmatprep.subr.msk.bf16.mxu1 %vm18767_vm8, %v18662_v48  ;;  %vm18776_vm8 = vnez %v18775_v14  ;;  %v18793_v14 = vld [vmem:[#allocation237_spill] sm:$0xff]  ;;  %v18800_v31 = vand.u32 4294901760, %v18799_v3 }
 0x38f   :  { %8333 = vmatpush1.bf16.msk.msra.mxu0 %vm13898_vm9, %v18662_v48  ;;  %v8342_v55 = vpack.c.bf16 %v18780_v57, %v18779_v61  ;;  %v8728_v61 = vpack.c.bf16 %v18788_v15, %v18787_v12  ;;  %v18791_v57 = vand.u32 4294901760, %v18541_v5  ;;  %v18801_v5 = vld [vmem:[#allocation181_spill] sm:$0xff] }
 0x390   :  { %8335 = vmatprep.subr.msk.bf16.mxu0 %vm18771_vm12, %v18662_v48  ;;  %v18802_v49 = vand.u32 4294901760, %v18801_v5  ;;  %v18817_v3 = vld [vmem:[#allocation209_spill] sm:$0xff] }
 0x391   :  { %8717 = vmatpush1.bf16.msk.msra.mxu1 %vm13924_vm13, %v18662_v48  ;;  %v8730_v56 = vpack.c.bf16 %v18792_v10, %v18791_v57  ;;  %v18803_v10 = vld [vmem:[#allocation183_spill] sm:$0xff]  ;;  %v18810_v57 = vld [vmem:[#allocation140_spill] sm:$0xff] }
 0x392   :  { %8719 = vmatprep.subr.msk.bf16.mxu1 %vm18773_vm0, %v18662_v48  ;;  %v18804_v12 = vand.u32 4294901760, %v18803_v10 }
 0x393   :  { %8337 = vmatpush1.bf16.msk.msra.mxu0 %vm13974_vm15, %v18662_v48 }
 0x394   :  { %8339 = vmatprep.subr.msk.bf16.mxu0 %vm14018_vm5, %v18662_v48  ;;  %v8350_v15 = vpack.c.bf16 %v18804_v12, %v18802_v49  ;;  %v18819_v49 = vld [vmem:[#allocation211_spill] sm:$0xff]  ;;  %v18821_v12 = vld [vmem:[#allocation212_spill] sm:$0xff] }
 0x395   :  { %8721 = vmatpush1.bf16.msk.msra.mxu1 %vm18776_vm8, %v18662_v48  ;;  %v18820_v10 = vand.u32 4294901760, %v18819_v49  ;;  %v18836_v49 = vld [vmem:[#allocation199_spill] sm:$0xff] }
 0x396   :  { %8723 = vmatprep.subr.msk.bf16.mxu1 %vm14040_vm4, %v18662_v48 }
 0x397   :  { %8341 = vmatpush1.bf16.msk.msra.mxu0 %vm14067_vm7, %v18662_v48 }
 0x398   :  { %8343 = vmatprep.subr.bf16.mxu0 %v8342_v55  ;;  %v18798_v55 = vand.u32 4294901760, %v18797_v34  ;;  %v18815_v34 = vld [vmem:[#allocation197_spill] sm:$0xff] }
 0x399   :  { %8725 = vmatpush1.bf16.msk.msra.mxu1 %vm14092_vm2, %v18662_v48 }
 0x39a   :  { %8727 = vmatprep.subr.bf16.mxu1 %v8726_v42  ;;  %4478 = vmatmul.mubr.f32.vlgmr.msra.gmra.mrb[4].mxu0 %v18793_v14  ;;  %v18796_v42 = vand.u32 4294901760, %v18795_v8  ;;  %v8732_v4 = vpack.c.bf16 %v18800_v31, %v18798_v55  ;;  %v18816_v55 = vand.u32 4294901760, %v18815_v34  ;;  %v18818_v31 = vand.u32 4294901760, %v18817_v3 }
 0x39b   :  { %8345 = vmatpush1.bf16.msra.mxu0 %v8344_v46  ;;  %4486 = vmatprep.mubr.f32.mxu0 %v18809_v53 }
 0x39c   :  { %5824 = vmatmul.mubr.f32.vlgmr.msra.gmra.mrb[4].mxu1 %v18793_v14  ;;  %v8348_v45 = vpack.c.bf16 %v18796_v42, %v18794_v51  ;;  %8347 = vmatprep.subr.bf16.mxu0 %v8346_v62  ;;  %v18805_v14 = vld [vmem:[#allocation184_spill] sm:$0xff]  ;;  %v18811_v62 = vld [vmem:[#allocation194_spill] sm:$0xff]  ;;  %v8736_v5 = vpack.c.bf16 %v18818_v31, %v18816_v55  ;;  %v18834_v55 = vld [vmem:[#allocation117_spill] sm:$0xff] }
 0x39d   :  { %8729 = vmatpush1.bf16.msra.mxu1 %v8728_v61  ;;  %v18806_v46 = vand.u32 4294901760, %v18805_v14  ;;  %v18807_v61 = vld [vmem:[#allocation192_spill] sm:$0xff]  ;;  %5832 = vmatprep.mubr.f32.mxu1 %v18809_v53  ;;  %v18822_v14 = vand.u32 4294901760, %v18821_v12  ;;  %v18835_v3 = vand.u32 4294901760, %v18834_v55  ;;  %v18838_v12 = vld [vmem:[#allocation202_spill] sm:$0xff] }
 0x39e   :  { %8731 = vmatprep.subr.bf16.mxu1 %v8730_v56  ;;  %v18808_v43 = vand.u32 4294901760, %v18807_v61  ;;  %4490 = vmatmul.mubr.f32.gmra.mrb[6].mxu0 %v18810_v57  ;;  %v18812_v56 = vand.u32 4294901760, %v18811_v62  ;;  %v18813_v51 = vld [vmem:[#allocation196_spill] sm:$0xff]  ;;  %v18828_v62 = vld [vmem:[#allocation113_spill] sm:$0xff] }
 0x39f   :  { %8349 = vmatpush1.bf16.msra.mxu0 %v8348_v45  ;;  %v18814_v8 = vand.u32 4294901760, %v18813_v51  ;;  %v18823_v61 = vld [vmem:[#allocation104_spill] sm:$0xff] }
 0x3a0   :  { %v8734_v21 = vpack.c.bf16 %v18808_v43, %v18806_v46  ;;  %5836 = vmatmul.mubr.f32.gmra.mrb[6].mxu1 %v18810_v57  ;;  %8351 = vmatprep.subr.bf16.mxu0 %v8350_v15  ;;  %v8354_v46 = vpack.c.bf16 %v18822_v14, %v18820_v10  ;;  %v18824_v45 = vand.u32 4294901760, %v18823_v61  ;;  %v18827_v57 = vld [vmem:[#allocation231_spill] sm:$0xff]  ;;  %v18830_v15 = vld [vmem:[#allocation114_spill] sm:$0xff]  ;;  %v18837_v10 = vand.u32 4294901760, %v18836_v49  ;;  %v18852_v49 = vld [vmem:[#allocation48_spill] sm:$0xff] }
 0x3a1   :  { %8733 = vmatpush1.bf16.msra.mxu1 %v8732_v4  ;;  %v8352_v42 = vpack.c.bf16 %v18814_v8, %v18812_v56  ;;  %v18825_v4 = vld [vmem:[#allocation105_spill] sm:$0xff]  ;;  %4753 = vmatprep.mubr.f32.mxu0 %v18827_v57  ;;  %v18829_v56 = vand.u32 4294901760, %v18828_v62  ;;  %v18832_v8 = vld [vmem:[#allocation116_spill] sm:$0xff]  ;;  %v18839_v14 = vand.u32 4294901760, %v18838_v12  ;;  %v18844_v62 = vld [vmem:[#allocation42_spill] sm:$0xff] }
 0x3a2   :  { %8735 = vmatprep.subr.bf16.mxu1 %v8734_v21  ;;  %v18826_v43 = vand.u32 4294901760, %v18825_v4  ;;  %6099 = vmatprep.mubr.f32.mxu1 %v18827_v57  ;;  %v18831_v21 = vand.u32 4294901760, %v18830_v15  ;;  %v18833_v34 = vand.u32 4294901760, %v18832_v8  ;;  %v18846_v15 = vld [vmem:[#allocation44_spill] sm:$0xff]  ;;  %v18854_v12 = vld [vmem:[#allocation51_spill] sm:$0xff] }
 0x3a3   :  { %8353 = vmatpush1.bf16.msra.mxu0 %v8352_v42  ;;  %v8358_v61 = vpack.c.bf16 %v18839_v14, %v18837_v10  ;;  %v18853_v10 = vand.u32 4294901760, %v18852_v49  ;;  %v18855_v14 = vand.u32 4294901760, %v18854_v12  ;;  %v18868_v49 = vld [vmem:[#allocation60_spill] sm:$0xff]  ;;  %v18870_v12 = vld [vmem:[#allocation63_spill] sm:$0xff] }
 0x3a4   :  { %v8738_v53 = vpack.c.bf16 %v18826_v43, %v18824_v45  ;;  %v8356_v51 = vpack.c.bf16 %v18831_v21, %v18829_v56  ;;  %v8740_v31 = vpack.c.bf16 %v18835_v3, %v18833_v34  ;;  %8355 = vmatprep.subr.bf16.mxu0 %v8354_v46  ;;  %v18840_v45 = vld [vmem:[#allocation40_spill] sm:$0xff]  ;;  %v18845_v56 = vand.u32 4294901760, %v18844_v62  ;;  %v18848_v34 = vld [vmem:[#allocation45_spill] sm:$0xff]  ;;  %v18860_v62 = vld [vmem:[#allocation54_spill] sm:$0xff] }
 0x3a5   :  { %8737 = vmatpush1.bf16.msra.mxu1 %v8736_v5  ;;  %v18841_v42 = vand.u32 4294901760, %v18840_v45  ;;  %v18842_v5 = vld [vmem:[#allocation41_spill] sm:$0xff]  ;;  %v18847_v21 = vand.u32 4294901760, %v18846_v15  ;;  %v18849_v46 = vand.u32 4294901760, %v18848_v34  ;;  %v8362_v45 = vpack.c.bf16 %v18855_v14, %v18853_v10  ;;  %v18862_v15 = vld [vmem:[#allocation56_spill] sm:$0xff] }
 0x3a6   :  { %8739 = vmatprep.subr.bf16.mxu1 %v8738_v53  ;;  %v18843_v4 = vand.u32 4294901760, %v18842_v5  ;;  %v18850_v53 = vld [vmem:[#allocation47_spill] sm:$0xff]  ;;  %v18869_v10 = vand.u32 4294901760, %v18868_v49  ;;  %v18871_v14 = vand.u32 4294901760, %v18870_v12  ;;  %v18884_v49 = vand.u32 4294901760, %v18591_v29 }
 0x3a7   :  { %8357 = vmatpush1.bf16.msra.mxu0 %v8356_v51  ;;  %v8360_v8 = vpack.c.bf16 %v18847_v21, %v18845_v56  ;;  %v18851_v55 = vand.u32 4294901760, %v18850_v53  ;;  %v18861_v56 = vand.u32 4294901760, %v18860_v62  ;;  %v18863_v21 = vand.u32 4294901760, %v18862_v15  ;;  %v18876_v62 = vld [vmem:[#allocation66_spill] sm:$0xff]  ;;  %v18878_v15 = vld [vmem:[#allocation68_spill] sm:$0xff] }
 0x3a8   :  { %v8742_v43 = vpack.c.bf16 %v18843_v4, %v18841_v42  ;;  %8359 = vmatprep.subr.bf16.mxu0 %v8358_v61  ;;  %v18856_v42 = vld [vmem:[#allocation52_spill] sm:$0xff] }
 0x3a9   :  { %8741 = vmatpush1.bf16.msra.mxu1 %v8740_v31  ;;  %v8744_v3 = vpack.c.bf16 %v18851_v55, %v18849_v46  ;;  %v18857_v51 = vand.u32 4294901760, %v18856_v42  ;;  %v18858_v31 = vld [vmem:[#allocation53_spill] sm:$0xff]  ;;  %v8364_v34 = vpack.c.bf16 %v18863_v21, %v18861_v56  ;;  %v8366_v42 = vpack.c.bf16 %v18871_v14, %v18869_v10 }
 0x3aa   :  { %8743 = vmatprep.subr.bf16.mxu1 %v8742_v43  ;;  %v18859_v5 = vand.u32 4294901760, %v18858_v31  ;;  %v18864_v46 = vld [vmem:[#allocation57_spill] sm:$0xff]  ;;  %v18866_v43 = vld [vmem:[#allocation59_spill] sm:$0xff]  ;;  %v18877_v56 = vand.u32 4294901760, %v18876_v62  ;;  %v18879_v21 = vand.u32 4294901760, %v18878_v15  ;;  %v18885_v10 = vand.u32 4294901760, %v18592_v7 }
 0x3ab   :  { %8361 = vmatpush1.bf16.msra.mxu0 %v8360_v8  ;;  %v18865_v61 = vand.u32 4294901760, %v18864_v46  ;;  %v18867_v53 = vand.u32 4294901760, %v18866_v43  ;;  %v18892_v7 = vand.u32 4294901760, %v18599_v16  ;;  %v18895_v62 = vand.u32 4294901760, %v18602_v18 }
 0x3ac   :  { %v8746_v4 = vpack.c.bf16 %v18859_v5, %v18857_v51  ;;  %8363 = vmatprep.subr.bf16.mxu0 %v8362_v45  ;;  %v18872_v51 = vld [vmem:[#allocation64_spill] sm:$0xff]  ;;  %v8368_v46 = vpack.c.bf16 %v18879_v21, %v18877_v56  ;;  %v8370_v12 = vpack.c.bf16 %v18885_v10, %v18884_v49  ;;  %v18898_v56 = vand.u32 4294901760, %v18377_v27  ;;  %v18910_v27 = vld [vmem:[#allocation107_spill] sm:$0xff] }
 0x3ad   :  { %8745 = vmatpush1.bf16.msra.mxu1 %v8744_v3  ;;  %v8748_v55 = vpack.c.bf16 %v18867_v53, %v18865_v61  ;;  %v18873_v8 = vand.u32 4294901760, %v18872_v51  ;;  %v18874_v3 = vld [vmem:[#allocation65_spill] sm:$0xff]  ;;  %v18888_v51 = vand.u32 4294901760, %v18595_v20  ;;  %v18899_v15 = vand.u32 4294901760, %v18378_v2  ;;  %v18912_v10 = vld [vmem:[#allocation108_spill] sm:$0xff] }
 0x3ae   :  { %8747 = vmatprep.subr.bf16.mxu1 %v8746_v4  ;;  %v18875_v31 = vand.u32 4294901760, %v18874_v3  ;;  %v18880_v61 = vld [vmem:[#allocation69_spill] sm:$0xff]  ;;  %v18882_v4 = vld [vmem:[#allocation71_spill] sm:$0xff]  ;;  %v18911_v49 = vand.u32 4294901760, %v18910_v27  ;;  %v18940_v27 = vld [vmem:[#allocation158_spill] sm:$0xff] }
 0x3af   :  { %8365 = vmatpush1.bf16.msra.mxu0 %v8364_v34  ;;  %v18881_v45 = vand.u32 4294901760, %v18880_v61  ;;  %v18883_v43 = vand.u32 4294901760, %v18882_v4  ;;  %v18886_v34 = vand.u32 4294901760, %v18593_v9  ;;  %v18893_v9 = vand.u32 4294901760, %v18600_v44  ;;  %v18900_v44 = vld [vmem:[#allocation96_spill] sm:$0xff]  ;;  %v18906_v4 = vld [vmem:[#allocation101_spill] sm:$0xff] }
 0x3b0   :  { %v8750_v5 = vpack.c.bf16 %v18875_v31, %v18873_v8  ;;  %8367 = vmatprep.subr.bf16.mxu0 %v8366_v42  ;;  %v18889_v8 = vand.u32 4294901760, %v18596_v23  ;;  %v18890_v42 = vand.u32 4294901760, %v18597_v50  ;;  %v18891_v31 = vand.u32 4294901760, %v18598_v36  ;;  %v18904_v61 = vld [vmem:[#allocation100_spill] sm:$0xff] }
 0x3b1   :  { %8749 = vmatpush1.bf16.msra.mxu1 %v8748_v55  ;;  %v8752_v53 = vpack.c.bf16 %v18883_v43, %v18881_v45  ;;  %v18887_v55 = vand.u32 4294901760, %v18594_v26  ;;  %v8374_v26 = vpack.c.bf16 %v18893_v9, %v18892_v7  ;;  %v18896_v23 = vand.u32 4294901760, %v18368_v11  ;;  %v18922_v9 = vld [vmem:[#allocation129_spill] sm:$0xff] }
 0x3b2   :  { %8751 = vmatprep.subr.bf16.mxu1 %v8750_v5  ;;  %v8372_v3 = vpack.c.bf16 %v18889_v8, %v18888_v51  ;;  %v8756_v29 = vpack.c.bf16 %v18891_v31, %v18890_v42  ;;  %v18894_v5 = vand.u32 4294901760, %v18601_v60  ;;  %v18897_v50 = vand.u32 4294901760, %v18369_v22  ;;  %v18902_v60 = vld [vmem:[#allocation99_spill] sm:$0xff]  ;;  %v18908_v22 = vld [vmem:[#allocation102_spill] sm:$0xff]  ;;  %v18916_v51 = vld [vmem:[#allocation112_spill] sm:$0xff] }
 0x3b3   :  { %v8754_v14 = vpack.c.bf16 %v18887_v55, %v18886_v34  ;;  %8369 = vmatpush1.bf16.msra.mxu0 %v8368_v46  ;;  %v8760_v16 = vpack.c.bf16 %v18899_v15, %v18898_v56  ;;  %v18901_v21 = vand.u32 4294901760, %v18900_v44  ;;  %v18903_v46 = vand.u32 4294901760, %v18902_v60  ;;  %v18914_v34 = vld [vmem:[#allocation111_spill] sm:$0xff]  ;;  %v18928_v56 = vld [vmem:[#allocation134_spill] sm:$0xff] }
 0x3b4   :  { %8371 = vmatprep.subr.bf16.mxu0 %v8370_v12  ;;  %v8758_v20 = vpack.c.bf16 %v18895_v62, %v18894_v5  ;;  %v8376_v36 = vpack.c.bf16 %v18897_v50, %v18896_v23  ;;  %v18905_v45 = vand.u32 4294901760, %v18904_v61  ;;  %v18907_v43 = vand.u32 4294901760, %v18906_v4  ;;  %v18924_v62 = vld [vmem:[#allocation130_spill] sm:$0xff]  ;;  %v18926_v23 = vld [vmem:[#allocation133_spill] sm:$0xff]  ;;  %v18932_v60 = vld [vmem:[#allocation143_spill] sm:$0xff] }
 0x3b5   :  { %8753 = vmatpush1.bf16.msra.mxu1 %v8752_v53  ;;  %v8378_v18 = vpack.c.bf16 %v18903_v46, %v18901_v21  ;;  %v18909_v53 = vand.u32 4294901760, %v18908_v22  ;;  %v18913_v12 = vand.u32 4294901760, %v18912_v10  ;;  %v18915_v55 = vand.u32 4294901760, %v18914_v34  ;;  %v18936_v4 = vld [vmem:[#allocation146_spill] sm:$0xff]  ;;  %v18944_v34 = vld [vmem:[#allocation161_spill] sm:$0xff] }
 0x3b6   :  { %8755 = vmatprep.subr.bf16.mxu1 %v8754_v14  ;;  %v8762_v11 = vpack.c.bf16 %v18907_v43, %v18905_v45  ;;  %v18917_v8 = vand.u32 4294901760, %v18916_v51  ;;  %v18927_v50 = vand.u32 4294901760, %v18926_v23  ;;  %v18929_v15 = vand.u32 4294901760, %v18928_v56 }
 0x3b7   :  { %8373 = vmatpush1.bf16.msra.mxu0 %v8372_v3  ;;  %v8380_v2 = vpack.c.bf16 %v18911_v49, %v18909_v53  ;;  %v8764_v14 = vpack.c.bf16 %v18915_v55, %v18913_v12  ;;  %v18918_v3 = vld [vmem:[#allocation119_spill] sm:$0xff]  ;;  %v18933_v46 = vand.u32 4294901760, %v18932_v60  ;;  %v18937_v43 = vand.u32 4294901760, %v18936_v4 }
 0x3b8   :  { %8375 = vmatprep.subr.bf16.mxu0 %v8374_v26  ;;  %v18919_v42 = vand.u32 4294901760, %v18918_v3  ;;  %v18923_v26 = vand.u32 4294901760, %v18922_v9  ;;  %v18941_v49 = vand.u32 4294901760, %v18940_v27  ;;  %v18945_v55 = vand.u32 4294901760, %v18944_v34  ;;  %v18948_v3 = vld [vmem:[#allocation171_spill] sm:$0xff]  ;;  %v18980_v27 = vld [vmem:[#allocation21_spill] sm:$0xff] }
 0x3b9   :  { %8757 = vmatpush1.bf16.msra.mxu1 %v8756_v29  ;;  %v18920_v29 = vld [vmem:[#allocation120_spill] sm:$0xff]  ;;  %v18952_v9 = vand.u32 4294901760, %v18636_v39  ;;  %v18956_v23 = vand.u32 4294901760, %v18638_v38  ;;  %v18958_v56 = vand.u32 4294901760, %v18641_v24  ;;  %v18960_v39 = vand.u32 4294901760, %v18644_v6  ;;  %v18986_v34 = vld [vmem:[#allocation58_spill] sm:$0xff] }
 0x3ba   :  { %8759 = vmatprep.subr.bf16.mxu1 %v8758_v20  ;;  %v8382_v31 = vpack.c.bf16 %v18919_v42, %v18917_v8  ;;  %v18921_v7 = vand.u32 4294901760, %v18920_v29  ;;  %v18925_v20 = vand.u32 4294901760, %v18924_v62  ;;  %v18949_v42 = vand.u32 4294901760, %v18948_v3  ;;  %v18996_v3 = vld [vmem:[#allocation32_spill] sm:$0xff] }
 0x3bb   :  { %8377 = vmatpush1.bf16.msra.mxu0 %v8376_v36  ;;  %v18962_v60 = vand.u32 4294901760, %v18647_v1  ;;  %v18963_v38 = vand.u32 4294901760, %v18651_v54  ;;  %v18967_v6 = vand.u32 4294901760, %v18491_v40 }
 0x3bc   :  { %8379 = vmatprep.subr.bf16.mxu0 %v8378_v18  ;;  %v8766_v5 = vpack.c.bf16 %v18923_v26, %v18921_v7  ;;  %v8384_v36 = vpack.c.bf16 %v18927_v50, %v18925_v20  ;;  %v18934_v18 = vld [vmem:[#allocation144_spill] sm:$0xff]  ;;  %v18953_v26 = vld [vmem:[#allocation177_spill] sm:$0xff]  ;;  %v18955_v20 = vand.u32 4294901760, %v18639_v59 }
 0x3bd   :  { %8761 = vmatpush1.bf16.msra.mxu1 %v8760_v16  ;;  %v18930_v16 = vld [vmem:[#allocation11_spill] sm:$0xff]  ;;  %v18935_v61 = vand.u32 4294901760, %v18934_v18  ;;  %v18966_v18 = vand.u32 4294901760, %v18488_v63 }
 0x3be   :  { %8763 = vmatprep.subr.bf16.mxu1 %v8762_v11  ;;  %v18931_v44 = vand.u32 4294901760, %v18930_v16  ;;  %v18938_v11 = vld [vmem:[#allocation149_spill] sm:$0xff]  ;;  %v8392_v50 = vpack.c.bf16 %v18956_v23, %v18955_v20  ;;  %v18959_v16 = vand.u32 4294901760, %v18645_v58  ;;  %v19014_v23 = vld [vmem:[#allocation62_spill] sm:$0xff] }
 0x3bf   :  { %8381 = vmatpush1.bf16.msra.mxu0 %v8380_v2  ;;  %v8386_v45 = vpack.c.bf16 %v18935_v61, %v18933_v46  ;;  %v18939_v22 = vand.u32 4294901760, %v18938_v11  ;;  %v18942_v2 = vld [vmem:[#allocation159_spill] sm:$0xff]  ;;  %v18965_v46 = vand.u32 4294901760, %v18487_v47  ;;  %v18969_v61 = vand.u32 4294901760, %v18493_v0  ;;  %v18972_v47 = vld [vmem:[#allocation230_spill] sm:$0xff]  ;;  %v19012_v20 = vld [vmem:[#allocation61_spill] sm:$0xff] }
 0x3c0   :  { %v8768_v21 = vpack.c.bf16 %v18931_v44, %v18929_v15  ;;  %8383 = vmatprep.subr.bf16.mxu0 %v8382_v31  ;;  %v18943_v10 = vand.u32 4294901760, %v18942_v2  ;;  %v18950_v31 = vld [vmem:[#allocation172_spill] sm:$0xff]  ;;  %v8394_v44 = vpack.c.bf16 %v18960_v39, %v18959_v16  ;;  %v18973_v4 = vand.u32 4294901760, %v18972_v47  ;;  %v19026_v16 = vld [vmem:[#allocation135_spill] sm:$0xff] }
 0x3c1   :  { %8765 = vmatpush1.bf16.msra.mxu1 %v8764_v14  ;;  %v8770_v53 = vpack.c.bf16 %v18939_v22, %v18937_v43  ;;  %v18946_v14 = vld [vmem:[#allocation162_spill] sm:$0xff]  ;;  %v18951_v29 = vand.u32 4294901760, %v18950_v31  ;;  %v8780_v58 = vpack.c.bf16 %v18966_v18, %v18965_v46  ;;  %v18974_v43 = vand.u32 4294901760, %v18497_v28  ;;  %v18982_v28 = vld [vmem:[#allocation49_spill] sm:$0xff]  ;;  %v18999_v31 = vld [vmem:[#allocation127_spill] sm:$0xff] }
 0x3c2   :  { %8767 = vmatprep.subr.bf16.mxu1 %v8766_v5  ;;  %v8388_v12 = vpack.c.bf16 %v18943_v10, %v18941_v49  ;;  %v18947_v51 = vand.u32 4294901760, %v18946_v14  ;;  %v18954_v5 = vand.u32 4294901760, %v18953_v26  ;;  %v18975_v11 = vand.u32 4294901760, %v18498_v52  ;;  %v18984_v10 = vld [vmem:[#allocation50_spill] sm:$0xff]  ;;  %v19006_v26 = vld [vmem:[#allocation43_spill] sm:$0xff]  ;;  %v19064_v47 = vld [vmem:[#allocation136_spill] sm:$0xff] }
 0x3c3   :  { %8385 = vmatpush1.bf16.msra.mxu0 %v8384_v36  ;;  %v8390_v7 = vpack.c.bf16 %v18951_v29, %v18949_v42  ;;  %v18957_v36 = vand.u32 4294901760, %v18642_v13  ;;  %v18964_v13 = vand.u32 4294901760, %v18650_v37  ;;  %v18971_v37 = vand.u32 4294901760, %v18495_v35  ;;  %v18998_v42 = vld [vmem:[#allocation123_spill] sm:$0xff]  ;;  %v19046_v18 = vld [vmem:[#allocation106_spill] sm:$0xff] }
 0x3c4   :  { %v8772_v8 = vpack.c.bf16 %v18947_v51, %v18945_v55  ;;  %8387 = vmatprep.subr.bf16.mxu0 %v8386_v45  ;;  %v8774_v62 = vpack.c.bf16 %v18954_v5, %v18952_v9  ;;  %v18970_v45 = vand.u32 4294901760, %v18494_v30  ;;  %v8784_v40 = vpack.c.bf16 %v18975_v11, %v18974_v43  ;;  %v18992_v51 = vld [vmem:[#allocation28_spill] sm:$0xff]  ;;  %v19000_v29 = vld [vmem:[#allocation35_spill] sm:$0xff]  ;;  %v19008_v5 = vld [vmem:[#allocation46_spill] sm:$0xff] }
 0x3c5   :  { %8769 = vmatpush1.bf16.msra.mxu1 %v8768_v21  ;;  %v8776_v15 = vpack.c.bf16 %v18958_v56, %v18957_v36  ;;  %v18961_v21 = vand.u32 4294901760, %v18648_v32  ;;  %v8396_v24 = vpack.c.bf16 %v18964_v13, %v18963_v38  ;;  %v18968_v32 = vand.u32 4294901760, %v18492_v33  ;;  %v19004_v9 = vld [vmem:[#allocation39_spill] sm:$0xff]  ;;  %v19020_v36 = vld [vmem:[#allocation73_spill] sm:$0xff]  ;;  %v19022_v56 = vld [vmem:[#allocation74_spill] sm:$0xff] }
 0x3c6   :  { %8771 = vmatprep.subr.bf16.mxu1 %v8770_v53  ;;  %v8782_v54 = vpack.c.bf16 %v18970_v45, %v18969_v61  ;;  %v8400_v63 = vpack.c.bf16 %v18973_v4, %v18971_v37  ;;  %v18976_v33 = vand.u32 4294901760, %v18499_v25  ;;  %v18977_v0 = vand.u32 4294901760, %v18500_v41  ;;  %v19028_v39 = vld [vmem:[#allocation79_spill] sm:$0xff]  ;;  %v19038_v38 = vld [vmem:[#allocation94_spill] sm:$0xff]  ;;  %v19040_v13 = vld [vmem:[#allocation97_spill] sm:$0xff] }
 0x3c7   :  { %8389 = vmatpush1.bf16.msra.mxu0 %v8388_v12  ;;  %v8778_v59 = vpack.c.bf16 %v18962_v60, %v18961_v21  ;;  %v8398_v1 = vpack.c.bf16 %v18968_v32, %v18967_v6  ;;  %v18978_v22 = vand.u32 4294901760, %v18501_v19  ;;  %v18979_v53 = vand.u32 4294901760, %v18502_v17  ;;  %v18990_v19 = vld [vmem:[#allocation234_spill] sm:$0xff]  ;;  %v19032_v21 = vld [vmem:[#allocation85_spill] sm:$0xff]  ;;  %v19044_v46 = vld [vmem:[#allocation103_spill] sm:$0xff] }
 0x3c8   :  { %8391 = vmatprep.subr.bf16.mxu0 %v8390_v7  ;;  %v8402_v30 = vpack.c.bf16 %v18977_v0, %v18976_v33  ;;  %v18981_v49 = vand.u32 4294901760, %v18980_v27  ;;  %v18983_v2 = vand.u32 4294901760, %v18982_v28  ;;  %v18985_v12 = vand.u32 4294901760, %v18984_v10  ;;  %v19002_v7 = vld [vmem:[#allocation38_spill] sm:$0xff]  ;;  %v19052_v32 = vld [vmem:[#allocation115_spill] sm:$0xff]  ;;  %v19070_v43 = vld [vmem:[#allocation145_spill] sm:$0xff] }
 0x3c9   :  { %8773 = vmatpush1.bf16.msra.mxu1 %v8772_v8  ;;  %v8786_v35 = vpack.c.bf16 %v18979_v53, %v18978_v22  ;;  %v18987_v55 = vand.u32 4294901760, %v18986_v34  ;;  %vm18993_vm2 = vnez %v18992_v51  ;;  %v18994_v8 = vld [vmem:[#allocation31_spill] sm:$0xff]  ;;  %v19034_v60 = vld [vmem:[#allocation86_spill] sm:$0xff]  ;;  %v19076_v33 = vld [vmem:[#allocation157_spill] sm:$0xff] }
 0x3ca   :  { %8775 = vmatprep.subr.bf16.mxu1 %v8774_v62  ;;  %v8404_v52 = vpack.c.bf16 %v18983_v2, %v18981_v49  ;;  %vm18995_vm7 = vnez %v18994_v8  ;;  %v19010_v62 = vld [vmem:[#allocation55_spill] sm:$0xff]  ;;  %v19050_v6 = vld [vmem:[#allocation110_spill] sm:$0xff]  ;;  %v19078_v0 = vld [vmem:[#allocation160_spill] sm:$0xff] }
 0x3cb   :  { %8393 = vmatpush1.bf16.msra.mxu0 %v8392_v50  ;;  %v8788_v25 = vpack.c.bf16 %v18987_v55, %v18985_v12  ;;  %v19016_v50 = vld [vmem:[#allocation67_spill] sm:$0xff]  ;;  %v19056_v61 = vld [vmem:[#allocation122_spill] sm:$0xff]  ;;  %v19091_v2 = vld [vmem:[#allocation204_spill] sm:$0xff] }
 0x3cc   :  { %8395 = vmatprep.subr.bf16.mxu0 %v8394_v44  ;;  %v19030_v44 = vld [vmem:[#allocation82_spill] sm:$0xff]  ;;  %v19062_v37 = vld [vmem:[#allocation131_spill] sm:$0xff]  ;;  %v19104_v51 = vld [vmem:[#allocation229_spill] sm:$0xff] }
 0x3cd   :  { %8777 = vmatpush1.bf16.msra.mxu1 %v8776_v15  ;;  %v19024_v15 = vld [vmem:[#allocation132_spill] sm:$0xff]  ;;  %v19058_v45 = vld [vmem:[#allocation126_spill] sm:$0xff]  ;;  %v19066_v4 = vld [vmem:[#allocation139_spill] sm:$0xff] }
 0x3ce   :  { %8779 = vmatprep.subr.bf16.mxu1 %v8778_v59  ;;  %v19036_v59 = vld [vmem:[#allocation91_spill] sm:$0xff]  ;;  %v19088_v49 = vld [vmem:[#allocation182_spill] sm:$0xff] }
 0x3cf   :  { %8397 = vmatpush1.bf16.msra.mxu0 %v8396_v24  ;;  %v19042_v24 = vld [vmem:[#allocation98_spill] sm:$0xff]  ;;  %v19072_v11 = vld [vmem:[#allocation151_spill] sm:$0xff] }
 0x3d0   :  { %8399 = vmatprep.subr.bf16.mxu0 %v8398_v1  ;;  %v19054_v1 = vld [vmem:[#allocation118_spill] sm:$0xff]  ;;  %v19082_v22 = vld [vmem:[#allocation167_spill] sm:$0xff] }
 0x3d1   :  { %8781 = vmatpush1.bf16.msra.mxu1 %v8780_v58  ;;  %v19048_v58 = vld [vmem:[#allocation109_spill] sm:$0xff]  ;;  %v19086_v27 = vld [vmem:[#allocation179_spill] sm:$0xff] }
 0x3d2   :  { %8783 = vmatprep.subr.bf16.mxu1 %v8782_v54  ;;  %v19060_v54 = vld [vmem:[#allocation128_spill] sm:$0xff]  ;;  %v19100_v17 = vld [vmem:[#allocation219_spill] sm:$0xff] }
 0x3d3   :  { %8401 = vmatpush1.bf16.msra.mxu0 %v8400_v63  ;;  %v19068_v63 = vld [vmem:[#allocation142_spill] sm:$0xff]  ;;  %v19102_v14 = vld [vmem:[#allocation223_spill] sm:$0xff] }
 0x3d4   :  { %8403 = vmatprep.subr.bf16.mxu0 %v8402_v30  ;;  %v19080_v30 = vld [vmem:[#allocation165_spill] sm:$0xff] }
 0x3d5   :  { %8785 = vmatpush1.bf16.msra.mxu1 %v8784_v40  ;;  %v19074_v40 = vld [vmem:[#allocation154_spill] sm:$0xff] }
 0x3d6   :  { %8787 = vmatprep.subr.bf16.mxu1 %v8786_v35 }
 0x3d7   :  { %8405 = vmatpush1.bf16.msra.mxu0 %v8404_v52 }
 0x3d8   :  { %8407 = vmatprep.subr.msk.bf16.mxu0 %vm12831_vm11, %v18662_v48  ;;  %vm18997_vm11 = vnez %v18996_v3 }
 0x3d9   :  { %8789 = vmatpush1.bf16.msra.mxu1 %v8788_v25 }
 0x3da   :  { %8791 = vmatprep.subr.msk.bf16.mxu1 %vm12847_vm14, %v18662_v48  ;;  %4755 = vmatmul.mubr.f32.vlgmr.msra.gmra.mrb[4].mxu0 %v18990_v19  ;;  %vm19003_vm14 = vnez %v19002_v7 }
 0x3db   :  { %8409 = vmatpush1.bf16.msk.msra.mxu0 %vm12864_vm10, %v18662_v48  ;;  %4761 = vmatprep.mubr.f32.mxu0 %v18998_v42  ;;  %vm19001_vm10 = vnez %v19000_v29 }
 0x3dc   :  { %6101 = vmatmul.mubr.f32.vlgmr.msra.gmra.mrb[4].mxu1 %v18990_v19  ;;  %8411 = vmatprep.subr.msk.bf16.mxu0 %vm18995_vm7, %v18662_v48  ;;  %vm19005_vm7 = vnez %v19004_v9 }
 0x3dd   :  { %8793 = vmatpush1.bf16.msk.msra.mxu1 %vm18993_vm2, %v18662_v48  ;;  %6107 = vmatprep.mubr.f32.mxu1 %v18998_v42  ;;  %vm19007_vm2 = vnez %v19006_v26 }
 0x3de   :  { %8795 = vmatprep.subr.msk.bf16.mxu1 %vm18997_vm11, %v18662_v48  ;;  %4763 = vmatmul.mubr.f32.gmra.mrb[6].mxu0 %v18999_v31  ;;  %vm19009_vm11 = vnez %v19008_v5 }
 0x3df   :  { %8413 = vmatpush1.bf16.msk.msra.mxu0 %vm19001_vm10, %v18662_v48  ;;  %4898 = vmatprep.mubr.f32.mxu0 %v18827_v57  ;;  %vm19011_vm10 = vnez %v19010_v62 }
 0x3e0   :  { %6109 = vmatmul.mubr.f32.gmra.mrb[6].mxu1 %v18999_v31  ;;  %8415 = vmatprep.subr.msk.bf16.mxu0 %vm19005_vm7, %v18662_v48  ;;  %vm19015_vm7 = vnez %v19014_v23 }
 0x3e1   :  { %8797 = vmatpush1.bf16.msk.msra.mxu1 %vm19003_vm14, %v18662_v48  ;;  %6244 = vmatprep.mubr.f32.mxu1 %v18827_v57  ;;  %vm19013_vm14 = vnez %v19012_v20  ;;  %v19018_v57 = vld [vmem:[#allocation70_spill] sm:$0xff] }
 0x3e2   :  { %8799 = vmatprep.subr.msk.bf16.mxu1 %vm19007_vm2, %v18662_v48  ;;  %vm19017_vm2 = vnez %v19016_v50  ;;  %vm19019_vm4 = vnez %v19018_v57 }
 0x3e3   :  { %8417 = vmatpush1.bf16.msk.msra.mxu0 %vm19009_vm11, %v18662_v48  ;;  %vm19021_vm11 = vnez %v19020_v36 }
 0x3e4   :  { %8419 = vmatprep.subr.msk.bf16.mxu0 %vm19013_vm14, %v18662_v48  ;;  %vm19025_vm14 = vnez %v19024_v15 }
 0x3e5   :  { %8801 = vmatpush1.bf16.msk.msra.mxu1 %vm19011_vm10, %v18662_v48  ;;  %vm19023_vm10 = vnez %v19022_v56 }
 0x3e6   :  { %8803 = vmatprep.subr.msk.bf16.mxu1 %vm19015_vm7, %v18662_v48  ;;  %vm19027_vm7 = vnez %v19026_v16 }
 0x3e7   :  { %8421 = vmatpush1.bf16.msk.msra.mxu0 %vm19017_vm2, %v18662_v48  ;;  %vm19029_vm2 = vnez %v19028_v39 }
 0x3e8   :  { %8423 = vmatprep.subr.msk.bf16.mxu0 %vm19021_vm11, %v18662_v48  ;;  %vm19033_vm11 = vnez %v19032_v21 }
 0x3e9   :  { %8805 = vmatpush1.bf16.msk.msra.mxu1 %vm19019_vm4, %v18662_v48  ;;  %vm19031_vm4 = vnez %v19030_v44 }
 0x3ea   :  { %8807 = vmatprep.subr.msk.bf16.mxu1 %vm19023_vm10, %v18662_v48  ;;  %vm19035_vm10 = vnez %v19034_v60 }
 0x3eb   :  { %8425 = vmatpush1.bf16.msk.msra.mxu0 %vm19025_vm14, %v18662_v48  ;;  %vm19037_vm14 = vnez %v19036_v59 }
 0x3ec   :  { %8427 = vmatprep.subr.msk.bf16.mxu0 %vm19029_vm2, %v18662_v48  ;;  %vm19041_vm2 = vnez %v19040_v13 }
 0x3ed   :  { %8809 = vmatpush1.bf16.msk.msra.mxu1 %vm19027_vm7, %v18662_v48  ;;  %vm19039_vm7 = vnez %v19038_v38 }
 0x3ee   :  { %8811 = vmatprep.subr.msk.bf16.mxu1 %vm19031_vm4, %v18662_v48  ;;  %vm19043_vm4 = vnez %v19042_v24 }
 0x3ef   :  { %8429 = vmatpush1.bf16.msk.msra.mxu0 %vm19033_vm11, %v18662_v48  ;;  %vm19045_vm11 = vnez %v19044_v46 }
 0x3f0   :  { %8431 = vmatprep.subr.msk.bf16.mxu0 %vm19037_vm14, %v18662_v48  ;;  %vm19049_vm14 = vnez %v19048_v58 }
 0x3f1   :  { %8813 = vmatpush1.bf16.msk.msra.mxu1 %vm19035_vm10, %v18662_v48  ;;  %vm19047_vm10 = vnez %v19046_v18 }
 0x3f2   :  { %8815 = vmatprep.subr.msk.bf16.mxu1 %vm19039_vm7, %v18662_v48  ;;  %vm19051_vm7 = vnez %v19050_v6 }
 0x3f3   :  { %8433 = vmatpush1.bf16.msk.msra.mxu0 %vm19041_vm2, %v18662_v48  ;;  %vm19053_vm2 = vnez %v19052_v32 }
 0x3f4   :  { %8435 = vmatprep.subr.msk.bf16.mxu0 %vm19045_vm11, %v18662_v48  ;;  %vm19057_vm11 = vnez %v19056_v61 }
 0x3f5   :  { %8817 = vmatpush1.bf16.msk.msra.mxu1 %vm19043_vm4, %v18662_v48  ;;  %vm19055_vm4 = vnez %v19054_v1 }
 0x3f6   :  { %8819 = vmatprep.subr.msk.bf16.mxu1 %vm19047_vm10, %v18662_v48  ;;  %vm19059_vm10 = vnez %v19058_v45 }
 0x3f7   :  { %8437 = vmatpush1.bf16.msk.msra.mxu0 %vm19049_vm14, %v18662_v48  ;;  %vm19061_vm14 = vnez %v19060_v54 }
 0x3f8   :  { %8439 = vmatprep.subr.msk.bf16.mxu0 %vm19053_vm2, %v18662_v48  ;;  %vm19065_vm2 = vnez %v19064_v47 }
 0x3f9   :  { %8821 = vmatpush1.bf16.msk.msra.mxu1 %vm19051_vm7, %v18662_v48  ;;  %vm19063_vm7 = vnez %v19062_v37 }
 0x3fa   :  { %8823 = vmatprep.subr.msk.bf16.mxu1 %vm19055_vm4, %v18662_v48  ;;  %vm19067_vm4 = vnez %v19066_v4 }
 0x3fb   :  { %8441 = vmatpush1.bf16.msk.msra.mxu0 %vm19057_vm11, %v18662_v48  ;;  %vm19069_vm11 = vnez %v19068_v63 }
 0x3fc   :  { %8443 = vmatprep.subr.msk.bf16.mxu0 %vm19061_vm14, %v18662_v48  ;;  %vm19073_vm14 = vnez %v19072_v11 }
 0x3fd   :  { %8825 = vmatpush1.bf16.msk.msra.mxu1 %vm19059_vm10, %v18662_v48  ;;  %vm19071_vm10 = vnez %v19070_v43 }
 0x3fe   :  { %8827 = vmatprep.subr.msk.bf16.mxu1 %vm19063_vm7, %v18662_v48  ;;  %vm19075_vm7 = vnez %v19074_v40 }
 0x3ff   :  { %8445 = vmatpush1.bf16.msk.msra.mxu0 %vm19065_vm2, %v18662_v48  ;;  %vm19077_vm2 = vnez %v19076_v33 }
 0x400   :  { %8447 = vmatprep.subr.msk.bf16.mxu0 %vm19069_vm11, %v18662_v48  ;;  %vm19081_vm11 = vnez %v19080_v30 }
 0x401   :  { %8829 = vmatpush1.bf16.msk.msra.mxu1 %vm19067_vm4, %v18662_v48  ;;  %vm19079_vm4 = vnez %v19078_v0 }
 0x402   :  { %8831 = vmatprep.subr.msk.bf16.mxu1 %vm19071_vm10, %v18662_v48  ;;  %vm19083_vm10 = vnez %v19082_v22 }
 0x403   :  { %8449 = vmatpush1.bf16.msk.msra.mxu0 %vm19073_vm14, %v18662_v48  ;;  %vm19087_vm14 = vnez %v19086_v27 }
 0x404   :  { %8451 = vmatprep.subr.msk.bf16.mxu0 %vm19077_vm2, %v18662_v48  ;;  %vm19092_vm2 = vnez %v19091_v2 }
 0x405   :  { %8833 = vmatpush1.bf16.msk.msra.mxu1 %vm19075_vm7, %v18662_v48  ;;  %vm19089_vm7 = vnez %v19088_v49 }
 0x406   :  { %8835 = vmatprep.subr.msk.bf16.mxu1 %vm19079_vm4, %v18662_v48 }
 0x407   :  { %8453 = vmatpush1.bf16.msk.msra.mxu0 %vm19081_vm11, %v18662_v48 }
 0x408   :  { %8455 = vmatprep.subr.msk.bf16.mxu0 %vm18757_vm3, %v18662_v48  ;;  %vm19103_vm3 = vnez %v19102_v14 }
 0x409   :  { %8837 = vmatpush1.bf16.msk.msra.mxu1 %vm19083_vm10, %v18662_v48 }
 0x40a   :  { %8839 = vmatprep.subr.msk.bf16.mxu1 %vm18759_vm1, %v18662_v48  ;;  %vm19105_vm1 = vnez %v19104_v51 }
 0x40b   :  { %8457 = vmatpush1.bf16.msk.msra.mxu0 %vm19087_vm14, %v18662_v48 }
 0x40c   :  { %8459 = vmatprep.subr.msk.bf16.mxu0 %vm18765_vm6, %v18662_v48  ;;  %vm19101_vm6 = vnez %v19100_v17 }
 0x40d   :  { %8841 = vmatpush1.bf16.msk.msra.mxu1 %vm19089_vm7, %v18662_v48 }
 0x40e   :  { %8843 = vmatprep.subr.msk.bf16.mxu1 %vm19092_vm2, %v18662_v48 }
 0x40f   :  { %8461 = vmatpush1.bf16.msk.msra.mxu0 %vm13898_vm9, %v18662_v48 }
 0x410   :  { %8463 = vmatprep.subr.msk.bf16.mxu0 %vm18771_vm12, %v18662_v48 }
 0x411   :  { %8845 = vmatpush1.bf16.msk.msra.mxu1 %vm13924_vm13, %v18662_v48 }
 0x412   :  { %8847 = vmatprep.subr.msk.bf16.mxu1 %vm18773_vm0, %v18662_v48 }
 0x413   :  { %8465 = vmatpush1.bf16.msk.msra.mxu0 %vm13974_vm15, %v18662_v48 }
 0x414   :  { %8467 = vmatprep.subr.msk.bf16.mxu0 %vm14018_vm5, %v18662_v48 }
 0x415   :  { %8849 = vmatpush1.bf16.msk.msra.mxu1 %vm18776_vm8, %v18662_v48 }
 0x416   :  { %8851 = vmatprep.subr.msk.bf16.mxu1 %vm19101_vm6, %v18662_v48 }
 0x417   :  { %8469 = vmatpush1.bf16.msk.msra.mxu0 %vm19103_vm3, %v18662_v48 }
 0x419   :  { %8853 = vmatpush1.bf16.msk.msra.mxu1 %vm19105_vm1, %v18662_v48 }
 0x41a   :  { %4900 = vmatmul.mubr.f32.vlgmr.msra.gmra.mrb[4].mxu0 %v18990_v19 }
 0x41b   :  { %4906 = vmatprep.mubr.f32.mxu0 %v18998_v42 }
 0x41c   :  { %6246 = vmatmul.mubr.f32.vlgmr.msra.gmra.mrb[4].mxu1 %v18990_v19 }
 0x41d   :  { %6252 = vmatprep.mubr.f32.mxu1 %v18998_v42 }
 0x41e   :  { %4908 = vmatmul.mubr.f32.gmra.mrb[6].mxu0 %v18999_v31 }
 0x420   :  { %6254 = vmatmul.mubr.f32.gmra.mrb[6].mxu1 %v18999_v31 }
 0x4ed   :  { %v4901_v8 = vpop.f32.mrb[4].mxu0 }
 0x4ee   :  { %6264 = vst [vmem:[#allocation7 + $0x20] sm:$0xff] %v4901_v8  ;;  %v4903_v29 = vpop.f32.mrb[5].mxu0 }
 0x4ef   :  { %v6247_v3 = vpop.f32.mrb[4].mxu1  ;;  %6265 = vst [vmem:[#allocation7 + $0x28] sm:$0xff] %v4903_v29 }
 0x4f0   :  { %6266 = vst [vmem:[#allocation7 + $0x30] sm:$0xff] %v6247_v3  ;;  %v6249_v48 = vpop.f32.mrb[5].mxu1 }
 0x4f1   :  { %6267 = vst [vmem:[#allocation7 + $0x38] sm:$0xff] %v6249_v48  ;;  %v4909_v19 = vpop.f32.mrb[6].mxu0 }
 0x4f2   :  { %6272 = vst [vmem:[#allocation7 + $0x60] sm:$0xff] %v4909_v19  ;;  %v4911_v42 = vpop.f32.mrb[7].mxu0 }
 0x4f3   :  { %v6255_v7 = vpop.f32.mrb[6].mxu1  ;;  %6273 = vst [vmem:[#allocation7 + $0x68] sm:$0xff] %v4911_v42 }
 0x4f4   :  { %6274 = vst [vmem:[#allocation7 + $0x70] sm:$0xff] %v6255_v7  ;;  %v6257_v9 = vpop.f32.mrb[7].mxu1 }
 0x4f5   :  { %6275 = vst [vmem:[#allocation7 + $0x78] sm:$0xff] %v6257_v9 }
 0x4f6   :  { %8999 = shalt.err (!%p8996_p6)
}
 0x4f7   :  { %s9000_s10 = scalar_lea.hbm %s15371_s2, 2048 }
 0x4f8   :  { %p9001_p7 = scmp.ne.s32.totalorder %s15371_s2, %s9000_s10  ;;  %p9004_p8 = scmp.lt.u32.totalorder %s9000_s10, %s15371_s2 }
 0x4fa   :  { %p9006_p9 = pnand %p9004_p8, %p9001_p7 }
 0x4fc   :  { %9009 = shalt.err (!%p9006_p9)
}
 0x4fd   :  { %s9023_s15 = smov 1024   ;;  %s9024_s16 = smov 64  }
 0x4fe   :  { %6287 = dma.vmem_to_hbm [thread:$0]  %s6282_s6, 2048, %s15371_s2, [#allocation4], %s9023_s15, %s9023_s15, %s9024_s16  }
 0x4ff   :  { %9014 = dma.done.wait [#allocation4], 2048  }
 0x500   :  { %9015 = vsyncadd [#allocation4], 4294965248 }
 0x501   :  { %6291 = vsyncpa [#allocation3], 1 }
 0x502   :  { %6292 = vsyncpa [#allocation6], 1 }
 0x503   :  { %6293 = vsyncpa [#allocation4], 1 }

</bundles_post_ra>
